<compile_context>
chip_gen: v5e
topology: v5e:2x2
jax: 0.10.0
libtpu: 0.0.40
codegen_flags: <defaults>
</compile_context>

<pallas_src>
import functools
import math

import jax
import jax.numpy as jnp
from jax.experimental import pallas as pl
from jax.experimental.pallas import tpu as pltpu

SQRT2 = math.sqrt(2.0)

DEPTH = 5
WIDTH = 512            # small stand-in for width=4096 (same code paths)
IN_FEATURES = 3072     # 3 * 32 * 32, fixed by the module
OUT_FEATURES = 10
NPAD = 128             # lane-dense padding of the final output columns
MIN_SUBLANE = 16       # bf16 sublane tile -> pad batch to a multiple of 16


# ----------------------- generation-aware VMEM budgets ------------------------
def _vmem_capacity_bytes():
    try:
        return int(pltpu.get_tpu_info().vmem_capacity_bytes)
    except Exception:
        return 64 * 1024 * 1024          # conservative fallback (v7x-sized)


_VMEM_CAPACITY = _vmem_capacity_bytes()
# Leave compiler-scratch headroom: ~110 MiB on 128 MiB v5e/v6e, ~46 MiB on v7x.
_VMEM_LIMIT = max(32 * 1024 * 1024, _VMEM_CAPACITY - 18 * 1024 * 1024)
_FUSED_VMEM_BUDGET = int(_VMEM_LIMIT * 0.75)


def _is_multi_tensorcore_chip():
    # v7x has 2 TensorCores/chip: a grid-less fused kernel only uses one and
    # sees ~half the chip's HBM bandwidth, so prefer the N-parallel tiled path.
    try:
        return "v7" in jax.devices()[0].device_kind.lower()
    except Exception:
        return False


_PREFER_TILED = _is_multi_tensorcore_chip()
_MIN_GRID_BLOCKS = 2 if _PREFER_TILED else 1


# -----------------------------------------------------------------------------
# Fully fused kernel: whole MLP in one pallas_call (weights resident in VMEM)
# -----------------------------------------------------------------------------
def _fused_mlp_kernel(x_ref, w0_ref, wh_ref, wf_ref, o_ref):
    # initial layer + relu(x) * sqrt(2); bf16 inputs, f32 accumulation
    h = jnp.dot(x_ref[...], w0_ref[...], preferred_element_type=jnp.float32)
    h = jnp.maximum(h, 0.0) * SQRT2
    # hidden layers; wh_ref is (depth-2, W, W), static Python unroll
    for i in range(wh_ref.shape[0]):
        h = jnp.dot(h.astype(jnp.bfloat16), wh_ref[i],
                    preferred_element_type=jnp.float32)
        h = jnp.maximum(h, 0.0) * SQRT2
    # final layer (columns padded to NPAD for a lane-dense store), no activation
    o_ref[...] = jnp.dot(h.astype(jnp.bfloat16), wf_ref[...],
                         preferred_element_type=jnp.float32).astype(o_ref.dtype)


def mlp_fused_pallas(x2d, w0, wh, wf_pad):
    """One pallas_call for the whole forward; full arrays pulled into VMEM."""
    m = x2d.shape[0]
    npad = wf_pad.shape[1]
    return pl.pallas_call(
        _fused_mlp_kernel,
        out_shape=jax.ShapeDtypeStruct((m, npad), jnp.float32),
        compiler_params=pltpu.CompilerParams(vmem_limit_bytes=_VMEM_LIMIT),
    )(x2d, w0, wh, wf_pad)


# -----------------------------------------------------------------------------
# Per-layer path: single-shot dot (K whole), only N tiled, activation fused
# -----------------------------------------------------------------------------
def _linear_act_kernel(x_ref, w_ref, o_ref, *, apply_act):
    y = jnp.dot(x_ref[...], w_ref[...], preferred_element_type=jnp.float32)
    if apply_act:
        y = jnp.maximum(y, 0.0) * SQRT2          # F.relu(x) * sqrt(2)
    o_ref[...] = y.astype(o_ref.dtype)


def _pick_tn(m, k, n, min_blocks):
    """Largest 128-multiple divisor of n whose *double-buffered* block fits VMEM."""
    budget = int(_VMEM_LIMIT * 0.7)
    best = 128 if n % 128 == 0 else n
    for tn in range(128, n + 1, 128):
        if n % tn:
            continue
        if n // tn < min_blocks and tn > 128:
            continue
        # 2x bf16 weight blocks + 2x output blocks + resident bf16 activation
        need = 2 * (k * tn * 2) + 2 * (m * tn * 4) + m * k * 2
        if need <= budget:
            best = tn
    return best


def linear_pallas(x, w, *, apply_act, out_dtype):
    """act(x @ w): K kept whole (no accumulator), N tiled, grid marked parallel."""
    m, k = x.shape
    kw, n = w.shape
    assert k == kw, (k, kw)
    assert m % MIN_SUBLANE == 0, m
    assert k % 128 == 0, k
    assert n % 128 == 0, n

    tn = _pick_tn(m, k, n, _MIN_GRID_BLOCKS)
    grid = (n // tn,)
    kernel = functools.partial(_linear_act_kernel, apply_act=apply_act)

    return pl.pallas_call(
        kernel,
        out_shape=jax.ShapeDtypeStruct((m, n), out_dtype),
        grid_spec=pltpu.PrefetchScalarGridSpec(
            num_scalar_prefetch=0,
            grid=grid,
            in_specs=[
                pl.BlockSpec((m, k), lambda j: (0, 0)),    # full activation, resident
                pl.BlockSpec((k, tn), lambda j: (0, j)),   # weight column block
            ],
            out_specs=pl.BlockSpec((m, tn), lambda j: (0, j)),
        ),
        compiler_params=pltpu.CompilerParams(
            dimension_semantics=("parallel",),             # v7x: both TCs pull weights
            vmem_limit_bytes=_VMEM_LIMIT,
        ),
    )(x, w)


# -----------------------------------------------------------------------------
# Parameters + forward wrapper
# -----------------------------------------------------------------------------
def init_params(key, depth, width):
    """Deterministic synthetic parameters (shapes match the torch module).

    Weights are stored as (in_features, out_features) -- the transpose of
    torch.nn.Linear.weight -- in bf16, and the final projection is zero-padded
    to NPAD output columns once here (not per forward call)."""
    keys = jax.random.split(key, depth)
    w0 = (jax.random.normal(keys[0], (IN_FEATURES, width), jnp.float32)
          / math.sqrt(IN_FEATURES))
    hidden = [jax.random.normal(keys[1 + i], (width, width), jnp.float32)
              / math.sqrt(width) for i in range(depth - 2)]
    wf = (jax.random.normal(keys[depth - 1], (width, OUT_FEATURES), jnp.float32)
          / math.sqrt(width))
    wf_pad = jnp.pad(wf, ((0, 0), (0, NPAD - OUT_FEATURES)))
    return {
        "initial": w0.astype(jnp.bfloat16),                 # (3072, W)
        "hidden": jnp.stack(hidden).astype(jnp.bfloat16),   # (depth-2, W, W)
        "final": wf_pad.astype(jnp.bfloat16),               # (W, NPAD), cols >=10 are 0
    }


def _forward_impl(params, x, force_tiled=False):
    # x: (B, 3, 32, 32) -> flatten like torch's x.view(x.shape[0], -1)
    b = x.shape[0]
    h = x.reshape(b, -1).astype(jnp.float32)                # (B, 3072)
    assert h.shape[1] == params["initial"].shape[0]
    width = params["initial"].shape[1]

    # Pad batch to a multiple of 16 (bf16 sublane tile); sliced off at the end.
    m_pad = (-b) % MIN_SUBLANE
    if m_pad:
        h = jnp.pad(h, ((0, m_pad), (0, 0)))
    h = h.astype(jnp.bfloat16)
    m = h.shape[0]

    w0 = params["initial"]
    wh = params["hidden"]
    wf_pad = params["final"]

    # bf16 weights + bf16 input + f32 output + margin for in-kernel f32 temps.
    resident_bytes = (2 * (w0.size + wh.size + wf_pad.size)
                      + 2 * h.size + 4 * m * NPAD + 4 * 4 * m * width)
    use_fused = (not force_tiled) and (not _PREFER_TILED) \
        and resident_bytes <= _FUSED_VMEM_BUDGET

    if use_fused:
        # Fully fused: one kernel launch, activations never leave VMEM.
        out_pad = mlp_fused_pallas(h, w0, wh, wf_pad)
    else:
        # Per-layer path (large widths / multi-TC chips): N-tiled weight blocks,
        # bf16 intermediate activations.
        hcur = linear_pallas(h, w0, apply_act=True, out_dtype=jnp.bfloat16)
        for i in range(wh.shape[0]):
            hcur = linear_pallas(hcur, wh[i], apply_act=True, out_dtype=jnp.bfloat16)
        out_pad = linear_pallas(hcur, wf_pad, apply_act=False, out_dtype=jnp.float32)

    return out_pad[:b, :OUT_FEATURES]


mlp_forward = jax.jit(_forward_impl)
mlp_forward_tiled = jax.jit(functools.partial(_forward_impl, force_tiled=True))


if __name__ == "__main__":
    key = jax.random.PRNGKey(0)
    pkey, xkey = jax.random.split(key)

    params = init_params(pkey, DEPTH, WIDTH)
    x = jax.random.normal(xkey, (8, 3, 32, 32), jnp.float32)   # NCHW input

    out = mlp_forward(params, x)
    jax.block_until_ready(out)

    # Also exercise the tiled per-layer path (used for large widths / v7x).
    out_tiled = mlp_forward_tiled(params, x)
    jax.block_until_ready(out_tiled)

    # Reference in plain JAX using the SAME bf16-weight / f32-accumulation math.
    def ref_forward(params, x):
        h = x.reshape(x.shape[0], -1).astype(jnp.bfloat16)
        h = jnp.dot(h, params["initial"], preferred_element_type=jnp.float32)
        h = jnp.maximum(h, 0.0) * SQRT2
        for i in range(params["hidden"].shape[0]):
            h = jnp.dot(h.astype(jnp.bfloat16), params["hidden"][i],
                        preferred_element_type=jnp.float32)
            h = jnp.maximum(h, 0.0) * SQRT2
        out = jnp.dot(h.astype(jnp.bfloat16), params["final"],
                      preferred_element_type=jnp.float32)
        return out[:, :OUT_FEATURES]

    ref = ref_forward(params, x)
    assert out.shape == (8, OUT_FEATURES), out.shape
    assert out_tiled.shape == (8, OUT_FEATURES), out_tiled.shape
    assert jnp.allclose(out, ref, atol=1e-2, rtol=1e-2), "fused kernel mismatch"
    assert jnp.allclose(out_tiled, ref, atol=1e-2, rtol=1e-2), "tiled kernel mismatch"

    print("KERNEL_OK")
</pallas_src>

<mosaic_0001>
module attributes {stable_mosaic.version = 11 : i64} {
  func.func @_fused_mlp_kernel(%arg0: memref<16x3072xbf16, #tpu.memory_space<vmem>>, %arg1: memref<3072x512xbf16, #tpu.memory_space<vmem>>, %arg2: memref<3x512x512xbf16, #tpu.memory_space<vmem>>, %arg3: memref<512x128xbf16, #tpu.memory_space<vmem>>, %arg4: memref<16x128xf32, #tpu.memory_space<vmem>>) attributes {dimension_semantics = [], scalar_prefetch = 0 : i64, scratch_operands = 0 : i64, tpu.core_type = #tpu.core_type<tc>} {
    %c0 = arith.constant 0 : index
    %c0_0 = arith.constant 0 : index
    %0 = vector.load %arg0[%c0, %c0_0] : memref<16x3072xbf16, #tpu.memory_space<vmem>>, vector<16x3072xbf16>
    %c0_1 = arith.constant 0 : index
    %c0_2 = arith.constant 0 : index
    %1 = vector.load %arg1[%c0_1, %c0_2] : memref<3072x512xbf16, #tpu.memory_space<vmem>>, vector<3072x512xbf16>
    %cst = arith.constant dense<0.000000e+00> : vector<16x512xf32>
    %2 = tpu.matmul %0, %1, %cst {dimension_numbers = #tpu.dot_dimension_numbers<[1], [0], [0], [1], [0, 0, 1, 1], [], []>} : vector<16x3072xbf16>, vector<3072x512xbf16>, vector<16x512xf32> -> vector<16x512xf32>
    %cst_3 = arith.constant 0.000000e+00 : f32
    %3 = vector.broadcast %cst_3 : f32 to vector<16x512xf32>
    %4 = arith.maximumf %2, %3 : vector<16x512xf32>
    %cst_4 = arith.constant 1.41421354 : f32
    %5 = vector.broadcast %cst_4 : f32 to vector<16x512xf32>
    %6 = arith.mulf %4, %5 : vector<16x512xf32>
    %7 = arith.truncf %6 : vector<16x512xf32> to vector<16x512xbf16>
    %c0_5 = arith.constant 0 : index
    %c0_6 = arith.constant 0 : index
    %c0_7 = arith.constant 0 : index
    %8 = vector.load %arg2[%c0_5, %c0_6, %c0_7] : memref<3x512x512xbf16, #tpu.memory_space<vmem>>, vector<1x512x512xbf16>
    %9 = vector.shape_cast %8 : vector<1x512x512xbf16> to vector<512x512xbf16>
    %cst_8 = arith.constant dense<0.000000e+00> : vector<16x512xf32>
    %10 = tpu.matmul %7, %9, %cst_8 {dimension_numbers = #tpu.dot_dimension_numbers<[1], [0], [0], [1], [0, 0, 1, 1], [], []>} : vector<16x512xbf16>, vector<512x512xbf16>, vector<16x512xf32> -> vector<16x512xf32>
    %cst_9 = arith.constant 0.000000e+00 : f32
    %11 = vector.broadcast %cst_9 : f32 to vector<16x512xf32>
    %12 = arith.maximumf %10, %11 : vector<16x512xf32>
    %cst_10 = arith.constant 1.41421354 : f32
    %13 = vector.broadcast %cst_10 : f32 to vector<16x512xf32>
    %14 = arith.mulf %12, %13 : vector<16x512xf32>
    %15 = arith.truncf %14 : vector<16x512xf32> to vector<16x512xbf16>
    %c1 = arith.constant 1 : index
    %c0_11 = arith.constant 0 : index
    %c0_12 = arith.constant 0 : index
    %16 = vector.load %arg2[%c1, %c0_11, %c0_12] : memref<3x512x512xbf16, #tpu.memory_space<vmem>>, vector<1x512x512xbf16>
    %17 = vector.shape_cast %16 : vector<1x512x512xbf16> to vector<512x512xbf16>
    %cst_13 = arith.constant dense<0.000000e+00> : vector<16x512xf32>
    %18 = tpu.matmul %15, %17, %cst_13 {dimension_numbers = #tpu.dot_dimension_numbers<[1], [0], [0], [1], [0, 0, 1, 1], [], []>} : vector<16x512xbf16>, vector<512x512xbf16>, vector<16x512xf32> -> vector<16x512xf32>
    %cst_14 = arith.constant 0.000000e+00 : f32
    %19 = vector.broadcast %cst_14 : f32 to vector<16x512xf32>
    %20 = arith.maximumf %18, %19 : vector<16x512xf32>
    %cst_15 = arith.constant 1.41421354 : f32
    %21 = vector.broadcast %cst_15 : f32 to vector<16x512xf32>
    %22 = arith.mulf %20, %21 : vector<16x512xf32>
    %23 = arith.truncf %22 : vector<16x512xf32> to vector<16x512xbf16>
    %c2 = arith.constant 2 : index
    %c0_16 = arith.constant 0 : index
    %c0_17 = arith.constant 0 : index
    %24 = vector.load %arg2[%c2, %c0_16, %c0_17] : memref<3x512x512xbf16, #tpu.memory_space<vmem>>, vector<1x512x512xbf16>
    %25 = vector.shape_cast %24 : vector<1x512x512xbf16> to vector<512x512xbf16>
    %cst_18 = arith.constant dense<0.000000e+00> : vector<16x512xf32>
    %26 = tpu.matmul %23, %25, %cst_18 {dimension_numbers = #tpu.dot_dimension_numbers<[1], [0], [0], [1], [0, 0, 1, 1], [], []>} : vector<16x512xbf16>, vector<512x512xbf16>, vector<16x512xf32> -> vector<16x512xf32>
    %cst_19 = arith.constant 0.000000e+00 : f32
    %27 = vector.broadcast %cst_19 : f32 to vector<16x512xf32>
    %28 = arith.maximumf %26, %27 : vector<16x512xf32>
    %cst_20 = arith.constant 1.41421354 : f32
    %29 = vector.broadcast %cst_20 : f32 to vector<16x512xf32>
    %30 = arith.mulf %28, %29 : vector<16x512xf32>
    %31 = arith.truncf %30 : vector<16x512xf32> to vector<16x512xbf16>
    %c0_21 = arith.constant 0 : index
    %c0_22 = arith.constant 0 : index
    %32 = vector.load %arg3[%c0_21, %c0_22] : memref<512x128xbf16, #tpu.memory_space<vmem>>, vector<512x128xbf16>
    %cst_23 = arith.constant dense<0.000000e+00> : vector<16x128xf32>
    %33 = tpu.matmul %31, %32, %cst_23 {dimension_numbers = #tpu.dot_dimension_numbers<[1], [0], [0], [1], [0, 0, 1, 1], [], []>} : vector<16x512xbf16>, vector<512x128xbf16>, vector<16x128xf32> -> vector<16x128xf32>
    %c0_24 = arith.constant 0 : index
    %c0_25 = arith.constant 0 : index
    %34 = vector.load %arg4[%c0_24, %c0_25] : memref<16x128xf32, #tpu.memory_space<vmem>>, vector<16x128xf32>
    tpu.vector_store %arg4[%c0_24, %c0_25], %33 {strides = array<i32>} : memref<16x128xf32, #tpu.memory_space<vmem>>, vector<16x128xf32>,
    return
  }
}

</mosaic_0001>

<bundles_post_ra>
// kernel: _forward_impl.1
= control target key start
LH: loop header
LB: loop body
LE: loop exit
PB: predicated region body
PF: predicated region fallthrough
CT: control target
= control target key end

     0   :  { %9 = vsyncpa [#allocation3], 0  ;;  %s16452_s0 = inlined_call_operand.vmem [shape: bf16[16,3072], index: 0, kind: input, shape index: {}]   ;;  %s16453_s1 = inlined_call_operand.hbm [shape: bf16[3072,512], index: 1, kind: input, shape index: {}]   ;;  %s16454_s2 = inlined_call_operand.hbm [shape: bf16[3,512,512], index: 2, kind: input, shape index: {}]   ;;  %s16455_s3 = inlined_call_operand.hbm [shape: bf16[512,128], index: 3, kind: input, shape index: {}]   ;;  %s16456_s4 = inlined_call_operand.vmem [shape: f32[16,128], index: 4, kind: output, shape index: {}]  }
   0x1   :  { %10 = vsyncpa [#allocation5], 0  ;;  %s30_s17 = sshll.u32 %s16454_s2, 4  ;;  %s15661_s18 = smov [#allocation4]   ;;  %s31_s17 = int_to_ptr.hbm [resolvable:$true] %s30_s17 }
   0x2   :  { %s32_s19 = sshll.u32 %s15661_s18, 4  ;;  %s17_s22 = sshll.u32 %s16453_s1, 4  ;;  %s33_s19 = int_to_ptr.vmem [resolvable:$true] %s32_s19  ;;  %s18_s22 = int_to_ptr.hbm [resolvable:$true] %s17_s22 }
   0x3   :  { %s15662_s23 = smov 256   ;;  %s15663_s24 = smov 16  }
   0x4   :  { %38 = dma.hbm_to_vmem [thread:$0]  %s31_s17, 49152, %s33_s19, [#allocation5], %s15662_s23, %s15662_s23, %s15663_s24  }
   0x5   :  { %s15664_s25 = smov [#allocation2]   ;;  %s43_s29 = sshll.u32 %s16455_s3, 4  ;;  %s44_s29 = int_to_ptr.hbm [resolvable:$true] %s43_s29 }
   0x6   :  { %s19_s26 = sshll.u32 %s15664_s25, 4  ;;  %s15665_s2 = smov [#allocation6]   ;;  %s20_s26 = int_to_ptr.vmem [resolvable:$true] %s19_s26 }
   0x7   :  { %25 = dma.hbm_to_vmem [thread:$0]  %s18_s22, 98304, %s20_s26, [#allocation3], %s15662_s23, %s15662_s23, %s15663_s24  }
   0x8   :  { %s45_s30 = sshll.u32 %s15665_s2, 4  ;;  %s15666_s5 = smov 64   ;;  %s46_s30 = int_to_ptr.vmem [resolvable:$true] %s45_s30 }
   0x9   :  { %s15667_s6 = smov 4  }
   0xa   :  { %51 = dma.hbm_to_vmem [thread:$0]  %s44_s29, 4096, %s46_s30, [#allocation5], %s15666_s5, %s15666_s5, %s15667_s6  }
   0xb   :  { %15657 = dma.done.wait [#allocation3], 98304  }
   0xc   :  { %15658 = vsyncadd [#allocation3], 4294868992 }
   0xd   :  { %15659 = dma.done.wait [#allocation5], 53248  }
   0xe   :  { %15660 = vsyncadd [#allocation5], 4294914048  ;;  %v9748_v0 = vld [vmem:[#allocation2 + $0xe0] sm:$0xf]  ;;  %v14424_v1 = vld [vmem:[#allocation2 + $0xec] sm:$0xf0] }
   0xf   :  { %v9876_v2 = vld [vmem:[#allocation2 + $0x1e0] sm:$0xf]  ;;  %v9749_v3 = vor.u32 %v14424_v1, %v9748_v0  ;;  %v14456_v4 = vld [vmem:[#allocation2 + $0x1ec] sm:$0xf0] }
  0x10   :  { %v10004_v5 = vld [vmem:[#allocation2 + $0x2e0] sm:$0xf]  ;;  %v14488_v6 = vld [vmem:[#allocation2 + $0x2ec] sm:$0xf0]  ;;  %v9877_v7 = vor.u32 %v14456_v4, %v9876_v2 }
  0x11   :  { %v10005_v8 = vor.u32 %v14488_v6, %v10004_v5  ;;  %v10132_v9 = vld [vmem:[#allocation2 + $0x3e0] sm:$0xf]  ;;  %v14520_v10 = vld [vmem:[#allocation2 + $0x3ec] sm:$0xf0]  ;;  %4816 = vmatpush.bf16.msra.mxu0 %v9749_v3 }
  0x12   :  { %v9732_v11 = vld [vmem:[#allocation2 + $0xc0] sm:$0xf]  ;;  %v10133_v12 = vor.u32 %v14520_v10, %v10132_v9  ;;  %v14420_v13 = vld [vmem:[#allocation2 + $0xcc] sm:$0xf0]  ;;  %4830 = vmatpush.bf16.msra.mxu1 %v9877_v7 }
  0x13   :  { %v9860_v14 = vld [vmem:[#allocation2 + $0x1c0] sm:$0xf]  ;;  %v14452_v15 = vld [vmem:[#allocation2 + $0x1cc] sm:$0xf0]  ;;  %4844 = vmatpush.bf16.msra.mxu2 %v10005_v8  ;;  %v9733_v16 = vor.u32 %v14420_v13, %v9732_v11 }
  0x14   :  { %v9861_v17 = vor.u32 %v14452_v15, %v9860_v14  ;;  %v9988_v18 = vld [vmem:[#allocation2 + $0x2c0] sm:$0xf]  ;;  %v14484_v19 = vld [vmem:[#allocation2 + $0x2cc] sm:$0xf0]  ;;  %4858 = vmatpush.bf16.msra.mxu3 %v10133_v12 }
  0x15   :  { %v10116_v20 = vld [vmem:[#allocation2 + $0x3c0] sm:$0xf]  ;;  %v9989_v21 = vor.u32 %v14484_v19, %v9988_v18  ;;  %v14516_v22 = vld [vmem:[#allocation2 + $0x3cc] sm:$0xf0]  ;;  %4817 = vmatpush.bf16.msra.mxu0 %v9733_v16 }
  0x16   :  { %v9716_v23 = vld [vmem:[#allocation2 + $0xa0] sm:$0xf]  ;;  %v14416_v24 = vld [vmem:[#allocation2 + $0xac] sm:$0xf0]  ;;  %v10117_v25 = vor.u32 %v14516_v22, %v10116_v20  ;;  %4831 = vmatpush.bf16.msra.mxu1 %v9861_v17 }
  0x17   :  { %v9844_v26 = vld [vmem:[#allocation2 + $0x1a0] sm:$0xf]  ;;  %v14448_v27 = vld [vmem:[#allocation2 + $0x1ac] sm:$0xf0]  ;;  %v9717_v29 = vor.u32 %v14416_v24, %v9716_v23  ;;  %4845 = vmatpush.bf16.msra.mxu2 %v9989_v21 }
  0x18   :  { %v9972_v28 = vld [vmem:[#allocation2 + $0x2a0] sm:$0xf]  ;;  %v14480_v30 = vld [vmem:[#allocation2 + $0x2ac] sm:$0xf0]  ;;  %v9845_v33 = vor.u32 %v14448_v27, %v9844_v26  ;;  %4859 = vmatpush.bf16.msra.mxu3 %v10117_v25 }
  0x19   :  { %v10100_v31 = vld [vmem:[#allocation2 + $0x3a0] sm:$0xf]  ;;  %v14512_v32 = vld [vmem:[#allocation2 + $0x3ac] sm:$0xf0]  ;;  %v9973_v34 = vor.u32 %v14480_v30, %v9972_v28  ;;  %4818 = vmatpush.bf16.msra.mxu0 %v9717_v29 }
  0x1a   :  { %v9700_v35 = vld [vmem:[#allocation2 + $0x80] sm:$0xf]  ;;  %v14412_v36 = vld [vmem:[#allocation2 + $0x8c] sm:$0xf0]  ;;  %v10101_v38 = vor.u32 %v14512_v32, %v10100_v31  ;;  %4832 = vmatpush.bf16.msra.mxu1 %v9845_v33 }
  0x1b   :  { %v9828_v37 = vld [vmem:[#allocation2 + $0x180] sm:$0xf]  ;;  %v14444_v39 = vld [vmem:[#allocation2 + $0x18c] sm:$0xf0]  ;;  %v9701_v44 = vor.u32 %v14412_v36, %v9700_v35  ;;  %4846 = vmatpush.bf16.msra.mxu2 %v9973_v34 }
  0x1c   :  { %v9956_v40 = vld [vmem:[#allocation2 + $0x280] sm:$0xf]  ;;  %v14476_v41 = vld [vmem:[#allocation2 + $0x28c] sm:$0xf0]  ;;  %v9829_v45 = vor.u32 %v14444_v39, %v9828_v37  ;;  %4860 = vmatpush.bf16.msra.mxu3 %v10101_v38 }
  0x1d   :  { %v10084_v42 = vld [vmem:[#allocation2 + $0x380] sm:$0xf]  ;;  %v14508_v43 = vld [vmem:[#allocation2 + $0x38c] sm:$0xf0]  ;;  %v9957_v46 = vor.u32 %v14476_v41, %v9956_v40  ;;  %4819 = vmatpush.bf16.msra.mxu0 %v9701_v44 }
  0x1e   :  { %v9684_v47 = vld [vmem:[#allocation2 + $0x60] sm:$0xf]  ;;  %v14408_v48 = vld [vmem:[#allocation2 + $0x6c] sm:$0xf0]  ;;  %v10085_v50 = vor.u32 %v14508_v43, %v10084_v42  ;;  %4833 = vmatpush.bf16.msra.mxu1 %v9829_v45 }
  0x1f   :  { %v9812_v49 = vld [vmem:[#allocation2 + $0x160] sm:$0xf]  ;;  %v14440_v51 = vld [vmem:[#allocation2 + $0x16c] sm:$0xf0]  ;;  %v9685_v56 = vor.u32 %v14408_v48, %v9684_v47  ;;  %4847 = vmatpush.bf16.msra.mxu2 %v9957_v46 }
  0x20   :  { %v9940_v52 = vld [vmem:[#allocation2 + $0x260] sm:$0xf]  ;;  %v14472_v53 = vld [vmem:[#allocation2 + $0x26c] sm:$0xf0]  ;;  %v9813_v57 = vor.u32 %v14440_v51, %v9812_v49  ;;  %4861 = vmatpush.bf16.msra.mxu3 %v10085_v50 }
  0x21   :  { %v10068_v54 = vld [vmem:[#allocation2 + $0x360] sm:$0xf]  ;;  %v14504_v55 = vld [vmem:[#allocation2 + $0x36c] sm:$0xf0]  ;;  %v9941_v58 = vor.u32 %v14472_v53, %v9940_v52  ;;  %4820 = vmatpush.bf16.msra.mxu0 %v9685_v56 }
  0x22   :  { %v9668_v59 = vld [vmem:[#allocation2 + $0x40] sm:$0xf]  ;;  %v14404_v60 = vld [vmem:[#allocation2 + $0x4c] sm:$0xf0]  ;;  %v10069_v62 = vor.u32 %v14504_v55, %v10068_v54  ;;  %4834 = vmatpush.bf16.msra.mxu1 %v9813_v57  ;;  %v9548_v54 = vld [vmem:[%s16452_s0 + $0x8] sm:$0xf] }
  0x23   :  { %v9796_v61 = vld [vmem:[#allocation2 + $0x140] sm:$0xf]  ;;  %v14436_v63 = vld [vmem:[#allocation2 + $0x14c] sm:$0xf0]  ;;  %v9669_v4 = vor.u32 %v14404_v60, %v9668_v59  ;;  %4848 = vmatpush.bf16.msra.mxu2 %v9941_v58  ;;  %v14383_v59 = vld [vmem:[%s16452_s0 + $0x64] sm:$0xf0] }
  0x24   :  { %v9924_v0 = vld [vmem:[#allocation2 + $0x240] sm:$0xf]  ;;  %v14468_v1 = vld [vmem:[#allocation2 + $0x24c] sm:$0xf0]  ;;  %v9797_v5 = vor.u32 %v14436_v63, %v9796_v61  ;;  %4862 = vmatpush.bf16.msra.mxu3 %v10069_v62 }
  0x25   :  { %v10052_v2 = vld [vmem:[#allocation2 + $0x340] sm:$0xf]  ;;  %v14500_v3 = vld [vmem:[#allocation2 + $0x34c] sm:$0xf0]  ;;  %v9925_v6 = vor.u32 %v14468_v1, %v9924_v0  ;;  %4821 = vmatpush.bf16.msra.mxu0 %v9669_v4  ;;  %v15716_v1 = vor.u32 %v14383_v59, %v9548_v54 }
  0x26   :  { %v9652_v7 = vld [vmem:[#allocation2 + $0x20] sm:$0xf]  ;;  %v14400_v8 = vld [vmem:[#allocation2 + $0x2c] sm:$0xf0]  ;;  %v10053_v10 = vor.u32 %v14500_v3, %v10052_v2  ;;  %4835 = vmatpush.bf16.msra.mxu1 %v9797_v5 }
  0x27   :  { %v9780_v9 = vld [vmem:[#allocation2 + $0x120] sm:$0xf]  ;;  %v14432_v11 = vld [vmem:[#allocation2 + $0x12c] sm:$0xf0]  ;;  %v9653_v16 = vor.u32 %v14400_v8, %v9652_v7  ;;  %4849 = vmatpush.bf16.msra.mxu2 %v9925_v6  ;;  %v14370_v6 = vld [vmem:[%s16452_s0 + $0x4] sm:$0xf] }
  0x28   :  { %v9908_v12 = vld [vmem:[#allocation2 + $0x220] sm:$0xf]  ;;  %v14464_v13 = vld [vmem:[#allocation2 + $0x22c] sm:$0xf0]  ;;  %v9781_v19 = vor.u32 %v14432_v11, %v9780_v9  ;;  %4863 = vmatpush.bf16.msra.mxu3 %v10053_v10  ;;  %v9542_v7 = vld [vmem:[%s16452_s0 + $0x60] sm:$0xf0] }
  0x29   :  { %v10036_v14 = vld [vmem:[#allocation2 + $0x320] sm:$0xf]  ;;  %v14496_v15 = vld [vmem:[#allocation2 + $0x32c] sm:$0xf0]  ;;  %v9909_v20 = vor.u32 %v14464_v13, %v9908_v12  ;;  %4822 = vmatpush.bf16.msra.mxu0 %v9653_v16  ;;  %v14371_v8 = vld [vmem:[%s16452_s0 + $0xc] sm:$0xf]  ;;  %v15729_v10 = vor.u32 %v14370_v6, %v9542_v7 }
  0x2a   :  { %v9636_v17 = vld [vmem:[#allocation2] sm:$0xf]  ;;  %v14396_v18 = vld [vmem:[#allocation2 + $0xc] sm:$0xf0]  ;;  %v10037_v24 = vor.u32 %v14496_v15, %v10036_v14  ;;  %4836 = vmatpush.bf16.msra.mxu1 %v9781_v19  ;;  %v9550_v11 = vld [vmem:[%s16452_s0 + $0x68] sm:$0xf0] }
  0x2b   :  { %v9764_v21 = vld [vmem:[#allocation2 + $0x100] sm:$0xf]  ;;  %v14428_v22 = vld [vmem:[#allocation2 + $0x10c] sm:$0xf0]  ;;  %v9637_v31 = vor.u32 %v14396_v18, %v9636_v17  ;;  %4850 = vmatpush.bf16.msra.mxu2 %v9909_v20  ;;  %v15734_v17 = vor.u32 %v14371_v8, %v9550_v11 }
  0x2c   :  { %v9892_v23 = vld [vmem:[#allocation2 + $0x200] sm:$0xf]  ;;  %v14460_v25 = vld [vmem:[#allocation2 + $0x20c] sm:$0xf0]  ;;  %v9765_v35 = vor.u32 %v14428_v22, %v9764_v21  ;;  %4864 = vmatpush.bf16.msra.mxu3 %v10037_v24 }
  0x2d   :  { %v10020_v26 = vld [vmem:[#allocation2 + $0x300] sm:$0xf]  ;;  %v14492_v27 = vld [vmem:[#allocation2 + $0x30c] sm:$0xf0]  ;;  %v9893_v36 = vor.u32 %v14460_v25, %v9892_v23  ;;  %4823 = vmatpush.bf16.msra.mxu0 %v9637_v31 }
  0x2e   :  { %v10260_v28 = vld [vmem:[#allocation2 + $0x4e0] sm:$0xf]  ;;  %v14552_v29 = vld [vmem:[#allocation2 + $0x4ec] sm:$0xf0]  ;;  %v10021_v39 = vor.u32 %v14492_v27, %v10020_v26  ;;  %4837 = vmatpush.bf16.msra.mxu1 %v9765_v35 }
  0x2f   :  { %v10388_v30 = vld [vmem:[#allocation2 + $0x5e0] sm:$0xf]  ;;  %v14584_v32 = vld [vmem:[#allocation2 + $0x5ec] sm:$0xf0]  ;;  %v10261_v40 = vor.u32 %v14552_v29, %v10260_v28  ;;  %4851 = vmatpush.bf16.msra.mxu2 %v9893_v36 }
  0x30   :  { %v10516_v33 = vld [vmem:[#allocation2 + $0x6e0] sm:$0xf]  ;;  %v14616_v34 = vld [vmem:[#allocation2 + $0x6ec] sm:$0xf0]  ;;  %v10389_v43 = vor.u32 %v14584_v32, %v10388_v30  ;;  %4865 = vmatpush.bf16.msra.mxu3 %v10021_v39 }
  0x31   :  { %v10644_v37 = vld [vmem:[#allocation2 + $0x7e0] sm:$0xf]  ;;  %v14648_v38 = vld [vmem:[#allocation2 + $0x7ec] sm:$0xf0]  ;;  %v10517_v44 = vor.u32 %v14616_v34, %v10516_v33  ;;  %4872 = vmatpush.bf16.msrb.mxu0 %v10261_v40  ;;  %4838 = vmatmul.bf16.vlgmr.msra.gmra.mxu1 %v15729_v10 }
  0x32   :  { %v10244_v41 = vld [vmem:[#allocation2 + $0x4c0] sm:$0xf]  ;;  %v14548_v42 = vld [vmem:[#allocation2 + $0x4cc] sm:$0xf0]  ;;  %v10645_v48 = vor.u32 %v14648_v38, %v10644_v37  ;;  %4886 = vmatpush.bf16.msrb.mxu1 %v10389_v43  ;;  %4852 = vmatmul.bf16.vlgmr.msra.gmra.mxu2 %v15716_v1 }
  0x33   :  { %v10372_v45 = vld [vmem:[#allocation2 + $0x5c0] sm:$0xf]  ;;  %v14580_v46 = vld [vmem:[#allocation2 + $0x5cc] sm:$0xf0]  ;;  %v10245_v55 = vor.u32 %v14548_v42, %v10244_v41  ;;  %4900 = vmatpush.bf16.msrb.mxu2 %v10517_v44  ;;  %4866 = vmatmul.bf16.vlgmr.msra.gmra.mxu3 %v15734_v17 }
  0x34   :  { %v10500_v47 = vld [vmem:[#allocation2 + $0x6c0] sm:$0xf]  ;;  %v14612_v49 = vld [vmem:[#allocation2 + $0x6cc] sm:$0xf0]  ;;  %v10373_v60 = vor.u32 %v14580_v46, %v10372_v45  ;;  %4914 = vmatpush.bf16.msrb.mxu3 %v10645_v48 }
  0x35   :  { %v10628_v50 = vld [vmem:[#allocation2 + $0x7c0] sm:$0xf]  ;;  %v14644_v51 = vld [vmem:[#allocation2 + $0x7cc] sm:$0xf0]  ;;  %v10501_v61 = vor.u32 %v14612_v49, %v10500_v47  ;;  %4873 = vmatpush.bf16.msrb.mxu0 %v10245_v55 }
  0x36   :  { %v9540_v52 = vld [vmem:[%s16452_s0] sm:$0xf]  ;;  %v14544_v57 = vld [vmem:[#allocation2 + $0x4ac] sm:$0xf0]  ;;  %v10629_v2 = vor.u32 %v14644_v51, %v10628_v50  ;;  %4887 = vmatpush.bf16.msrb.mxu1 %v10373_v60 }
  0x37   :  { %v14382_v53 = vld [vmem:[%s16452_s0 + $0x5c] sm:$0xf0]  ;;  %v14576_v63 = vld [vmem:[#allocation2 + $0x5ac] sm:$0xf0]  ;;  %4901 = vmatpush.bf16.msrb.mxu2 %v10501_v61 }
  0x38   :  { %v10228_v56 = vld [vmem:[#allocation2 + $0x4a0] sm:$0xf]  ;;  %v15711_v58 = vor.u32 %v14382_v53, %v9540_v52  ;;  %v14608_v3 = vld [vmem:[#allocation2 + $0x6ac] sm:$0xf0]  ;;  %4915 = vmatpush.bf16.msrb.mxu3 %v10629_v2 }
  0x39   :  { %v10356_v62 = vld [vmem:[#allocation2 + $0x5a0] sm:$0xf]  ;;  %v14640_v5 = vld [vmem:[#allocation2 + $0x7ac] sm:$0xf0]  ;;  %v10229_v9 = vor.u32 %v14544_v57, %v10228_v56 }
  0x3a   :  { %v10484_v0 = vld [vmem:[#allocation2 + $0x6a0] sm:$0xf]  ;;  %4824 = vmatmul.bf16.vlgmr.msra.gmra.mxu0 %v15711_v58  ;;  %v10357_v12 = vor.u32 %v14576_v63, %v10356_v62  ;;  %v14540_v15 = vld [vmem:[#allocation2 + $0x48c] sm:$0xf0] }
  0x3b   :  { %v10612_v4 = vld [vmem:[#allocation2 + $0x7a0] sm:$0xf]  ;;  %v10485_v13 = vor.u32 %v14608_v3, %v10484_v0  ;;  %v14572_v19 = vld [vmem:[#allocation2 + $0x58c] sm:$0xf0]  ;;  %4874 = vmatpush.bf16.msrb.mxu0 %v10229_v9 }
  0x3c   :  { %v10212_v14 = vld [vmem:[#allocation2 + $0x480] sm:$0xf]  ;;  %v10613_v18 = vor.u32 %v14640_v5, %v10612_v4  ;;  %v14604_v21 = vld [vmem:[#allocation2 + $0x68c] sm:$0xf0]  ;;  %4888 = vmatpush.bf16.msrb.mxu1 %v10357_v12 }
  0x3d   :  { %v10340_v16 = vld [vmem:[#allocation2 + $0x580] sm:$0xf]  ;;  %v14636_v23 = vld [vmem:[#allocation2 + $0x78c] sm:$0xf0]  ;;  %v10213_v24 = vor.u32 %v14540_v15, %v10212_v14  ;;  %4902 = vmatpush.bf16.msrb.mxu2 %v10485_v13 }
  0x3e   :  { %v10468_v20 = vld [vmem:[#allocation2 + $0x680] sm:$0xf]  ;;  %v10341_v25 = vor.u32 %v14572_v19, %v10340_v16  ;;  %v14536_v28 = vld [vmem:[#allocation2 + $0x46c] sm:$0xf0]  ;;  %4916 = vmatpush.bf16.msrb.mxu3 %v10613_v18 }
  0x3f   :  { %v10596_v22 = vld [vmem:[#allocation2 + $0x780] sm:$0xf]  ;;  %v10469_v26 = vor.u32 %v14604_v21, %v10468_v20  ;;  %v14568_v31 = vld [vmem:[#allocation2 + $0x56c] sm:$0xf0]  ;;  %4875 = vmatpush.bf16.msrb.mxu0 %v10213_v24 }
  0x40   :  { %v10196_v27 = vld [vmem:[#allocation2 + $0x460] sm:$0xf]  ;;  %v10597_v30 = vor.u32 %v14636_v23, %v10596_v22  ;;  %v14600_v33 = vld [vmem:[#allocation2 + $0x66c] sm:$0xf0]  ;;  %4889 = vmatpush.bf16.msrb.mxu1 %v10341_v25  ;;  %v9564_v25 = vld [vmem:[%s16452_s0 + $0x18] sm:$0xf] }
  0x41   :  { %v10324_v29 = vld [vmem:[#allocation2 + $0x560] sm:$0xf]  ;;  %v14632_v35 = vld [vmem:[#allocation2 + $0x76c] sm:$0xf0]  ;;  %v10197_v36 = vor.u32 %v14536_v28, %v10196_v27  ;;  %4903 = vmatpush.bf16.msrb.mxu2 %v10469_v26  ;;  %v14385_v26 = vld [vmem:[%s16452_s0 + $0x74] sm:$0xf0] }
  0x42   :  { %v10452_v32 = vld [vmem:[#allocation2 + $0x660] sm:$0xf]  ;;  %v10325_v37 = vor.u32 %v14568_v31, %v10324_v29  ;;  %v14532_v40 = vld [vmem:[#allocation2 + $0x44c] sm:$0xf0]  ;;  %4917 = vmatpush.bf16.msrb.mxu3 %v10597_v30  ;;  %v14372_v27 = vld [vmem:[%s16452_s0 + $0x14] sm:$0xf] }
  0x43   :  { %v10580_v34 = vld [vmem:[#allocation2 + $0x760] sm:$0xf]  ;;  %v10453_v38 = vor.u32 %v14600_v33, %v10452_v32  ;;  %v14564_v43 = vld [vmem:[#allocation2 + $0x54c] sm:$0xf0]  ;;  %4876 = vmatpush.bf16.msrb.mxu0 %v10197_v36  ;;  %v9558_v30 = vld [vmem:[%s16452_s0 + $0x70] sm:$0xf0] }
  0x44   :  { %v10180_v39 = vld [vmem:[#allocation2 + $0x440] sm:$0xf]  ;;  %v10581_v42 = vor.u32 %v14632_v35, %v10580_v34  ;;  %v14596_v45 = vld [vmem:[#allocation2 + $0x64c] sm:$0xf0]  ;;  %4890 = vmatpush.bf16.msrb.mxu1 %v10325_v37  ;;  %v14373_v31 = vld [vmem:[%s16452_s0 + $0x1c] sm:$0xf] }
  0x45   :  { %v10308_v41 = vld [vmem:[#allocation2 + $0x540] sm:$0xf]  ;;  %v14628_v47 = vld [vmem:[#allocation2 + $0x74c] sm:$0xf0]  ;;  %v10181_v48 = vor.u32 %v14532_v40, %v10180_v39  ;;  %4904 = vmatpush.bf16.msrb.mxu2 %v10453_v38  ;;  %v9566_v32 = vld [vmem:[%s16452_s0 + $0x78] sm:$0xf0] }
  0x46   :  { %v10436_v44 = vld [vmem:[#allocation2 + $0x640] sm:$0xf]  ;;  %v10309_v50 = vor.u32 %v14564_v43, %v10308_v41  ;;  %v14528_v52 = vld [vmem:[#allocation2 + $0x42c] sm:$0xf0]  ;;  %4918 = vmatpush.bf16.msrb.mxu3 %v10581_v42  ;;  %v15764_v43 = vor.u32 %v14385_v26, %v9564_v25 }
  0x47   :  { %v10564_v46 = vld [vmem:[#allocation2 + $0x740] sm:$0xf]  ;;  %v10437_v51 = vor.u32 %v14596_v45, %v10436_v44  ;;  %v14560_v54 = vld [vmem:[#allocation2 + $0x52c] sm:$0xf0]  ;;  %4877 = vmatpush.bf16.msrb.mxu0 %v10181_v48  ;;  %v15766_v44 = vor.u32 %v14372_v27, %v9558_v30 }
  0x48   :  { %v10164_v49 = vld [vmem:[#allocation2 + $0x420] sm:$0xf]  ;;  %v10565_v55 = vor.u32 %v14628_v47, %v10564_v46  ;;  %v14592_v57 = vld [vmem:[#allocation2 + $0x62c] sm:$0xf0]  ;;  %4891 = vmatpush.bf16.msrb.mxu1 %v10309_v50  ;;  %v15768_v47 = vor.u32 %v14373_v31, %v9566_v32 }
  0x49   :  { %v10292_v53 = vld [vmem:[#allocation2 + $0x520] sm:$0xf]  ;;  %v14624_v60 = vld [vmem:[#allocation2 + $0x72c] sm:$0xf0]  ;;  %v10165_v63 = vor.u32 %v14528_v52, %v10164_v49  ;;  %4905 = vmatpush.bf16.msrb.mxu2 %v10437_v51 }
  0x4a   :  { %v10420_v56 = vld [vmem:[#allocation2 + $0x620] sm:$0xf]  ;;  %v14524_v62 = vld [vmem:[#allocation2 + $0x40c] sm:$0xf0]  ;;  %v10293_v5 = vor.u32 %v14560_v54, %v10292_v53  ;;  %4919 = vmatpush.bf16.msrb.mxu3 %v10565_v55 }
  0x4b   :  { %v10548_v59 = vld [vmem:[#allocation2 + $0x720] sm:$0xf]  ;;  %v14556_v2 = vld [vmem:[#allocation2 + $0x50c] sm:$0xf0]  ;;  %v10421_v6 = vor.u32 %v14592_v57, %v10420_v56  ;;  %4878 = vmatpush.bf16.msrb.mxu0 %v10165_v63 }
  0x4c   :  { %v10148_v61 = vld [vmem:[#allocation2 + $0x400] sm:$0xf]  ;;  %v14588_v4 = vld [vmem:[#allocation2 + $0x60c] sm:$0xf0]  ;;  %v10549_v11 = vor.u32 %v14624_v60, %v10548_v59  ;;  %4892 = vmatpush.bf16.msrb.mxu1 %v10293_v5 }
  0x4d   :  { %v10276_v0 = vld [vmem:[#allocation2 + $0x500] sm:$0xf]  ;;  %v14620_v8 = vld [vmem:[#allocation2 + $0x70c] sm:$0xf0]  ;;  %v10149_v19 = vor.u32 %v14524_v62, %v10148_v61  ;;  %4906 = vmatpush.bf16.msrb.mxu2 %v10421_v6 }
  0x4e   :  { %v10404_v3 = vld [vmem:[#allocation2 + $0x600] sm:$0xf]  ;;  %v14680_v12 = vld [vmem:[#allocation2 + $0x8ec] sm:$0xf0]  ;;  %v10277_v23 = vor.u32 %v14556_v2, %v10276_v0  ;;  %4920 = vmatpush.bf16.msrb.mxu3 %v10549_v11 }
  0x4f   :  { %v10532_v7 = vld [vmem:[#allocation2 + $0x700] sm:$0xf]  ;;  %v14712_v14 = vld [vmem:[#allocation2 + $0x9ec] sm:$0xf0]  ;;  %v10405_v24 = vor.u32 %v14588_v4, %v10404_v3  ;;  %4879 = vmatpush.bf16.msrb.mxu0 %v10149_v19 }
  0x50   :  { %v10772_v9 = vld [vmem:[#allocation2 + $0x8e0] sm:$0xf]  ;;  %v14744_v16 = vld [vmem:[#allocation2 + $0xaec] sm:$0xf0]  ;;  %v10533_v28 = vor.u32 %v14620_v8, %v10532_v7  ;;  %4893 = vmatpush.bf16.msrb.mxu1 %v10277_v23 }
  0x51   :  { %v10900_v13 = vld [vmem:[#allocation2 + $0x9e0] sm:$0xf]  ;;  %v14776_v20 = vld [vmem:[#allocation2 + $0xbec] sm:$0xf0]  ;;  %v10773_v29 = vor.u32 %v14680_v12, %v10772_v9  ;;  %4907 = vmatpush.bf16.msrb.mxu2 %v10405_v24 }
  0x52   :  { %v11028_v15 = vld [vmem:[#allocation2 + $0xae0] sm:$0xf]  ;;  %v9556_v21 = vld [vmem:[%s16452_s0 + $0x10] sm:$0xf]  ;;  %v10901_v33 = vor.u32 %v14712_v14, %v10900_v13  ;;  %4921 = vmatpush.bf16.msrb.mxu3 %v10533_v28 }
  0x53   :  { %v11156_v18 = vld [vmem:[#allocation2 + $0xbe0] sm:$0xf]  ;;  %v14384_v22 = vld [vmem:[%s16452_s0 + $0x6c] sm:$0xf0]  ;;  %v11029_v34 = vor.u32 %v14744_v16, %v11028_v15  ;;  %4928 = vmatpush.bf16.msra.mxu0 %v10773_v29  ;;  %4894 = vmatmul.bf16.vlgmr.msrb.gmra.mxu1 %v15766_v44 }
  0x54   :  { %v10756_v35 = vld [vmem:[#allocation2 + $0x8c0] sm:$0xf]  ;;  %v14676_v36 = vld [vmem:[#allocation2 + $0x8cc] sm:$0xf0]  ;;  %v11157_v38 = vor.u32 %v14776_v20, %v11156_v18  ;;  %v15762_v39 = vor.u32 %v14384_v22, %v9556_v21  ;;  %4942 = vmatpush.bf16.msra.mxu1 %v10901_v33  ;;  %4908 = vmatmul.bf16.vlgmr.msrb.gmra.mxu2 %v15764_v43 }
  0x55   :  { %v10884_v37 = vld [vmem:[#allocation2 + $0x9c0] sm:$0xf]  ;;  %v14708_v40 = vld [vmem:[#allocation2 + $0x9cc] sm:$0xf0]  ;;  %v10757_v48 = vor.u32 %v14676_v36, %v10756_v35  ;;  %4956 = vmatpush.bf16.msra.mxu2 %v11029_v34  ;;  %4922 = vmatmul.bf16.vlgmr.msrb.gmra.mxu3 %v15768_v47 }
  0x56   :  { %v11012_v41 = vld [vmem:[#allocation2 + $0xac0] sm:$0xf]  ;;  %v14740_v42 = vld [vmem:[#allocation2 + $0xacc] sm:$0xf0]  ;;  %v10885_v49 = vor.u32 %v14708_v40, %v10884_v37  ;;  %4970 = vmatpush.bf16.msra.mxu3 %v11157_v38  ;;  %4880 = vmatmul.bf16.vlgmr.msrb.gmra.mxu0 %v15762_v39 }
  0x57   :  { %v11140_v45 = vld [vmem:[#allocation2 + $0xbc0] sm:$0xf]  ;;  %v14772_v46 = vld [vmem:[#allocation2 + $0xbcc] sm:$0xf0]  ;;  %v11013_v50 = vor.u32 %v14740_v42, %v11012_v41  ;;  %4929 = vmatpush.bf16.msra.mxu0 %v10757_v48 }
  0x58   :  { %v10740_v51 = vld [vmem:[#allocation2 + $0x8a0] sm:$0xf]  ;;  %v14672_v52 = vld [vmem:[#allocation2 + $0x8ac] sm:$0xf0]  ;;  %v11141_v54 = vor.u32 %v14772_v46, %v11140_v45  ;;  %4943 = vmatpush.bf16.msra.mxu1 %v10885_v49 }
  0x59   :  { %v10868_v53 = vld [vmem:[#allocation2 + $0x9a0] sm:$0xf]  ;;  %v14704_v55 = vld [vmem:[#allocation2 + $0x9ac] sm:$0xf0]  ;;  %v10741_v61 = vor.u32 %v14672_v52, %v10740_v51  ;;  %4957 = vmatpush.bf16.msra.mxu2 %v11013_v50 }
  0x5a   :  { %v10996_v56 = vld [vmem:[#allocation2 + $0xaa0] sm:$0xf]  ;;  %v14736_v57 = vld [vmem:[#allocation2 + $0xaac] sm:$0xf0]  ;;  %v10869_v62 = vor.u32 %v14704_v55, %v10868_v53  ;;  %4971 = vmatpush.bf16.msra.mxu3 %v11141_v54 }
  0x5b   :  { %v11124_v59 = vld [vmem:[#allocation2 + $0xba0] sm:$0xf]  ;;  %v14768_v60 = vld [vmem:[#allocation2 + $0xbac] sm:$0xf0]  ;;  %v10997_v63 = vor.u32 %v14736_v57, %v10996_v56  ;;  %4930 = vmatpush.bf16.msra.mxu0 %v10741_v61 }
  0x5c   :  { %v10724_v0 = vld [vmem:[#allocation2 + $0x880] sm:$0xf]  ;;  %v14668_v2 = vld [vmem:[#allocation2 + $0x88c] sm:$0xf0]  ;;  %v11125_v4 = vor.u32 %v14768_v60, %v11124_v59  ;;  %4944 = vmatpush.bf16.msra.mxu1 %v10869_v62 }
  0x5d   :  { %v10852_v3 = vld [vmem:[#allocation2 + $0x980] sm:$0xf]  ;;  %v14700_v5 = vld [vmem:[#allocation2 + $0x98c] sm:$0xf0]  ;;  %v10725_v11 = vor.u32 %v14668_v2, %v10724_v0  ;;  %4958 = vmatpush.bf16.msra.mxu2 %v10997_v63 }
  0x5e   :  { %v10980_v6 = vld [vmem:[#allocation2 + $0xa80] sm:$0xf]  ;;  %v14732_v7 = vld [vmem:[#allocation2 + $0xa8c] sm:$0xf0]  ;;  %v10853_v12 = vor.u32 %v14700_v5, %v10852_v3  ;;  %4972 = vmatpush.bf16.msra.mxu3 %v11125_v4 }
  0x5f   :  { %v11108_v8 = vld [vmem:[#allocation2 + $0xb80] sm:$0xf]  ;;  %v14764_v9 = vld [vmem:[#allocation2 + $0xb8c] sm:$0xf0]  ;;  %v10981_v13 = vor.u32 %v14732_v7, %v10980_v6  ;;  %4931 = vmatpush.bf16.msra.mxu0 %v10725_v11 }
  0x60   :  { %v10708_v14 = vld [vmem:[#allocation2 + $0x860] sm:$0xf]  ;;  %v14664_v15 = vld [vmem:[#allocation2 + $0x86c] sm:$0xf0]  ;;  %v11109_v18 = vor.u32 %v14764_v9, %v11108_v8  ;;  %4945 = vmatpush.bf16.msra.mxu1 %v10853_v12 }
  0x61   :  { %v10836_v16 = vld [vmem:[#allocation2 + $0x960] sm:$0xf]  ;;  %v14696_v19 = vld [vmem:[#allocation2 + $0x96c] sm:$0xf0]  ;;  %v10709_v24 = vor.u32 %v14664_v15, %v10708_v14  ;;  %4959 = vmatpush.bf16.msra.mxu2 %v10981_v13 }
  0x62   :  { %v10964_v20 = vld [vmem:[#allocation2 + $0xa60] sm:$0xf]  ;;  %v14728_v21 = vld [vmem:[#allocation2 + $0xa6c] sm:$0xf0]  ;;  %v10837_v25 = vor.u32 %v14696_v19, %v10836_v16  ;;  %4973 = vmatpush.bf16.msra.mxu3 %v11109_v18  ;;  %v9580_v16 = vld [vmem:[%s16452_s0 + $0x28] sm:$0xf] }
  0x63   :  { %v11092_v22 = vld [vmem:[#allocation2 + $0xb60] sm:$0xf]  ;;  %v14760_v23 = vld [vmem:[#allocation2 + $0xb6c] sm:$0xf0]  ;;  %v10965_v26 = vor.u32 %v14728_v21, %v10964_v20  ;;  %4932 = vmatpush.bf16.msra.mxu0 %v10709_v24  ;;  %v14387_v18 = vld [vmem:[%s16452_s0 + $0x84] sm:$0xf0] }
  0x64   :  { %v10692_v27 = vld [vmem:[#allocation2 + $0x840] sm:$0xf]  ;;  %v14660_v28 = vld [vmem:[#allocation2 + $0x84c] sm:$0xf0]  ;;  %v11093_v30 = vor.u32 %v14760_v23, %v11092_v22  ;;  %4946 = vmatpush.bf16.msra.mxu1 %v10837_v25  ;;  %v14374_v19 = vld [vmem:[%s16452_s0 + $0x24] sm:$0xf] }
  0x65   :  { %v10820_v29 = vld [vmem:[#allocation2 + $0x940] sm:$0xf]  ;;  %v14692_v31 = vld [vmem:[#allocation2 + $0x94c] sm:$0xf0]  ;;  %v10693_v36 = vor.u32 %v14660_v28, %v10692_v27  ;;  %4960 = vmatpush.bf16.msra.mxu2 %v10965_v26  ;;  %v9574_v22 = vld [vmem:[%s16452_s0 + $0x80] sm:$0xf0] }
  0x66   :  { %v10948_v32 = vld [vmem:[#allocation2 + $0xa40] sm:$0xf]  ;;  %v14724_v33 = vld [vmem:[#allocation2 + $0xa4c] sm:$0xf0]  ;;  %v10821_v38 = vor.u32 %v14692_v31, %v10820_v29  ;;  %4974 = vmatpush.bf16.msra.mxu3 %v11093_v30  ;;  %v14375_v23 = vld [vmem:[%s16452_s0 + $0x2c] sm:$0xf] }
  0x67   :  { %v11076_v34 = vld [vmem:[#allocation2 + $0xb40] sm:$0xf]  ;;  %v14756_v35 = vld [vmem:[#allocation2 + $0xb4c] sm:$0xf0]  ;;  %v10949_v40 = vor.u32 %v14724_v33, %v10948_v32  ;;  %4933 = vmatpush.bf16.msra.mxu0 %v10693_v36  ;;  %v9582_v24 = vld [vmem:[%s16452_s0 + $0x88] sm:$0xf0]  ;;  %v15802_v36 = vor.u32 %v14374_v19, %v9574_v22 }
  0x68   :  { %v10676_v37 = vld [vmem:[#allocation2 + $0x820] sm:$0xf]  ;;  %v14656_v41 = vld [vmem:[#allocation2 + $0x82c] sm:$0xf0]  ;;  %v11077_v46 = vor.u32 %v14756_v35, %v11076_v34  ;;  %4947 = vmatpush.bf16.msra.mxu1 %v10821_v38  ;;  %v15800_v35 = vor.u32 %v14387_v18, %v9580_v16 }
  0x69   :  { %v10804_v42 = vld [vmem:[#allocation2 + $0x920] sm:$0xf]  ;;  %v14688_v45 = vld [vmem:[#allocation2 + $0x92c] sm:$0xf0]  ;;  %v10677_v54 = vor.u32 %v14656_v41, %v10676_v37  ;;  %4961 = vmatpush.bf16.msra.mxu2 %v10949_v40  ;;  %v15804_v40 = vor.u32 %v14375_v23, %v9582_v24 }
  0x6a   :  { %v10932_v48 = vld [vmem:[#allocation2 + $0xa20] sm:$0xf]  ;;  %v14720_v49 = vld [vmem:[#allocation2 + $0xa2c] sm:$0xf0]  ;;  %v10805_v60 = vor.u32 %v14688_v45, %v10804_v42  ;;  %4975 = vmatpush.bf16.msra.mxu3 %v11077_v46 }
  0x6b   :  { %v11060_v50 = vld [vmem:[#allocation2 + $0xb20] sm:$0xf]  ;;  %v14752_v51 = vld [vmem:[#allocation2 + $0xb2c] sm:$0xf0]  ;;  %v10933_v61 = vor.u32 %v14720_v49, %v10932_v48  ;;  %4934 = vmatpush.bf16.msra.mxu0 %v10677_v54 }
  0x6c   :  { %v10660_v52 = vld [vmem:[#allocation2 + $0x800] sm:$0xf]  ;;  %v14652_v53 = vld [vmem:[#allocation2 + $0x80c] sm:$0xf0]  ;;  %v11061_v2 = vor.u32 %v14752_v51, %v11060_v50  ;;  %4948 = vmatpush.bf16.msra.mxu1 %v10805_v60 }
  0x6d   :  { %v10788_v55 = vld [vmem:[#allocation2 + $0x900] sm:$0xf]  ;;  %v14684_v56 = vld [vmem:[#allocation2 + $0x90c] sm:$0xf0]  ;;  %v10661_v9 = vor.u32 %v14652_v53, %v10660_v52  ;;  %4962 = vmatpush.bf16.msra.mxu2 %v10933_v61 }
  0x6e   :  { %v10916_v57 = vld [vmem:[#allocation2 + $0xa00] sm:$0xf]  ;;  %v14716_v59 = vld [vmem:[#allocation2 + $0xa0c] sm:$0xf0]  ;;  %v10789_v14 = vor.u32 %v14684_v56, %v10788_v55  ;;  %4976 = vmatpush.bf16.msra.mxu3 %v11061_v2 }
  0x6f   :  { %v11044_v62 = vld [vmem:[#allocation2 + $0xb00] sm:$0xf]  ;;  %v14748_v63 = vld [vmem:[#allocation2 + $0xb0c] sm:$0xf0]  ;;  %v10917_v15 = vor.u32 %v14716_v59, %v10916_v57  ;;  %4935 = vmatpush.bf16.msra.mxu0 %v10661_v9 }
  0x70   :  { %v11284_v0 = vld [vmem:[#allocation2 + $0xce0] sm:$0xf]  ;;  %v14808_v3 = vld [vmem:[#allocation2 + $0xcec] sm:$0xf0]  ;;  %v11045_v20 = vor.u32 %v14748_v63, %v11044_v62  ;;  %4949 = vmatpush.bf16.msra.mxu1 %v10789_v14 }
  0x71   :  { %v11412_v4 = vld [vmem:[#allocation2 + $0xde0] sm:$0xf]  ;;  %v14840_v5 = vld [vmem:[#allocation2 + $0xdec] sm:$0xf0]  ;;  %v11285_v21 = vor.u32 %v14808_v3, %v11284_v0  ;;  %4963 = vmatpush.bf16.msra.mxu2 %v10917_v15 }
  0x72   :  { %v11540_v6 = vld [vmem:[#allocation2 + $0xee0] sm:$0xf]  ;;  %v14872_v7 = vld [vmem:[#allocation2 + $0xeec] sm:$0xf0]  ;;  %v11413_v25 = vor.u32 %v14840_v5, %v11412_v4  ;;  %4977 = vmatpush.bf16.msra.mxu3 %v11045_v20 }
  0x73   :  { %v11668_v8 = vld [vmem:[#allocation2 + $0xfe0] sm:$0xf]  ;;  %v14904_v11 = vld [vmem:[#allocation2 + $0xfec] sm:$0xf0]  ;;  %v11541_v26 = vor.u32 %v14872_v7, %v11540_v6  ;;  %4984 = vmatpush.bf16.msrb.mxu0 %v11285_v21  ;;  %4950 = vmatmul.bf16.vlgmr.msra.gmra.mxu1 %v15802_v36 }
  0x74   :  { %v9572_v12 = vld [vmem:[%s16452_s0 + $0x20] sm:$0xf]  ;;  %v14804_v28 = vld [vmem:[#allocation2 + $0xccc] sm:$0xf0]  ;;  %v11669_v30 = vor.u32 %v14904_v11, %v11668_v8  ;;  %4998 = vmatpush.bf16.msrb.mxu1 %v11413_v25  ;;  %4964 = vmatmul.bf16.vlgmr.msra.gmra.mxu2 %v15800_v35 }
  0x75   :  { %v14386_v13 = vld [vmem:[%s16452_s0 + $0x7c] sm:$0xf0]  ;;  %v14836_v32 = vld [vmem:[#allocation2 + $0xdcc] sm:$0xf0]  ;;  %5012 = vmatpush.bf16.msrb.mxu2 %v11541_v26  ;;  %4978 = vmatmul.bf16.vlgmr.msra.gmra.mxu3 %v15804_v40 }
  0x76   :  { %v11268_v27 = vld [vmem:[#allocation2 + $0xcc0] sm:$0xf]  ;;  %v15798_v31 = vor.u32 %v14386_v13, %v9572_v12  ;;  %v14868_v34 = vld [vmem:[#allocation2 + $0xecc] sm:$0xf0]  ;;  %5026 = vmatpush.bf16.msrb.mxu3 %v11669_v30 }
  0x77   :  { %v11396_v29 = vld [vmem:[#allocation2 + $0xdc0] sm:$0xf]  ;;  %v14900_v38 = vld [vmem:[#allocation2 + $0xfcc] sm:$0xf0]  ;;  %v11269_v41 = vor.u32 %v14804_v28, %v11268_v27 }
  0x78   :  { %v11524_v33 = vld [vmem:[#allocation2 + $0xec0] sm:$0xf]  ;;  %v11397_v42 = vor.u32 %v14836_v32, %v11396_v29  ;;  %v14800_v48 = vld [vmem:[#allocation2 + $0xcac] sm:$0xf0]  ;;  %4936 = vmatmul.bf16.vlgmr.msra.gmra.mxu0 %v15798_v31 }
  0x79   :  { %v11652_v37 = vld [vmem:[#allocation2 + $0xfc0] sm:$0xf]  ;;  %v11525_v45 = vor.u32 %v14868_v34, %v11524_v33  ;;  %v14832_v51 = vld [vmem:[#allocation2 + $0xdac] sm:$0xf0]  ;;  %4985 = vmatpush.bf16.msrb.mxu0 %v11269_v41 }
  0x7a   :  { %v11252_v46 = vld [vmem:[#allocation2 + $0xca0] sm:$0xf]  ;;  %v11653_v50 = vor.u32 %v14900_v38, %v11652_v37  ;;  %v14864_v53 = vld [vmem:[#allocation2 + $0xeac] sm:$0xf0]  ;;  %4999 = vmatpush.bf16.msrb.mxu1 %v11397_v42 }
  0x7b   :  { %v11380_v49 = vld [vmem:[#allocation2 + $0xda0] sm:$0xf]  ;;  %v14896_v55 = vld [vmem:[#allocation2 + $0xfac] sm:$0xf0]  ;;  %v11253_v56 = vor.u32 %v14800_v48, %v11252_v46  ;;  %5013 = vmatpush.bf16.msrb.mxu2 %v11525_v45 }
  0x7c   :  { %v11508_v52 = vld [vmem:[#allocation2 + $0xea0] sm:$0xf]  ;;  %v11381_v57 = vor.u32 %v14832_v51, %v11380_v49  ;;  %v14796_v61 = vld [vmem:[#allocation2 + $0xc8c] sm:$0xf0]  ;;  %5027 = vmatpush.bf16.msrb.mxu3 %v11653_v50 }
  0x7d   :  { %v11636_v54 = vld [vmem:[#allocation2 + $0xfa0] sm:$0xf]  ;;  %v11509_v59 = vor.u32 %v14864_v53, %v11508_v52  ;;  %v14828_v0 = vld [vmem:[#allocation2 + $0xd8c] sm:$0xf0]  ;;  %4986 = vmatpush.bf16.msrb.mxu0 %v11253_v56 }
  0x7e   :  { %v11236_v60 = vld [vmem:[#allocation2 + $0xc80] sm:$0xf]  ;;  %v11637_v63 = vor.u32 %v14896_v55, %v11636_v54  ;;  %v14860_v3 = vld [vmem:[#allocation2 + $0xe8c] sm:$0xf0]  ;;  %5000 = vmatpush.bf16.msrb.mxu1 %v11381_v57 }
  0x7f   :  { %v11364_v62 = vld [vmem:[#allocation2 + $0xd80] sm:$0xf]  ;;  %v14892_v5 = vld [vmem:[#allocation2 + $0xf8c] sm:$0xf0]  ;;  %v11237_v6 = vor.u32 %v14796_v61, %v11236_v60  ;;  %5014 = vmatpush.bf16.msrb.mxu2 %v11509_v59 }
  0x80   :  { %v11492_v2 = vld [vmem:[#allocation2 + $0xe80] sm:$0xf]  ;;  %v11365_v7 = vor.u32 %v14828_v0, %v11364_v62  ;;  %v14792_v11 = vld [vmem:[#allocation2 + $0xc6c] sm:$0xf0]  ;;  %5028 = vmatpush.bf16.msrb.mxu3 %v11637_v63 }
  0x81   :  { %v11620_v4 = vld [vmem:[#allocation2 + $0xf80] sm:$0xf]  ;;  %v11493_v8 = vor.u32 %v14860_v3, %v11492_v2  ;;  %v14824_v14 = vld [vmem:[#allocation2 + $0xd6c] sm:$0xf0]  ;;  %4987 = vmatpush.bf16.msrb.mxu0 %v11237_v6 }
  0x82   :  { %v11220_v9 = vld [vmem:[#allocation2 + $0xc60] sm:$0xf]  ;;  %v11621_v13 = vor.u32 %v14892_v5, %v11620_v4  ;;  %v14856_v16 = vld [vmem:[#allocation2 + $0xe6c] sm:$0xf0]  ;;  %5001 = vmatpush.bf16.msrb.mxu1 %v11365_v7 }
  0x83   :  { %v11348_v12 = vld [vmem:[#allocation2 + $0xd60] sm:$0xf]  ;;  %v14888_v19 = vld [vmem:[#allocation2 + $0xf6c] sm:$0xf0]  ;;  %v11221_v20 = vor.u32 %v14792_v11, %v11220_v9  ;;  %5015 = vmatpush.bf16.msrb.mxu2 %v11493_v8 }
  0x84   :  { %v11476_v15 = vld [vmem:[#allocation2 + $0xe60] sm:$0xf]  ;;  %v11349_v21 = vor.u32 %v14824_v14, %v11348_v12  ;;  %v14788_v24 = vld [vmem:[#allocation2 + $0xc4c] sm:$0xf0]  ;;  %5029 = vmatpush.bf16.msrb.mxu3 %v11621_v13 }
  0x85   :  { %v11604_v18 = vld [vmem:[#allocation2 + $0xf60] sm:$0xf]  ;;  %v11477_v22 = vor.u32 %v14856_v16, %v11476_v15  ;;  %v14820_v27 = vld [vmem:[#allocation2 + $0xd4c] sm:$0xf0]  ;;  %4988 = vmatpush.bf16.msrb.mxu0 %v11221_v20  ;;  %v9596_v16 = vld [vmem:[%s16452_s0 + $0x38] sm:$0xf] }
  0x86   :  { %v11204_v23 = vld [vmem:[#allocation2 + $0xc40] sm:$0xf]  ;;  %v11605_v26 = vor.u32 %v14888_v19, %v11604_v18  ;;  %v14852_v29 = vld [vmem:[#allocation2 + $0xe4c] sm:$0xf0]  ;;  %5002 = vmatpush.bf16.msrb.mxu1 %v11349_v21  ;;  %v14389_v18 = vld [vmem:[%s16452_s0 + $0x94] sm:$0xf0] }
  0x87   :  { %v11332_v25 = vld [vmem:[#allocation2 + $0xd40] sm:$0xf]  ;;  %v14884_v32 = vld [vmem:[#allocation2 + $0xf4c] sm:$0xf0]  ;;  %v11205_v33 = vor.u32 %v14788_v24, %v11204_v23  ;;  %5016 = vmatpush.bf16.msrb.mxu2 %v11477_v22  ;;  %v14376_v19 = vld [vmem:[%s16452_s0 + $0x34] sm:$0xf] }
  0x88   :  { %v11460_v28 = vld [vmem:[#allocation2 + $0xe40] sm:$0xf]  ;;  %v11333_v37 = vor.u32 %v14820_v27, %v11332_v25  ;;  %v14784_v41 = vld [vmem:[#allocation2 + $0xc2c] sm:$0xf0]  ;;  %5030 = vmatpush.bf16.msrb.mxu3 %v11605_v26  ;;  %v9590_v22 = vld [vmem:[%s16452_s0 + $0x90] sm:$0xf0] }
  0x89   :  { %v11588_v30 = vld [vmem:[#allocation2 + $0xf40] sm:$0xf]  ;;  %v11461_v38 = vor.u32 %v14852_v29, %v11460_v28  ;;  %v14816_v45 = vld [vmem:[#allocation2 + $0xd2c] sm:$0xf0]  ;;  %4989 = vmatpush.bf16.msrb.mxu0 %v11205_v33  ;;  %v14377_v23 = vld [vmem:[%s16452_s0 + $0x3c] sm:$0xf] }
  0x8a   :  { %v11188_v34 = vld [vmem:[#allocation2 + $0xc20] sm:$0xf]  ;;  %v11589_v46 = vor.u32 %v14884_v32, %v11588_v30  ;;  %v14848_v49 = vld [vmem:[#allocation2 + $0xe2c] sm:$0xf0]  ;;  %5003 = vmatpush.bf16.msrb.mxu1 %v11333_v37  ;;  %v9598_v24 = vld [vmem:[%s16452_s0 + $0x98] sm:$0xf0] }
  0x8b   :  { %v11316_v42 = vld [vmem:[#allocation2 + $0xd20] sm:$0xf]  ;;  %v14880_v51 = vld [vmem:[#allocation2 + $0xf2c] sm:$0xf0]  ;;  %v11189_v54 = vor.u32 %v14784_v41, %v11188_v34  ;;  %5017 = vmatpush.bf16.msrb.mxu2 %v11461_v38  ;;  %v15836_v38 = vor.u32 %v14389_v18, %v9596_v16  ;;  %v15838_v41 = vor.u32 %v14376_v19, %v9590_v22 }
  0x8c   :  { %v11444_v48 = vld [vmem:[#allocation2 + $0xe20] sm:$0xf]  ;;  %v14780_v53 = vld [vmem:[#allocation2 + $0xc0c] sm:$0xf0]  ;;  %v11317_v60 = vor.u32 %v14816_v45, %v11316_v42  ;;  %5031 = vmatpush.bf16.msrb.mxu3 %v11589_v46  ;;  %v15840_v46 = vor.u32 %v14377_v23, %v9598_v24 }
  0x8d   :  { %v11572_v50 = vld [vmem:[#allocation2 + $0xf20] sm:$0xf]  ;;  %v14812_v56 = vld [vmem:[#allocation2 + $0xd0c] sm:$0xf0]  ;;  %v11445_v61 = vor.u32 %v14848_v49, %v11444_v48  ;;  %4990 = vmatpush.bf16.msrb.mxu0 %v11189_v54 }
  0x8e   :  { %v11172_v52 = vld [vmem:[#allocation2 + $0xc00] sm:$0xf]  ;;  %v14844_v59 = vld [vmem:[#allocation2 + $0xe0c] sm:$0xf0]  ;;  %v11573_v2 = vor.u32 %v14880_v51, %v11572_v50  ;;  %5004 = vmatpush.bf16.msrb.mxu1 %v11317_v60 }
  0x8f   :  { %v11300_v55 = vld [vmem:[#allocation2 + $0xd00] sm:$0xf]  ;;  %v14876_v63 = vld [vmem:[#allocation2 + $0xf0c] sm:$0xf0]  ;;  %v11173_v9 = vor.u32 %v14780_v53, %v11172_v52  ;;  %5018 = vmatpush.bf16.msrb.mxu2 %v11445_v61 }
  0x90   :  { %v11428_v57 = vld [vmem:[#allocation2 + $0xe00] sm:$0xf]  ;;  %v14936_v3 = vld [vmem:[#allocation2 + $0x10ec] sm:$0xf0]  ;;  %v11301_v14 = vor.u32 %v14812_v56, %v11300_v55  ;;  %5032 = vmatpush.bf16.msrb.mxu3 %v11573_v2 }
  0x91   :  { %v11556_v62 = vld [vmem:[#allocation2 + $0xf00] sm:$0xf]  ;;  %v14968_v5 = vld [vmem:[#allocation2 + $0x11ec] sm:$0xf0]  ;;  %v11429_v15 = vor.u32 %v14844_v59, %v11428_v57  ;;  %4991 = vmatpush.bf16.msrb.mxu0 %v11173_v9 }
  0x92   :  { %v11796_v0 = vld [vmem:[#allocation2 + $0x10e0] sm:$0xf]  ;;  %v15000_v7 = vld [vmem:[#allocation2 + $0x12ec] sm:$0xf0]  ;;  %v11557_v20 = vor.u32 %v14876_v63, %v11556_v62  ;;  %5005 = vmatpush.bf16.msrb.mxu1 %v11301_v14 }
  0x93   :  { %v11924_v4 = vld [vmem:[#allocation2 + $0x11e0] sm:$0xf]  ;;  %v15032_v11 = vld [vmem:[#allocation2 + $0x13ec] sm:$0xf0]  ;;  %v11797_v21 = vor.u32 %v14936_v3, %v11796_v0  ;;  %5019 = vmatpush.bf16.msrb.mxu2 %v11429_v15 }
  0x94   :  { %v12052_v6 = vld [vmem:[#allocation2 + $0x12e0] sm:$0xf]  ;;  %v9588_v12 = vld [vmem:[%s16452_s0 + $0x30] sm:$0xf]  ;;  %v11925_v25 = vor.u32 %v14968_v5, %v11924_v4  ;;  %5033 = vmatpush.bf16.msrb.mxu3 %v11557_v20 }
  0x95   :  { %v12180_v8 = vld [vmem:[#allocation2 + $0x13e0] sm:$0xf]  ;;  %v14388_v13 = vld [vmem:[%s16452_s0 + $0x8c] sm:$0xf0]  ;;  %v12053_v26 = vor.u32 %v15000_v7, %v12052_v6  ;;  %5040 = vmatpush.bf16.msra.mxu0 %v11797_v21  ;;  %5006 = vmatmul.bf16.vlgmr.msrb.gmra.mxu1 %v15838_v41 }
  0x96   :  { %v11780_v27 = vld [vmem:[#allocation2 + $0x10c0] sm:$0xf]  ;;  %v14932_v28 = vld [vmem:[#allocation2 + $0x10cc] sm:$0xf0]  ;;  %v12181_v30 = vor.u32 %v15032_v11, %v12180_v8  ;;  %v15834_v32 = vor.u32 %v14388_v13, %v9588_v12  ;;  %5054 = vmatpush.bf16.msra.mxu1 %v11925_v25  ;;  %5020 = vmatmul.bf16.vlgmr.msrb.gmra.mxu2 %v15836_v38 }
  0x97   :  { %v11908_v29 = vld [vmem:[#allocation2 + $0x11c0] sm:$0xf]  ;;  %v14964_v33 = vld [vmem:[#allocation2 + $0x11cc] sm:$0xf0]  ;;  %v11781_v48 = vor.u32 %v14932_v28, %v11780_v27  ;;  %5068 = vmatpush.bf16.msra.mxu2 %v12053_v26  ;;  %5034 = vmatmul.bf16.vlgmr.msrb.gmra.mxu3 %v15840_v46 }
  0x98   :  { %v12036_v34 = vld [vmem:[#allocation2 + $0x12c0] sm:$0xf]  ;;  %v14996_v37 = vld [vmem:[#allocation2 + $0x12cc] sm:$0xf0]  ;;  %v11909_v49 = vor.u32 %v14964_v33, %v11908_v29  ;;  %5082 = vmatpush.bf16.msra.mxu3 %v12181_v30  ;;  %4992 = vmatmul.bf16.vlgmr.msrb.gmra.mxu0 %v15834_v32 }
  0x99   :  { %v12164_v42 = vld [vmem:[#allocation2 + $0x13c0] sm:$0xf]  ;;  %v15028_v45 = vld [vmem:[#allocation2 + $0x13cc] sm:$0xf0]  ;;  %v12037_v50 = vor.u32 %v14996_v37, %v12036_v34  ;;  %5041 = vmatpush.bf16.msra.mxu0 %v11781_v48 }
  0x9a   :  { %v11764_v51 = vld [vmem:[#allocation2 + $0x10a0] sm:$0xf]  ;;  %v14928_v52 = vld [vmem:[#allocation2 + $0x10ac] sm:$0xf0]  ;;  %v12165_v54 = vor.u32 %v15028_v45, %v12164_v42  ;;  %5055 = vmatpush.bf16.msra.mxu1 %v11909_v49 }
  0x9b   :  { %v11892_v53 = vld [vmem:[#allocation2 + $0x11a0] sm:$0xf]  ;;  %v14960_v55 = vld [vmem:[#allocation2 + $0x11ac] sm:$0xf0]  ;;  %v11765_v61 = vor.u32 %v14928_v52, %v11764_v51  ;;  %5069 = vmatpush.bf16.msra.mxu2 %v12037_v50 }
  0x9c   :  { %v12020_v56 = vld [vmem:[#allocation2 + $0x12a0] sm:$0xf]  ;;  %v14992_v57 = vld [vmem:[#allocation2 + $0x12ac] sm:$0xf0]  ;;  %v11893_v62 = vor.u32 %v14960_v55, %v11892_v53  ;;  %5083 = vmatpush.bf16.msra.mxu3 %v12165_v54 }
  0x9d   :  { %v12148_v59 = vld [vmem:[#allocation2 + $0x13a0] sm:$0xf]  ;;  %v15024_v60 = vld [vmem:[#allocation2 + $0x13ac] sm:$0xf0]  ;;  %v12021_v63 = vor.u32 %v14992_v57, %v12020_v56  ;;  %5042 = vmatpush.bf16.msra.mxu0 %v11765_v61 }
  0x9e   :  { %v11748_v0 = vld [vmem:[#allocation2 + $0x1080] sm:$0xf]  ;;  %v14924_v2 = vld [vmem:[#allocation2 + $0x108c] sm:$0xf0]  ;;  %v12149_v4 = vor.u32 %v15024_v60, %v12148_v59  ;;  %5056 = vmatpush.bf16.msra.mxu1 %v11893_v62 }
  0x9f   :  { %v11876_v3 = vld [vmem:[#allocation2 + $0x1180] sm:$0xf]  ;;  %v14956_v5 = vld [vmem:[#allocation2 + $0x118c] sm:$0xf0]  ;;  %v11749_v11 = vor.u32 %v14924_v2, %v11748_v0  ;;  %5070 = vmatpush.bf16.msra.mxu2 %v12021_v63 }
  0xa0   :  { %v12004_v6 = vld [vmem:[#allocation2 + $0x1280] sm:$0xf]  ;;  %v14988_v7 = vld [vmem:[#allocation2 + $0x128c] sm:$0xf0]  ;;  %v11877_v12 = vor.u32 %v14956_v5, %v11876_v3  ;;  %5084 = vmatpush.bf16.msra.mxu3 %v12149_v4 }
  0xa1   :  { %v12132_v8 = vld [vmem:[#allocation2 + $0x1380] sm:$0xf]  ;;  %v15020_v9 = vld [vmem:[#allocation2 + $0x138c] sm:$0xf0]  ;;  %v12005_v13 = vor.u32 %v14988_v7, %v12004_v6  ;;  %5043 = vmatpush.bf16.msra.mxu0 %v11749_v11 }
  0xa2   :  { %v11732_v14 = vld [vmem:[#allocation2 + $0x1060] sm:$0xf]  ;;  %v14920_v15 = vld [vmem:[#allocation2 + $0x106c] sm:$0xf0]  ;;  %v12133_v18 = vor.u32 %v15020_v9, %v12132_v8  ;;  %5057 = vmatpush.bf16.msra.mxu1 %v11877_v12 }
  0xa3   :  { %v11860_v16 = vld [vmem:[#allocation2 + $0x1160] sm:$0xf]  ;;  %v14952_v19 = vld [vmem:[#allocation2 + $0x116c] sm:$0xf0]  ;;  %v11733_v24 = vor.u32 %v14920_v15, %v11732_v14  ;;  %5071 = vmatpush.bf16.msra.mxu2 %v12005_v13 }
  0xa4   :  { %v11988_v20 = vld [vmem:[#allocation2 + $0x1260] sm:$0xf]  ;;  %v14984_v21 = vld [vmem:[#allocation2 + $0x126c] sm:$0xf0]  ;;  %v11861_v25 = vor.u32 %v14952_v19, %v11860_v16  ;;  %5085 = vmatpush.bf16.msra.mxu3 %v12133_v18 }
  0xa5   :  { %v12116_v22 = vld [vmem:[#allocation2 + $0x1360] sm:$0xf]  ;;  %v15016_v23 = vld [vmem:[#allocation2 + $0x136c] sm:$0xf0]  ;;  %v11989_v26 = vor.u32 %v14984_v21, %v11988_v20  ;;  %5044 = vmatpush.bf16.msra.mxu0 %v11733_v24 }
  0xa6   :  { %v11716_v27 = vld [vmem:[#allocation2 + $0x1040] sm:$0xf]  ;;  %v14916_v28 = vld [vmem:[#allocation2 + $0x104c] sm:$0xf0]  ;;  %v12117_v30 = vor.u32 %v15016_v23, %v12116_v22  ;;  %5058 = vmatpush.bf16.msra.mxu1 %v11861_v25  ;;  %v9612_v25 = vld [vmem:[%s16452_s0 + $0x48] sm:$0xf] }
  0xa7   :  { %v11844_v29 = vld [vmem:[#allocation2 + $0x1140] sm:$0xf]  ;;  %v14948_v33 = vld [vmem:[#allocation2 + $0x114c] sm:$0xf0]  ;;  %v11717_v48 = vor.u32 %v14916_v28, %v11716_v27  ;;  %5072 = vmatpush.bf16.msra.mxu2 %v11989_v26  ;;  %v14391_v26 = vld [vmem:[%s16452_s0 + $0xa4] sm:$0xf0] }
  0xa8   :  { %v11972_v34 = vld [vmem:[#allocation2 + $0x1240] sm:$0xf]  ;;  %v14980_v37 = vld [vmem:[#allocation2 + $0x124c] sm:$0xf0]  ;;  %v11845_v50 = vor.u32 %v14948_v33, %v11844_v29  ;;  %5086 = vmatpush.bf16.msra.mxu3 %v12117_v30  ;;  %v14378_v27 = vld [vmem:[%s16452_s0 + $0x44] sm:$0xf] }
  0xa9   :  { %v12100_v42 = vld [vmem:[#allocation2 + $0x1340] sm:$0xf]  ;;  %v15012_v45 = vld [vmem:[#allocation2 + $0x134c] sm:$0xf0]  ;;  %v11973_v51 = vor.u32 %v14980_v37, %v11972_v34  ;;  %5045 = vmatpush.bf16.msra.mxu0 %v11717_v48  ;;  %v9606_v30 = vld [vmem:[%s16452_s0 + $0xa0] sm:$0xf0] }
  0xaa   :  { %v11700_v49 = vld [vmem:[#allocation2 + $0x1020] sm:$0xf]  ;;  %v14912_v52 = vld [vmem:[#allocation2 + $0x102c] sm:$0xf0]  ;;  %v12101_v55 = vor.u32 %v15012_v45, %v12100_v42  ;;  %5059 = vmatpush.bf16.msra.mxu1 %v11845_v50  ;;  %v14379_v33 = vld [vmem:[%s16452_s0 + $0x4c] sm:$0xf] }
  0xab   :  { %v11828_v53 = vld [vmem:[#allocation2 + $0x1120] sm:$0xf]  ;;  %v14944_v54 = vld [vmem:[#allocation2 + $0x112c] sm:$0xf0]  ;;  %v11701_v63 = vor.u32 %v14912_v52, %v11700_v49  ;;  %5073 = vmatpush.bf16.msra.mxu2 %v11973_v51  ;;  %v9614_v34 = vld [vmem:[%s16452_s0 + $0xa8] sm:$0xf0] }
  0xac   :  { %v11956_v56 = vld [vmem:[#allocation2 + $0x1220] sm:$0xf]  ;;  %v14976_v57 = vld [vmem:[#allocation2 + $0x122c] sm:$0xf0]  ;;  %v11829_v5 = vor.u32 %v14944_v54, %v11828_v53  ;;  %5087 = vmatpush.bf16.msra.mxu3 %v12101_v55  ;;  %v15872_v55 = vor.u32 %v14391_v26, %v9612_v25 }
  0xad   :  { %v12084_v59 = vld [vmem:[#allocation2 + $0x1320] sm:$0xf]  ;;  %v15008_v60 = vld [vmem:[#allocation2 + $0x132c] sm:$0xf0]  ;;  %v11957_v6 = vor.u32 %v14976_v57, %v11956_v56  ;;  %5046 = vmatpush.bf16.msra.mxu0 %v11701_v63  ;;  %v15874_v56 = vor.u32 %v14378_v27, %v9606_v30 }
  0xae   :  { %v11684_v61 = vld [vmem:[#allocation2 + $0x1000] sm:$0xf]  ;;  %v14908_v62 = vld [vmem:[#allocation2 + $0x100c] sm:$0xf0]  ;;  %v12085_v11 = vor.u32 %v15008_v60, %v12084_v59  ;;  %5060 = vmatpush.bf16.msra.mxu1 %v11829_v5  ;;  %v15876_v60 = vor.u32 %v14379_v33, %v9614_v34 }
  0xaf   :  { %v11812_v0 = vld [vmem:[#allocation2 + $0x1100] sm:$0xf]  ;;  %v14940_v2 = vld [vmem:[#allocation2 + $0x110c] sm:$0xf0]  ;;  %v11685_v19 = vor.u32 %v14908_v62, %v11684_v61  ;;  %5074 = vmatpush.bf16.msra.mxu2 %v11957_v6 }
  0xb0   :  { %v11940_v3 = vld [vmem:[#allocation2 + $0x1200] sm:$0xf]  ;;  %v14972_v4 = vld [vmem:[#allocation2 + $0x120c] sm:$0xf0]  ;;  %v11813_v23 = vor.u32 %v14940_v2, %v11812_v0  ;;  %5088 = vmatpush.bf16.msra.mxu3 %v12085_v11 }
  0xb1   :  { %v12068_v7 = vld [vmem:[#allocation2 + $0x1300] sm:$0xf]  ;;  %v15004_v8 = vld [vmem:[#allocation2 + $0x130c] sm:$0xf0]  ;;  %v11941_v24 = vor.u32 %v14972_v4, %v11940_v3  ;;  %5047 = vmatpush.bf16.msra.mxu0 %v11685_v19 }
  0xb2   :  { %v12308_v9 = vld [vmem:[#allocation2 + $0x14e0] sm:$0xf]  ;;  %v15064_v12 = vld [vmem:[#allocation2 + $0x14ec] sm:$0xf0]  ;;  %v12069_v28 = vor.u32 %v15004_v8, %v12068_v7  ;;  %5061 = vmatpush.bf16.msra.mxu1 %v11813_v23 }
  0xb3   :  { %v12436_v13 = vld [vmem:[#allocation2 + $0x15e0] sm:$0xf]  ;;  %v15096_v14 = vld [vmem:[#allocation2 + $0x15ec] sm:$0xf0]  ;;  %v12309_v29 = vor.u32 %v15064_v12, %v12308_v9  ;;  %5075 = vmatpush.bf16.msra.mxu2 %v11941_v24 }
  0xb4   :  { %v12564_v15 = vld [vmem:[#allocation2 + $0x16e0] sm:$0xf]  ;;  %v15128_v16 = vld [vmem:[#allocation2 + $0x16ec] sm:$0xf0]  ;;  %v12437_v37 = vor.u32 %v15096_v14, %v12436_v13  ;;  %5089 = vmatpush.bf16.msra.mxu3 %v12069_v28 }
  0xb5   :  { %v12692_v18 = vld [vmem:[#allocation2 + $0x17e0] sm:$0xf]  ;;  %v15160_v20 = vld [vmem:[#allocation2 + $0x17ec] sm:$0xf0]  ;;  %v12565_v42 = vor.u32 %v15128_v16, %v12564_v15  ;;  %5096 = vmatpush.bf16.msrb.mxu0 %v12309_v29  ;;  %5062 = vmatmul.bf16.vlgmr.msra.gmra.mxu1 %v15874_v56 }
  0xb6   :  { %v9604_v21 = vld [vmem:[%s16452_s0 + $0x40] sm:$0xf]  ;;  %v15060_v48 = vld [vmem:[#allocation2 + $0x14cc] sm:$0xf0]  ;;  %v12693_v50 = vor.u32 %v15160_v20, %v12692_v18  ;;  %5110 = vmatpush.bf16.msrb.mxu1 %v12437_v37  ;;  %5076 = vmatmul.bf16.vlgmr.msra.gmra.mxu2 %v15872_v55 }
  0xb7   :  { %v14390_v22 = vld [vmem:[%s16452_s0 + $0x9c] sm:$0xf0]  ;;  %v15092_v52 = vld [vmem:[#allocation2 + $0x15cc] sm:$0xf0]  ;;  %5124 = vmatpush.bf16.msrb.mxu2 %v12565_v42  ;;  %5090 = vmatmul.bf16.vlgmr.msra.gmra.mxu3 %v15876_v60 }
  0xb8   :  { %v12292_v45 = vld [vmem:[#allocation2 + $0x14c0] sm:$0xf]  ;;  %v15870_v51 = vor.u32 %v14390_v22, %v9604_v21  ;;  %v15124_v54 = vld [vmem:[#allocation2 + $0x16cc] sm:$0xf0]  ;;  %5138 = vmatpush.bf16.msrb.mxu3 %v12693_v50 }
  0xb9   :  { %v12420_v49 = vld [vmem:[#allocation2 + $0x15c0] sm:$0xf]  ;;  %v15156_v59 = vld [vmem:[#allocation2 + $0x17cc] sm:$0xf0]  ;;  %v12293_v61 = vor.u32 %v15060_v48, %v12292_v45  ;;  %v4825_v48 = vpop.f32.mrf.mxu0 }
  0xba   :  { %v12548_v53 = vld [vmem:[#allocation2 + $0x16c0] sm:$0xf]  ;;  %v12421_v62 = vor.u32 %v15092_v52, %v12420_v49  ;;  %v15056_v2 = vld [vmem:[#allocation2 + $0x14ac] sm:$0xf0]  ;;  %5048 = vmatmul.bf16.vlgmr.msra.gmra.mxu0 %v15870_v51  ;;  %v4839_v49 = vpop.f32.mrf.mxu1 }
  0xbb   :  { %v12676_v57 = vld [vmem:[#allocation2 + $0x17c0] sm:$0xf]  ;;  %v12549_v63 = vor.u32 %v15124_v54, %v12548_v53  ;;  %v15088_v5 = vld [vmem:[#allocation2 + $0x15ac] sm:$0xf0]  ;;  %5097 = vmatpush.bf16.msrb.mxu0 %v12293_v61  ;;  %v4840_v52 = vadd.f32 %v4839_v49, %v4825_v48  ;;  %v9750_v48 = vld [vmem:[#allocation2 + $0xf0] sm:$0xf0] }
  0xbc   :  { %v12276_v0 = vld [vmem:[#allocation2 + $0x14a0] sm:$0xf]  ;;  %v12677_v4 = vor.u32 %v15156_v59, %v12676_v57  ;;  %v15120_v7 = vld [vmem:[#allocation2 + $0x16ac] sm:$0xf0]  ;;  %5111 = vmatpush.bf16.msrb.mxu1 %v12421_v62  ;;  %v14454_v49 = vld [vmem:[#allocation2 + $0x1e4] sm:$0xf] }
  0xbd   :  { %v12404_v3 = vld [vmem:[#allocation2 + $0x15a0] sm:$0xf]  ;;  %v15152_v9 = vld [vmem:[#allocation2 + $0x17ac] sm:$0xf0]  ;;  %v12277_v11 = vor.u32 %v15056_v2, %v12276_v0  ;;  %5125 = vmatpush.bf16.msrb.mxu2 %v12549_v63 }
  0xbe   :  { %v12532_v6 = vld [vmem:[#allocation2 + $0x16a0] sm:$0xf]  ;;  %v12405_v12 = vor.u32 %v15088_v5, %v12404_v3  ;;  %v15052_v15 = vld [vmem:[#allocation2 + $0x148c] sm:$0xf0]  ;;  %5139 = vmatpush.bf16.msrb.mxu3 %v12677_v4  ;;  %v4853_v3 = vpop.f32.mrf.mxu2 }
  0xbf   :  { %v12660_v8 = vld [vmem:[#allocation2 + $0x17a0] sm:$0xf]  ;;  %v12533_v13 = vor.u32 %v15120_v7, %v12532_v6  ;;  %v15084_v19 = vld [vmem:[#allocation2 + $0x158c] sm:$0xf0]  ;;  %5098 = vmatpush.bf16.msrb.mxu0 %v12277_v11  ;;  %v4854_v6 = vadd.f32 %v4853_v3, %v4840_v52  ;;  %v14486_v52 = vld [vmem:[#allocation2 + $0x2e4] sm:$0xf] }
  0xc0   :  { %v12260_v14 = vld [vmem:[#allocation2 + $0x1480] sm:$0xf]  ;;  %v12661_v18 = vor.u32 %v15152_v9, %v12660_v8  ;;  %v15116_v21 = vld [vmem:[#allocation2 + $0x168c] sm:$0xf0]  ;;  %5112 = vmatpush.bf16.msrb.mxu1 %v12405_v12  ;;  %v14393_v3 = vld [vmem:[%s16452_s0 + $0xb4] sm:$0xf0] }
  0xc1   :  { %v12388_v16 = vld [vmem:[#allocation2 + $0x1580] sm:$0xf]  ;;  %v15148_v23 = vld [vmem:[#allocation2 + $0x178c] sm:$0xf0]  ;;  %v12261_v24 = vor.u32 %v15052_v15, %v12260_v14  ;;  %5126 = vmatpush.bf16.msrb.mxu2 %v12533_v13 }
  0xc2   :  { %v12516_v20 = vld [vmem:[#allocation2 + $0x1680] sm:$0xf]  ;;  %v12389_v25 = vor.u32 %v15084_v19, %v12388_v16  ;;  %v15048_v28 = vld [vmem:[#allocation2 + $0x146c] sm:$0xf0]  ;;  %5140 = vmatpush.bf16.msrb.mxu3 %v12661_v18 }
  0xc3   :  { %v12644_v22 = vld [vmem:[#allocation2 + $0x1780] sm:$0xf]  ;;  %v12517_v26 = vor.u32 %v15116_v21, %v12516_v20  ;;  %v15080_v33 = vld [vmem:[#allocation2 + $0x156c] sm:$0xf0]  ;;  %5099 = vmatpush.bf16.msrb.mxu0 %v12261_v24  ;;  %v4867_v20 = vpop.f32.mrf.mxu3 }
  0xc4   :  { %v12244_v27 = vld [vmem:[#allocation2 + $0x1460] sm:$0xf]  ;;  %v12645_v30 = vor.u32 %v15148_v23, %v12644_v22  ;;  %v15112_v37 = vld [vmem:[#allocation2 + $0x166c] sm:$0xf0]  ;;  %5113 = vmatpush.bf16.msrb.mxu1 %v12389_v25  ;;  %v15882_v24 = vadd.f32 %v4867_v20, %v4854_v6  ;;  %v9862_v20 = vld [vmem:[#allocation2 + $0x1d0] sm:$0xf0] }
  0xc5   :  { %v12372_v29 = vld [vmem:[#allocation2 + $0x1560] sm:$0xf]  ;;  %v15144_v45 = vld [vmem:[#allocation2 + $0x176c] sm:$0xf0]  ;;  %v12245_v50 = vor.u32 %v15048_v28, %v12244_v27  ;;  %5127 = vmatpush.bf16.msrb.mxu2 %v12517_v26 }
  0xc6   :  { %v12500_v34 = vld [vmem:[#allocation2 + $0x1660] sm:$0xf]  ;;  %v12373_v53 = vor.u32 %v15080_v33, %v12372_v29  ;;  %v15044_v59 = vld [vmem:[#allocation2 + $0x144c] sm:$0xf0]  ;;  %5141 = vmatpush.bf16.msrb.mxu3 %v12645_v30 }
  0xc7   :  { %v12628_v42 = vld [vmem:[#allocation2 + $0x1760] sm:$0xf]  ;;  %v12501_v54 = vor.u32 %v15112_v37, %v12500_v34  ;;  %v15076_v63 = vld [vmem:[#allocation2 + $0x154c] sm:$0xf0]  ;;  %5100 = vmatpush.bf16.msrb.mxu0 %v12245_v50  ;;  %v9878_v50 = vld [vmem:[#allocation2 + $0x1f0] sm:$0xf0] }
  0xc8   :  { %v12228_v57 = vld [vmem:[#allocation2 + $0x1440] sm:$0xf]  ;;  %v12629_v62 = vor.u32 %v15144_v45, %v12628_v42  ;;  %v15108_v2 = vld [vmem:[#allocation2 + $0x164c] sm:$0xf0]  ;;  %5114 = vmatpush.bf16.msrb.mxu1 %v12373_v53  ;;  %v14422_v42 = vld [vmem:[#allocation2 + $0xe4] sm:$0xf] }
  0xc9   :  { %v12356_v61 = vld [vmem:[#allocation2 + $0x1540] sm:$0xf]  ;;  %v15140_v5 = vld [vmem:[#allocation2 + $0x174c] sm:$0xf0]  ;;  %v12229_v7 = vor.u32 %v15044_v59, %v12228_v57  ;;  %5128 = vmatpush.bf16.msrb.mxu2 %v12501_v54  ;;  %v10006_v53 = vld [vmem:[#allocation2 + $0x2f0] sm:$0xf0]  ;;  %v9753_v6 = vor.u32 %v14422_v42, %v9750_v48 }
  0xca   :  { %v12484_v0 = vld [vmem:[#allocation2 + $0x1640] sm:$0xf]  ;;  %v12357_v9 = vor.u32 %v15076_v63, %v12356_v61  ;;  %v15040_v12 = vld [vmem:[#allocation2 + $0x142c] sm:$0xf0]  ;;  %5142 = vmatpush.bf16.msrb.mxu3 %v12629_v62  ;;  %v14518_v54 = vld [vmem:[#allocation2 + $0x3e4] sm:$0xf] }
  0xcb   :  { %v12612_v4 = vld [vmem:[#allocation2 + $0x1740] sm:$0xf]  ;;  %v12485_v11 = vor.u32 %v15108_v2, %v12484_v0  ;;  %v15072_v14 = vld [vmem:[#allocation2 + $0x152c] sm:$0xf0]  ;;  %5101 = vmatpush.bf16.msrb.mxu0 %v12229_v7  ;;  %v10134_v59 = vld [vmem:[#allocation2 + $0x3f0] sm:$0xf0] }
  0xcc   :  { %v12212_v8 = vld [vmem:[#allocation2 + $0x1420] sm:$0xf]  ;;  %v12613_v15 = vor.u32 %v15140_v5, %v12612_v4  ;;  %v15104_v18 = vld [vmem:[#allocation2 + $0x162c] sm:$0xf0]  ;;  %5115 = vmatpush.bf16.msrb.mxu1 %v12357_v9  ;;  %v9628_v2 = vld [vmem:[%s16452_s0 + $0x58] sm:$0xf] }
  0xcd   :  { %v12340_v13 = vld [vmem:[#allocation2 + $0x1520] sm:$0xf]  ;;  %v15136_v21 = vld [vmem:[#allocation2 + $0x172c] sm:$0xf0]  ;;  %v12213_v25 = vor.u32 %v15040_v12, %v12212_v8  ;;  %5129 = vmatpush.bf16.msrb.mxu2 %v12485_v11  ;;  %v14380_v4 = vld [vmem:[%s16452_s0 + $0x54] sm:$0xf]  ;;  %v9881_v11 = vor.u32 %v14454_v49, %v9878_v50  ;;  %v10009_v12 = vor.u32 %v14486_v52, %v10006_v53 }
  0xce   :  { %v12468_v16 = vld [vmem:[#allocation2 + $0x1620] sm:$0xf]  ;;  %v15036_v23 = vld [vmem:[#allocation2 + $0x140c] sm:$0xf0]  ;;  %v12341_v30 = vor.u32 %v15072_v14, %v12340_v13  ;;  %5143 = vmatpush.bf16.msrb.mxu3 %v12613_v15  ;;  %v9622_v7 = vld [vmem:[%s16452_s0 + $0xb0] sm:$0xf0]  ;;  %v15908_v13 = vpop.f32.mrf.mxu0 }
  0xcf   :  { %v12596_v19 = vld [vmem:[#allocation2 + $0x1720] sm:$0xf]  ;;  %v15068_v27 = vld [vmem:[#allocation2 + $0x150c] sm:$0xf0]  ;;  %v12469_v33 = vor.u32 %v15104_v18, %v12468_v16  ;;  %5102 = vmatpush.bf16.msrb.mxu0 %v12213_v25  ;;  %v14381_v8 = vld [vmem:[%s16452_s0 + $0x5c] sm:$0xf]  ;;  %v10137_v18 = vor.u32 %v14518_v54, %v10134_v59  ;;  %v15914_v25 = vor.u32 %v14380_v4, %v9622_v7  ;;  %v15924_v59 = vpop.f32.mrf.mxu2  ;;  %v15926_v4 = vpop.f32.mrf.mxu3 }
  0xd0   :  { %v12196_v22 = vld [vmem:[#allocation2 + $0x1400] sm:$0xf]  ;;  %v15100_v29 = vld [vmem:[#allocation2 + $0x160c] sm:$0xf0]  ;;  %v12597_v45 = vor.u32 %v15136_v21, %v12596_v19  ;;  %5116 = vmatpush.bf16.msrb.mxu1 %v12341_v30  ;;  %v9630_v9 = vld [vmem:[%s16452_s0 + $0xb8] sm:$0xf0] }
  0xd1   :  { %v12324_v26 = vld [vmem:[#allocation2 + $0x1500] sm:$0xf]  ;;  %v15132_v37 = vld [vmem:[#allocation2 + $0x170c] sm:$0xf0]  ;;  %v12197_v57 = vor.u32 %v15036_v23, %v12196_v22  ;;  %5130 = vmatpush.bf16.msrb.mxu2 %v12469_v33  ;;  %v14418_v14 = vld [vmem:[#allocation2 + $0xc4] sm:$0xf]  ;;  %v15912_v23 = vor.u32 %v14393_v3, %v9628_v2 }
  0xd2   :  { %v12452_v28 = vld [vmem:[#allocation2 + $0x1600] sm:$0xf]  ;;  %v9620_v61 = vld [vmem:[%s16452_s0 + $0x50] sm:$0xf]  ;;  %v12325_v63 = vor.u32 %v15068_v27, %v12324_v26  ;;  %5144 = vmatpush.bf16.msrb.mxu3 %v12597_v45  ;;  %v9734_v15 = vld [vmem:[#allocation2 + $0xd0] sm:$0xf0] }
  0xd3   :  { %v12580_v34 = vld [vmem:[#allocation2 + $0x1700] sm:$0xf]  ;;  %v14392_v62 = vld [vmem:[%s16452_s0 + $0xac] sm:$0xf0]  ;;  %v12453_v0 = vor.u32 %v15100_v29, %v12452_v28  ;;  %v14450_v16 = vld [vmem:[#allocation2 + $0x1c4] sm:$0xf]  ;;  %5103 = vmatpush.bf16.msrb.mxu0 %v12197_v57  ;;  %v15916_v28 = vpop.f32.mrf.mxu1  ;;  %v15918_v29 = vor.u32 %v14381_v8, %v9630_v9  ;;  %v9737_v30 = vor.u32 %v14418_v14, %v9734_v15 }
  0xd4   :  { %v12581_v5 = vor.u32 %v15132_v37, %v12580_v34  ;;  %v15910_v19 = vor.u32 %v14392_v62, %v9620_v61  ;;  %v14482_v21 = vld [vmem:[#allocation2 + $0x2c4] sm:$0xf]  ;;  %v9990_v22 = vld [vmem:[#allocation2 + $0x2d0] sm:$0xf0]  ;;  %5117 = vmatpush.bf16.msrb.mxu1 %v12325_v63  ;;  %16459 = vst [vmem:[#allocation9_spill] sm:$0xff] %v15912_v23  ;;  %v9865_v33 = vor.u32 %v14450_v16, %v9862_v20 }
  0xd5   :  { %5131 = vmatpush.bf16.msrb.mxu2 %v12453_v0  ;;  %v14514_v26 = vld [vmem:[#allocation2 + $0x3c4] sm:$0xf]  ;;  %v10118_v27 = vld [vmem:[#allocation2 + $0x3d0] sm:$0xf0]  ;;  %16460 = vst [vmem:[#allocation10_spill] sm:$0xff] %v15918_v29  ;;  %v9993_v34 = vor.u32 %v14482_v21, %v9990_v22 }
  0xd6   :  { %5145 = vmatpush.bf16.msrb.mxu3 %v12581_v5  ;;  %v14414_v37 = vld [vmem:[#allocation2 + $0xa4] sm:$0xf]  ;;  %v9718_v42 = vld [vmem:[#allocation2 + $0xb0] sm:$0xf0]  ;;  %5104 = vmatmul.bf16.vlgmr.msrb.gmra.mxu0 %v15910_v19  ;;  %v10121_v48 = vor.u32 %v14514_v26, %v10118_v27  ;;  %v4881_v8 = vpop.f32.mrf.mxu0 }
  0xd7   :  { %5152 = vmatpush.bf16.msra.mxu0 %v9753_v6  ;;  %v14446_v45 = vld [vmem:[#allocation2 + $0x1a4] sm:$0xf]  ;;  %v9846_v49 = vld [vmem:[#allocation2 + $0x1b0] sm:$0xf0]  ;;  %5118 = vmatmul.bf16.vlgmr.msrb.gmra.mxu1 %v15914_v25  ;;  %v9721_v57 = vor.u32 %v14414_v37, %v9718_v42 }
  0xd8   :  { %5166 = vmatpush.bf16.msra.mxu1 %v9881_v11  ;;  %v14478_v50 = vld [vmem:[#allocation2 + $0x2a4] sm:$0xf]  ;;  %v9974_v52 = vld [vmem:[#allocation2 + $0x2b0] sm:$0xf0]  ;;  %5132 = vmatmul.bf16.vlgmr.msrb.gmra.mxu2 %v15912_v23  ;;  %v9849_v61 = vor.u32 %v14446_v45, %v9846_v49 }
  0xd9   :  { %5180 = vmatpush.bf16.msra.mxu2 %v10009_v12  ;;  %v14510_v53 = vld [vmem:[#allocation2 + $0x3a4] sm:$0xf]  ;;  %v10102_v54 = vld [vmem:[#allocation2 + $0x3b0] sm:$0xf0]  ;;  %5146 = vmatmul.bf16.vlgmr.msrb.gmra.mxu3 %v15918_v29  ;;  %v9977_v62 = vor.u32 %v14478_v50, %v9974_v52  ;;  %v4882_v12 = vadd.f32 %v4881_v8, %v15882_v24 }
  0xda   :  { %5194 = vmatpush.bf16.msra.mxu3 %v10137_v18  ;;  %v14410_v63 = vld [vmem:[#allocation2 + $0x84] sm:$0xf]  ;;  %v9702_v0 = vld [vmem:[#allocation2 + $0x90] sm:$0xf0]  ;;  %v10105_v3 = vor.u32 %v14510_v53, %v10102_v54  ;;  %v4909_v54 = vpop.f32.mrf.mxu2 }
  0xdb   :  { %5153 = vmatpush.bf16.msra.mxu0 %v9737_v30  ;;  %v14442_v2 = vld [vmem:[#allocation2 + $0x184] sm:$0xf]  ;;  %v9830_v5 = vld [vmem:[#allocation2 + $0x190] sm:$0xf0]  ;;  %v9705_v14 = vor.u32 %v14410_v63, %v9702_v0  ;;  %v4895_v18 = vpop.f32.mrf.mxu1 }
  0xdc   :  { %5167 = vmatpush.bf16.msra.mxu1 %v9865_v33  ;;  %v14474_v6 = vld [vmem:[#allocation2 + $0x284] sm:$0xf]  ;;  %v9958_v7 = vld [vmem:[#allocation2 + $0x290] sm:$0xf0]  ;;  %v9833_v15 = vor.u32 %v14442_v2, %v9830_v5  ;;  %v4896_v27 = vadd.f32 %v4895_v18, %v4882_v12 }
  0xdd   :  { %5181 = vmatpush.bf16.msra.mxu2 %v9993_v34  ;;  %v14506_v9 = vld [vmem:[#allocation2 + $0x384] sm:$0xf]  ;;  %v10086_v11 = vld [vmem:[#allocation2 + $0x390] sm:$0xf0]  ;;  %v9961_v16 = vor.u32 %v14474_v6, %v9958_v7 }
  0xde   :  { %5195 = vmatpush.bf16.msra.mxu3 %v10121_v48  ;;  %v14406_v20 = vld [vmem:[#allocation2 + $0x64] sm:$0xf]  ;;  %v9686_v21 = vld [vmem:[#allocation2 + $0x70] sm:$0xf0]  ;;  %v10089_v26 = vor.u32 %v14506_v9, %v10086_v11  ;;  %v4910_v63 = vadd.f32 %v4909_v54, %v4896_v27 }
  0xdf   :  { %5154 = vmatpush.bf16.msra.mxu0 %v9721_v57  ;;  %v14438_v22 = vld [vmem:[#allocation2 + $0x164] sm:$0xf]  ;;  %v9814_v30 = vld [vmem:[#allocation2 + $0x170] sm:$0xf0]  ;;  %v9689_v45 = vor.u32 %v14406_v20, %v9686_v21 }
  0xe0   :  { %5168 = vmatpush.bf16.msra.mxu1 %v9849_v61  ;;  %v14470_v33 = vld [vmem:[#allocation2 + $0x264] sm:$0xf]  ;;  %v9942_v34 = vld [vmem:[#allocation2 + $0x270] sm:$0xf0]  ;;  %v9817_v24 = vor.u32 %v14438_v22, %v9814_v30 }
  0xe1   :  { %5182 = vmatpush.bf16.msra.mxu2 %v9977_v62  ;;  %v14502_v37 = vld [vmem:[#allocation2 + $0x364] sm:$0xf]  ;;  %v10070_v42 = vld [vmem:[#allocation2 + $0x370] sm:$0xf0]  ;;  %v9945_v48 = vor.u32 %v14470_v33, %v9942_v34 }
  0xe2   :  { %5196 = vmatpush.bf16.msra.mxu3 %v10105_v3  ;;  %v14402_v49 = vld [vmem:[#allocation2 + $0x44] sm:$0xf]  ;;  %v9670_v50 = vld [vmem:[#allocation2 + $0x50] sm:$0xf0]  ;;  %v10073_v53 = vor.u32 %v14502_v37, %v10070_v42  ;;  %v4923_v3 = vpop.f32.mrf.mxu3 }
  0xe3   :  { %5155 = vmatpush.bf16.msra.mxu0 %v9705_v14  ;;  %v14434_v52 = vld [vmem:[#allocation2 + $0x144] sm:$0xf]  ;;  %v9798_v57 = vld [vmem:[#allocation2 + $0x150] sm:$0xf0]  ;;  %v9673_v5 = vor.u32 %v14402_v49, %v9670_v50  ;;  %v15929_v6 = vadd.f32 %v4923_v3, %v4910_v63 }
  0xe4   :  { %5169 = vmatpush.bf16.msra.mxu1 %v9833_v15  ;;  %v14466_v61 = vld [vmem:[#allocation2 + $0x244] sm:$0xf]  ;;  %v9926_v62 = vld [vmem:[#allocation2 + $0x250] sm:$0xf0]  ;;  %v9801_v7 = vor.u32 %v14434_v52, %v9798_v57 }
  0xe5   :  { %5183 = vmatpush.bf16.msra.mxu2 %v9961_v16  ;;  %v14498_v0 = vld [vmem:[#allocation2 + $0x344] sm:$0xf]  ;;  %v10054_v2 = vld [vmem:[#allocation2 + $0x350] sm:$0xf0]  ;;  %v9929_v8 = vor.u32 %v14466_v61, %v9926_v62 }
  0xe6   :  { %5197 = vmatpush.bf16.msra.mxu3 %v10089_v26  ;;  %v14398_v9 = vld [vmem:[#allocation2 + $0x24] sm:$0xf]  ;;  %v9654_v11 = vld [vmem:[#allocation2 + $0x30] sm:$0xf0]  ;;  %v10057_v14 = vor.u32 %v14498_v0, %v10054_v2 }
  0xe7   :  { %5156 = vmatpush.bf16.msra.mxu0 %v9689_v45  ;;  %v14430_v12 = vld [vmem:[#allocation2 + $0x124] sm:$0xf]  ;;  %v9782_v15 = vld [vmem:[#allocation2 + $0x130] sm:$0xf0]  ;;  %v9657_v22 = vor.u32 %v14398_v9, %v9654_v11 }
  0xe8   :  { %5170 = vmatpush.bf16.msra.mxu1 %v9817_v24  ;;  %v14462_v16 = vld [vmem:[#allocation2 + $0x224] sm:$0xf]  ;;  %v9910_v18 = vld [vmem:[#allocation2 + $0x230] sm:$0xf0]  ;;  %v9785_v30 = vor.u32 %v14430_v12, %v9782_v15 }
  0xe9   :  { %5184 = vmatpush.bf16.msra.mxu2 %v9945_v48  ;;  %v14494_v20 = vld [vmem:[#allocation2 + $0x324] sm:$0xf]  ;;  %v10038_v21 = vld [vmem:[#allocation2 + $0x330] sm:$0xf0]  ;;  %v9913_v33 = vor.u32 %v14462_v16, %v9910_v18 }
  0xea   :  { %5198 = vmatpush.bf16.msra.mxu3 %v10073_v53  ;;  %v14394_v26 = vld [vmem:[#allocation2 + $0x4] sm:$0xf]  ;;  %v9638_v27 = vld [vmem:[#allocation2 + $0x10] sm:$0xf0]  ;;  %v10041_v45 = vor.u32 %v14494_v20, %v10038_v21  ;;  %v15931_v21 = vpop.f32.mrf.mxu0 }
  0xeb   :  { %5157 = vmatpush.bf16.msra.mxu0 %v9673_v5  ;;  %v14426_v34 = vld [vmem:[#allocation2 + $0x104] sm:$0xf]  ;;  %v9766_v37 = vld [vmem:[#allocation2 + $0x110] sm:$0xf0]  ;;  %v9641_v54 = vor.u32 %v14394_v26, %v9638_v27  ;;  %16461 = vst [vmem:[#allocation11_spill] sm:$0xff] %v15931_v21  ;;  %v15933_v27 = vpop.f32.mrf.mxu1 }
  0xec   :  { %5171 = vmatpush.bf16.msra.mxu1 %v9801_v7  ;;  %v14458_v42 = vld [vmem:[#allocation2 + $0x204] sm:$0xf]  ;;  %v9894_v24 = vld [vmem:[#allocation2 + $0x210] sm:$0xf0]  ;;  %v9769_v63 = vor.u32 %v14426_v34, %v9766_v37  ;;  %16462 = vst [vmem:[#allocation12_spill] sm:$0xff] %v15933_v27 }
  0xed   :  { %5185 = vmatpush.bf16.msra.mxu2 %v9929_v8  ;;  %v14490_v48 = vld [vmem:[#allocation2 + $0x304] sm:$0xf]  ;;  %v10022_v49 = vld [vmem:[#allocation2 + $0x310] sm:$0xf0]  ;;  %v9897_v0 = vor.u32 %v14458_v42, %v9894_v24  ;;  %v10380_v27 = vld [vmem:[#allocation2 + $0x5c8] sm:$0xf] }
  0xee   :  { %5199 = vmatpush.bf16.msra.mxu3 %v10057_v14  ;;  %v14550_v50 = vld [vmem:[#allocation2 + $0x4e4] sm:$0xf]  ;;  %v10262_v52 = vld [vmem:[#allocation2 + $0x4f0] sm:$0xf0]  ;;  %v10025_v5 = vor.u32 %v14490_v48, %v10022_v49  ;;  %v14613_v21 = vld [vmem:[#allocation2 + $0x6d4] sm:$0xf0] }
  0xef   :  { %v14582_v53 = vld [vmem:[#allocation2 + $0x5e4] sm:$0xf]  ;;  %5158 = vmatpush.bf16.msra.mxu0 %v9657_v22  ;;  %v10390_v57 = vld [vmem:[#allocation2 + $0x5f0] sm:$0xf0]  ;;  %v10265_v7 = vor.u32 %v14550_v50, %v10262_v52 }
  0xf0   :  { %v14614_v61 = vld [vmem:[#allocation2 + $0x6e4] sm:$0xf]  ;;  %v10518_v62 = vld [vmem:[#allocation2 + $0x6f0] sm:$0xf0]  ;;  %5172 = vmatpush.bf16.msra.mxu1 %v9785_v30  ;;  %v10393_v8 = vor.u32 %v14582_v53, %v10390_v57 }
  0xf1   :  { %5186 = vmatpush.bf16.msra.mxu2 %v9913_v33  ;;  %v14646_v2 = vld [vmem:[#allocation2 + $0x7e4] sm:$0xf]  ;;  %v10646_v3 = vld [vmem:[#allocation2 + $0x7f0] sm:$0xf0]  ;;  %v10521_v9 = vor.u32 %v14614_v61, %v10518_v62 }
  0xf2   :  { %5200 = vmatpush.bf16.msra.mxu3 %v10041_v45  ;;  %v14546_v11 = vld [vmem:[#allocation2 + $0x4c4] sm:$0xf]  ;;  %v10246_v12 = vld [vmem:[#allocation2 + $0x4d0] sm:$0xf0]  ;;  %v10649_v15 = vor.u32 %v14646_v2, %v10646_v3  ;;  %v15939_v2 = vpop.f32.mrf.mxu2 }
  0xf3   :  { %v14578_v14 = vld [vmem:[#allocation2 + $0x5c4] sm:$0xf]  ;;  %5159 = vmatpush.bf16.msra.mxu0 %v9641_v54  ;;  %v10374_v16 = vld [vmem:[#allocation2 + $0x5d0] sm:$0xf0]  ;;  %v10249_v30 = vor.u32 %v14546_v11, %v10246_v12  ;;  %16463 = vst [vmem:[#allocation13_spill] sm:$0xff] %v15939_v2 }
  0xf4   :  { %v14610_v18 = vld [vmem:[#allocation2 + $0x6c4] sm:$0xf]  ;;  %v10502_v20 = vld [vmem:[#allocation2 + $0x6d0] sm:$0xf0]  ;;  %5173 = vmatpush.bf16.msra.mxu1 %v9769_v63  ;;  %v10377_v33 = vor.u32 %v14578_v14, %v10374_v16  ;;  %v14549_v2 = vld [vmem:[#allocation2 + $0x4d4] sm:$0xf0] }
  0xf5   :  { %5187 = vmatpush.bf16.msra.mxu2 %v9897_v0  ;;  %v14642_v22 = vld [vmem:[#allocation2 + $0x7c4] sm:$0xf]  ;;  %v10630_v26 = vld [vmem:[#allocation2 + $0x7d0] sm:$0xf0]  ;;  %v10505_v34 = vor.u32 %v14610_v18, %v10502_v20  ;;  %v4937_v11 = vpop.f32.mrf.mxu0  ;;  %v4951_v18 = vpop.f32.mrf.mxu1 }
  0xf6   :  { %5201 = vmatpush.bf16.msra.mxu3 %v10025_v5  ;;  %v14542_v37 = vld [vmem:[#allocation2 + $0x4a4] sm:$0xf]  ;;  %v10230_v42 = vld [vmem:[#allocation2 + $0x4b0] sm:$0xf0]  ;;  %v10633_v24 = vor.u32 %v14642_v22, %v10630_v26  ;;  %5160 = vmatmul.bf16.vlgmr.msra.gmra.mxu0 %v15711_v58 }
  0xf7   :  { %5208 = vmatpush.bf16.msrb.mxu0 %v10265_v7  ;;  %v14574_v45 = vld [vmem:[#allocation2 + $0x5a4] sm:$0xf]  ;;  %v10358_v48 = vld [vmem:[#allocation2 + $0x5b0] sm:$0xf0]  ;;  %5174 = vmatmul.bf16.vlgmr.msra.gmra.mxu1 %v15729_v10  ;;  %v10233_v54 = vor.u32 %v14542_v37, %v10230_v42 }
  0xf8   :  { %5222 = vmatpush.bf16.msrb.mxu1 %v10393_v8  ;;  %v14606_v49 = vld [vmem:[#allocation2 + $0x6a4] sm:$0xf]  ;;  %v10486_v50 = vld [vmem:[#allocation2 + $0x6b0] sm:$0xf0]  ;;  %5188 = vmatmul.bf16.vlgmr.msra.gmra.mxu2 %v15716_v1  ;;  %v10361_v57 = vor.u32 %v14574_v45, %v10358_v48 }
  0xf9   :  { %5236 = vmatpush.bf16.msrb.mxu2 %v10521_v9  ;;  %v14638_v52 = vld [vmem:[#allocation2 + $0x7a4] sm:$0xf]  ;;  %v10614_v53 = vld [vmem:[#allocation2 + $0x7b0] sm:$0xf0]  ;;  %5202 = vmatmul.bf16.vlgmr.msra.gmra.mxu3 %v15734_v17  ;;  %v10489_v61 = vor.u32 %v14606_v49, %v10486_v50  ;;  %v15941_v9 = vpop.f32.mrf.mxu3 }
  0xfa   :  { %5250 = vmatpush.bf16.msrb.mxu3 %v10649_v15  ;;  %v14538_v62 = vld [vmem:[#allocation2 + $0x484] sm:$0xf]  ;;  %v10214_v63 = vld [vmem:[#allocation2 + $0x490] sm:$0xf0]  ;;  %v10617_v3 = vor.u32 %v14638_v52, %v10614_v53  ;;  %16464 = vst [vmem:[#allocation14_spill] sm:$0xff] %v15941_v9  ;;  %v4938_v15 = vadd.f32 %v4937_v11, %v15929_v6 }
  0xfb   :  { %5209 = vmatpush.bf16.msrb.mxu0 %v10249_v30  ;;  %v14570_v0 = vld [vmem:[#allocation2 + $0x584] sm:$0xf]  ;;  %v10342_v5 = vld [vmem:[#allocation2 + $0x590] sm:$0xf0]  ;;  %v10217_v16 = vor.u32 %v14538_v62, %v10214_v63  ;;  %v4965_v62 = vpop.f32.mrf.mxu2 }
  0xfc   :  { %5223 = vmatpush.bf16.msrb.mxu1 %v10377_v33  ;;  %v14602_v7 = vld [vmem:[#allocation2 + $0x684] sm:$0xf]  ;;  %v10470_v8 = vld [vmem:[#allocation2 + $0x690] sm:$0xf0]  ;;  %v10345_v20 = vor.u32 %v14570_v0, %v10342_v5  ;;  %v4952_v37 = vadd.f32 %v4951_v18, %v4938_v15 }
  0xfd   :  { %5237 = vmatpush.bf16.msrb.mxu2 %v10505_v34  ;;  %v14634_v12 = vld [vmem:[#allocation2 + $0x784] sm:$0xf]  ;;  %v10598_v14 = vld [vmem:[#allocation2 + $0x790] sm:$0xf0]  ;;  %v10473_v22 = vor.u32 %v14602_v7, %v10470_v8  ;;  %v15946_v9 = vpop.f32.mrf.mxu0 }
  0xfe   :  { %5251 = vmatpush.bf16.msrb.mxu3 %v10633_v24  ;;  %v14534_v26 = vld [vmem:[#allocation2 + $0x464] sm:$0xf]  ;;  %v10198_v30 = vld [vmem:[#allocation2 + $0x470] sm:$0xf0]  ;;  %v10601_v34 = vor.u32 %v14634_v12, %v10598_v14  ;;  %v4966_v5 = vadd.f32 %v4965_v62, %v4952_v37  ;;  %16465 = vst [vmem:[#allocation15_spill] sm:$0xff] %v15946_v9 }
  0xff   :  { %5210 = vmatpush.bf16.msrb.mxu0 %v10233_v54  ;;  %v14566_v33 = vld [vmem:[#allocation2 + $0x564] sm:$0xf]  ;;  %v10326_v42 = vld [vmem:[#allocation2 + $0x570] sm:$0xf0]  ;;  %v10201_v50 = vor.u32 %v14534_v26, %v10198_v30 }
 0x100   :  { %5224 = vmatpush.bf16.msrb.mxu1 %v10361_v57  ;;  %v14598_v45 = vld [vmem:[#allocation2 + $0x664] sm:$0xf]  ;;  %v10454_v24 = vld [vmem:[#allocation2 + $0x670] sm:$0xf0]  ;;  %v10329_v6 = vor.u32 %v14566_v33, %v10326_v42 }
 0x101   :  { %5238 = vmatpush.bf16.msrb.mxu2 %v10489_v61  ;;  %v14630_v48 = vld [vmem:[#allocation2 + $0x764] sm:$0xf]  ;;  %v10582_v49 = vld [vmem:[#allocation2 + $0x770] sm:$0xf0]  ;;  %v10457_v52 = vor.u32 %v14598_v45, %v10454_v24  ;;  %v4979_v7 = vpop.f32.mrf.mxu3 }
 0x102   :  { %5252 = vmatpush.bf16.msrb.mxu3 %v10617_v3  ;;  %v14530_v53 = vld [vmem:[#allocation2 + $0x444] sm:$0xf]  ;;  %v10182_v54 = vld [vmem:[#allocation2 + $0x450] sm:$0xf0]  ;;  %v10585_v61 = vor.u32 %v14630_v48, %v10582_v49  ;;  %v15944_v14 = vadd.f32 %v4979_v7, %v4966_v5 }
 0x103   :  { %5211 = vmatpush.bf16.msrb.mxu0 %v10217_v16  ;;  %v14562_v57 = vld [vmem:[#allocation2 + $0x544] sm:$0xf]  ;;  %v10310_v63 = vld [vmem:[#allocation2 + $0x550] sm:$0xf0]  ;;  %v10185_v12 = vor.u32 %v14530_v53, %v10182_v54 }
 0x104   :  { %5225 = vmatpush.bf16.msrb.mxu1 %v10345_v20  ;;  %v14594_v0 = vld [vmem:[#allocation2 + $0x644] sm:$0xf]  ;;  %v10438_v3 = vld [vmem:[#allocation2 + $0x650] sm:$0xf0]  ;;  %v10313_v15 = vor.u32 %v14562_v57, %v10310_v63 }
 0x105   :  { %5239 = vmatpush.bf16.msrb.mxu2 %v10473_v22  ;;  %v14626_v8 = vld [vmem:[#allocation2 + $0x744] sm:$0xf]  ;;  %v10566_v11 = vld [vmem:[#allocation2 + $0x750] sm:$0xf0]  ;;  %v10441_v16 = vor.u32 %v14594_v0, %v10438_v3 }
 0x106   :  { %5253 = vmatpush.bf16.msrb.mxu3 %v10601_v34  ;;  %v14526_v18 = vld [vmem:[#allocation2 + $0x424] sm:$0xf]  ;;  %v10166_v20 = vld [vmem:[#allocation2 + $0x430] sm:$0xf0]  ;;  %v10569_v26 = vor.u32 %v14626_v8, %v10566_v11 }
 0x107   :  { %5212 = vmatpush.bf16.msrb.mxu0 %v10201_v50  ;;  %v14558_v22 = vld [vmem:[#allocation2 + $0x524] sm:$0xf]  ;;  %v10294_v30 = vld [vmem:[#allocation2 + $0x530] sm:$0xf0]  ;;  %v10169_v45 = vor.u32 %v14526_v18, %v10166_v20 }
 0x108   :  { %5226 = vmatpush.bf16.msrb.mxu1 %v10329_v6  ;;  %v14590_v33 = vld [vmem:[#allocation2 + $0x624] sm:$0xf]  ;;  %v10422_v34 = vld [vmem:[#allocation2 + $0x630] sm:$0xf0]  ;;  %v10297_v49 = vor.u32 %v14558_v22, %v10294_v30 }
 0x109   :  { %5240 = vmatpush.bf16.msrb.mxu2 %v10457_v52  ;;  %v14622_v37 = vld [vmem:[#allocation2 + $0x724] sm:$0xf]  ;;  %v10550_v42 = vld [vmem:[#allocation2 + $0x730] sm:$0xf0]  ;;  %v10425_v50 = vor.u32 %v14590_v33, %v10422_v34 }
 0x10a   :  { %5254 = vmatpush.bf16.msrb.mxu3 %v10585_v61  ;;  %v14522_v24 = vld [vmem:[#allocation2 + $0x404] sm:$0xf]  ;;  %v10150_v48 = vld [vmem:[#allocation2 + $0x410] sm:$0xf0]  ;;  %v10553_v54 = vor.u32 %v14622_v37, %v10550_v42 }
 0x10b   :  { %5213 = vmatpush.bf16.msrb.mxu0 %v10185_v12  ;;  %v14554_v6 = vld [vmem:[#allocation2 + $0x504] sm:$0xf]  ;;  %v10278_v52 = vld [vmem:[#allocation2 + $0x510] sm:$0xf0]  ;;  %v10153_v5 = vor.u32 %v14522_v24, %v10150_v48 }
 0x10c   :  { %5227 = vmatpush.bf16.msrb.mxu1 %v10313_v15  ;;  %v14586_v53 = vld [vmem:[#allocation2 + $0x604] sm:$0xf]  ;;  %v10406_v57 = vld [vmem:[#allocation2 + $0x610] sm:$0xf0]  ;;  %v10281_v12 = vor.u32 %v14554_v6, %v10278_v52  ;;  %v15948_v6 = vpop.f32.mrf.mxu1 }
 0x10d   :  { %5241 = vmatpush.bf16.msrb.mxu2 %v10441_v16  ;;  %v14618_v61 = vld [vmem:[#allocation2 + $0x704] sm:$0xf]  ;;  %v10534_v62 = vld [vmem:[#allocation2 + $0x710] sm:$0xf0]  ;;  %v10409_v15 = vor.u32 %v14586_v53, %v10406_v57  ;;  %16466 = vst [vmem:[#allocation16_spill] sm:$0xff] %v15948_v6 }
 0x10e   :  { %5255 = vmatpush.bf16.msrb.mxu3 %v10569_v26  ;;  %v14678_v63 = vld [vmem:[#allocation2 + $0x8e4] sm:$0xf]  ;;  %v10774_v0 = vld [vmem:[#allocation2 + $0x8f0] sm:$0xf0]  ;;  %v10537_v20 = vor.u32 %v14618_v61, %v10534_v62 }
 0x10f   :  { %v14710_v3 = vld [vmem:[#allocation2 + $0x9e4] sm:$0xf]  ;;  %5214 = vmatpush.bf16.msrb.mxu0 %v10169_v45  ;;  %v10902_v7 = vld [vmem:[#allocation2 + $0x9f0] sm:$0xf0]  ;;  %v10777_v22 = vor.u32 %v14678_v63, %v10774_v0 }
 0x110   :  { %v14742_v8 = vld [vmem:[#allocation2 + $0xae4] sm:$0xf]  ;;  %v11030_v11 = vld [vmem:[#allocation2 + $0xaf0] sm:$0xf0]  ;;  %5228 = vmatpush.bf16.msrb.mxu1 %v10297_v49  ;;  %v10905_v26 = vor.u32 %v14710_v3, %v10902_v7 }
 0x111   :  { %5242 = vmatpush.bf16.msrb.mxu2 %v10425_v50  ;;  %v14774_v16 = vld [vmem:[#allocation2 + $0xbe4] sm:$0xf]  ;;  %v11158_v18 = vld [vmem:[#allocation2 + $0xbf0] sm:$0xf0]  ;;  %v11033_v30 = vor.u32 %v14742_v8, %v11030_v11 }
 0x112   :  { %5256 = vmatpush.bf16.msrb.mxu3 %v10553_v54  ;;  %v14674_v33 = vld [vmem:[#allocation2 + $0x8c4] sm:$0xf]  ;;  %v10758_v34 = vld [vmem:[#allocation2 + $0x8d0] sm:$0xf0]  ;;  %v11161_v42 = vor.u32 %v14774_v16, %v11158_v18 }
 0x113   :  { %v14706_v37 = vld [vmem:[#allocation2 + $0x9c4] sm:$0xf]  ;;  %5215 = vmatpush.bf16.msrb.mxu0 %v10153_v5  ;;  %v10886_v45 = vld [vmem:[#allocation2 + $0x9d0] sm:$0xf0]  ;;  %v10761_v52 = vor.u32 %v14674_v33, %v10758_v34 }
 0x114   :  { %v14738_v24 = vld [vmem:[#allocation2 + $0xac4] sm:$0xf]  ;;  %v11014_v48 = vld [vmem:[#allocation2 + $0xad0] sm:$0xf0]  ;;  %5229 = vmatpush.bf16.msrb.mxu1 %v10281_v12  ;;  %v10889_v53 = vor.u32 %v14706_v37, %v10886_v45  ;;  %v15956_v37 = vpop.f32.mrf.mxu3 }
 0x115   :  { %5243 = vmatpush.bf16.msrb.mxu2 %v10409_v15  ;;  %v14770_v49 = vld [vmem:[#allocation2 + $0xbc4] sm:$0xf]  ;;  %v11142_v50 = vld [vmem:[#allocation2 + $0xbd0] sm:$0xf0]  ;;  %v11017_v54 = vor.u32 %v14738_v24, %v11014_v48  ;;  %16468 = vst [vmem:[#allocation18_spill] sm:$0xff] %v15956_v37 }
 0x116   :  { %5257 = vmatpush.bf16.msrb.mxu3 %v10537_v20  ;;  %v14670_v57 = vld [vmem:[#allocation2 + $0x8a4] sm:$0xf]  ;;  %v10742_v61 = vld [vmem:[#allocation2 + $0x8b0] sm:$0xf0]  ;;  %5216 = vmatmul.bf16.vlgmr.msrb.gmra.mxu0 %v15762_v39  ;;  %v11145_v63 = vor.u32 %v14770_v49, %v11142_v50  ;;  %v5007_v50 = vpop.f32.mrf.mxu1 }
 0x117   :  { %5264 = vmatpush.bf16.msra.mxu0 %v10777_v22  ;;  %v14702_v62 = vld [vmem:[#allocation2 + $0x9a4] sm:$0xf]  ;;  %v10870_v0 = vld [vmem:[#allocation2 + $0x9b0] sm:$0xf0]  ;;  %5230 = vmatmul.bf16.vlgmr.msrb.gmra.mxu1 %v15766_v44  ;;  %v10745_v11 = vor.u32 %v14670_v57, %v10742_v61  ;;  %v15954_v22 = vpop.f32.mrf.mxu2 }
 0x118   :  { %5278 = vmatpush.bf16.msra.mxu1 %v10905_v26  ;;  %v14734_v3 = vld [vmem:[#allocation2 + $0xaa4] sm:$0xf]  ;;  %v10998_v5 = vld [vmem:[#allocation2 + $0xab0] sm:$0xf0]  ;;  %5244 = vmatmul.bf16.vlgmr.msrb.gmra.mxu2 %v15764_v43  ;;  %v10873_v12 = vor.u32 %v14702_v62, %v10870_v0  ;;  %16467 = vst [vmem:[#allocation17_spill] sm:$0xff] %v15954_v22 }
 0x119   :  { %5292 = vmatpush.bf16.msra.mxu2 %v11033_v30  ;;  %v14766_v7 = vld [vmem:[#allocation2 + $0xba4] sm:$0xf]  ;;  %v11126_v8 = vld [vmem:[#allocation2 + $0xbb0] sm:$0xf0]  ;;  %5258 = vmatmul.bf16.vlgmr.msrb.gmra.mxu3 %v15768_v47  ;;  %v11001_v15 = vor.u32 %v14734_v3, %v10998_v5 }
 0x11a   :  { %5306 = vmatpush.bf16.msra.mxu3 %v11161_v42  ;;  %v14666_v16 = vld [vmem:[#allocation2 + $0x884] sm:$0xf]  ;;  %v10726_v18 = vld [vmem:[#allocation2 + $0x890] sm:$0xf0]  ;;  %v11129_v26 = vor.u32 %v14766_v7, %v11126_v8  ;;  %v4993_v42 = vpop.f32.mrf.mxu0 }
 0x11b   :  { %5265 = vmatpush.bf16.msra.mxu0 %v10761_v52  ;;  %v14698_v20 = vld [vmem:[#allocation2 + $0x984] sm:$0xf]  ;;  %v10854_v30 = vld [vmem:[#allocation2 + $0x990] sm:$0xf0]  ;;  %v4994_v48 = vadd.f32 %v4993_v42, %v15944_v14  ;;  %v10729_v49 = vor.u32 %v14666_v16, %v10726_v18 }
 0x11c   :  { %5279 = vmatpush.bf16.msra.mxu1 %v10889_v53  ;;  %v14730_v33 = vld [vmem:[#allocation2 + $0xa84] sm:$0xf]  ;;  %v10982_v34 = vld [vmem:[#allocation2 + $0xa90] sm:$0xf0]  ;;  %v10857_v52 = vor.u32 %v14698_v20, %v10854_v30 }
 0x11d   :  { %5293 = vmatpush.bf16.msra.mxu2 %v11017_v54  ;;  %v14762_v45 = vld [vmem:[#allocation2 + $0xb84] sm:$0xf]  ;;  %v11110_v24 = vld [vmem:[#allocation2 + $0xb90] sm:$0xf0]  ;;  %v10985_v53 = vor.u32 %v14730_v33, %v10982_v34 }
 0x11e   :  { %5307 = vmatpush.bf16.msra.mxu3 %v11145_v63  ;;  %v14662_v54 = vld [vmem:[#allocation2 + $0x864] sm:$0xf]  ;;  %v10710_v57 = vld [vmem:[#allocation2 + $0x870] sm:$0xf0]  ;;  %v11113_v62 = vor.u32 %v14762_v45, %v11110_v24  ;;  %v5008_v63 = vadd.f32 %v5007_v50, %v4994_v48  ;;  %v5035_v45 = vpop.f32.mrf.mxu3 }
 0x11f   :  { %5266 = vmatpush.bf16.msra.mxu0 %v10745_v11  ;;  %v14694_v61 = vld [vmem:[#allocation2 + $0x964] sm:$0xf]  ;;  %v10838_v0 = vld [vmem:[#allocation2 + $0x970] sm:$0xf0]  ;;  %v10713_v11 = vor.u32 %v14662_v54, %v10710_v57  ;;  %v5021_v30 = vpop.f32.mrf.mxu2 }
 0x120   :  { %5280 = vmatpush.bf16.msra.mxu1 %v10873_v12  ;;  %v14726_v3 = vld [vmem:[#allocation2 + $0xa64] sm:$0xf]  ;;  %v10966_v5 = vld [vmem:[#allocation2 + $0xa70] sm:$0xf0]  ;;  %v10841_v14 = vor.u32 %v14694_v61, %v10838_v0  ;;  %v5022_v42 = vadd.f32 %v5021_v30, %v5008_v63 }
 0x121   :  { %5294 = vmatpush.bf16.msra.mxu2 %v11001_v15  ;;  %v14758_v7 = vld [vmem:[#allocation2 + $0xb64] sm:$0xf]  ;;  %v11094_v8 = vld [vmem:[#allocation2 + $0xb70] sm:$0xf0]  ;;  %v10969_v12 = vor.u32 %v14726_v3, %v10966_v5 }
 0x122   :  { %5308 = vmatpush.bf16.msra.mxu3 %v11129_v26  ;;  %v14658_v15 = vld [vmem:[#allocation2 + $0x844] sm:$0xf]  ;;  %v10694_v16 = vld [vmem:[#allocation2 + $0x850] sm:$0xf0]  ;;  %v11097_v20 = vor.u32 %v14758_v7, %v11094_v8  ;;  %v15959_v50 = vadd.f32 %v5035_v45, %v5022_v42  ;;  %v15961_v9 = vpop.f32.mrf.mxu0 }
 0x123   :  { %5267 = vmatpush.bf16.msra.mxu0 %v10729_v49  ;;  %v14690_v18 = vld [vmem:[#allocation2 + $0x944] sm:$0xf]  ;;  %v10822_v26 = vld [vmem:[#allocation2 + $0x950] sm:$0xf0]  ;;  %v10697_v49 = vor.u32 %v14658_v15, %v10694_v16  ;;  %16469 = vst [vmem:[#allocation19_spill] sm:$0xff] %v15961_v9 }
 0x124   :  { %5281 = vmatpush.bf16.msra.mxu1 %v10857_v52  ;;  %v14722_v33 = vld [vmem:[#allocation2 + $0xa44] sm:$0xf]  ;;  %v10950_v34 = vld [vmem:[#allocation2 + $0xa50] sm:$0xf0]  ;;  %v10825_v52 = vor.u32 %v14690_v18, %v10822_v26 }
 0x125   :  { %5295 = vmatpush.bf16.msra.mxu2 %v10985_v53  ;;  %v14754_v24 = vld [vmem:[#allocation2 + $0xb44] sm:$0xf]  ;;  %v11078_v48 = vld [vmem:[#allocation2 + $0xb50] sm:$0xf0]  ;;  %v10953_v53 = vor.u32 %v14722_v33, %v10950_v34 }
 0x126   :  { %5309 = vmatpush.bf16.msra.mxu3 %v11113_v62  ;;  %v14654_v54 = vld [vmem:[#allocation2 + $0x824] sm:$0xf]  ;;  %v10678_v57 = vld [vmem:[#allocation2 + $0x830] sm:$0xf0]  ;;  %v11081_v62 = vor.u32 %v14754_v24, %v11078_v48 }
 0x127   :  { %5268 = vmatpush.bf16.msra.mxu0 %v10713_v11  ;;  %v14686_v61 = vld [vmem:[#allocation2 + $0x924] sm:$0xf]  ;;  %v10806_v0 = vld [vmem:[#allocation2 + $0x930] sm:$0xf0]  ;;  %v10681_v8 = vor.u32 %v14654_v54, %v10678_v57 }
 0x128   :  { %5282 = vmatpush.bf16.msra.mxu1 %v10841_v14  ;;  %v14718_v3 = vld [vmem:[#allocation2 + $0xa24] sm:$0xf]  ;;  %v10934_v5 = vld [vmem:[#allocation2 + $0xa30] sm:$0xf0]  ;;  %v10809_v14 = vor.u32 %v14686_v61, %v10806_v0 }
 0x129   :  { %5296 = vmatpush.bf16.msra.mxu2 %v10969_v12  ;;  %v14750_v63 = vld [vmem:[#allocation2 + $0xb24] sm:$0xf]  ;;  %v11062_v7 = vld [vmem:[#allocation2 + $0xb30] sm:$0xf0]  ;;  %v10937_v12 = vor.u32 %v14718_v3, %v10934_v5 }
 0x12a   :  { %5310 = vmatpush.bf16.msra.mxu3 %v11097_v20  ;;  %v14650_v11 = vld [vmem:[#allocation2 + $0x804] sm:$0xf]  ;;  %v10662_v15 = vld [vmem:[#allocation2 + $0x810] sm:$0xf0]  ;;  %v11065_v26 = vor.u32 %v14750_v63, %v11062_v7 }
 0x12b   :  { %5269 = vmatpush.bf16.msra.mxu0 %v10697_v49  ;;  %v14682_v16 = vld [vmem:[#allocation2 + $0x904] sm:$0xf]  ;;  %v10790_v18 = vld [vmem:[#allocation2 + $0x910] sm:$0xf0]  ;;  %v10665_v48 = vor.u32 %v14650_v11, %v10662_v15 }
 0x12c   :  { %5283 = vmatpush.bf16.msra.mxu1 %v10825_v52  ;;  %v14714_v30 = vld [vmem:[#allocation2 + $0xa04] sm:$0xf]  ;;  %v10918_v20 = vld [vmem:[#allocation2 + $0xa10] sm:$0xf0]  ;;  %v10793_v52 = vor.u32 %v14682_v16, %v10790_v18  ;;  %v15963_v16 = vpop.f32.mrf.mxu1 }
 0x12d   :  { %5297 = vmatpush.bf16.msra.mxu2 %v10953_v53  ;;  %v14746_v33 = vld [vmem:[#allocation2 + $0xb04] sm:$0xf]  ;;  %v11046_v34 = vld [vmem:[#allocation2 + $0xb10] sm:$0xf0]  ;;  %v10921_v53 = vor.u32 %v14714_v30, %v10918_v20  ;;  %16470 = vst [vmem:[#allocation20_spill] sm:$0xff] %v15963_v16 }
 0x12e   :  { %5311 = vmatpush.bf16.msra.mxu3 %v11081_v62  ;;  %v14806_v42 = vld [vmem:[#allocation2 + $0xce4] sm:$0xf]  ;;  %v11286_v45 = vld [vmem:[#allocation2 + $0xcf0] sm:$0xf0]  ;;  %v11049_v62 = vor.u32 %v14746_v33, %v11046_v34 }
 0x12f   :  { %v14838_v24 = vld [vmem:[#allocation2 + $0xde4] sm:$0xf]  ;;  %5270 = vmatpush.bf16.msra.mxu0 %v10681_v8  ;;  %v11414_v49 = vld [vmem:[#allocation2 + $0xdf0] sm:$0xf0]  ;;  %v11289_v3 = vor.u32 %v14806_v42, %v11286_v45 }
 0x130   :  { %v14870_v54 = vld [vmem:[#allocation2 + $0xee4] sm:$0xf]  ;;  %v11542_v57 = vld [vmem:[#allocation2 + $0xef0] sm:$0xf0]  ;;  %5284 = vmatpush.bf16.msra.mxu1 %v10809_v14  ;;  %v11417_v5 = vor.u32 %v14838_v24, %v11414_v49 }
 0x131   :  { %5298 = vmatpush.bf16.msra.mxu2 %v10937_v12  ;;  %v14902_v61 = vld [vmem:[#allocation2 + $0xfe4] sm:$0xf]  ;;  %v11670_v0 = vld [vmem:[#allocation2 + $0xff0] sm:$0xf0]  ;;  %v11545_v63 = vor.u32 %v14870_v54, %v11542_v57 }
 0x132   :  { %5312 = vmatpush.bf16.msra.mxu3 %v11065_v26  ;;  %v14802_v7 = vld [vmem:[#allocation2 + $0xcc4] sm:$0xf]  ;;  %v11270_v37 = vld [vmem:[#allocation2 + $0xcd0] sm:$0xf0]  ;;  %v11673_v8 = vor.u32 %v14902_v61, %v11670_v0  ;;  %v15969_v61 = vpop.f32.mrf.mxu2 }
 0x133   :  { %v14834_v22 = vld [vmem:[#allocation2 + $0xdc4] sm:$0xf]  ;;  %5271 = vmatpush.bf16.msra.mxu0 %v10665_v48  ;;  %v11398_v11 = vld [vmem:[#allocation2 + $0xdd0] sm:$0xf0]  ;;  %v11273_v18 = vor.u32 %v14802_v7, %v11270_v37  ;;  %16471 = vst [vmem:[#allocation21_spill] sm:$0xff] %v15969_v61 }
 0x134   :  { %v14866_v15 = vld [vmem:[#allocation2 + $0xec4] sm:$0xf]  ;;  %v11526_v6 = vld [vmem:[#allocation2 + $0xed0] sm:$0xf0]  ;;  %5285 = vmatpush.bf16.msra.mxu1 %v10793_v52  ;;  %v11401_v30 = vor.u32 %v14834_v22, %v11398_v11 }
 0x135   :  { %5299 = vmatpush.bf16.msra.mxu2 %v10921_v53  ;;  %v14898_v14 = vld [vmem:[#allocation2 + $0xfc4] sm:$0xf]  ;;  %v11654_v12 = vld [vmem:[#allocation2 + $0xfd0] sm:$0xf0]  ;;  %v11529_v26 = vor.u32 %v14866_v15, %v11526_v6 }
 0x136   :  { %5313 = vmatpush.bf16.msra.mxu3 %v11049_v62  ;;  %v14798_v20 = vld [vmem:[#allocation2 + $0xca4] sm:$0xf]  ;;  %v11254_v33 = vld [vmem:[#allocation2 + $0xcb0] sm:$0xf0]  ;;  %5272 = vmatmul.bf16.vlgmr.msra.gmra.mxu0 %v15798_v31  ;;  %v11657_v42 = vor.u32 %v14898_v14, %v11654_v12  ;;  %v5063_v12 = vpop.f32.mrf.mxu1 }
 0x137   :  { %5320 = vmatpush.bf16.msrb.mxu0 %v11289_v3  ;;  %v14830_v34 = vld [vmem:[#allocation2 + $0xda4] sm:$0xf]  ;;  %v11382_v45 = vld [vmem:[#allocation2 + $0xdb0] sm:$0xf0]  ;;  %5286 = vmatmul.bf16.vlgmr.msra.gmra.mxu1 %v15802_v36  ;;  %v11257_v6 = vor.u32 %v14798_v20, %v11254_v33  ;;  %v5049_v7 = vpop.f32.mrf.mxu0 }
 0x138   :  { %5334 = vmatpush.bf16.msrb.mxu1 %v11417_v5  ;;  %v14862_v24 = vld [vmem:[#allocation2 + $0xea4] sm:$0xf]  ;;  %v11510_v48 = vld [vmem:[#allocation2 + $0xeb0] sm:$0xf0]  ;;  %5300 = vmatmul.bf16.vlgmr.msra.gmra.mxu2 %v15800_v35  ;;  %v11385_v22 = vor.u32 %v14830_v34, %v11382_v45  ;;  %v5050_v15 = vadd.f32 %v5049_v7, %v15959_v50 }
 0x139   :  { %5348 = vmatpush.bf16.msrb.mxu2 %v11545_v63  ;;  %v14894_v49 = vld [vmem:[#allocation2 + $0xfa4] sm:$0xf]  ;;  %v11638_v37 = vld [vmem:[#allocation2 + $0xfb0] sm:$0xf0]  ;;  %5314 = vmatmul.bf16.vlgmr.msra.gmra.mxu3 %v15804_v40  ;;  %v11513_v54 = vor.u32 %v14862_v24, %v11510_v48  ;;  %v15971_v63 = vpop.f32.mrf.mxu3 }
 0x13a   :  { %5362 = vmatpush.bf16.msrb.mxu3 %v11673_v8  ;;  %v14794_v57 = vld [vmem:[#allocation2 + $0xc84] sm:$0xf]  ;;  %v11238_v52 = vld [vmem:[#allocation2 + $0xc90] sm:$0xf0]  ;;  %v11641_v0 = vor.u32 %v14894_v49, %v11638_v37  ;;  %16472 = vst [vmem:[#allocation22_spill] sm:$0xff] %v15971_v63 }
 0x13b   :  { %5321 = vmatpush.bf16.msrb.mxu0 %v11273_v18  ;;  %v14826_v53 = vld [vmem:[#allocation2 + $0xd84] sm:$0xf]  ;;  %v11366_v62 = vld [vmem:[#allocation2 + $0xd90] sm:$0xf0]  ;;  %v11241_v14 = vor.u32 %v14794_v57, %v11238_v52 }
 0x13c   :  { %5335 = vmatpush.bf16.msrb.mxu1 %v11401_v30  ;;  %v14858_v3 = vld [vmem:[#allocation2 + $0xe84] sm:$0xf]  ;;  %v11494_v5 = vld [vmem:[#allocation2 + $0xe90] sm:$0xf0]  ;;  %v11369_v18 = vor.u32 %v14826_v53, %v11366_v62  ;;  %v5077_v62 = vpop.f32.mrf.mxu2 }
 0x13d   :  { %5349 = vmatpush.bf16.msrb.mxu2 %v11529_v26  ;;  %v14890_v8 = vld [vmem:[#allocation2 + $0xf84] sm:$0xf]  ;;  %v11622_v11 = vld [vmem:[#allocation2 + $0xf90] sm:$0xf0]  ;;  %v11497_v30 = vor.u32 %v14858_v3, %v11494_v5 }
 0x13e   :  { %5363 = vmatpush.bf16.msrb.mxu3 %v11657_v42  ;;  %v14790_v26 = vld [vmem:[#allocation2 + $0xc64] sm:$0xf]  ;;  %v11222_v20 = vld [vmem:[#allocation2 + $0xc70] sm:$0xf0]  ;;  %v11625_v34 = vor.u32 %v14890_v8, %v11622_v11  ;;  %v5064_v42 = vadd.f32 %v5063_v12, %v5050_v15 }
 0x13f   :  { %5322 = vmatpush.bf16.msrb.mxu0 %v11257_v6  ;;  %v14822_v33 = vld [vmem:[#allocation2 + $0xd64] sm:$0xf]  ;;  %v11350_v45 = vld [vmem:[#allocation2 + $0xd70] sm:$0xf0]  ;;  %v11225_v6 = vor.u32 %v14790_v26, %v11222_v20  ;;  %v15976_v9 = vpop.f32.mrf.mxu0 }
 0x140   :  { %5336 = vmatpush.bf16.msrb.mxu1 %v11385_v22  ;;  %v14854_v24 = vld [vmem:[#allocation2 + $0xe64] sm:$0xf]  ;;  %v11478_v48 = vld [vmem:[#allocation2 + $0xe70] sm:$0xf0]  ;;  %v11353_v50 = vor.u32 %v14822_v33, %v11350_v45  ;;  %v5078_v7 = vadd.f32 %v5077_v62, %v5064_v42  ;;  %16473 = vst [vmem:[#allocation23_spill] sm:$0xff] %v15976_v9 }
 0x141   :  { %5350 = vmatpush.bf16.msrb.mxu2 %v11513_v54  ;;  %v14886_v49 = vld [vmem:[#allocation2 + $0xf64] sm:$0xf]  ;;  %v11606_v37 = vld [vmem:[#allocation2 + $0xf70] sm:$0xf0]  ;;  %v11481_v22 = vor.u32 %v14854_v24, %v11478_v48  ;;  %v5091_v8 = vpop.f32.mrf.mxu3  ;;  %v14505_v9 = vld [vmem:[#allocation2 + $0x374] sm:$0xf0] }
 0x142   :  { %5364 = vmatpush.bf16.msrb.mxu3 %v11641_v0  ;;  %v14786_v54 = vld [vmem:[#allocation2 + $0xc44] sm:$0xf]  ;;  %v11206_v57 = vld [vmem:[#allocation2 + $0xc50] sm:$0xf0]  ;;  %v11609_v53 = vor.u32 %v14886_v49, %v11606_v37  ;;  %v15974_v12 = vadd.f32 %v5091_v8, %v5078_v7 }
 0x143   :  { %5323 = vmatpush.bf16.msrb.mxu0 %v11241_v14  ;;  %v14818_v52 = vld [vmem:[#allocation2 + $0xd44] sm:$0xf]  ;;  %v11334_v0 = vld [vmem:[#allocation2 + $0xd50] sm:$0xf0]  ;;  %v11209_v14 = vor.u32 %v14786_v54, %v11206_v57 }
 0x144   :  { %5337 = vmatpush.bf16.msrb.mxu1 %v11369_v18  ;;  %v14850_v3 = vld [vmem:[#allocation2 + $0xe44] sm:$0xf]  ;;  %v11462_v5 = vld [vmem:[#allocation2 + $0xe50] sm:$0xf0]  ;;  %v11337_v18 = vor.u32 %v14818_v52, %v11334_v0 }
 0x145   :  { %5351 = vmatpush.bf16.msrb.mxu2 %v11497_v30  ;;  %v14882_v11 = vld [vmem:[#allocation2 + $0xf44] sm:$0xf]  ;;  %v11590_v15 = vld [vmem:[#allocation2 + $0xf50] sm:$0xf0]  ;;  %v11465_v30 = vor.u32 %v14850_v3, %v11462_v5 }
 0x146   :  { %5365 = vmatpush.bf16.msrb.mxu3 %v11625_v34  ;;  %v14782_v26 = vld [vmem:[#allocation2 + $0xc24] sm:$0xf]  ;;  %v11190_v20 = vld [vmem:[#allocation2 + $0xc30] sm:$0xf0]  ;;  %v11593_v34 = vor.u32 %v14882_v11, %v11590_v15 }
 0x147   :  { %5324 = vmatpush.bf16.msrb.mxu0 %v11225_v6  ;;  %v14814_v33 = vld [vmem:[#allocation2 + $0xd24] sm:$0xf]  ;;  %v11318_v45 = vld [vmem:[#allocation2 + $0xd30] sm:$0xf0]  ;;  %v11193_v37 = vor.u32 %v14782_v26, %v11190_v20 }
 0x148   :  { %5338 = vmatpush.bf16.msrb.mxu1 %v11353_v50  ;;  %v14846_v24 = vld [vmem:[#allocation2 + $0xe24] sm:$0xf]  ;;  %v11446_v48 = vld [vmem:[#allocation2 + $0xe30] sm:$0xf0]  ;;  %v11321_v50 = vor.u32 %v14814_v33, %v11318_v45 }
 0x149   :  { %5352 = vmatpush.bf16.msrb.mxu2 %v11481_v22  ;;  %v14878_v42 = vld [vmem:[#allocation2 + $0xf24] sm:$0xf]  ;;  %v11574_v49 = vld [vmem:[#allocation2 + $0xf30] sm:$0xf0]  ;;  %v11449_v22 = vor.u32 %v14846_v24, %v11446_v48 }
 0x14a   :  { %5366 = vmatpush.bf16.msrb.mxu3 %v11609_v53  ;;  %v14778_v6 = vld [vmem:[#allocation2 + $0xc04] sm:$0xf]  ;;  %v11174_v54 = vld [vmem:[#allocation2 + $0xc10] sm:$0xf0]  ;;  %v11577_v0 = vor.u32 %v14878_v42, %v11574_v49 }
 0x14b   :  { %5325 = vmatpush.bf16.msrb.mxu0 %v11209_v14  ;;  %v14810_v57 = vld [vmem:[#allocation2 + $0xd04] sm:$0xf]  ;;  %v11302_v52 = vld [vmem:[#allocation2 + $0xd10] sm:$0xf0]  ;;  %v11177_v15 = vor.u32 %v14778_v6, %v11174_v54 }
 0x14c   :  { %5339 = vmatpush.bf16.msrb.mxu1 %v11337_v18  ;;  %v14842_v62 = vld [vmem:[#allocation2 + $0xe04] sm:$0xf]  ;;  %v11430_v53 = vld [vmem:[#allocation2 + $0xe10] sm:$0xf0]  ;;  %v11305_v18 = vor.u32 %v14810_v57, %v11302_v52  ;;  %v15978_v57 = vpop.f32.mrf.mxu1 }
 0x14d   :  { %5353 = vmatpush.bf16.msrb.mxu2 %v11465_v30  ;;  %v14874_v3 = vld [vmem:[#allocation2 + $0xf04] sm:$0xf]  ;;  %v11558_v5 = vld [vmem:[#allocation2 + $0xf10] sm:$0xf0]  ;;  %v11433_v30 = vor.u32 %v14842_v62, %v11430_v53  ;;  %16474 = vst [vmem:[#allocation24_spill] sm:$0xff] %v15978_v57 }
 0x14e   :  { %5367 = vmatpush.bf16.msrb.mxu3 %v11593_v34  ;;  %v14934_v7 = vld [vmem:[#allocation2 + $0x10e4] sm:$0xf]  ;;  %v11798_v8 = vld [vmem:[#allocation2 + $0x10f0] sm:$0xf0]  ;;  %v11561_v34 = vor.u32 %v14874_v3, %v11558_v5  ;;  %v9996_v57 = vld [vmem:[#allocation2 + $0x2c8] sm:$0xf] }
 0x14f   :  { %v14966_v11 = vld [vmem:[#allocation2 + $0x11e4] sm:$0xf]  ;;  %5326 = vmatpush.bf16.msrb.mxu0 %v11193_v37  ;;  %v11926_v14 = vld [vmem:[#allocation2 + $0x11f0] sm:$0xf0]  ;;  %v11801_v24 = vor.u32 %v14934_v7, %v11798_v8 }
 0x150   :  { %v14998_v26 = vld [vmem:[#allocation2 + $0x12e4] sm:$0xf]  ;;  %v12054_v20 = vld [vmem:[#allocation2 + $0x12f0] sm:$0xf0]  ;;  %5340 = vmatpush.bf16.msrb.mxu1 %v11321_v50  ;;  %v11929_v48 = vor.u32 %v14966_v11, %v11926_v14 }
 0x151   :  { %5354 = vmatpush.bf16.msrb.mxu2 %v11449_v22  ;;  %v15030_v33 = vld [vmem:[#allocation2 + $0x13e4] sm:$0xf]  ;;  %v12182_v45 = vld [vmem:[#allocation2 + $0x13f0] sm:$0xf0]  ;;  %v12057_v42 = vor.u32 %v14998_v26, %v12054_v20 }
 0x152   :  { %5368 = vmatpush.bf16.msrb.mxu3 %v11577_v0  ;;  %v14930_v49 = vld [vmem:[#allocation2 + $0x10c4] sm:$0xf]  ;;  %v11782_v63 = vld [vmem:[#allocation2 + $0x10d0] sm:$0xf0]  ;;  %v12185_v37 = vor.u32 %v15030_v33, %v12182_v45  ;;  %v15984_v33 = vpop.f32.mrf.mxu2 }
 0x153   :  { %v14962_v61 = vld [vmem:[#allocation2 + $0x11c4] sm:$0xf]  ;;  %5327 = vmatpush.bf16.msrb.mxu0 %v11177_v15  ;;  %v11910_v6 = vld [vmem:[#allocation2 + $0x11d0] sm:$0xf0]  ;;  %v11785_v52 = vor.u32 %v14930_v49, %v11782_v63  ;;  %16475 = vst [vmem:[#allocation25_spill] sm:$0xff] %v15984_v33  ;;  %v5105_v49 = vpop.f32.mrf.mxu0 }
 0x154   :  { %v14994_v54 = vld [vmem:[#allocation2 + $0x12c4] sm:$0xf]  ;;  %v12038_v16 = vld [vmem:[#allocation2 + $0x12d0] sm:$0xf0]  ;;  %5341 = vmatpush.bf16.msrb.mxu1 %v11305_v18  ;;  %v11913_v62 = vor.u32 %v14962_v61, %v11910_v6 }
 0x155   :  { %5355 = vmatpush.bf16.msrb.mxu2 %v11433_v30  ;;  %v15026_v50 = vld [vmem:[#allocation2 + $0x13c4] sm:$0xf]  ;;  %v12166_v22 = vld [vmem:[#allocation2 + $0x13d0] sm:$0xf0]  ;;  %v12041_v0 = vor.u32 %v14994_v54, %v12038_v16  ;;  %v5106_v54 = vadd.f32 %v5105_v49, %v15974_v12 }
 0x156   :  { %5369 = vmatpush.bf16.msrb.mxu3 %v11561_v34  ;;  %v14926_v53 = vld [vmem:[#allocation2 + $0x10a4] sm:$0xf]  ;;  %v11766_v3 = vld [vmem:[#allocation2 + $0x10b0] sm:$0xf0]  ;;  %5328 = vmatmul.bf16.vlgmr.msrb.gmra.mxu0 %v15834_v32  ;;  %v12169_v7 = vor.u32 %v15026_v50, %v12166_v22  ;;  %v5119_v22 = vpop.f32.mrf.mxu1 }
 0x157   :  { %5376 = vmatpush.bf16.msra.mxu0 %v11801_v24  ;;  %v14958_v5 = vld [vmem:[#allocation2 + $0x11a4] sm:$0xf]  ;;  %v11894_v8 = vld [vmem:[#allocation2 + $0x11b0] sm:$0xf0]  ;;  %5342 = vmatmul.bf16.vlgmr.msrb.gmra.mxu1 %v15838_v41  ;;  %v11769_v16 = vor.u32 %v14926_v53, %v11766_v3 }
 0x158   :  { %5390 = vmatpush.bf16.msra.mxu1 %v11929_v48  ;;  %v14990_v11 = vld [vmem:[#allocation2 + $0x12a4] sm:$0xf]  ;;  %v12022_v15 = vld [vmem:[#allocation2 + $0x12b0] sm:$0xf0]  ;;  %5356 = vmatmul.bf16.vlgmr.msrb.gmra.mxu2 %v15836_v38  ;;  %v11897_v61 = vor.u32 %v14958_v5, %v11894_v8 }
 0x159   :  { %5404 = vmatpush.bf16.msra.mxu2 %v12057_v42  ;;  %v15022_v14 = vld [vmem:[#allocation2 + $0x13a4] sm:$0xf]  ;;  %v12150_v63 = vld [vmem:[#allocation2 + $0x13b0] sm:$0xf0]  ;;  %5370 = vmatmul.bf16.vlgmr.msrb.gmra.mxu3 %v15840_v46  ;;  %v12025_v26 = vor.u32 %v14990_v11, %v12022_v15  ;;  %v15986_v42 = vpop.f32.mrf.mxu3 }
 0x15a   :  { %5418 = vmatpush.bf16.msra.mxu3 %v12185_v37  ;;  %v14922_v20 = vld [vmem:[#allocation2 + $0x1084] sm:$0xf]  ;;  %v11750_v18 = vld [vmem:[#allocation2 + $0x1090] sm:$0xf0]  ;;  %v12153_v45 = vor.u32 %v15022_v14, %v12150_v63  ;;  %16476 = vst [vmem:[#allocation26_spill] sm:$0xff] %v15986_v42 }
 0x15b   :  { %5377 = vmatpush.bf16.msra.mxu0 %v11785_v52  ;;  %v14954_v30 = vld [vmem:[#allocation2 + $0x1184] sm:$0xf]  ;;  %v11878_v34 = vld [vmem:[#allocation2 + $0x1190] sm:$0xf0]  ;;  %v11753_v50 = vor.u32 %v14922_v20, %v11750_v18 }
 0x15c   :  { %5391 = vmatpush.bf16.msra.mxu1 %v11913_v62  ;;  %v14986_v24 = vld [vmem:[#allocation2 + $0x1284] sm:$0xf]  ;;  %v12006_v48 = vld [vmem:[#allocation2 + $0x1290] sm:$0xf0]  ;;  %v11881_v52 = vor.u32 %v14954_v30, %v11878_v34  ;;  %v5133_v34 = vpop.f32.mrf.mxu2 }
 0x15d   :  { %5405 = vmatpush.bf16.msra.mxu2 %v12041_v0  ;;  %v15018_v37 = vld [vmem:[#allocation2 + $0x1384] sm:$0xf]  ;;  %v12134_v6 = vld [vmem:[#allocation2 + $0x1390] sm:$0xf0]  ;;  %v12009_v62 = vor.u32 %v14986_v24, %v12006_v48 }
 0x15e   :  { %5419 = vmatpush.bf16.msra.mxu3 %v12169_v7  ;;  %v14918_v0 = vld [vmem:[#allocation2 + $0x1064] sm:$0xf]  ;;  %v11734_v53 = vld [vmem:[#allocation2 + $0x1070] sm:$0xf0]  ;;  %v12137_v5 = vor.u32 %v15018_v37, %v12134_v6  ;;  %v5120_v7 = vadd.f32 %v5119_v22, %v5106_v54 }
 0x15f   :  { %5378 = vmatpush.bf16.msra.mxu0 %v11769_v16  ;;  %v14950_v3 = vld [vmem:[#allocation2 + $0x1164] sm:$0xf]  ;;  %v11862_v8 = vld [vmem:[#allocation2 + $0x1170] sm:$0xf0]  ;;  %v11737_v16 = vor.u32 %v14918_v0, %v11734_v53 }
 0x160   :  { %5392 = vmatpush.bf16.msra.mxu1 %v11897_v61  ;;  %v14982_v11 = vld [vmem:[#allocation2 + $0x1264] sm:$0xf]  ;;  %v11990_v15 = vld [vmem:[#allocation2 + $0x1270] sm:$0xf0]  ;;  %v11865_v12 = vor.u32 %v14950_v3, %v11862_v8  ;;  %v5134_v49 = vadd.f32 %v5133_v34, %v5120_v7 }
 0x161   :  { %5406 = vmatpush.bf16.msra.mxu2 %v12025_v26  ;;  %v15014_v14 = vld [vmem:[#allocation2 + $0x1364] sm:$0xf]  ;;  %v12118_v63 = vld [vmem:[#allocation2 + $0x1370] sm:$0xf0]  ;;  %v11993_v61 = vor.u32 %v14982_v11, %v11990_v15  ;;  %v5147_v37 = vpop.f32.mrf.mxu3 }
 0x162   :  { %5420 = vmatpush.bf16.msra.mxu3 %v12153_v45  ;;  %v14914_v26 = vld [vmem:[#allocation2 + $0x1044] sm:$0xf]  ;;  %v11718_v20 = vld [vmem:[#allocation2 + $0x1050] sm:$0xf0]  ;;  %v12121_v30 = vor.u32 %v15014_v14, %v12118_v63  ;;  %v15989_v22 = vadd.f32 %v5147_v37, %v5134_v49 }
 0x163   :  { %5379 = vmatpush.bf16.msra.mxu0 %v11753_v50  ;;  %v14946_v18 = vld [vmem:[#allocation2 + $0x1144] sm:$0xf]  ;;  %v11846_v45 = vld [vmem:[#allocation2 + $0x1150] sm:$0xf0]  ;;  %v11721_v50 = vor.u32 %v14914_v26, %v11718_v20 }
 0x164   :  { %5393 = vmatpush.bf16.msra.mxu1 %v11881_v52  ;;  %v14978_v24 = vld [vmem:[#allocation2 + $0x1244] sm:$0xf]  ;;  %v11974_v48 = vld [vmem:[#allocation2 + $0x1250] sm:$0xf0]  ;;  %16477 = vst [vmem:[#allocation27_spill] sm:$0xff] %v15989_v22  ;;  %v11849_v52 = vor.u32 %v14946_v18, %v11846_v45 }
 0x165   :  { %5407 = vmatpush.bf16.msra.mxu2 %v12009_v62  ;;  %v15010_v6 = vld [vmem:[#allocation2 + $0x1344] sm:$0xf]  ;;  %v12102_v54 = vld [vmem:[#allocation2 + $0x1350] sm:$0xf0]  ;;  %v11977_v62 = vor.u32 %v14978_v24, %v11974_v48 }
 0x166   :  { %5421 = vmatpush.bf16.msra.mxu3 %v12137_v5  ;;  %v14910_v0 = vld [vmem:[#allocation2 + $0x1024] sm:$0xf]  ;;  %v11702_v53 = vld [vmem:[#allocation2 + $0x1030] sm:$0xf0]  ;;  %v12105_v5 = vor.u32 %v15010_v6, %v12102_v54 }
 0x167   :  { %5380 = vmatpush.bf16.msra.mxu0 %v11737_v16  ;;  %v14942_v3 = vld [vmem:[#allocation2 + $0x1124] sm:$0xf]  ;;  %v11830_v8 = vld [vmem:[#allocation2 + $0x1130] sm:$0xf0]  ;;  %v11705_v63 = vor.u32 %v14910_v0, %v11702_v53 }
 0x168   :  { %5394 = vmatpush.bf16.msra.mxu1 %v11865_v12  ;;  %v14974_v11 = vld [vmem:[#allocation2 + $0x1224] sm:$0xf]  ;;  %v11958_v15 = vld [vmem:[#allocation2 + $0x1230] sm:$0xf0]  ;;  %v11833_v12 = vor.u32 %v14942_v3, %v11830_v8 }
 0x169   :  { %5408 = vmatpush.bf16.msra.mxu2 %v11993_v61  ;;  %v15006_v7 = vld [vmem:[#allocation2 + $0x1324] sm:$0xf]  ;;  %v12086_v14 = vld [vmem:[#allocation2 + $0x1330] sm:$0xf0]  ;;  %v11961_v61 = vor.u32 %v14974_v11, %v11958_v15 }
 0x16a   :  { %5422 = vmatpush.bf16.msra.mxu3 %v12121_v30  ;;  %v14906_v16 = vld [vmem:[#allocation2 + $0x1004] sm:$0xf]  ;;  %v11686_v26 = vld [vmem:[#allocation2 + $0x1010] sm:$0xf0]  ;;  %v12089_v45 = vor.u32 %v15006_v7, %v12086_v14 }
 0x16b   :  { %5381 = vmatpush.bf16.msra.mxu0 %v11721_v50  ;;  %v14938_v20 = vld [vmem:[#allocation2 + $0x1104] sm:$0xf]  ;;  %v11814_v18 = vld [vmem:[#allocation2 + $0x1110] sm:$0xf0]  ;;  %v11689_v54 = vor.u32 %v14906_v16, %v11686_v26 }
 0x16c   :  { %5395 = vmatpush.bf16.msra.mxu1 %v11849_v52  ;;  %v14970_v34 = vld [vmem:[#allocation2 + $0x1204] sm:$0xf]  ;;  %v11942_v30 = vld [vmem:[#allocation2 + $0x1210] sm:$0xf0]  ;;  %v11817_v52 = vor.u32 %v14938_v20, %v11814_v18  ;;  %v15991_v20 = vpop.f32.mrf.mxu0  ;;  %v15993_v18 = vpop.f32.mrf.mxu1 }
 0x16d   :  { %5409 = vmatpush.bf16.msra.mxu2 %v11977_v62  ;;  %v15002_v24 = vld [vmem:[#allocation2 + $0x1304] sm:$0xf]  ;;  %v12070_v48 = vld [vmem:[#allocation2 + $0x1310] sm:$0xf0]  ;;  %v11945_v62 = vor.u32 %v14970_v34, %v11942_v30  ;;  %16478 = vst [vmem:[#allocation28_spill] sm:$0xff] %v15991_v20 }
 0x16e   :  { %5423 = vmatpush.bf16.msra.mxu3 %v12105_v5  ;;  %v15062_v49 = vld [vmem:[#allocation2 + $0x14e4] sm:$0xf]  ;;  %v12310_v37 = vld [vmem:[#allocation2 + $0x14f0] sm:$0xf0]  ;;  %v12073_v5 = vor.u32 %v15002_v24, %v12070_v48  ;;  %16479 = vst [vmem:[#allocation29_spill] sm:$0xff] %v15993_v18 }
 0x16f   :  { %v15094_v6 = vld [vmem:[#allocation2 + $0x15e4] sm:$0xf]  ;;  %5382 = vmatpush.bf16.msra.mxu0 %v11705_v63  ;;  %v12438_v50 = vld [vmem:[#allocation2 + $0x15f0] sm:$0xf0]  ;;  %v12313_v11 = vor.u32 %v15062_v49, %v12310_v37  ;;  %v9740_v18 = vld [vmem:[#allocation2 + $0xc8] sm:$0xf] }
 0x170   :  { %v15126_v0 = vld [vmem:[#allocation2 + $0x16e4] sm:$0xf]  ;;  %v12566_v53 = vld [vmem:[#allocation2 + $0x16f0] sm:$0xf0]  ;;  %5396 = vmatpush.bf16.msra.mxu1 %v11833_v12  ;;  %v12441_v15 = vor.u32 %v15094_v6, %v12438_v50  ;;  %v14421_v20 = vld [vmem:[#allocation2 + $0xd4] sm:$0xf0] }
 0x171   :  { %5410 = vmatpush.bf16.msra.mxu2 %v11961_v61  ;;  %v15158_v3 = vld [vmem:[#allocation2 + $0x17e4] sm:$0xf]  ;;  %v12694_v8 = vld [vmem:[#allocation2 + $0x17f0] sm:$0xf0]  ;;  %v12569_v7 = vor.u32 %v15126_v0, %v12566_v53 }
 0x172   :  { %5424 = vmatpush.bf16.msra.mxu3 %v12089_v45  ;;  %v15058_v14 = vld [vmem:[#allocation2 + $0x14c4] sm:$0xf]  ;;  %v12294_v22 = vld [vmem:[#allocation2 + $0x14d0] sm:$0xf0]  ;;  %v12697_v63 = vor.u32 %v15158_v3, %v12694_v8  ;;  %v15999_v8 = vpop.f32.mrf.mxu2 }
 0x173   :  { %v15090_v42 = vld [vmem:[#allocation2 + $0x15c4] sm:$0xf]  ;;  %5383 = vmatpush.bf16.msra.mxu0 %v11689_v54  ;;  %v12422_v16 = vld [vmem:[#allocation2 + $0x15d0] sm:$0xf0]  ;;  %v12297_v34 = vor.u32 %v15058_v14, %v12294_v22  ;;  %16480 = vst [vmem:[#allocation30_spill] sm:$0xff] %v15999_v8  ;;  %v16001_v14 = vpop.f32.mrf.mxu3 }
 0x174   :  { %v15122_v26 = vld [vmem:[#allocation2 + $0x16c4] sm:$0xf]  ;;  %v12550_v33 = vld [vmem:[#allocation2 + $0x16d0] sm:$0xf0]  ;;  %5397 = vmatpush.bf16.msra.mxu1 %v11817_v52  ;;  %v12425_v45 = vor.u32 %v15090_v42, %v12422_v16  ;;  %16481 = vst [vmem:[#allocation31_spill] sm:$0xff] %v16001_v14 }
 0x175   :  { %5411 = vmatpush.bf16.msra.mxu2 %v11945_v62  ;;  %v15154_v12 = vld [vmem:[#allocation2 + $0x17c4] sm:$0xf]  ;;  %v12678_v61 = vld [vmem:[#allocation2 + $0x17d0] sm:$0xf0]  ;;  %v12553_v30 = vor.u32 %v15122_v26, %v12550_v33 }
 0x176   :  { %5425 = vmatpush.bf16.msra.mxu3 %v12073_v5  ;;  %v15054_v24 = vld [vmem:[#allocation2 + $0x14a4] sm:$0xf]  ;;  %v12278_v48 = vld [vmem:[#allocation2 + $0x14b0] sm:$0xf0]  ;;  %5384 = vmatmul.bf16.vlgmr.msra.gmra.mxu0 %v15870_v51  ;;  %v12681_v37 = vor.u32 %v15154_v12, %v12678_v61  ;;  %v5161_v12 = vpop.f32.mrf.mxu0  ;;  %v5175_v61 = vpop.f32.mrf.mxu1 }
 0x177   :  { %5432 = vmatpush.bf16.msrb.mxu0 %v12313_v11  ;;  %v15086_v49 = vld [vmem:[#allocation2 + $0x15a4] sm:$0xf]  ;;  %v12406_v6 = vld [vmem:[#allocation2 + $0x15b0] sm:$0xf0]  ;;  %5398 = vmatmul.bf16.vlgmr.msra.gmra.mxu1 %v15874_v56  ;;  %v12281_v33 = vor.u32 %v15054_v24, %v12278_v48 }
 0x178   :  { %5446 = vmatpush.bf16.msrb.mxu1 %v12441_v15  ;;  %v15118_v54 = vld [vmem:[#allocation2 + $0x16a4] sm:$0xf]  ;;  %v12534_v50 = vld [vmem:[#allocation2 + $0x16b0] sm:$0xf0]  ;;  %5412 = vmatmul.bf16.vlgmr.msra.gmra.mxu2 %v15872_v55  ;;  %v12409_v42 = vor.u32 %v15086_v49, %v12406_v6  ;;  %v5176_v49 = vadd.f32 %v5175_v61, %v5161_v12 }
 0x179   :  { %5460 = vmatpush.bf16.msrb.mxu2 %v12569_v7  ;;  %v15150_v0 = vld [vmem:[#allocation2 + $0x17a4] sm:$0xf]  ;;  %v12662_v22 = vld [vmem:[#allocation2 + $0x17b0] sm:$0xf0]  ;;  %5426 = vmatmul.bf16.vlgmr.msra.gmra.mxu3 %v15876_v60  ;;  %v12537_v53 = vor.u32 %v15118_v54, %v12534_v50 }
 0x17a   :  { %5474 = vmatpush.bf16.msrb.mxu3 %v12697_v63  ;;  %v15050_v52 = vld [vmem:[#allocation2 + $0x1484] sm:$0xf]  ;;  %v12262_v62 = vld [vmem:[#allocation2 + $0x1490] sm:$0xf0]  ;;  %v12665_v5 = vor.u32 %v15150_v0, %v12662_v22 }
 0x17b   :  { %5433 = vmatpush.bf16.msrb.mxu0 %v12297_v34  ;;  %v15082_v3 = vld [vmem:[#allocation2 + $0x1584] sm:$0xf]  ;;  %v12390_v11 = vld [vmem:[#allocation2 + $0x1590] sm:$0xf0]  ;;  %v12265_v26 = vor.u32 %v15050_v52, %v12262_v62 }
 0x17c   :  { %5447 = vmatpush.bf16.msrb.mxu1 %v12425_v45  ;;  %v15114_v15 = vld [vmem:[#allocation2 + $0x1684] sm:$0xf]  ;;  %v12518_v7 = vld [vmem:[#allocation2 + $0x1690] sm:$0xf0]  ;;  %v12393_v34 = vor.u32 %v15082_v3, %v12390_v11 }
 0x17d   :  { %5461 = vmatpush.bf16.msrb.mxu2 %v12553_v30  ;;  %v15146_v63 = vld [vmem:[#allocation2 + $0x1784] sm:$0xf]  ;;  %v12646_v16 = vld [vmem:[#allocation2 + $0x1790] sm:$0xf0]  ;;  %v12521_v45 = vor.u32 %v15114_v15, %v12518_v7 }
 0x17e   :  { %5475 = vmatpush.bf16.msrb.mxu3 %v12681_v37  ;;  %v15046_v30 = vld [vmem:[#allocation2 + $0x1464] sm:$0xf]  ;;  %v12246_v24 = vld [vmem:[#allocation2 + $0x1470] sm:$0xf0]  ;;  %v12649_v37 = vor.u32 %v15146_v63, %v12646_v16  ;;  %v5189_v63 = vpop.f32.mrf.mxu2 }
 0x17f   :  { %5434 = vmatpush.bf16.msrb.mxu0 %v12281_v33  ;;  %v15078_v48 = vld [vmem:[#allocation2 + $0x1564] sm:$0xf]  ;;  %v12374_v6 = vld [vmem:[#allocation2 + $0x1570] sm:$0xf0]  ;;  %v12249_v33 = vor.u32 %v15046_v30, %v12246_v24  ;;  %v5190_v61 = vadd.f32 %v5189_v63, %v5176_v49 }
 0x180   :  { %5448 = vmatpush.bf16.msrb.mxu1 %v12409_v42  ;;  %v15110_v54 = vld [vmem:[#allocation2 + $0x1664] sm:$0xf]  ;;  %v12502_v50 = vld [vmem:[#allocation2 + $0x1670] sm:$0xf0]  ;;  %v12377_v52 = vor.u32 %v15078_v48, %v12374_v6 }
 0x181   :  { %5462 = vmatpush.bf16.msrb.mxu2 %v12537_v53  ;;  %v15142_v0 = vld [vmem:[#allocation2 + $0x1764] sm:$0xf]  ;;  %v12630_v22 = vld [vmem:[#allocation2 + $0x1770] sm:$0xf0]  ;;  %v12505_v42 = vor.u32 %v15110_v54, %v12502_v50 }
 0x182   :  { %5476 = vmatpush.bf16.msrb.mxu3 %v12665_v5  ;;  %v15042_v53 = vld [vmem:[#allocation2 + $0x1444] sm:$0xf]  ;;  %v12230_v62 = vld [vmem:[#allocation2 + $0x1450] sm:$0xf0]  ;;  %v12633_v11 = vor.u32 %v15142_v0, %v12630_v22 }
 0x183   :  { %5435 = vmatpush.bf16.msrb.mxu0 %v12265_v26  ;;  %v15074_v3 = vld [vmem:[#allocation2 + $0x1544] sm:$0xf]  ;;  %v12358_v15 = vld [vmem:[#allocation2 + $0x1550] sm:$0xf0]  ;;  %v12233_v14 = vor.u32 %v15042_v53, %v12230_v62  ;;  %v5203_v26 = vpop.f32.mrf.mxu3 }
 0x184   :  { %5449 = vmatpush.bf16.msrb.mxu1 %v12393_v34  ;;  %v15106_v7 = vld [vmem:[#allocation2 + $0x1644] sm:$0xf]  ;;  %v12486_v5 = vld [vmem:[#allocation2 + $0x1650] sm:$0xf0]  ;;  %v12361_v34 = vor.u32 %v15074_v3, %v12358_v15  ;;  %v16003_v6 = vadd.f32 %v5203_v26, %v5190_v61  ;;  %v9884_v61 = vld [vmem:[#allocation2 + $0x1e8] sm:$0xf] }
 0x185   :  { %5463 = vmatpush.bf16.msrb.mxu2 %v12521_v45  ;;  %v15138_v16 = vld [vmem:[#allocation2 + $0x1744] sm:$0xf]  ;;  %v12614_v12 = vld [vmem:[#allocation2 + $0x1750] sm:$0xf0]  ;;  %v12489_v45 = vor.u32 %v15106_v7, %v12486_v5  ;;  %v14457_v26 = vld [vmem:[#allocation2 + $0x1f4] sm:$0xf0] }
 0x186   :  { %5477 = vmatpush.bf16.msrb.mxu3 %v12649_v37  ;;  %v15038_v30 = vld [vmem:[#allocation2 + $0x1424] sm:$0xf]  ;;  %v12214_v24 = vld [vmem:[#allocation2 + $0x1430] sm:$0xf0]  ;;  %v12617_v37 = vor.u32 %v15138_v16, %v12614_v12  ;;  %v9756_v16 = vld [vmem:[#allocation2 + $0xe8] sm:$0xf] }
 0x187   :  { %5436 = vmatpush.bf16.msrb.mxu0 %v12249_v33  ;;  %v15070_v48 = vld [vmem:[#allocation2 + $0x1524] sm:$0xf]  ;;  %v12342_v54 = vld [vmem:[#allocation2 + $0x1530] sm:$0xf0]  ;;  %v12217_v49 = vor.u32 %v15038_v30, %v12214_v24  ;;  %v14425_v12 = vld [vmem:[#allocation2 + $0xf4] sm:$0xf0] }
 0x188   :  { %5450 = vmatpush.bf16.msrb.mxu1 %v12377_v52  ;;  %v15102_v50 = vld [vmem:[#allocation2 + $0x1624] sm:$0xf]  ;;  %v12470_v0 = vld [vmem:[#allocation2 + $0x1630] sm:$0xf0]  ;;  %v12345_v52 = vor.u32 %v15070_v48, %v12342_v54  ;;  %v10012_v30 = vld [vmem:[#allocation2 + $0x2e8] sm:$0xf] }
 0x189   :  { %5464 = vmatpush.bf16.msrb.mxu2 %v12505_v42  ;;  %v15134_v22 = vld [vmem:[#allocation2 + $0x1724] sm:$0xf]  ;;  %v12598_v8 = vld [vmem:[#allocation2 + $0x1730] sm:$0xf0]  ;;  %v12473_v42 = vor.u32 %v15102_v50, %v12470_v0  ;;  %v14489_v24 = vld [vmem:[#allocation2 + $0x2f4] sm:$0xf0]  ;;  %v9885_v50 = vor.u32 %v14457_v26, %v9884_v61 }
 0x18a   :  { %5478 = vmatpush.bf16.msrb.mxu3 %v12633_v11  ;;  %v15034_v33 = vld [vmem:[#allocation2 + $0x1404] sm:$0xf]  ;;  %v12198_v53 = vld [vmem:[#allocation2 + $0x1410] sm:$0xf0]  ;;  %v12601_v7 = vor.u32 %v15134_v22, %v12598_v8  ;;  %v10140_v48 = vld [vmem:[#allocation2 + $0x3e8] sm:$0xf]  ;;  %v9757_v8 = vor.u32 %v14425_v12, %v9756_v16  ;;  %v10013_v0 = vor.u32 %v14489_v24, %v10012_v30  ;;  %v16005_v22 = vpop.f32.mrf.mxu0 }
 0x18b   :  { %5437 = vmatpush.bf16.msrb.mxu0 %v12233_v14  ;;  %v15066_v62 = vld [vmem:[#allocation2 + $0x1504] sm:$0xf]  ;;  %v12326_v3 = vld [vmem:[#allocation2 + $0x1510] sm:$0xf0]  ;;  %v12201_v14 = vor.u32 %v15034_v33, %v12198_v53  ;;  %v14521_v54 = vld [vmem:[#allocation2 + $0x3f4] sm:$0xf0] }
 0x18c   :  { %5451 = vmatpush.bf16.msrb.mxu1 %v12361_v34  ;;  %v15098_v15 = vld [vmem:[#allocation2 + $0x1604] sm:$0xf]  ;;  %v12454_v11 = vld [vmem:[#allocation2 + $0x1610] sm:$0xf0]  ;;  %v12329_v34 = vor.u32 %v15066_v62, %v12326_v3  ;;  %v10141_v33 = vor.u32 %v14521_v54, %v10140_v48  ;;  %v14453_v53 = vld [vmem:[#allocation2 + $0x1d4] sm:$0xf0]  ;;  %v16007_v3 = vpop.f32.mrf.mxu1 }
 0x18d   :  { %5465 = vmatpush.bf16.msrb.mxu2 %v12489_v45  ;;  %v15130_v5 = vld [vmem:[#allocation2 + $0x1704] sm:$0xf]  ;;  %v12582_v63 = vld [vmem:[#allocation2 + $0x1710] sm:$0xf0]  ;;  %v12457_v45 = vor.u32 %v15098_v15, %v12454_v11  ;;  %v14517_v62 = vld [vmem:[#allocation2 + $0x3d4] sm:$0xf0]  ;;  %v9741_v15 = vor.u32 %v14421_v20, %v9740_v18  ;;  %v16013_v18 = vpop.f32.mrf.mxu2 }
 0x18e   :  { %5479 = vmatpush.bf16.msrb.mxu3 %v12617_v37  ;;  %v12585_v37 = vor.u32 %v15130_v5, %v12582_v63  ;;  %v9724_v5 = vld [vmem:[#allocation2 + $0xa8] sm:$0xf]  ;;  %v14417_v63 = vld [vmem:[#allocation2 + $0xb4] sm:$0xf0] }
 0x18f   :  { %5438 = vmatpush.bf16.msrb.mxu0 %v12217_v49  ;;  %v9868_v49 = vld [vmem:[#allocation2 + $0x1c8] sm:$0xf]  ;;  %v14449_v61 = vld [vmem:[#allocation2 + $0x1b4] sm:$0xf0] }
 0x190   :  { %5452 = vmatpush.bf16.msrb.mxu1 %v12345_v52  ;;  %v14485_v52 = vld [vmem:[#allocation2 + $0x2d4] sm:$0xf0]  ;;  %v9852_v16 = vld [vmem:[#allocation2 + $0x1a8] sm:$0xf] }
 0x191   :  { %5466 = vmatpush.bf16.msrb.mxu2 %v12473_v42  ;;  %v10124_v42 = vld [vmem:[#allocation2 + $0x3c8] sm:$0xf]  ;;  %v9997_v11 = vor.u32 %v14485_v52, %v9996_v57  ;;  %v14481_v26 = vld [vmem:[#allocation2 + $0x2b4] sm:$0xf0]  ;;  %v9725_v57 = vor.u32 %v14417_v63, %v9724_v5  ;;  %v9853_v24 = vor.u32 %v14449_v61, %v9852_v16 }
 0x192   :  { %5480 = vmatpush.bf16.msrb.mxu3 %v12601_v7  ;;  %v9869_v7 = vor.u32 %v14453_v53, %v9868_v49  ;;  %v10125_v12 = vor.u32 %v14517_v62, %v10124_v42  ;;  %v10108_v30 = vld [vmem:[#allocation2 + $0x3a8] sm:$0xf]  ;;  %v14513_v20 = vld [vmem:[#allocation2 + $0x3b4] sm:$0xf0] }
 0x193   :  { %5439 = vmatpush.bf16.msrb.mxu0 %v12201_v14  ;;  %v9980_v14 = vld [vmem:[#allocation2 + $0x2a8] sm:$0xf]  ;;  %v14413_v48 = vld [vmem:[#allocation2 + $0x94] sm:$0xf0] }
 0x194   :  { %5453 = vmatpush.bf16.msrb.mxu1 %v12329_v34  ;;  %v9981_v34 = vor.u32 %v14481_v26, %v9980_v14  ;;  %v9836_v54 = vld [vmem:[#allocation2 + $0x188] sm:$0xf]  ;;  %v14477_v49 = vld [vmem:[#allocation2 + $0x294] sm:$0xf0] }
 0x195   :  { %5467 = vmatpush.bf16.msrb.mxu2 %v12457_v45  ;;  %v9708_v45 = vld [vmem:[#allocation2 + $0x88] sm:$0xf]  ;;  %v14509_v52 = vld [vmem:[#allocation2 + $0x394] sm:$0xf0] }
 0x196   :  { %5481 = vmatpush.bf16.msrb.mxu3 %v12585_v37  ;;  %5440 = vmatmul.bf16.vlgmr.msrb.gmra.mxu0 %v15910_v19  ;;  %v10109_v37 = vor.u32 %v14513_v20, %v10108_v30  ;;  %v10092_v53 = vld [vmem:[#allocation2 + $0x388] sm:$0xf]  ;;  %v9709_v62 = vor.u32 %v14413_v48, %v9708_v45  ;;  %v14409_v63 = vld [vmem:[#allocation2 + $0x74] sm:$0xf0] }
 0x197   :  { %5488 = vmatpush.bf16.msra.mxu0 %v9757_v8  ;;  %5454 = vmatmul.bf16.vlgmr.msrb.gmra.mxu1 %v15914_v25  ;;  %v16015_v8 = vpop.f32.mrf.mxu3  ;;  %v9692_v5 = vld [vmem:[#allocation2 + $0x68] sm:$0xf]  ;;  %v14441_v14 = vld [vmem:[#allocation2 + $0x174] sm:$0xf0] }
 0x198   :  { %5502 = vmatpush.bf16.msra.mxu1 %v9885_v50  ;;  %5468 = vmatmul.bf16.vlgmr.msrb.gmra.mxu2 %v15912_v23  ;;  %16482 = vst [vmem:[#allocation32_spill] sm:$0xff] %v16015_v8  ;;  %v14445_v50 = vld [vmem:[#allocation2 + $0x194] sm:$0xf0]  ;;  %v9820_v16 = vld [vmem:[#allocation2 + $0x168] sm:$0xf] }
 0x199   :  { %5516 = vmatpush.bf16.msra.mxu2 %v10013_v0  ;;  %5482 = vmatmul.bf16.vlgmr.msrb.gmra.mxu3 %v15918_v29  ;;  %v9964_v0 = vld [vmem:[#allocation2 + $0x288] sm:$0xf]  ;;  %v14473_v30 = vld [vmem:[#allocation2 + $0x274] sm:$0xf0] }
 0x19a   :  { %5530 = vmatpush.bf16.msra.mxu3 %v10141_v33  ;;  %v5217_v33 = vpop.f32.mrf.mxu0  ;;  %v9948_v26 = vld [vmem:[#allocation2 + $0x268] sm:$0xf]  ;;  %v14405_v45 = vld [vmem:[#allocation2 + $0x54] sm:$0xf0] }
 0x19b   :  { %5489 = vmatpush.bf16.msra.mxu0 %v9741_v15  ;;  %v5218_v42 = vadd.f32 %v5217_v33, %v16003_v6  ;;  %v9837_v15 = vor.u32 %v14445_v50, %v9836_v54  ;;  %v10076_v20 = vld [vmem:[#allocation2 + $0x368] sm:$0xf]  ;;  %v9821_v6 = vor.u32 %v14441_v14, %v9820_v16  ;;  %v5245_v50 = vpop.f32.mrf.mxu2 }
 0x19c   :  { %5503 = vmatpush.bf16.msra.mxu1 %v9869_v7  ;;  %v9965_v7 = vor.u32 %v14477_v49, %v9964_v0  ;;  %v9804_v48 = vld [vmem:[#allocation2 + $0x148] sm:$0xf]  ;;  %v10077_v54 = vor.u32 %v14505_v9, %v10076_v20  ;;  %v14469_v49 = vld [vmem:[#allocation2 + $0x254] sm:$0xf0] }
 0x19d   :  { %5517 = vmatpush.bf16.msra.mxu2 %v9997_v11  ;;  %v5231_v11 = vpop.f32.mrf.mxu1  ;;  %v9932_v0 = vld [vmem:[#allocation2 + $0x248] sm:$0xf] }
 0x19e   :  { %5531 = vmatpush.bf16.msra.mxu3 %v10125_v12  ;;  %v10093_v12 = vor.u32 %v14509_v52, %v10092_v53  ;;  %v5232_v61 = vadd.f32 %v5231_v11, %v5218_v42  ;;  %v10060_v53 = vld [vmem:[#allocation2 + $0x348] sm:$0xf]  ;;  %v14501_v52 = vld [vmem:[#allocation2 + $0x354] sm:$0xf0]  ;;  %v9933_v11 = vor.u32 %v14469_v49, %v9932_v0 }
 0x19f   :  { %5490 = vmatpush.bf16.msra.mxu0 %v9725_v57  ;;  %v9693_v57 = vor.u32 %v14409_v63, %v9692_v5  ;;  %v5259_v42 = vpop.f32.mrf.mxu3  ;;  %v9660_v5 = vld [vmem:[#allocation2 + $0x28] sm:$0xf]  ;;  %v14401_v63 = vld [vmem:[#allocation2 + $0x34] sm:$0xf0]  ;;  %v10061_v9 = vor.u32 %v14501_v52, %v10060_v53 }
 0x1a0   :  { %5504 = vmatpush.bf16.msra.mxu1 %v9853_v24  ;;  %v9949_v24 = vor.u32 %v14473_v30, %v9948_v26  ;;  %v5246_v33 = vadd.f32 %v5245_v50, %v5232_v61  ;;  %v9788_v16 = vld [vmem:[#allocation2 + $0x128] sm:$0xf]  ;;  %v14465_v26 = vld [vmem:[#allocation2 + $0x234] sm:$0xf0]  ;;  %v9661_v20 = vor.u32 %v14401_v63, %v9660_v5 }
 0x1a1   :  { %5518 = vmatpush.bf16.msra.mxu2 %v9981_v34  ;;  %v9676_v34 = vld [vmem:[#allocation2 + $0x48] sm:$0xf]  ;;  %v14497_v30 = vld [vmem:[#allocation2 + $0x334] sm:$0xf0] }
 0x1a2   :  { %5532 = vmatpush.bf16.msra.mxu3 %v10109_v37  ;;  %v14437_v37 = vld [vmem:[#allocation2 + $0x154] sm:$0xf0]  ;;  %v9916_v14 = vld [vmem:[#allocation2 + $0x228] sm:$0xf]  ;;  %v16020_v8 = vpop.f32.mrf.mxu0 }
 0x1a3   :  { %5491 = vmatpush.bf16.msra.mxu0 %v9709_v62  ;;  %v9677_v62 = vor.u32 %v14405_v45, %v9676_v34  ;;  %v10044_v61 = vld [vmem:[#allocation2 + $0x328] sm:$0xf]  ;;  %v14397_v34 = vld [vmem:[#allocation2 + $0x14] sm:$0xf0]  ;;  %16483 = vst [vmem:[#allocation33_spill] sm:$0xff] %v16020_v8 }
 0x1a4   :  { %5505 = vmatpush.bf16.msra.mxu1 %v9837_v15  ;;  %v16018_v15 = vadd.f32 %v5259_v42, %v5246_v33  ;;  %v9772_v45 = vld [vmem:[#allocation2 + $0x108] sm:$0xf]  ;;  %v14493_v49 = vld [vmem:[#allocation2 + $0x314] sm:$0xf0] }
 0x1a5   :  { %5519 = vmatpush.bf16.msra.mxu2 %v9965_v7  ;;  %v9805_v7 = vor.u32 %v14437_v37, %v9804_v48  ;;  %v14429_v48 = vld [vmem:[#allocation2 + $0x114] sm:$0xf0]  ;;  %v9900_v50 = vld [vmem:[#allocation2 + $0x208] sm:$0xf]  ;;  %v10045_v37 = vor.u32 %v14497_v30, %v10044_v61 }
 0x1a6   :  { %5533 = vmatpush.bf16.msra.mxu3 %v10093_v12  ;;  %v14433_v12 = vld [vmem:[#allocation2 + $0x134] sm:$0xf0]  ;;  %v10028_v0 = vld [vmem:[#allocation2 + $0x308] sm:$0xf] }
 0x1a7   :  { %5492 = vmatpush.bf16.msra.mxu0 %v9693_v57  ;;  %v9644_v57 = vld [vmem:[#allocation2 + $0x8] sm:$0xf]  ;;  %v14553_v53 = vld [vmem:[#allocation2 + $0x4f4] sm:$0xf0] }
 0x1a8   :  { %5506 = vmatpush.bf16.msra.mxu1 %v9821_v6  ;;  %v9789_v6 = vor.u32 %v14433_v12, %v9788_v16  ;;  %v10268_v33 = vld [vmem:[#allocation2 + $0x4e8] sm:$0xf]  ;;  %v9645_v42 = vor.u32 %v14397_v34, %v9644_v57  ;;  %v14617_v63 = vld [vmem:[#allocation2 + $0x6f4] sm:$0xf0] }
 0x1a9   :  { %5520 = vmatpush.bf16.msra.mxu2 %v9949_v24  ;;  %v9917_v24 = vor.u32 %v14465_v26, %v9916_v14  ;;  %v10396_v52 = vld [vmem:[#allocation2 + $0x5e8] sm:$0xf]  ;;  %v14649_v12 = vld [vmem:[#allocation2 + $0x7f4] sm:$0xf0]  ;;  %v10269_v14 = vor.u32 %v14553_v53, %v10268_v33 }
 0x1aa   :  { %5534 = vmatpush.bf16.msra.mxu3 %v10077_v54  ;;  %v14461_v54 = vld [vmem:[#allocation2 + $0x214] sm:$0xf0]  ;;  %v10524_v5 = vld [vmem:[#allocation2 + $0x6e8] sm:$0xf] }
 0x1ab   :  { %5493 = vmatpush.bf16.msra.mxu0 %v9677_v62  ;;  %v14585_v62 = vld [vmem:[#allocation2 + $0x5f4] sm:$0xf0]  ;;  %v10652_v16 = vld [vmem:[#allocation2 + $0x7e8] sm:$0xf]  ;;  %v10525_v61 = vor.u32 %v14617_v63, %v10524_v5 }
 0x1ac   :  { %5507 = vmatpush.bf16.msra.mxu1 %v9805_v7  ;;  %v9773_v7 = vor.u32 %v14429_v48, %v9772_v45  ;;  %v10397_v26 = vor.u32 %v14585_v62, %v10396_v52  ;;  %v10252_v30 = vld [vmem:[#allocation2 + $0x4c8] sm:$0xf]  ;;  %v14581_v57 = vld [vmem:[#allocation2 + $0x5d4] sm:$0xf0]  ;;  %v16022_v45 = vpop.f32.mrf.mxu1 }
 0x1ad   :  { %5521 = vmatpush.bf16.msra.mxu2 %v9933_v11  ;;  %v9901_v11 = vor.u32 %v14461_v54, %v9900_v50  ;;  %v10508_v34 = vld [vmem:[#allocation2 + $0x6c8] sm:$0xf]  ;;  %16484 = vst [vmem:[#allocation34_spill] sm:$0xff] %v16022_v45  ;;  %v10253_v48 = vor.u32 %v14549_v2, %v10252_v30  ;;  %v10381_v50 = vor.u32 %v14581_v57, %v10380_v27  ;;  %v14577_v53 = vld [vmem:[#allocation2 + $0x5b4] sm:$0xf0] }
 0x1ae   :  { %5535 = vmatpush.bf16.msra.mxu3 %v10061_v9  ;;  %v10029_v9 = vor.u32 %v14493_v49, %v10028_v0  ;;  %v10236_v54 = vld [vmem:[#allocation2 + $0x4a8] sm:$0xf]  ;;  %v14545_v0 = vld [vmem:[#allocation2 + $0x4b4] sm:$0xf0] }
 0x1af   :  { %5494 = vmatpush.bf16.msra.mxu0 %v9661_v20  ;;  %v10653_v20 = vor.u32 %v14649_v12, %v10652_v16  ;;  %v10364_v49 = vld [vmem:[#allocation2 + $0x5a8] sm:$0xf]  ;;  %v14641_v5 = vld [vmem:[#allocation2 + $0x7b4] sm:$0xf0]  ;;  %v10237_v2 = vor.u32 %v14545_v0, %v10236_v54  ;;  %v16028_v16 = vpop.f32.mrf.mxu2 }
 0x1b0   :  { %5508 = vmatpush.bf16.msra.mxu1 %v9789_v6  ;;  %v10636_v6 = vld [vmem:[#allocation2 + $0x7c8] sm:$0xf]  ;;  %16485 = vst [vmem:[#allocation35_spill] sm:$0xff] %v16028_v16  ;;  %v14637_v57 = vld [vmem:[#allocation2 + $0x794] sm:$0xf0] }
 0x1b1   :  { %5522 = vmatpush.bf16.msra.mxu2 %v9917_v24  ;;  %v14645_v24 = vld [vmem:[#allocation2 + $0x7d4] sm:$0xf0]  ;;  %v10492_v52 = vld [vmem:[#allocation2 + $0x6a8] sm:$0xf] }
 0x1b2   :  { %5536 = vmatpush.bf16.msra.mxu3 %v10045_v37  ;;  %v10509_v37 = vor.u32 %v14613_v21, %v10508_v34  ;;  %v10637_v33 = vor.u32 %v14645_v24, %v10636_v6  ;;  %v10620_v62 = vld [vmem:[#allocation2 + $0x7a8] sm:$0xf]  ;;  %v10365_v21 = vor.u32 %v14577_v53, %v10364_v49  ;;  %v14537_v54 = vld [vmem:[#allocation2 + $0x474] sm:$0xf0] }
 0x1b3   :  { %5495 = vmatpush.bf16.msra.mxu0 %v9645_v42  ;;  %v14609_v42 = vld [vmem:[#allocation2 + $0x6b4] sm:$0xf0]  ;;  %v10220_v63 = vld [vmem:[#allocation2 + $0x488] sm:$0xf]  ;;  %v10621_v12 = vor.u32 %v14641_v5, %v10620_v62  ;;  %v5273_v30 = vpop.f32.mrf.mxu0 }
 0x1b4   :  { %5509 = vmatpush.bf16.msra.mxu1 %v9773_v7  ;;  %v10493_v27 = vor.u32 %v14609_v42, %v10492_v52  ;;  %v14541_v7 = vld [vmem:[#allocation2 + $0x494] sm:$0xf0]  ;;  %v5274_v34 = vadd.f32 %v5273_v30, %v16018_v15  ;;  %v5287_v24 = vpop.f32.mrf.mxu1  ;;  %v10332_v0 = vld [vmem:[#allocation2 + $0x568] sm:$0xf] }
 0x1b5   :  { %5523 = vmatpush.bf16.msra.mxu2 %v9901_v11  ;;  %v10348_v11 = vld [vmem:[#allocation2 + $0x588] sm:$0xf]  ;;  %v10221_v6 = vor.u32 %v14541_v7, %v10220_v63  ;;  %v14569_v53 = vld [vmem:[#allocation2 + $0x574] sm:$0xf0] }
 0x1b6   :  { %5537 = vmatpush.bf16.msra.mxu3 %v10029_v9  ;;  %5496 = vmatmul.bf16.vlgmr.msra.gmra.mxu0 %v15711_v58  ;;  %v14573_v9 = vld [vmem:[#allocation2 + $0x594] sm:$0xf0]  ;;  %v10460_v52 = vld [vmem:[#allocation2 + $0x668] sm:$0xf]  ;;  %v10333_v15 = vor.u32 %v14569_v53, %v10332_v0 }
 0x1b7   :  { %5544 = vmatpush.bf16.msrb.mxu0 %v10269_v14  ;;  %5510 = vmatmul.bf16.vlgmr.msra.gmra.mxu1 %v15729_v10  ;;  %v10476_v14 = vld [vmem:[#allocation2 + $0x688] sm:$0xf]  ;;  %v14601_v42 = vld [vmem:[#allocation2 + $0x674] sm:$0xf0] }
 0x1b8   :  { %5558 = vmatpush.bf16.msrb.mxu1 %v10397_v26  ;;  %5524 = vmatmul.bf16.vlgmr.msra.gmra.mxu2 %v15716_v1  ;;  %v14605_v26 = vld [vmem:[#allocation2 + $0x694] sm:$0xf0]  ;;  %v10588_v62 = vld [vmem:[#allocation2 + $0x768] sm:$0xf] }
 0x1b9   :  { %5572 = vmatpush.bf16.msrb.mxu2 %v10525_v61  ;;  %5538 = vmatmul.bf16.vlgmr.msra.gmra.mxu3 %v15734_v17  ;;  %v16030_v61 = vpop.f32.mrf.mxu3  ;;  %v14633_v5 = vld [vmem:[#allocation2 + $0x774] sm:$0xf0]  ;;  %v10316_v7 = vld [vmem:[#allocation2 + $0x548] sm:$0xf] }
 0x1ba   :  { %5586 = vmatpush.bf16.msrb.mxu3 %v10653_v20  ;;  %16486 = vst [vmem:[#allocation36_spill] sm:$0xff] %v16030_v61  ;;  %v10604_v20 = vld [vmem:[#allocation2 + $0x788] sm:$0xf]  ;;  %v14533_v63 = vld [vmem:[#allocation2 + $0x454] sm:$0xf0] }
 0x1bb   :  { %5545 = vmatpush.bf16.msrb.mxu0 %v10253_v48  ;;  %v10349_v48 = vor.u32 %v14573_v9, %v10348_v11  ;;  %v10605_v49 = vor.u32 %v14637_v57, %v10604_v20  ;;  %v10589_v11 = vor.u32 %v14633_v5, %v10588_v62  ;;  %v5301_v9 = vpop.f32.mrf.mxu2  ;;  %v10572_v57 = vld [vmem:[#allocation2 + $0x748] sm:$0xf]  ;;  %v14561_v53 = vld [vmem:[#allocation2 + $0x534] sm:$0xf0]  ;;  %v16035_v8 = vpop.f32.mrf.mxu0 }
 0x1bc   :  { %5559 = vmatpush.bf16.msrb.mxu1 %v10381_v50  ;;  %v10477_v50 = vor.u32 %v14605_v26, %v10476_v14  ;;  %v10444_v14 = vld [vmem:[#allocation2 + $0x648] sm:$0xf]  ;;  %v14597_v26 = vld [vmem:[#allocation2 + $0x654] sm:$0xf0]  ;;  %16487 = vst [vmem:[#allocation37_spill] sm:$0xff] %v16035_v8 }
 0x1bd   :  { %5573 = vmatpush.bf16.msrb.mxu2 %v10509_v37  ;;  %v10204_v37 = vld [vmem:[#allocation2 + $0x468] sm:$0xf]  ;;  %v14625_v62 = vld [vmem:[#allocation2 + $0x734] sm:$0xf0] }
 0x1be   :  { %5587 = vmatpush.bf16.msrb.mxu3 %v10637_v33  ;;  %v5288_v33 = vadd.f32 %v5287_v24, %v5274_v34  ;;  %v14629_v34 = vld [vmem:[#allocation2 + $0x754] sm:$0xf0]  ;;  %v10300_v0 = vld [vmem:[#allocation2 + $0x528] sm:$0xf] }
 0x1bf   :  { %5546 = vmatpush.bf16.msrb.mxu0 %v10237_v2  ;;  %v10205_v2 = vor.u32 %v14537_v54, %v10204_v37  ;;  %v10172_v37 = vld [vmem:[#allocation2 + $0x428] sm:$0xf]  ;;  %v14529_v54 = vld [vmem:[#allocation2 + $0x434] sm:$0xf0] }
 0x1c0   :  { %5560 = vmatpush.bf16.msrb.mxu1 %v10365_v21  ;;  %v10461_v21 = vor.u32 %v14601_v42, %v10460_v52  ;;  %v5302_v30 = vadd.f32 %v5301_v9, %v5288_v33  ;;  %v10428_v52 = vld [vmem:[#allocation2 + $0x628] sm:$0xf]  ;;  %v14593_v42 = vld [vmem:[#allocation2 + $0x634] sm:$0xf0]  ;;  %v10173_v5 = vor.u32 %v14529_v54, %v10172_v37 }
 0x1c1   :  { %5574 = vmatpush.bf16.msrb.mxu2 %v10493_v27  ;;  %v10188_v27 = vld [vmem:[#allocation2 + $0x448] sm:$0xf]  ;;  %v5315_v20 = vpop.f32.mrf.mxu3  ;;  %v14745_v54 = vld [vmem:[#allocation2 + $0xaf4] sm:$0xf0] }
 0x1c2   :  { %5588 = vmatpush.bf16.msrb.mxu3 %v10621_v12  ;;  %v14565_v12 = vld [vmem:[#allocation2 + $0x554] sm:$0xf0]  ;;  %v16033_v24 = vadd.f32 %v5315_v20, %v5302_v30  ;;  %v10556_v33 = vld [vmem:[#allocation2 + $0x728] sm:$0xf] }
 0x1c3   :  { %5547 = vmatpush.bf16.msrb.mxu0 %v10221_v6  ;;  %v10189_v6 = vor.u32 %v14533_v63, %v10188_v27  ;;  %v14525_v27 = vld [vmem:[#allocation2 + $0x414] sm:$0xf0]  ;;  %v10284_v63 = vld [vmem:[#allocation2 + $0x508] sm:$0xf] }
 0x1c4   :  { %5561 = vmatpush.bf16.msrb.mxu1 %v10349_v48  ;;  %v10317_v48 = vor.u32 %v14565_v12, %v10316_v7  ;;  %v14557_v7 = vld [vmem:[#allocation2 + $0x514] sm:$0xf0]  ;;  %v10412_v9 = vld [vmem:[#allocation2 + $0x608] sm:$0xf]  ;;  %v10557_v12 = vor.u32 %v14625_v62, %v10556_v33 }
 0x1c5   :  { %5575 = vmatpush.bf16.msrb.mxu2 %v10477_v50  ;;  %v10445_v50 = vor.u32 %v14597_v26, %v10444_v14  ;;  %v10540_v14 = vld [vmem:[#allocation2 + $0x708] sm:$0xf]  ;;  %v14621_v26 = vld [vmem:[#allocation2 + $0x714] sm:$0xf0] }
 0x1c6   :  { %5589 = vmatpush.bf16.msrb.mxu3 %v10605_v49  ;;  %v10573_v49 = vor.u32 %v14629_v34, %v10572_v57  ;;  %v10780_v30 = vld [vmem:[#allocation2 + $0x8e8] sm:$0xf]  ;;  %v14681_v20 = vld [vmem:[#allocation2 + $0x8f4] sm:$0xf0] }
 0x1c7   :  { %5548 = vmatpush.bf16.msrb.mxu0 %v10205_v2  ;;  %v10156_v2 = vld [vmem:[#allocation2 + $0x408] sm:$0xf]  ;;  %v14677_v61 = vld [vmem:[#allocation2 + $0x8d4] sm:$0xf0] }
 0x1c8   :  { %5562 = vmatpush.bf16.msrb.mxu1 %v10333_v15  ;;  %v10301_v15 = vor.u32 %v14561_v53, %v10300_v0  ;;  %v10908_v57 = vld [vmem:[#allocation2 + $0x9e8] sm:$0xf]  ;;  %v10157_v34 = vor.u32 %v14525_v27, %v10156_v2  ;;  %v14777_v53 = vld [vmem:[#allocation2 + $0xbf4] sm:$0xf0] }
 0x1c9   :  { %5576 = vmatpush.bf16.msrb.mxu2 %v10461_v21  ;;  %v10429_v21 = vor.u32 %v14593_v42, %v10428_v52  ;;  %v11036_v37 = vld [vmem:[#allocation2 + $0xae8] sm:$0xf]  ;;  %v10781_v52 = vor.u32 %v14681_v20, %v10780_v30  ;;  %v14709_v2 = vld [vmem:[#allocation2 + $0x9d4] sm:$0xf0] }
 0x1ca   :  { %5590 = vmatpush.bf16.msrb.mxu3 %v10589_v11  ;;  %v14589_v11 = vld [vmem:[#allocation2 + $0x614] sm:$0xf0]  ;;  %v11164_v0 = vld [vmem:[#allocation2 + $0xbe8] sm:$0xf]  ;;  %v11037_v33 = vor.u32 %v14745_v54, %v11036_v37 }
 0x1cb   :  { %5549 = vmatpush.bf16.msrb.mxu0 %v10189_v6  ;;  %v14713_v6 = vld [vmem:[#allocation2 + $0x9f4] sm:$0xf0]  ;;  %v10764_v62 = vld [vmem:[#allocation2 + $0x8c8] sm:$0xf] }
 0x1cc   :  { %5563 = vmatpush.bf16.msrb.mxu1 %v10317_v48  ;;  %v10285_v48 = vor.u32 %v14557_v7, %v10284_v63  ;;  %v10909_v42 = vor.u32 %v14713_v6, %v10908_v57  ;;  %v10892_v16 = vld [vmem:[#allocation2 + $0x9c8] sm:$0xf]  ;;  %v14741_v45 = vld [vmem:[#allocation2 + $0xad4] sm:$0xf0]  ;;  %v16037_v63 = vpop.f32.mrf.mxu1  ;;  %v10765_v7 = vor.u32 %v14677_v61, %v10764_v62 }
 0x1cd   :  { %5577 = vmatpush.bf16.msrb.mxu2 %v10445_v50  ;;  %v10413_v50 = vor.u32 %v14589_v11, %v10412_v9  ;;  %v11020_v27 = vld [vmem:[#allocation2 + $0xac8] sm:$0xf]  ;;  %16488 = vst [vmem:[#allocation38_spill] sm:$0xff] %v16037_v63  ;;  %v10893_v9 = vor.u32 %v14709_v2, %v10892_v16  ;;  %v14705_v20 = vld [vmem:[#allocation2 + $0x9b4] sm:$0xf0] }
 0x1ce   :  { %5591 = vmatpush.bf16.msrb.mxu3 %v10573_v49  ;;  %v10541_v49 = vor.u32 %v14621_v26, %v10540_v14  ;;  %v10748_v11 = vld [vmem:[#allocation2 + $0x8a8] sm:$0xf]  ;;  %v14673_v14 = vld [vmem:[#allocation2 + $0x8b4] sm:$0xf0] }
 0x1cf   :  { %5550 = vmatpush.bf16.msrb.mxu0 %v10173_v5  ;;  %v11165_v5 = vor.u32 %v14777_v53, %v11164_v0  ;;  %v10876_v26 = vld [vmem:[#allocation2 + $0x9a8] sm:$0xf]  ;;  %v14769_v61 = vld [vmem:[#allocation2 + $0xbb4] sm:$0xf0]  ;;  %v16043_v0 = vpop.f32.mrf.mxu2 }
 0x1d0   :  { %5564 = vmatpush.bf16.msrb.mxu1 %v10301_v15  ;;  %v11148_v15 = vld [vmem:[#allocation2 + $0xbc8] sm:$0xf]  ;;  %v10877_v16 = vor.u32 %v14705_v20, %v10876_v26  ;;  %16489 = vst [vmem:[#allocation39_spill] sm:$0xff] %v16043_v0  ;;  %v14765_v2 = vld [vmem:[#allocation2 + $0xb94] sm:$0xf0] }
 0x1d1   :  { %5578 = vmatpush.bf16.msrb.mxu2 %v10429_v21  ;;  %v14773_v21 = vld [vmem:[#allocation2 + $0xbd4] sm:$0xf0]  ;;  %v11004_v57 = vld [vmem:[#allocation2 + $0xaa8] sm:$0xf] }
 0x1d2   :  { %5592 = vmatpush.bf16.msrb.mxu3 %v10557_v12  ;;  %v11021_v12 = vor.u32 %v14741_v45, %v11020_v27  ;;  %v11149_v30 = vor.u32 %v14773_v21, %v11148_v15  ;;  %v11132_v6 = vld [vmem:[#allocation2 + $0xba8] sm:$0xf]  ;;  %v10749_v45 = vor.u32 %v14673_v14, %v10748_v11  ;;  %v14665_v11 = vld [vmem:[#allocation2 + $0x874] sm:$0xf0] }
 0x1d3   :  { %5551 = vmatpush.bf16.msrb.mxu0 %v10157_v34  ;;  %v14737_v34 = vld [vmem:[#allocation2 + $0xab4] sm:$0xf0]  ;;  %v10732_v54 = vld [vmem:[#allocation2 + $0x888] sm:$0xf]  ;;  %v11133_v53 = vor.u32 %v14769_v61, %v11132_v6  ;;  %v5329_v62 = vpop.f32.mrf.mxu0 }
 0x1d4   :  { %5565 = vmatpush.bf16.msrb.mxu1 %v10285_v48  ;;  %v11005_v37 = vor.u32 %v14737_v34, %v11004_v57  ;;  %v14669_v48 = vld [vmem:[#allocation2 + $0x894] sm:$0xf0]  ;;  %v5330_v27 = vadd.f32 %v5329_v62, %v16033_v24  ;;  %v5343_v21 = vpop.f32.mrf.mxu1  ;;  %v10844_v14 = vld [vmem:[#allocation2 + $0x968] sm:$0xf] }
 0x1d5   :  { %5579 = vmatpush.bf16.msrb.mxu2 %v10413_v50  ;;  %v10860_v50 = vld [vmem:[#allocation2 + $0x988] sm:$0xf]  ;;  %v10733_v15 = vor.u32 %v14669_v48, %v10732_v54  ;;  %v14697_v20 = vld [vmem:[#allocation2 + $0x974] sm:$0xf0] }
 0x1d6   :  { %5593 = vmatpush.bf16.msrb.mxu3 %v10541_v49  ;;  %5552 = vmatmul.bf16.vlgmr.msrb.gmra.mxu0 %v15762_v39  ;;  %v14701_v49 = vld [vmem:[#allocation2 + $0x994] sm:$0xf0]  ;;  %v10972_v57 = vld [vmem:[#allocation2 + $0xa68] sm:$0xf]  ;;  %v10845_v24 = vor.u32 %v14697_v20, %v10844_v14 }
 0x1d7   :  { %5600 = vmatpush.bf16.msra.mxu0 %v10781_v52  ;;  %5566 = vmatmul.bf16.vlgmr.msrb.gmra.mxu1 %v15766_v44  ;;  %v10988_v52 = vld [vmem:[#allocation2 + $0xa88] sm:$0xf]  ;;  %v14729_v34 = vld [vmem:[#allocation2 + $0xa74] sm:$0xf0] }
 0x1d8   :  { %5614 = vmatpush.bf16.msra.mxu1 %v10909_v42  ;;  %5580 = vmatmul.bf16.vlgmr.msrb.gmra.mxu2 %v15764_v43  ;;  %v14733_v42 = vld [vmem:[#allocation2 + $0xa94] sm:$0xf0]  ;;  %v11100_v6 = vld [vmem:[#allocation2 + $0xb68] sm:$0xf] }
 0x1d9   :  { %5628 = vmatpush.bf16.msra.mxu2 %v11037_v33  ;;  %5594 = vmatmul.bf16.vlgmr.msrb.gmra.mxu3 %v15768_v47  ;;  %v16045_v33 = vpop.f32.mrf.mxu3  ;;  %v14761_v61 = vld [vmem:[#allocation2 + $0xb74] sm:$0xf0]  ;;  %v10828_v48 = vld [vmem:[#allocation2 + $0x948] sm:$0xf] }
 0x1da   :  { %5642 = vmatpush.bf16.msra.mxu3 %v11165_v5  ;;  %16490 = vst [vmem:[#allocation40_spill] sm:$0xff] %v16045_v33  ;;  %v11116_v5 = vld [vmem:[#allocation2 + $0xb88] sm:$0xf]  ;;  %v14661_v54 = vld [vmem:[#allocation2 + $0x854] sm:$0xf0] }
 0x1db   :  { %5601 = vmatpush.bf16.msra.mxu0 %v10765_v7  ;;  %v10861_v7 = vor.u32 %v14701_v49, %v10860_v50  ;;  %v11117_v26 = vor.u32 %v14765_v2, %v11116_v5  ;;  %v11101_v50 = vor.u32 %v14761_v61, %v11100_v6  ;;  %v5357_v49 = vpop.f32.mrf.mxu2  ;;  %v11084_v2 = vld [vmem:[#allocation2 + $0xb48] sm:$0xf]  ;;  %v14689_v20 = vld [vmem:[#allocation2 + $0x934] sm:$0xf0]  ;;  %v16050_v8 = vpop.f32.mrf.mxu0 }
 0x1dc   :  { %5615 = vmatpush.bf16.msra.mxu1 %v10893_v9  ;;  %v10989_v9 = vor.u32 %v14733_v42, %v10988_v52  ;;  %v10956_v52 = vld [vmem:[#allocation2 + $0xa48] sm:$0xf]  ;;  %v14725_v42 = vld [vmem:[#allocation2 + $0xa54] sm:$0xf0]  ;;  %16491 = vst [vmem:[#allocation41_spill] sm:$0xff] %v16050_v8 }
 0x1dd   :  { %5629 = vmatpush.bf16.msra.mxu2 %v11021_v12  ;;  %v10716_v12 = vld [vmem:[#allocation2 + $0x868] sm:$0xf]  ;;  %v14753_v6 = vld [vmem:[#allocation2 + $0xb34] sm:$0xf0] }
 0x1de   :  { %5643 = vmatpush.bf16.msra.mxu3 %v11149_v30  ;;  %v5344_v30 = vadd.f32 %v5343_v21, %v5330_v27  ;;  %v14757_v27 = vld [vmem:[#allocation2 + $0xb54] sm:$0xf0]  ;;  %v10812_v14 = vld [vmem:[#allocation2 + $0x928] sm:$0xf] }
 0x1df   :  { %5602 = vmatpush.bf16.msra.mxu0 %v10749_v45  ;;  %v10717_v45 = vor.u32 %v14665_v11, %v10716_v12  ;;  %v10684_v12 = vld [vmem:[#allocation2 + $0x828] sm:$0xf]  ;;  %v14657_v11 = vld [vmem:[#allocation2 + $0x834] sm:$0xf0] }
 0x1e0   :  { %5616 = vmatpush.bf16.msra.mxu1 %v10877_v16  ;;  %v10973_v16 = vor.u32 %v14729_v34, %v10972_v57  ;;  %v5358_v62 = vadd.f32 %v5357_v49, %v5344_v30  ;;  %v10940_v57 = vld [vmem:[#allocation2 + $0xa28] sm:$0xf]  ;;  %v14721_v34 = vld [vmem:[#allocation2 + $0xa34] sm:$0xf0]  ;;  %v10685_v61 = vor.u32 %v14657_v11, %v10684_v12 }
 0x1e1   :  { %5630 = vmatpush.bf16.msra.mxu2 %v11005_v37  ;;  %v10700_v37 = vld [vmem:[#allocation2 + $0x848] sm:$0xf]  ;;  %v5371_v5 = vpop.f32.mrf.mxu3  ;;  %v14873_v11 = vld [vmem:[#allocation2 + $0xef4] sm:$0xf0] }
 0x1e2   :  { %5644 = vmatpush.bf16.msra.mxu3 %v11133_v53  ;;  %v14693_v53 = vld [vmem:[#allocation2 + $0x954] sm:$0xf0]  ;;  %v16048_v21 = vadd.f32 %v5371_v5, %v5358_v62  ;;  %v11068_v30 = vld [vmem:[#allocation2 + $0xb28] sm:$0xf] }
 0x1e3   :  { %5603 = vmatpush.bf16.msra.mxu0 %v10733_v15  ;;  %v10701_v15 = vor.u32 %v14661_v54, %v10700_v37  ;;  %v14653_v37 = vld [vmem:[#allocation2 + $0x814] sm:$0xf0]  ;;  %v10796_v54 = vld [vmem:[#allocation2 + $0x908] sm:$0xf] }
 0x1e4   :  { %5617 = vmatpush.bf16.msra.mxu1 %v10861_v7  ;;  %v10829_v7 = vor.u32 %v14693_v53, %v10828_v48  ;;  %v14685_v48 = vld [vmem:[#allocation2 + $0x914] sm:$0xf0]  ;;  %v10924_v49 = vld [vmem:[#allocation2 + $0xa08] sm:$0xf]  ;;  %v11069_v53 = vor.u32 %v14753_v6, %v11068_v30 }
 0x1e5   :  { %5631 = vmatpush.bf16.msra.mxu2 %v10989_v9  ;;  %v10957_v9 = vor.u32 %v14725_v42, %v10956_v52  ;;  %v11052_v52 = vld [vmem:[#allocation2 + $0xb08] sm:$0xf]  ;;  %v14749_v42 = vld [vmem:[#allocation2 + $0xb14] sm:$0xf0] }
 0x1e6   :  { %5645 = vmatpush.bf16.msra.mxu3 %v11117_v26  ;;  %v11085_v26 = vor.u32 %v14757_v27, %v11084_v2  ;;  %v11292_v62 = vld [vmem:[#allocation2 + $0xce8] sm:$0xf]  ;;  %v14809_v5 = vld [vmem:[#allocation2 + $0xcf4] sm:$0xf0] }
 0x1e7   :  { %5604 = vmatpush.bf16.msra.mxu0 %v10717_v45  ;;  %v10668_v45 = vld [vmem:[#allocation2 + $0x808] sm:$0xf]  ;;  %v14805_v33 = vld [vmem:[#allocation2 + $0xcd4] sm:$0xf0] }
 0x1e8   :  { %5618 = vmatpush.bf16.msra.mxu1 %v10845_v24  ;;  %v10813_v24 = vor.u32 %v14689_v20, %v10812_v14  ;;  %v11420_v2 = vld [vmem:[#allocation2 + $0xde8] sm:$0xf]  ;;  %v10669_v27 = vor.u32 %v14653_v37, %v10668_v45  ;;  %v14905_v20 = vld [vmem:[#allocation2 + $0xff4] sm:$0xf0] }
 0x1e9   :  { %5632 = vmatpush.bf16.msra.mxu2 %v10973_v16  ;;  %v10941_v16 = vor.u32 %v14721_v34, %v10940_v57  ;;  %v11548_v12 = vld [vmem:[#allocation2 + $0xee8] sm:$0xf]  ;;  %v11293_v57 = vor.u32 %v14809_v5, %v11292_v62  ;;  %v14837_v45 = vld [vmem:[#allocation2 + $0xdd4] sm:$0xf0] }
 0x1ea   :  { %5646 = vmatpush.bf16.msra.mxu3 %v11101_v50  ;;  %v14717_v50 = vld [vmem:[#allocation2 + $0xa14] sm:$0xf0]  ;;  %v11676_v14 = vld [vmem:[#allocation2 + $0xfe8] sm:$0xf]  ;;  %v11549_v30 = vor.u32 %v14873_v11, %v11548_v12 }
 0x1eb   :  { %5605 = vmatpush.bf16.msra.mxu0 %v10701_v15  ;;  %v14841_v15 = vld [vmem:[#allocation2 + $0xdf4] sm:$0xf0]  ;;  %v11276_v6 = vld [vmem:[#allocation2 + $0xcc8] sm:$0xf] }
 0x1ec   :  { %5619 = vmatpush.bf16.msra.mxu1 %v10829_v7  ;;  %v10797_v7 = vor.u32 %v14685_v48, %v10796_v54  ;;  %v11421_v34 = vor.u32 %v14841_v15, %v11420_v2  ;;  %v11404_v0 = vld [vmem:[#allocation2 + $0xdc8] sm:$0xf]  ;;  %v14869_v63 = vld [vmem:[#allocation2 + $0xed4] sm:$0xf0]  ;;  %v16052_v54 = vpop.f32.mrf.mxu1  ;;  %v11277_v48 = vor.u32 %v14805_v33, %v11276_v6 }
 0x1ed   :  { %5633 = vmatpush.bf16.msra.mxu2 %v10957_v9  ;;  %v10925_v9 = vor.u32 %v14717_v50, %v10924_v49  ;;  %v11532_v37 = vld [vmem:[#allocation2 + $0xec8] sm:$0xf]  ;;  %16492 = vst [vmem:[#allocation42_spill] sm:$0xff] %v16052_v54  ;;  %v11405_v49 = vor.u32 %v14837_v45, %v11404_v0  ;;  %v14833_v5 = vld [vmem:[#allocation2 + $0xdb4] sm:$0xf0] }
 0x1ee   :  { %5647 = vmatpush.bf16.msra.mxu3 %v11085_v26  ;;  %v11053_v26 = vor.u32 %v14749_v42, %v11052_v52  ;;  %v11260_v50 = vld [vmem:[#allocation2 + $0xca8] sm:$0xf]  ;;  %v14801_v52 = vld [vmem:[#allocation2 + $0xcb4] sm:$0xf0] }
 0x1ef   :  { %5606 = vmatpush.bf16.msra.mxu0 %v10685_v61  ;;  %v11677_v61 = vor.u32 %v14905_v20, %v11676_v14  ;;  %v11388_v42 = vld [vmem:[#allocation2 + $0xda8] sm:$0xf]  ;;  %v14897_v33 = vld [vmem:[#allocation2 + $0xfb4] sm:$0xf0]  ;;  %v16058_v14 = vpop.f32.mrf.mxu2 }
 0x1f0   :  { %5620 = vmatpush.bf16.msra.mxu1 %v10813_v24  ;;  %v11660_v24 = vld [vmem:[#allocation2 + $0xfc8] sm:$0xf]  ;;  %v11389_v0 = vor.u32 %v14833_v5, %v11388_v42  ;;  %16493 = vst [vmem:[#allocation43_spill] sm:$0xff] %v16058_v14  ;;  %v14893_v45 = vld [vmem:[#allocation2 + $0xf94] sm:$0xf0] }
 0x1f1   :  { %5634 = vmatpush.bf16.msra.mxu2 %v10941_v16  ;;  %v14901_v16 = vld [vmem:[#allocation2 + $0xfd4] sm:$0xf0]  ;;  %v11516_v2 = vld [vmem:[#allocation2 + $0xea8] sm:$0xf] }
 0x1f2   :  { %5648 = vmatpush.bf16.msra.mxu3 %v11069_v53  ;;  %v11533_v53 = vor.u32 %v14869_v63, %v11532_v37  ;;  %v11661_v62 = vor.u32 %v14901_v16, %v11660_v24  ;;  %v11644_v15 = vld [vmem:[#allocation2 + $0xfa8] sm:$0xf]  ;;  %v11261_v63 = vor.u32 %v14801_v52, %v11260_v50  ;;  %v14793_v50 = vld [vmem:[#allocation2 + $0xc74] sm:$0xf0] }
 0x1f3   :  { %5607 = vmatpush.bf16.msra.mxu0 %v10669_v27  ;;  %v14865_v27 = vld [vmem:[#allocation2 + $0xeb4] sm:$0xf0]  ;;  %v11244_v11 = vld [vmem:[#allocation2 + $0xc88] sm:$0xf]  ;;  %v11645_v20 = vor.u32 %v14897_v33, %v11644_v15  ;;  %v5385_v6 = vpop.f32.mrf.mxu0 }
 0x1f4   :  { %5621 = vmatpush.bf16.msra.mxu1 %v10797_v7  ;;  %v11517_v12 = vor.u32 %v14865_v27, %v11516_v2  ;;  %v14797_v7 = vld [vmem:[#allocation2 + $0xc94] sm:$0xf0]  ;;  %v5386_v37 = vadd.f32 %v5385_v6, %v16048_v21  ;;  %v5399_v16 = vpop.f32.mrf.mxu1  ;;  %v11356_v52 = vld [vmem:[#allocation2 + $0xd68] sm:$0xf] }
 0x1f5   :  { %5635 = vmatpush.bf16.msra.mxu2 %v10925_v9  ;;  %v11372_v9 = vld [vmem:[#allocation2 + $0xd88] sm:$0xf]  ;;  %v11245_v24 = vor.u32 %v14797_v7, %v11244_v11  ;;  %v14825_v5 = vld [vmem:[#allocation2 + $0xd74] sm:$0xf0] }
 0x1f6   :  { %5649 = vmatpush.bf16.msra.mxu3 %v11053_v26  ;;  %5608 = vmatmul.bf16.vlgmr.msra.gmra.mxu0 %v15798_v31  ;;  %v14829_v26 = vld [vmem:[#allocation2 + $0xd94] sm:$0xf0]  ;;  %v11484_v2 = vld [vmem:[#allocation2 + $0xe68] sm:$0xf]  ;;  %v11357_v21 = vor.u32 %v14825_v5, %v11356_v52 }
 0x1f7   :  { %5656 = vmatpush.bf16.msrb.mxu0 %v11293_v57  ;;  %5622 = vmatmul.bf16.vlgmr.msra.gmra.mxu1 %v15802_v36  ;;  %v11500_v57 = vld [vmem:[#allocation2 + $0xe88] sm:$0xf]  ;;  %v14857_v27 = vld [vmem:[#allocation2 + $0xe74] sm:$0xf0] }
 0x1f8   :  { %5670 = vmatpush.bf16.msrb.mxu1 %v11421_v34  ;;  %5636 = vmatmul.bf16.vlgmr.msra.gmra.mxu2 %v15800_v35  ;;  %v14861_v34 = vld [vmem:[#allocation2 + $0xe94] sm:$0xf0]  ;;  %v11612_v15 = vld [vmem:[#allocation2 + $0xf68] sm:$0xf] }
 0x1f9   :  { %5684 = vmatpush.bf16.msrb.mxu2 %v11549_v30  ;;  %5650 = vmatmul.bf16.vlgmr.msra.gmra.mxu3 %v15804_v40  ;;  %v16060_v30 = vpop.f32.mrf.mxu3  ;;  %v14889_v33 = vld [vmem:[#allocation2 + $0xf74] sm:$0xf0]  ;;  %v11340_v7 = vld [vmem:[#allocation2 + $0xd48] sm:$0xf] }
 0x1fa   :  { %5698 = vmatpush.bf16.msrb.mxu3 %v11677_v61  ;;  %16494 = vst [vmem:[#allocation44_spill] sm:$0xff] %v16060_v30  ;;  %v11628_v61 = vld [vmem:[#allocation2 + $0xf88] sm:$0xf]  ;;  %v14789_v11 = vld [vmem:[#allocation2 + $0xc54] sm:$0xf0] }
 0x1fb   :  { %5657 = vmatpush.bf16.msrb.mxu0 %v11277_v48  ;;  %v11373_v48 = vor.u32 %v14829_v26, %v11372_v9  ;;  %v11629_v42 = vor.u32 %v14893_v45, %v11628_v61  ;;  %v11613_v9 = vor.u32 %v14889_v33, %v11612_v15  ;;  %v5413_v26 = vpop.f32.mrf.mxu2  ;;  %v11596_v45 = vld [vmem:[#allocation2 + $0xf48] sm:$0xf]  ;;  %v14817_v5 = vld [vmem:[#allocation2 + $0xd34] sm:$0xf0]  ;;  %v16065_v8 = vpop.f32.mrf.mxu0 }
 0x1fc   :  { %5671 = vmatpush.bf16.msrb.mxu1 %v11405_v49  ;;  %v11501_v49 = vor.u32 %v14861_v34, %v11500_v57  ;;  %v11468_v57 = vld [vmem:[#allocation2 + $0xe48] sm:$0xf]  ;;  %v14853_v34 = vld [vmem:[#allocation2 + $0xe54] sm:$0xf0] }
 0x1fd   :  { %5685 = vmatpush.bf16.msrb.mxu2 %v11533_v53  ;;  %v11228_v53 = vld [vmem:[#allocation2 + $0xc68] sm:$0xf]  ;;  %v14881_v15 = vld [vmem:[#allocation2 + $0xf34] sm:$0xf0] }
 0x1fe   :  { %5699 = vmatpush.bf16.msrb.mxu3 %v11661_v62  ;;  %v5400_v62 = vadd.f32 %v5399_v16, %v5386_v37  ;;  %v14885_v37 = vld [vmem:[#allocation2 + $0xf54] sm:$0xf0]  ;;  %v11324_v52 = vld [vmem:[#allocation2 + $0xd28] sm:$0xf] }
 0x1ff   :  { %5658 = vmatpush.bf16.msrb.mxu0 %v11261_v63  ;;  %v11229_v63 = vor.u32 %v14793_v50, %v11228_v53  ;;  %v11196_v53 = vld [vmem:[#allocation2 + $0xc28] sm:$0xf]  ;;  %v14785_v50 = vld [vmem:[#allocation2 + $0xc34] sm:$0xf0] }
 0x200   :  { %5672 = vmatpush.bf16.msrb.mxu1 %v11389_v0  ;;  %v11485_v0 = vor.u32 %v14857_v27, %v11484_v2  ;;  %v5414_v6 = vadd.f32 %v5413_v26, %v5400_v62  ;;  %v11452_v2 = vld [vmem:[#allocation2 + $0xe28] sm:$0xf]  ;;  %v14849_v27 = vld [vmem:[#allocation2 + $0xe34] sm:$0xf0]  ;;  %v11197_v33 = vor.u32 %v14785_v50, %v11196_v53 }
 0x201   :  { %5686 = vmatpush.bf16.msrb.mxu2 %v11517_v12  ;;  %v11212_v12 = vld [vmem:[#allocation2 + $0xc48] sm:$0xf]  ;;  %v5427_v61 = vpop.f32.mrf.mxu3  ;;  %v15001_v50 = vld [vmem:[#allocation2 + $0x12f4] sm:$0xf0] }
 0x202   :  { %5700 = vmatpush.bf16.msrb.mxu3 %v11645_v20  ;;  %v14821_v20 = vld [vmem:[#allocation2 + $0xd54] sm:$0xf0]  ;;  %v16063_v16 = vadd.f32 %v5427_v61, %v5414_v6  ;;  %v11580_v62 = vld [vmem:[#allocation2 + $0xf28] sm:$0xf] }
 0x203   :  { %5659 = vmatpush.bf16.msrb.mxu0 %v11245_v24  ;;  %v11213_v24 = vor.u32 %v14789_v11, %v11212_v12  ;;  %v14781_v12 = vld [vmem:[#allocation2 + $0xc14] sm:$0xf0]  ;;  %v11308_v11 = vld [vmem:[#allocation2 + $0xd08] sm:$0xf] }
 0x204   :  { %5673 = vmatpush.bf16.msrb.mxu1 %v11373_v48  ;;  %v11341_v48 = vor.u32 %v14821_v20, %v11340_v7  ;;  %v14813_v7 = vld [vmem:[#allocation2 + $0xd14] sm:$0xf0]  ;;  %v11436_v26 = vld [vmem:[#allocation2 + $0xe08] sm:$0xf]  ;;  %v11581_v20 = vor.u32 %v14881_v15, %v11580_v62 }
 0x205   :  { %5687 = vmatpush.bf16.msrb.mxu2 %v11501_v49  ;;  %v11469_v49 = vor.u32 %v14853_v34, %v11468_v57  ;;  %v11564_v57 = vld [vmem:[#allocation2 + $0xf08] sm:$0xf]  ;;  %v14877_v34 = vld [vmem:[#allocation2 + $0xf14] sm:$0xf0] }
 0x206   :  { %5701 = vmatpush.bf16.msrb.mxu3 %v11629_v42  ;;  %v11597_v42 = vor.u32 %v14885_v37, %v11596_v45  ;;  %v11804_v6 = vld [vmem:[#allocation2 + $0x10e8] sm:$0xf]  ;;  %v14937_v61 = vld [vmem:[#allocation2 + $0x10f4] sm:$0xf0] }
 0x207   :  { %5660 = vmatpush.bf16.msrb.mxu0 %v11229_v63  ;;  %v11180_v63 = vld [vmem:[#allocation2 + $0xc08] sm:$0xf]  ;;  %v14933_v30 = vld [vmem:[#allocation2 + $0x10d4] sm:$0xf0] }
 0x208   :  { %5674 = vmatpush.bf16.msrb.mxu1 %v11357_v21  ;;  %v11325_v21 = vor.u32 %v14817_v5, %v11324_v52  ;;  %v11932_v45 = vld [vmem:[#allocation2 + $0x11e8] sm:$0xf]  ;;  %v11181_v37 = vor.u32 %v14781_v12, %v11180_v63  ;;  %v15033_v5 = vld [vmem:[#allocation2 + $0x13f4] sm:$0xf0] }
 0x209   :  { %5688 = vmatpush.bf16.msrb.mxu2 %v11485_v0  ;;  %v11453_v0 = vor.u32 %v14849_v27, %v11452_v2  ;;  %v12060_v53 = vld [vmem:[#allocation2 + $0x12e8] sm:$0xf]  ;;  %v11805_v2 = vor.u32 %v14937_v61, %v11804_v6  ;;  %v14965_v63 = vld [vmem:[#allocation2 + $0x11d4] sm:$0xf0] }
 0x20a   :  { %5702 = vmatpush.bf16.msrb.mxu3 %v11613_v9  ;;  %v14845_v9 = vld [vmem:[#allocation2 + $0xe14] sm:$0xf0]  ;;  %v12188_v52 = vld [vmem:[#allocation2 + $0x13e8] sm:$0xf]  ;;  %v12061_v62 = vor.u32 %v15001_v50, %v12060_v53 }
 0x20b   :  { %5661 = vmatpush.bf16.msrb.mxu0 %v11213_v24  ;;  %v14969_v24 = vld [vmem:[#allocation2 + $0x11f4] sm:$0xf0]  ;;  %v11788_v15 = vld [vmem:[#allocation2 + $0x10c8] sm:$0xf] }
 0x20c   :  { %5675 = vmatpush.bf16.msrb.mxu1 %v11341_v48  ;;  %v11309_v48 = vor.u32 %v14813_v7, %v11308_v11  ;;  %v11933_v27 = vor.u32 %v14969_v24, %v11932_v45  ;;  %v11916_v14 = vld [vmem:[#allocation2 + $0x11c8] sm:$0xf]  ;;  %v14997_v54 = vld [vmem:[#allocation2 + $0x12d4] sm:$0xf0]  ;;  %v16067_v11 = vpop.f32.mrf.mxu1  ;;  %v11789_v7 = vor.u32 %v14933_v30, %v11788_v15 }
 0x20d   :  { %5689 = vmatpush.bf16.msrb.mxu2 %v11469_v49  ;;  %v11437_v49 = vor.u32 %v14845_v9, %v11436_v26  ;;  %v12044_v12 = vld [vmem:[#allocation2 + $0x12c8] sm:$0xf]  ;;  %v11917_v26 = vor.u32 %v14965_v63, %v11916_v14  ;;  %v14961_v61 = vld [vmem:[#allocation2 + $0x11b4] sm:$0xf0] }
 0x20e   :  { %5703 = vmatpush.bf16.msrb.mxu3 %v11597_v42  ;;  %v11565_v42 = vor.u32 %v14877_v34, %v11564_v57  ;;  %v11772_v9 = vld [vmem:[#allocation2 + $0x10a8] sm:$0xf]  ;;  %v14929_v57 = vld [vmem:[#allocation2 + $0x10b4] sm:$0xf0] }
 0x20f   :  { %5662 = vmatpush.bf16.msrb.mxu0 %v11197_v33  ;;  %v12189_v33 = vor.u32 %v15033_v5, %v12188_v52  ;;  %v11900_v34 = vld [vmem:[#allocation2 + $0x11a8] sm:$0xf]  ;;  %v15025_v30 = vld [vmem:[#allocation2 + $0x13b4] sm:$0xf0]  ;;  %v16073_v52 = vpop.f32.mrf.mxu2 }
 0x210   :  { %5676 = vmatpush.bf16.msrb.mxu1 %v11325_v21  ;;  %v12172_v21 = vld [vmem:[#allocation2 + $0x13c8] sm:$0xf]  ;;  %v11901_v14 = vor.u32 %v14961_v61, %v11900_v34  ;;  %16495 = vst [vmem:[#allocation45_spill] sm:$0xff] %v16073_v52  ;;  %v15021_v63 = vld [vmem:[#allocation2 + $0x1394] sm:$0xf0] }
 0x211   :  { %5690 = vmatpush.bf16.msrb.mxu2 %v11453_v0  ;;  %v15029_v0 = vld [vmem:[#allocation2 + $0x13d4] sm:$0xf0]  ;;  %v12028_v45 = vld [vmem:[#allocation2 + $0x12a8] sm:$0xf] }
 0x212   :  { %5704 = vmatpush.bf16.msrb.mxu3 %v11581_v20  ;;  %v12045_v20 = vor.u32 %v14997_v54, %v12044_v12  ;;  %v12173_v6 = vor.u32 %v15029_v0, %v12172_v21  ;;  %v12156_v24 = vld [vmem:[#allocation2 + $0x13a8] sm:$0xf]  ;;  %v11773_v54 = vor.u32 %v14929_v57, %v11772_v9  ;;  %v14921_v9 = vld [vmem:[#allocation2 + $0x1074] sm:$0xf0] }
 0x213   :  { %5663 = vmatpush.bf16.msrb.mxu0 %v11181_v37  ;;  %v14993_v37 = vld [vmem:[#allocation2 + $0x12b4] sm:$0xf0]  ;;  %v11756_v50 = vld [vmem:[#allocation2 + $0x1088] sm:$0xf]  ;;  %v12157_v5 = vor.u32 %v15025_v30, %v12156_v24  ;;  %v5441_v15 = vpop.f32.mrf.mxu0 }
 0x214   :  { %5677 = vmatpush.bf16.msrb.mxu1 %v11309_v48  ;;  %v12029_v53 = vor.u32 %v14993_v37, %v12028_v45  ;;  %v14925_v48 = vld [vmem:[#allocation2 + $0x1094] sm:$0xf0]  ;;  %v5442_v12 = vadd.f32 %v5441_v15, %v16063_v16  ;;  %v5455_v0 = vpop.f32.mrf.mxu1  ;;  %v11868_v57 = vld [vmem:[#allocation2 + $0x1168] sm:$0xf] }
 0x215   :  { %5691 = vmatpush.bf16.msrb.mxu2 %v11437_v49  ;;  %v11884_v49 = vld [vmem:[#allocation2 + $0x1188] sm:$0xf]  ;;  %v11757_v21 = vor.u32 %v14925_v48, %v11756_v50  ;;  %v14953_v61 = vld [vmem:[#allocation2 + $0x1174] sm:$0xf0] }
 0x216   :  { %5705 = vmatpush.bf16.msrb.mxu3 %v11565_v42  ;;  %5664 = vmatmul.bf16.vlgmr.msrb.gmra.mxu0 %v15834_v32  ;;  %v14957_v42 = vld [vmem:[#allocation2 + $0x1194] sm:$0xf0]  ;;  %v11996_v45 = vld [vmem:[#allocation2 + $0x1268] sm:$0xf]  ;;  %v11869_v16 = vor.u32 %v14953_v61, %v11868_v57 }
 0x217   :  { %5712 = vmatpush.bf16.msra.mxu0 %v11805_v2  ;;  %5678 = vmatmul.bf16.vlgmr.msrb.gmra.mxu1 %v15838_v41  ;;  %v12012_v2 = vld [vmem:[#allocation2 + $0x1288] sm:$0xf]  ;;  %v14985_v37 = vld [vmem:[#allocation2 + $0x1274] sm:$0xf0] }
 0x218   :  { %5726 = vmatpush.bf16.msra.mxu1 %v11933_v27  ;;  %5692 = vmatmul.bf16.vlgmr.msrb.gmra.mxu2 %v15836_v38  ;;  %v14989_v27 = vld [vmem:[#allocation2 + $0x1294] sm:$0xf0]  ;;  %v12124_v24 = vld [vmem:[#allocation2 + $0x1368] sm:$0xf] }
 0x219   :  { %5740 = vmatpush.bf16.msra.mxu2 %v12061_v62  ;;  %5706 = vmatmul.bf16.vlgmr.msrb.gmra.mxu3 %v15840_v46  ;;  %v16075_v62 = vpop.f32.mrf.mxu3  ;;  %v15017_v30 = vld [vmem:[#allocation2 + $0x1374] sm:$0xf0]  ;;  %v11852_v48 = vld [vmem:[#allocation2 + $0x1148] sm:$0xf] }
 0x21a   :  { %5754 = vmatpush.bf16.msra.mxu3 %v12189_v33  ;;  %16496 = vst [vmem:[#allocation46_spill] sm:$0xff] %v16075_v62  ;;  %v12140_v33 = vld [vmem:[#allocation2 + $0x1388] sm:$0xf]  ;;  %v14917_v50 = vld [vmem:[#allocation2 + $0x1054] sm:$0xf0] }
 0x21b   :  { %5713 = vmatpush.bf16.msra.mxu0 %v11789_v7  ;;  %v11885_v7 = vor.u32 %v14957_v42, %v11884_v49  ;;  %v12141_v34 = vor.u32 %v15021_v63, %v12140_v33  ;;  %v12125_v49 = vor.u32 %v15017_v30, %v12124_v24  ;;  %v5469_v42 = vpop.f32.mrf.mxu2  ;;  %v12108_v63 = vld [vmem:[#allocation2 + $0x1348] sm:$0xf]  ;;  %v14945_v61 = vld [vmem:[#allocation2 + $0x1134] sm:$0xf0] }
 0x21c   :  { %5727 = vmatpush.bf16.msra.mxu1 %v11917_v26  ;;  %v12013_v26 = vor.u32 %v14989_v27, %v12012_v2  ;;  %v11980_v2 = vld [vmem:[#allocation2 + $0x1248] sm:$0xf]  ;;  %v14981_v27 = vld [vmem:[#allocation2 + $0x1254] sm:$0xf0] }
 0x21d   :  { %5741 = vmatpush.bf16.msra.mxu2 %v12045_v20  ;;  %v11740_v20 = vld [vmem:[#allocation2 + $0x1068] sm:$0xf]  ;;  %v15009_v24 = vld [vmem:[#allocation2 + $0x1334] sm:$0xf0] }
 0x21e   :  { %5755 = vmatpush.bf16.msra.mxu3 %v12173_v6  ;;  %v5456_v6 = vadd.f32 %v5455_v0, %v5442_v12  ;;  %v15013_v12 = vld [vmem:[#allocation2 + $0x1354] sm:$0xf0]  ;;  %v11836_v57 = vld [vmem:[#allocation2 + $0x1128] sm:$0xf] }
 0x21f   :  { %5714 = vmatpush.bf16.msra.mxu0 %v11773_v54  ;;  %v11741_v54 = vor.u32 %v14921_v9, %v11740_v20  ;;  %v11708_v20 = vld [vmem:[#allocation2 + $0x1028] sm:$0xf]  ;;  %v14913_v9 = vld [vmem:[#allocation2 + $0x1034] sm:$0xf0] }
 0x220   :  { %5728 = vmatpush.bf16.msra.mxu1 %v11901_v14  ;;  %v11997_v14 = vor.u32 %v14985_v37, %v11996_v45  ;;  %v5470_v15 = vadd.f32 %v5469_v42, %v5456_v6  ;;  %v11964_v45 = vld [vmem:[#allocation2 + $0x1228] sm:$0xf]  ;;  %v14977_v37 = vld [vmem:[#allocation2 + $0x1234] sm:$0xf0]  ;;  %v11709_v30 = vor.u32 %v14913_v9, %v11708_v20 }
 0x221   :  { %5742 = vmatpush.bf16.msra.mxu2 %v12029_v53  ;;  %v11724_v53 = vld [vmem:[#allocation2 + $0x1048] sm:$0xf]  ;;  %v5483_v33 = vpop.f32.mrf.mxu3  ;;  %v15129_v9 = vld [vmem:[#allocation2 + $0x16f4] sm:$0xf0] }
 0x222   :  { %5756 = vmatpush.bf16.msra.mxu3 %v12157_v5  ;;  %v14949_v5 = vld [vmem:[#allocation2 + $0x1154] sm:$0xf0]  ;;  %v16078_v0 = vadd.f32 %v5483_v33, %v5470_v15  ;;  %v12092_v6 = vld [vmem:[#allocation2 + $0x1328] sm:$0xf] }
 0x223   :  { %5715 = vmatpush.bf16.msra.mxu0 %v11757_v21  ;;  %v11725_v21 = vor.u32 %v14917_v50, %v11724_v53  ;;  %v14909_v53 = vld [vmem:[#allocation2 + $0x1014] sm:$0xf0]  ;;  %v11820_v50 = vld [vmem:[#allocation2 + $0x1108] sm:$0xf] }
 0x224   :  { %5729 = vmatpush.bf16.msra.mxu1 %v11885_v7  ;;  %16497 = vst [vmem:[#allocation47_spill] sm:$0xff] %v16078_v0  ;;  %v11853_v7 = vor.u32 %v14949_v5, %v11852_v48  ;;  %v14941_v48 = vld [vmem:[#allocation2 + $0x1114] sm:$0xf0]  ;;  %v11948_v42 = vld [vmem:[#allocation2 + $0x1208] sm:$0xf]  ;;  %v12093_v5 = vor.u32 %v15009_v24, %v12092_v6 }
 0x225   :  { %5743 = vmatpush.bf16.msra.mxu2 %v12013_v26  ;;  %v11981_v26 = vor.u32 %v14981_v27, %v11980_v2  ;;  %v12076_v2 = vld [vmem:[#allocation2 + $0x1308] sm:$0xf]  ;;  %v15005_v27 = vld [vmem:[#allocation2 + $0x1314] sm:$0xf0] }
 0x226   :  { %5757 = vmatpush.bf16.msra.mxu3 %v12141_v34  ;;  %v12109_v34 = vor.u32 %v15013_v12, %v12108_v63  ;;  %v12316_v15 = vld [vmem:[#allocation2 + $0x14e8] sm:$0xf]  ;;  %v15065_v33 = vld [vmem:[#allocation2 + $0x14f4] sm:$0xf0] }
 0x227   :  { %5716 = vmatpush.bf16.msra.mxu0 %v11741_v54  ;;  %v11692_v54 = vld [vmem:[#allocation2 + $0x1008] sm:$0xf]  ;;  %v15061_v0 = vld [vmem:[#allocation2 + $0x14d4] sm:$0xf0] }
 0x228   :  { %5730 = vmatpush.bf16.msra.mxu1 %v11869_v16  ;;  %v11837_v16 = vor.u32 %v14945_v61, %v11836_v57  ;;  %v12444_v63 = vld [vmem:[#allocation2 + $0x15e8] sm:$0xf]  ;;  %v11693_v12 = vor.u32 %v14909_v53, %v11692_v54  ;;  %v15161_v61 = vld [vmem:[#allocation2 + $0x17f4] sm:$0xf0] }
 0x229   :  { %5744 = vmatpush.bf16.msra.mxu2 %v11997_v14  ;;  %v11965_v14 = vor.u32 %v14977_v37, %v11964_v45  ;;  %v12572_v20 = vld [vmem:[#allocation2 + $0x16e8] sm:$0xf]  ;;  %v12317_v45 = vor.u32 %v15065_v33, %v12316_v15  ;;  %v15093_v54 = vld [vmem:[#allocation2 + $0x15d4] sm:$0xf0] }
 0x22a   :  { %5758 = vmatpush.bf16.msra.mxu3 %v12125_v49  ;;  %v14973_v49 = vld [vmem:[#allocation2 + $0x1214] sm:$0xf0]  ;;  %v12700_v57 = vld [vmem:[#allocation2 + $0x17e8] sm:$0xf]  ;;  %v12573_v6 = vor.u32 %v15129_v9, %v12572_v20 }
 0x22b   :  { %5717 = vmatpush.bf16.msra.mxu0 %v11725_v21  ;;  %v15097_v21 = vld [vmem:[#allocation2 + $0x15f4] sm:$0xf0]  ;;  %v12300_v24 = vld [vmem:[#allocation2 + $0x14c8] sm:$0xf] }
 0x22c   :  { %5731 = vmatpush.bf16.msra.mxu1 %v11853_v7  ;;  %v11821_v7 = vor.u32 %v14941_v48, %v11820_v50  ;;  %v12445_v37 = vor.u32 %v15097_v21, %v12444_v63  ;;  %v12428_v62 = vld [vmem:[#allocation2 + $0x15c8] sm:$0xf]  ;;  %v15125_v52 = vld [vmem:[#allocation2 + $0x16d4] sm:$0xf0]  ;;  %v12301_v50 = vor.u32 %v15061_v0, %v12300_v24 }
 0x22d   :  { %5745 = vmatpush.bf16.msra.mxu2 %v11981_v26  ;;  %v11949_v26 = vor.u32 %v14973_v49, %v11948_v42  ;;  %v12556_v53 = vld [vmem:[#allocation2 + $0x16c8] sm:$0xf]  ;;  %v12429_v48 = vor.u32 %v15093_v54, %v12428_v62  ;;  %v15057_v49 = vld [vmem:[#allocation2 + $0x14b4] sm:$0xf0] }
 0x22e   :  { %5759 = vmatpush.bf16.msra.mxu3 %v12109_v34  ;;  %v12077_v34 = vor.u32 %v15005_v27, %v12076_v2  ;;  %v12557_v42 = vor.u32 %v15125_v52, %v12556_v53  ;;  %v12412_v2 = vld [vmem:[#allocation2 + $0x15a8] sm:$0xf]  ;;  %v15089_v15 = vld [vmem:[#allocation2 + $0x15b4] sm:$0xf0] }
 0x22f   :  { %5718 = vmatpush.bf16.msra.mxu0 %v11709_v30  ;;  %v12701_v30 = vor.u32 %v15161_v61, %v12700_v57  ;;  %v12540_v33 = vld [vmem:[#allocation2 + $0x16a8] sm:$0xf]  ;;  %v15121_v63 = vld [vmem:[#allocation2 + $0x16b4] sm:$0xf0]  ;;  %v12413_v62 = vor.u32 %v15089_v15, %v12412_v2 }
 0x230   :  { %5732 = vmatpush.bf16.msra.mxu1 %v11837_v16  ;;  %v12684_v16 = vld [vmem:[#allocation2 + $0x17c8] sm:$0xf]  ;;  %v15153_v0 = vld [vmem:[#allocation2 + $0x17b4] sm:$0xf0]  ;;  %v12541_v21 = vor.u32 %v15121_v63, %v12540_v33 }
 0x231   :  { %5746 = vmatpush.bf16.msra.mxu2 %v11965_v14  ;;  %v15157_v14 = vld [vmem:[#allocation2 + $0x17d4] sm:$0xf0]  ;;  %v12268_v20 = vld [vmem:[#allocation2 + $0x1488] sm:$0xf] }
 0x232   :  { %5760 = vmatpush.bf16.msra.mxu3 %v12093_v5  ;;  %v12284_v5 = vld [vmem:[#allocation2 + $0x14a8] sm:$0xf]  ;;  %v12685_v27 = vor.u32 %v15157_v14, %v12684_v16  ;;  %v15053_v9 = vld [vmem:[#allocation2 + $0x1494] sm:$0xf0] }
 0x233   :  { %5719 = vmatpush.bf16.msra.mxu0 %v11693_v12  ;;  %v12668_v12 = vld [vmem:[#allocation2 + $0x17a8] sm:$0xf]  ;;  %v12285_v52 = vor.u32 %v15057_v49, %v12284_v5  ;;  %v15085_v57 = vld [vmem:[#allocation2 + $0x1594] sm:$0xf0] }
 0x234   :  { %5733 = vmatpush.bf16.msra.mxu1 %v11821_v7  ;;  %v12396_v7 = vld [vmem:[#allocation2 + $0x1588] sm:$0xf]  ;;  %v15049_v53 = vld [vmem:[#allocation2 + $0x1474] sm:$0xf0] }
 0x235   :  { %5747 = vmatpush.bf16.msra.mxu2 %v11949_v26  ;;  %v12669_v26 = vor.u32 %v15153_v0, %v12668_v12  ;;  %v12524_v61 = vld [vmem:[#allocation2 + $0x1688] sm:$0xf]  ;;  %v12397_v24 = vor.u32 %v15085_v57, %v12396_v7  ;;  %v15145_v49 = vld [vmem:[#allocation2 + $0x1774] sm:$0xf0] }
 0x236   :  { %5761 = vmatpush.bf16.msra.mxu3 %v12077_v34  ;;  %5720 = vmatmul.bf16.vlgmr.msra.gmra.mxu0 %v15870_v51  ;;  %v15117_v34 = vld [vmem:[#allocation2 + $0x1694] sm:$0xf0]  ;;  %v12252_v54 = vld [vmem:[#allocation2 + $0x1468] sm:$0xf] }
 0x237   :  { %5768 = vmatpush.bf16.msrb.mxu0 %v12317_v45  ;;  %5734 = vmatmul.bf16.vlgmr.msra.gmra.mxu1 %v15874_v56  ;;  %v12652_v45 = vld [vmem:[#allocation2 + $0x1788] sm:$0xf]  ;;  %v12253_v2 = vor.u32 %v15049_v53, %v12252_v54  ;;  %v15045_v63 = vld [vmem:[#allocation2 + $0x1454] sm:$0xf0] }
 0x238   :  { %5782 = vmatpush.bf16.msrb.mxu1 %v12445_v37  ;;  %5748 = vmatmul.bf16.vlgmr.msra.gmra.mxu2 %v15872_v55  ;;  %v15149_v37 = vld [vmem:[#allocation2 + $0x1794] sm:$0xf0]  ;;  %v12380_v16 = vld [vmem:[#allocation2 + $0x1568] sm:$0xf] }
 0x239   :  { %5796 = vmatpush.bf16.msrb.mxu2 %v12573_v6  ;;  %5762 = vmatmul.bf16.vlgmr.msra.gmra.mxu3 %v15876_v60  ;;  %v12269_v6 = vor.u32 %v15053_v9, %v12268_v20  ;;  %v12653_v14 = vor.u32 %v15149_v37, %v12652_v45  ;;  %v12636_v5 = vld [vmem:[#allocation2 + $0x1768] sm:$0xf]  ;;  %v15141_v9 = vld [vmem:[#allocation2 + $0x1754] sm:$0xf0] }
 0x23a   :  { %5810 = vmatpush.bf16.msrb.mxu3 %v12701_v30  ;;  %v12525_v30 = vor.u32 %v15117_v34, %v12524_v61  ;;  %v12236_v33 = vld [vmem:[#allocation2 + $0x1448] sm:$0xf]  ;;  %v12637_v0 = vor.u32 %v15145_v49, %v12636_v5  ;;  %v15041_v34 = vld [vmem:[#allocation2 + $0x1434] sm:$0xf0] }
 0x23b   :  { %5769 = vmatpush.bf16.msrb.mxu0 %v12301_v50  ;;  %v15081_v50 = vld [vmem:[#allocation2 + $0x1574] sm:$0xf0]  ;;  %v12364_v12 = vld [vmem:[#allocation2 + $0x1548] sm:$0xf]  ;;  %v12237_v7 = vor.u32 %v15045_v63, %v12236_v33 }
 0x23c   :  { %5783 = vmatpush.bf16.msrb.mxu1 %v12429_v48  ;;  %v12508_v48 = vld [vmem:[#allocation2 + $0x1668] sm:$0xf]  ;;  %v15137_v53 = vld [vmem:[#allocation2 + $0x1734] sm:$0xf0] }
 0x23d   :  { %5797 = vmatpush.bf16.msrb.mxu2 %v12557_v42  ;;  %v15113_v42 = vld [vmem:[#allocation2 + $0x1674] sm:$0xf0]  ;;  %v12620_v20 = vld [vmem:[#allocation2 + $0x1748] sm:$0xf] }
 0x23e   :  { %5811 = vmatpush.bf16.msrb.mxu3 %v12685_v27  ;;  %v12381_v27 = vor.u32 %v15081_v50, %v12380_v16  ;;  %v12509_v15 = vor.u32 %v15113_v42, %v12508_v48  ;;  %v12220_v61 = vld [vmem:[#allocation2 + $0x1428] sm:$0xf]  ;;  %v12621_v37 = vor.u32 %v15141_v9, %v12620_v20  ;;  %v15037_v50 = vld [vmem:[#allocation2 + $0x1414] sm:$0xf0]  ;;  %v14487_v20 = vld [vmem:[#allocation2 + $0x2ec] sm:$0xf] }
 0x23f   :  { %5770 = vmatpush.bf16.msrb.mxu0 %v12285_v52  ;;  %v15077_v52 = vld [vmem:[#allocation2 + $0x1554] sm:$0xf0]  ;;  %v12348_v45 = vld [vmem:[#allocation2 + $0x1528] sm:$0xf]  ;;  %v12221_v16 = vor.u32 %v15041_v34, %v12220_v61  ;;  %v10014_v9 = vld [vmem:[#allocation2 + $0x2f8] sm:$0xf0] }
 0x240   :  { %5784 = vmatpush.bf16.msrb.mxu1 %v12413_v62  ;;  %v12492_v62 = vld [vmem:[#allocation2 + $0x1648] sm:$0xf]  ;;  %v15069_v49 = vld [vmem:[#allocation2 + $0x1514] sm:$0xf0]  ;;  %v10142_v61 = vld [vmem:[#allocation2 + $0x3f8] sm:$0xf0] }
 0x241   :  { %5798 = vmatpush.bf16.msrb.mxu2 %v12541_v21  ;;  %v15109_v21 = vld [vmem:[#allocation2 + $0x1654] sm:$0xf0]  ;;  %v12604_v54 = vld [vmem:[#allocation2 + $0x1728] sm:$0xf] }
 0x242   :  { %5812 = vmatpush.bf16.msrb.mxu3 %v12669_v26  ;;  %v12365_v26 = vor.u32 %v15077_v52, %v12364_v12  ;;  %v12493_v57 = vor.u32 %v15109_v21, %v12492_v62  ;;  %v12332_v5 = vld [vmem:[#allocation2 + $0x1508] sm:$0xf]  ;;  %v15133_v63 = vld [vmem:[#allocation2 + $0x1714] sm:$0xf0]  ;;  %v14423_v12 = vld [vmem:[#allocation2 + $0xec] sm:$0xf] }
 0x243   :  { %5771 = vmatpush.bf16.msrb.mxu0 %v12269_v6  ;;  %v15073_v6 = vld [vmem:[#allocation2 + $0x1534] sm:$0xf0]  ;;  %v12588_v33 = vld [vmem:[#allocation2 + $0x1708] sm:$0xf]  ;;  %v14455_v52 = vld [vmem:[#allocation2 + $0x1ec] sm:$0xf] }
 0x244   :  { %5785 = vmatpush.bf16.msrb.mxu1 %v12397_v24  ;;  %v12476_v24 = vld [vmem:[#allocation2 + $0x1628] sm:$0xf]  ;;  %v12349_v48 = vor.u32 %v15073_v6, %v12348_v45  ;;  %v9886_v21 = vld [vmem:[#allocation2 + $0x1f8] sm:$0xf0]  ;;  %v12589_v34 = vor.u32 %v15133_v63, %v12588_v33  ;;  %v10017_v6 = vor.u32 %v14487_v20, %v10014_v9  ;;  %v14447_v33 = vld [vmem:[#allocation2 + $0x1ac] sm:$0xf] }
 0x245   :  { %5799 = vmatpush.bf16.msrb.mxu2 %v12525_v30  ;;  %v15105_v30 = vld [vmem:[#allocation2 + $0x1634] sm:$0xf0] }
 0x246   :  { %5813 = vmatpush.bf16.msrb.mxu3 %v12653_v14  ;;  %v12204_v14 = vld [vmem:[#allocation2 + $0x1408] sm:$0xf]  ;;  %v12477_v42 = vor.u32 %v15105_v30, %v12476_v24  ;;  %v14419_v24 = vld [vmem:[#allocation2 + $0xcc] sm:$0xf]  ;;  %v9742_v30 = vld [vmem:[#allocation2 + $0xd8] sm:$0xf0] }
 0x247   :  { %5772 = vmatpush.bf16.msrb.mxu0 %v12253_v2  ;;  %v12460_v2 = vld [vmem:[#allocation2 + $0x1608] sm:$0xf]  ;;  %v12205_v62 = vor.u32 %v15037_v50, %v12204_v14  ;;  %v14483_v14 = vld [vmem:[#allocation2 + $0x2cc] sm:$0xf]  ;;  %v9998_v50 = vld [vmem:[#allocation2 + $0x2d8] sm:$0xf0] }
 0x248   :  { %5786 = vmatpush.bf16.msrb.mxu1 %v12381_v27  ;;  %v12605_v27 = vor.u32 %v15137_v53, %v12604_v54  ;;  %v14451_v54 = vld [vmem:[#allocation2 + $0x1cc] sm:$0xf] }
 0x249   :  { %5800 = vmatpush.bf16.msrb.mxu2 %v12509_v15  ;;  %v15101_v15 = vld [vmem:[#allocation2 + $0x1614] sm:$0xf0] }
 0x24a   :  { %5814 = vmatpush.bf16.msrb.mxu3 %v12637_v0  ;;  %v9758_v0 = vld [vmem:[#allocation2 + $0xf8] sm:$0xf0] }
 0x24b   :  { %5773 = vmatpush.bf16.msrb.mxu0 %v12237_v7  ;;  %v12333_v7 = vor.u32 %v15069_v49, %v12332_v5  ;;  %v9761_v45 = vor.u32 %v14423_v12, %v9758_v0  ;;  %v9745_v5 = vor.u32 %v14419_v24, %v9742_v30  ;;  %v9854_v12 = vld [vmem:[#allocation2 + $0x1b8] sm:$0xf0]  ;;  %v14479_v0 = vld [vmem:[#allocation2 + $0x2ac] sm:$0xf] }
 0x24c   :  { %5787 = vmatpush.bf16.msrb.mxu1 %v12365_v26  ;;  %v12461_v26 = vor.u32 %v15101_v15, %v12460_v2  ;;  %v10001_v2 = vor.u32 %v14483_v14, %v9998_v50  ;;  %v9726_v15 = vld [vmem:[#allocation2 + $0xb8] sm:$0xf0]  ;;  %v9857_v9 = vor.u32 %v14447_v33, %v9854_v12  ;;  %v14507_v24 = vld [vmem:[#allocation2 + $0x38c] sm:$0xf] }
 0x24d   :  { %5801 = vmatpush.bf16.msrb.mxu2 %v12493_v57  ;;  %v14519_v57 = vld [vmem:[#allocation2 + $0x3ec] sm:$0xf]  ;;  %v10094_v30 = vld [vmem:[#allocation2 + $0x398] sm:$0xf0] }
 0x24e   :  { %5815 = vmatpush.bf16.msrb.mxu3 %v12621_v37  ;;  %v9889_v37 = vor.u32 %v14455_v52, %v9886_v21  ;;  %v10145_v53 = vor.u32 %v14519_v57, %v10142_v61  ;;  %v9982_v52 = vld [vmem:[#allocation2 + $0x2b8] sm:$0xf0]  ;;  %v14443_v61 = vld [vmem:[#allocation2 + $0x18c] sm:$0xf] }
 0x24f   :  { %5774 = vmatpush.bf16.msrb.mxu0 %v12221_v16  ;;  %v9870_v16 = vld [vmem:[#allocation2 + $0x1d8] sm:$0xf0]  ;;  %v14407_v14 = vld [vmem:[#allocation2 + $0x6c] sm:$0xf] }
 0x250   :  { %5788 = vmatpush.bf16.msrb.mxu1 %v12349_v48  ;;  %v14515_v48 = vld [vmem:[#allocation2 + $0x3cc] sm:$0xf]  ;;  %v9873_v49 = vor.u32 %v14451_v54, %v9870_v16  ;;  %v10110_v21 = vld [vmem:[#allocation2 + $0x3b8] sm:$0xf0] }
 0x251   :  { %5802 = vmatpush.bf16.msrb.mxu2 %v12477_v42  ;;  %v10126_v42 = vld [vmem:[#allocation2 + $0x3d8] sm:$0xf0] }
 0x252   :  { %5816 = vmatpush.bf16.msrb.mxu3 %v12605_v27  ;;  %v14415_v27 = vld [vmem:[#allocation2 + $0xac] sm:$0xf]  ;;  %v10129_v63 = vor.u32 %v14515_v48, %v10126_v42  ;;  %v9710_v57 = vld [vmem:[#allocation2 + $0x98] sm:$0xf0]  ;;  %v10097_v42 = vor.u32 %v14507_v24, %v10094_v30 }
 0x253   :  { %5775 = vmatpush.bf16.msrb.mxu0 %v12205_v62  ;;  %v14511_v62 = vld [vmem:[#allocation2 + $0x3ac] sm:$0xf]  ;;  %v9729_v20 = vor.u32 %v14415_v27, %v9726_v15  ;;  %v9694_v50 = vld [vmem:[#allocation2 + $0x78] sm:$0xf0] }
 0x254   :  { %5789 = vmatpush.bf16.msrb.mxu1 %v12333_v7  ;;  %v9985_v7 = vor.u32 %v14479_v0, %v9982_v52  ;;  %v14439_v48 = vld [vmem:[#allocation2 + $0x16c] sm:$0xf]  ;;  %v10078_v15 = vld [vmem:[#allocation2 + $0x378] sm:$0xf0]  ;;  %v9697_v33 = vor.u32 %v14407_v14, %v9694_v50 }
 0x255   :  { %5803 = vmatpush.bf16.msrb.mxu2 %v12461_v26  ;;  %v14411_v26 = vld [vmem:[#allocation2 + $0x8c] sm:$0xf]  ;;  %v9678_v52 = vld [vmem:[#allocation2 + $0x58] sm:$0xf0] }
 0x256   :  { %5817 = vmatpush.bf16.msrb.mxu3 %v12589_v34  ;;  %5776 = vmatmul.bf16.vlgmr.msrb.gmra.mxu0 %v15910_v19  ;;  %v10113_v34 = vor.u32 %v14511_v62, %v10110_v21  ;;  %v9713_v54 = vor.u32 %v14411_v26, %v9710_v57  ;;  %v14503_v27 = vld [vmem:[#allocation2 + $0x36c] sm:$0xf]  ;;  %v10062_v57 = vld [vmem:[#allocation2 + $0x358] sm:$0xf0] }
 0x257   :  { %5824 = vmatpush.bf16.msra.mxu0 %v9761_v45  ;;  %5790 = vmatmul.bf16.vlgmr.msrb.gmra.mxu1 %v15914_v25  ;;  %v9838_v45 = vld [vmem:[#allocation2 + $0x198] sm:$0xf0]  ;;  %v14403_v0 = vld [vmem:[#allocation2 + $0x4c] sm:$0xf]  ;;  %v10081_v21 = vor.u32 %v14503_v27, %v10078_v15 }
 0x258   :  { %5838 = vmatpush.bf16.msra.mxu1 %v9889_v37  ;;  %5804 = vmatmul.bf16.vlgmr.msrb.gmra.mxu2 %v15912_v23  ;;  %v14475_v37 = vld [vmem:[#allocation2 + $0x28c] sm:$0xf]  ;;  %v10046_v50 = vld [vmem:[#allocation2 + $0x338] sm:$0xf0] }
 0x259   :  { %5852 = vmatpush.bf16.msra.mxu2 %v10017_v6  ;;  %5818 = vmatmul.bf16.vlgmr.msrb.gmra.mxu3 %v15918_v29  ;;  %v9966_v6 = vld [vmem:[#allocation2 + $0x298] sm:$0xf0]  ;;  %v14435_v62 = vld [vmem:[#allocation2 + $0x14c] sm:$0xf] }
 0x25a   :  { %5866 = vmatpush.bf16.msra.mxu3 %v10145_v53  ;;  %v9841_v53 = vor.u32 %v14443_v61, %v9838_v45  ;;  %v9969_v16 = vor.u32 %v14475_v37, %v9966_v6  ;;  %v14499_v26 = vld [vmem:[#allocation2 + $0x34c] sm:$0xf]  ;;  %v9681_v61 = vor.u32 %v14403_v0, %v9678_v52  ;;  %v9662_v6 = vld [vmem:[#allocation2 + $0x38] sm:$0xf0] }
 0x25b   :  { %5825 = vmatpush.bf16.msra.mxu0 %v9745_v5  ;;  %v9822_v5 = vld [vmem:[#allocation2 + $0x178] sm:$0xf0]  ;;  %v14399_v37 = vld [vmem:[#allocation2 + $0x2c] sm:$0xf]  ;;  %v10065_v30 = vor.u32 %v14499_v26, %v10062_v57 }
 0x25c   :  { %5839 = vmatpush.bf16.msra.mxu1 %v9873_v49  ;;  %v14471_v49 = vld [vmem:[#allocation2 + $0x26c] sm:$0xf]  ;;  %v9774_v15 = vld [vmem:[#allocation2 + $0x118] sm:$0xf0] }
 0x25d   :  { %5853 = vmatpush.bf16.msra.mxu2 %v10001_v2  ;;  %v9950_v2 = vld [vmem:[#allocation2 + $0x278] sm:$0xf0]  ;;  %v14431_v24 = vld [vmem:[#allocation2 + $0x12c] sm:$0xf] }
 0x25e   :  { %5867 = vmatpush.bf16.msra.mxu3 %v10129_v63  ;;  %v9825_v63 = vor.u32 %v14439_v48, %v9822_v5  ;;  %v9953_v12 = vor.u32 %v14471_v49, %v9950_v2  ;;  %v14495_v14 = vld [vmem:[#allocation2 + $0x32c] sm:$0xf]  ;;  %v9665_v48 = vor.u32 %v14399_v37, %v9662_v6  ;;  %v9646_v5 = vld [vmem:[#allocation2 + $0x18] sm:$0xf0] }
 0x25f   :  { %5826 = vmatpush.bf16.msra.mxu0 %v9729_v20  ;;  %v9806_v20 = vld [vmem:[#allocation2 + $0x158] sm:$0xf0]  ;;  %v14427_v27 = vld [vmem:[#allocation2 + $0x10c] sm:$0xf] }
 0x260   :  { %5840 = vmatpush.bf16.msra.mxu1 %v9857_v9  ;;  %v14467_v9 = vld [vmem:[#allocation2 + $0x24c] sm:$0xf]  ;;  %v10030_v52 = vld [vmem:[#allocation2 + $0x318] sm:$0xf0] }
 0x261   :  { %5854 = vmatpush.bf16.msra.mxu2 %v9985_v7  ;;  %v9934_v7 = vld [vmem:[#allocation2 + $0x258] sm:$0xf0]  ;;  %v14491_v0 = vld [vmem:[#allocation2 + $0x30c] sm:$0xf] }
 0x262   :  { %5868 = vmatpush.bf16.msra.mxu3 %v10113_v34  ;;  %v9809_v34 = vor.u32 %v14435_v62, %v9806_v20  ;;  %v9937_v45 = vor.u32 %v14467_v9, %v9934_v7  ;;  %v14551_v62 = vld [vmem:[#allocation2 + $0x4ec] sm:$0xf]  ;;  %v10398_v7 = vld [vmem:[#allocation2 + $0x5f8] sm:$0xf0]  ;;  %v10033_v6 = vor.u32 %v14491_v0, %v10030_v52 }
 0x263   :  { %5827 = vmatpush.bf16.msra.mxu0 %v9713_v54  ;;  %v9790_v54 = vld [vmem:[#allocation2 + $0x138] sm:$0xf0]  ;;  %v14583_v20 = vld [vmem:[#allocation2 + $0x5ec] sm:$0xf] }
 0x264   :  { %5841 = vmatpush.bf16.msra.mxu1 %v9841_v53  ;;  %v14463_v53 = vld [vmem:[#allocation2 + $0x22c] sm:$0xf]  ;;  %v9793_v49 = vor.u32 %v14431_v24, %v9790_v54  ;;  %v10526_v57 = vld [vmem:[#allocation2 + $0x6f8] sm:$0xf0] }
 0x265   :  { %5855 = vmatpush.bf16.msra.mxu2 %v9969_v16  ;;  %v9918_v16 = vld [vmem:[#allocation2 + $0x238] sm:$0xf0]  ;;  %v14615_v26 = vld [vmem:[#allocation2 + $0x6ec] sm:$0xf] }
 0x266   :  { %5869 = vmatpush.bf16.msra.mxu3 %v10097_v42  ;;  %v14395_v42 = vld [vmem:[#allocation2 + $0xc] sm:$0xf]  ;;  %v9921_v2 = vor.u32 %v14463_v53, %v9918_v16  ;;  %v10654_v37 = vld [vmem:[#allocation2 + $0x7f8] sm:$0xf0]  ;;  %v10529_v54 = vor.u32 %v14615_v26, %v10526_v57 }
 0x267   :  { %5828 = vmatpush.bf16.msra.mxu0 %v9697_v33  ;;  %v14459_v33 = vld [vmem:[#allocation2 + $0x20c] sm:$0xf]  ;;  %v9649_v9 = vor.u32 %v14395_v42, %v9646_v5  ;;  %v10254_v16 = vld [vmem:[#allocation2 + $0x4d8] sm:$0xf0] }
 0x268   :  { %5842 = vmatpush.bf16.msra.mxu1 %v9825_v63  ;;  %v10049_v63 = vor.u32 %v14495_v14, %v10046_v50  ;;  %v14547_v53 = vld [vmem:[#allocation2 + $0x4cc] sm:$0xf]  ;;  %v10510_v5 = vld [vmem:[#allocation2 + $0x6d8] sm:$0xf0] }
 0x269   :  { %5856 = vmatpush.bf16.msra.mxu2 %v9953_v12  ;;  %v9902_v12 = vld [vmem:[#allocation2 + $0x218] sm:$0xf0]  ;;  %v14579_v14 = vld [vmem:[#allocation2 + $0x5cc] sm:$0xf] }
 0x26a   :  { %5870 = vmatpush.bf16.msra.mxu3 %v10081_v21  ;;  %v10270_v21 = vld [vmem:[#allocation2 + $0x4f8] sm:$0xf0]  ;;  %v14611_v42 = vld [vmem:[#allocation2 + $0x6cc] sm:$0xf] }
 0x26b   :  { %5829 = vmatpush.bf16.msra.mxu0 %v9681_v61  ;;  %v9777_v61 = vor.u32 %v14427_v27, %v9774_v15  ;;  %v10273_v24 = vor.u32 %v14551_v62, %v10270_v21  ;;  %v10257_v27 = vor.u32 %v14547_v53, %v10254_v16  ;;  %v14575_v0 = vld [vmem:[#allocation2 + $0x5ac] sm:$0xf]  ;;  %v10366_v62 = vld [vmem:[#allocation2 + $0x5b8] sm:$0xf0] }
 0x26c   :  { %5843 = vmatpush.bf16.msra.mxu1 %v9809_v34  ;;  %v9905_v34 = vor.u32 %v14459_v33, %v9902_v12  ;;  %v10513_v33 = vor.u32 %v14611_v42, %v10510_v5  ;;  %v10238_v12 = vld [vmem:[#allocation2 + $0x4b8] sm:$0xf0]  ;;  %v14607_v21 = vld [vmem:[#allocation2 + $0x6ac] sm:$0xf]  ;;  %v10369_v57 = vor.u32 %v14575_v0, %v10366_v62 }
 0x26d   :  { %5857 = vmatpush.bf16.msra.mxu2 %v9937_v45  ;;  %v14647_v45 = vld [vmem:[#allocation2 + $0x7ec] sm:$0xf]  ;;  %v10334_v42 = vld [vmem:[#allocation2 + $0x578] sm:$0xf0] }
 0x26e   :  { %5871 = vmatpush.bf16.msra.mxu3 %v10065_v30  ;;  %v10401_v30 = vor.u32 %v14583_v20, %v10398_v7  ;;  %v10657_v50 = vor.u32 %v14647_v45, %v10654_v37  ;;  %v10494_v20 = vld [vmem:[#allocation2 + $0x6b8] sm:$0xf0]  ;;  %v14571_v37 = vld [vmem:[#allocation2 + $0x58c] sm:$0xf] }
 0x26f   :  { %5830 = vmatpush.bf16.msra.mxu0 %v9665_v48  ;;  %v10382_v48 = vld [vmem:[#allocation2 + $0x5d8] sm:$0xf0]  ;;  %v14535_v16 = vld [vmem:[#allocation2 + $0x46c] sm:$0xf] }
 0x270   :  { %5844 = vmatpush.bf16.msra.mxu1 %v9793_v49  ;;  %v14643_v49 = vld [vmem:[#allocation2 + $0x7cc] sm:$0xf]  ;;  %v10385_v15 = vor.u32 %v14579_v14, %v10382_v48  ;;  %v10622_v7 = vld [vmem:[#allocation2 + $0x7b8] sm:$0xf0] }
 0x271   :  { %5858 = vmatpush.bf16.msra.mxu2 %v9921_v2  ;;  %v10638_v2 = vld [vmem:[#allocation2 + $0x7d8] sm:$0xf0]  ;;  %v14599_v5 = vld [vmem:[#allocation2 + $0x66c] sm:$0xf] }
 0x272   :  { %5872 = vmatpush.bf16.msra.mxu3 %v10049_v63  ;;  %v14543_v63 = vld [vmem:[#allocation2 + $0x4ac] sm:$0xf]  ;;  %v10641_v52 = vor.u32 %v14643_v49, %v10638_v2  ;;  %v10222_v45 = vld [vmem:[#allocation2 + $0x498] sm:$0xf0] }
 0x273   :  { %5831 = vmatpush.bf16.msra.mxu0 %v9649_v9  ;;  %v14639_v9 = vld [vmem:[#allocation2 + $0x7ac] sm:$0xf]  ;;  %v10241_v26 = vor.u32 %v14543_v63, %v10238_v12  ;;  %v10206_v14 = vld [vmem:[#allocation2 + $0x478] sm:$0xf0] }
 0x274   :  { %5845 = vmatpush.bf16.msra.mxu1 %v9777_v61  ;;  %v10497_v61 = vor.u32 %v14607_v21, %v10494_v20  ;;  %v10462_v49 = vld [vmem:[#allocation2 + $0x678] sm:$0xf0]  ;;  %v14631_v2 = vld [vmem:[#allocation2 + $0x76c] sm:$0xf] }
 0x275   :  { %5859 = vmatpush.bf16.msra.mxu2 %v9905_v34  ;;  %v14539_v34 = vld [vmem:[#allocation2 + $0x48c] sm:$0xf]  ;;  %v10465_v63 = vor.u32 %v14599_v5, %v10462_v49  ;;  %v10190_v0 = vld [vmem:[#allocation2 + $0x458] sm:$0xf0] }
 0x276   :  { %5873 = vmatpush.bf16.msra.mxu3 %v10033_v6  ;;  %5832 = vmatmul.bf16.vlgmr.msra.gmra.mxu0 %v15711_v58  ;;  %v10625_v6 = vor.u32 %v14639_v9, %v10622_v7  ;;  %v10350_v58 = vld [vmem:[#allocation2 + $0x598] sm:$0xf0]  ;;  %v14531_v12 = vld [vmem:[#allocation2 + $0x44c] sm:$0xf] }
 0x277   :  { %5880 = vmatpush.bf16.msrb.mxu0 %v10273_v24  ;;  %5846 = vmatmul.bf16.vlgmr.msra.gmra.mxu1 %v15729_v10  ;;  %v14603_v24 = vld [vmem:[#allocation2 + $0x68c] sm:$0xf]  ;;  %v10225_v10 = vor.u32 %v14539_v34, %v10222_v45  ;;  %v10353_v53 = vor.u32 %v14571_v37, %v10350_v58  ;;  %v10318_v21 = vld [vmem:[#allocation2 + $0x558] sm:$0xf0] }
 0x278   :  { %5894 = vmatpush.bf16.msrb.mxu1 %v10401_v30  ;;  %5860 = vmatmul.bf16.vlgmr.msra.gmra.mxu2 %v15716_v1  ;;  %v10478_v30 = vld [vmem:[#allocation2 + $0x698] sm:$0xf0]  ;;  %v14595_v20 = vld [vmem:[#allocation2 + $0x64c] sm:$0xf] }
 0x279   :  { %5908 = vmatpush.bf16.msrb.mxu2 %v10529_v54  ;;  %5874 = vmatmul.bf16.vlgmr.msra.gmra.mxu3 %v15734_v17  ;;  %v14635_v54 = vld [vmem:[#allocation2 + $0x78c] sm:$0xf]  ;;  %v10606_v1 = vld [vmem:[#allocation2 + $0x798] sm:$0xf0]  ;;  %v10481_v17 = vor.u32 %v14603_v24, %v10478_v30 }
 0x27a   :  { %5922 = vmatpush.bf16.msrb.mxu3 %v10657_v50  ;;  %v14567_v50 = vld [vmem:[#allocation2 + $0x56c] sm:$0xf]  ;;  %v10609_v48 = vor.u32 %v14635_v54, %v10606_v1  ;;  %v10446_v9 = vld [vmem:[#allocation2 + $0x658] sm:$0xf0] }
 0x27b   :  { %5881 = vmatpush.bf16.msrb.mxu0 %v10257_v27  ;;  %v10590_v27 = vld [vmem:[#allocation2 + $0x778] sm:$0xf0]  ;;  %v14627_v7 = vld [vmem:[#allocation2 + $0x74c] sm:$0xf]  ;;  %v10449_v34 = vor.u32 %v14595_v20, %v10446_v9 }
 0x27c   :  { %5895 = vmatpush.bf16.msrb.mxu1 %v10385_v15  ;;  %v10209_v15 = vor.u32 %v14535_v16, %v10206_v14  ;;  %v10593_v62 = vor.u32 %v14631_v2, %v10590_v27  ;;  %v14527_v45 = vld [vmem:[#allocation2 + $0x42c] sm:$0xf]  ;;  %v10174_v37 = vld [vmem:[#allocation2 + $0x438] sm:$0xf0] }
 0x27d   :  { %5909 = vmatpush.bf16.msrb.mxu2 %v10513_v33  ;;  %v10337_v33 = vor.u32 %v14567_v50, %v10334_v42  ;;  %v10302_v24 = vld [vmem:[#allocation2 + $0x538] sm:$0xf0]  ;;  %v14591_v30 = vld [vmem:[#allocation2 + $0x62c] sm:$0xf] }
 0x27e   :  { %5923 = vmatpush.bf16.msrb.mxu3 %v10641_v52  ;;  %v14563_v52 = vld [vmem:[#allocation2 + $0x54c] sm:$0xf]  ;;  %v10430_v54 = vld [vmem:[#allocation2 + $0x638] sm:$0xf0] }
 0x27f   :  { %5882 = vmatpush.bf16.msrb.mxu0 %v10241_v26  ;;  %v10574_v26 = vld [vmem:[#allocation2 + $0x758] sm:$0xf0]  ;;  %v14623_v1 = vld [vmem:[#allocation2 + $0x72c] sm:$0xf]  ;;  %v10433_v50 = vor.u32 %v14591_v30, %v10430_v54 }
 0x280   :  { %5896 = vmatpush.bf16.msrb.mxu1 %v10369_v57  ;;  %v10193_v57 = vor.u32 %v14531_v12, %v10190_v0  ;;  %v10577_v58 = vor.u32 %v14627_v7, %v10574_v26  ;;  %v10158_v16 = vld [vmem:[#allocation2 + $0x418] sm:$0xf0]  ;;  %v14587_v5 = vld [vmem:[#allocation2 + $0x60c] sm:$0xf] }
 0x281   :  { %5910 = vmatpush.bf16.msrb.mxu2 %v10497_v61  ;;  %v10321_v61 = vor.u32 %v14563_v52, %v10318_v21  ;;  %v10286_v42 = vld [vmem:[#allocation2 + $0x518] sm:$0xf0]  ;;  %v14619_v27 = vld [vmem:[#allocation2 + $0x70c] sm:$0xf] }
 0x282   :  { %5924 = vmatpush.bf16.msrb.mxu3 %v10625_v6  ;;  %v14559_v6 = vld [vmem:[#allocation2 + $0x52c] sm:$0xf]  ;;  %v10414_v2 = vld [vmem:[#allocation2 + $0x618] sm:$0xf0] }
 0x283   :  { %5883 = vmatpush.bf16.msrb.mxu0 %v10225_v10  ;;  %v10558_v10 = vld [vmem:[#allocation2 + $0x738] sm:$0xf0]  ;;  %v10305_v14 = vor.u32 %v14559_v6, %v10302_v24  ;;  %v14711_v12 = vld [vmem:[#allocation2 + $0x9ec] sm:$0xf]  ;;  %v10417_v9 = vor.u32 %v14587_v5, %v10414_v2 }
 0x284   :  { %5897 = vmatpush.bf16.msrb.mxu1 %v10353_v53  ;;  %v10177_v53 = vor.u32 %v14527_v45, %v10174_v37  ;;  %v10561_v49 = vor.u32 %v14623_v1, %v10558_v10  ;;  %v10910_v52 = vld [vmem:[#allocation2 + $0x9f8] sm:$0xf0]  ;;  %v14775_v7 = vld [vmem:[#allocation2 + $0xbec] sm:$0xf] }
 0x285   :  { %5911 = vmatpush.bf16.msrb.mxu2 %v10481_v17  ;;  %v14523_v17 = vld [vmem:[#allocation2 + $0x40c] sm:$0xf]  ;;  %v11038_v21 = vld [vmem:[#allocation2 + $0xaf8] sm:$0xf0] }
 0x286   :  { %5925 = vmatpush.bf16.msrb.mxu3 %v10609_v48  ;;  %v14555_v48 = vld [vmem:[#allocation2 + $0x50c] sm:$0xf]  ;;  %v10161_v0 = vor.u32 %v14523_v17, %v10158_v16  ;;  %v11166_v26 = vld [vmem:[#allocation2 + $0xbf8] sm:$0xf0] }
 0x287   :  { %5884 = vmatpush.bf16.msrb.mxu0 %v10209_v15  ;;  %v10542_v15 = vld [vmem:[#allocation2 + $0x718] sm:$0xf0]  ;;  %v10289_v20 = vor.u32 %v14555_v48, %v10286_v42  ;;  %v14675_v37 = vld [vmem:[#allocation2 + $0x8cc] sm:$0xf]  ;;  %v11169_v24 = vor.u32 %v14775_v7, %v11166_v26 }
 0x288   :  { %5898 = vmatpush.bf16.msrb.mxu1 %v10337_v33  ;;  %v14679_v33 = vld [vmem:[#allocation2 + $0x8ec] sm:$0xf]  ;;  %v10766_v6 = vld [vmem:[#allocation2 + $0x8d8] sm:$0xf0] }
 0x289   :  { %5912 = vmatpush.bf16.msrb.mxu2 %v10465_v63  ;;  %v10782_v63 = vld [vmem:[#allocation2 + $0x8f8] sm:$0xf0]  ;;  %v14739_v54 = vld [vmem:[#allocation2 + $0xacc] sm:$0xf]  ;;  %v10769_v17 = vor.u32 %v14675_v37, %v10766_v6 }
 0x28a   :  { %5926 = vmatpush.bf16.msrb.mxu3 %v10593_v62  ;;  %v14743_v62 = vld [vmem:[#allocation2 + $0xaec] sm:$0xf]  ;;  %v10894_v30 = vld [vmem:[#allocation2 + $0x9d8] sm:$0xf0] }
 0x28b   :  { %5885 = vmatpush.bf16.msrb.mxu0 %v10193_v57  ;;  %v10545_v57 = vor.u32 %v14619_v27, %v10542_v15  ;;  %v11041_v45 = vor.u32 %v14743_v62, %v11038_v21  ;;  %v11022_v1 = vld [vmem:[#allocation2 + $0xad8] sm:$0xf0]  ;;  %v14771_v10 = vld [vmem:[#allocation2 + $0xbcc] sm:$0xf] }
 0x28c   :  { %5899 = vmatpush.bf16.msrb.mxu1 %v10321_v61  ;;  %v10785_v61 = vor.u32 %v14679_v33, %v10782_v63  ;;  %v10750_v48 = vld [vmem:[#allocation2 + $0x8b8] sm:$0xf0]  ;;  %v14703_v42 = vld [vmem:[#allocation2 + $0x9ac] sm:$0xf] }
 0x28d   :  { %5913 = vmatpush.bf16.msrb.mxu2 %v10449_v34  ;;  %v10913_v34 = vor.u32 %v14711_v12, %v10910_v52  ;;  %v14735_v2 = vld [vmem:[#allocation2 + $0xaac] sm:$0xf]  ;;  %v11006_v27 = vld [vmem:[#allocation2 + $0xab8] sm:$0xf0] }
 0x28e   :  { %5927 = vmatpush.bf16.msrb.mxu3 %v10577_v58  ;;  %v14707_v58 = vld [vmem:[#allocation2 + $0x9cc] sm:$0xf]  ;;  %v11134_v33 = vld [vmem:[#allocation2 + $0xbb8] sm:$0xf0] }
 0x28f   :  { %5886 = vmatpush.bf16.msrb.mxu0 %v10177_v53  ;;  %v11150_v53 = vld [vmem:[#allocation2 + $0xbd8] sm:$0xf0]  ;;  %v10897_v16 = vor.u32 %v14707_v58, %v10894_v30  ;;  %v14767_v15 = vld [vmem:[#allocation2 + $0xbac] sm:$0xf] }
 0x290   :  { %5900 = vmatpush.bf16.msrb.mxu1 %v10305_v14  ;;  %v11025_v14 = vor.u32 %v14739_v54, %v11022_v1  ;;  %v11153_v5 = vor.u32 %v14771_v10, %v11150_v53  ;;  %v14667_v52 = vld [vmem:[#allocation2 + $0x88c] sm:$0xf]  ;;  %v11137_v21 = vor.u32 %v14767_v15, %v11134_v33  ;;  %v10846_v6 = vld [vmem:[#allocation2 + $0x978] sm:$0xf0]  ;;  %v16096_v10 = vpop.f32.mrf.mxu0  ;;  %v16098_v33 = vpop.f32.mrf.mxu1 }
 0x291   :  { %5914 = vmatpush.bf16.msrb.mxu2 %v10433_v50  ;;  %v14671_v50 = vld [vmem:[#allocation2 + $0x8ac] sm:$0xf]  ;;  %v11102_v54 = vld [vmem:[#allocation2 + $0xb78] sm:$0xf0]  ;;  %16498 = vst [vmem:[#allocation48_spill] sm:$0xff] %v16096_v10 }
 0x292   :  { %5928 = vmatpush.bf16.msrb.mxu3 %v10561_v49  ;;  %v10878_v49 = vld [vmem:[#allocation2 + $0x9b8] sm:$0xf0]  ;;  %v10753_v63 = vor.u32 %v14671_v50, %v10750_v48  ;;  %v14699_v62 = vld [vmem:[#allocation2 + $0x98c] sm:$0xf]  ;;  %16499 = vst [vmem:[#allocation49_spill] sm:$0xff] %v16098_v33 }
 0x293   :  { %5887 = vmatpush.bf16.msrb.mxu0 %v10161_v0  ;;  %v10881_v12 = vor.u32 %v14703_v42, %v10878_v49  ;;  %v11009_v0 = vor.u32 %v14735_v2, %v11006_v27  ;;  %v14763_v7 = vld [vmem:[#allocation2 + $0xb8c] sm:$0xf]  ;;  %v10830_v42 = vld [vmem:[#allocation2 + $0x958] sm:$0xf0] }
 0x294   :  { %5901 = vmatpush.bf16.msrb.mxu1 %v10289_v20  ;;  %v10862_v20 = vld [vmem:[#allocation2 + $0x998] sm:$0xf0]  ;;  %v14727_v58 = vld [vmem:[#allocation2 + $0xa6c] sm:$0xf] }
 0x295   :  { %5915 = vmatpush.bf16.msrb.mxu2 %v10417_v9  ;;  %v14731_v9 = vld [vmem:[#allocation2 + $0xa8c] sm:$0xf]  ;;  %v10958_v49 = vld [vmem:[#allocation2 + $0xa58] sm:$0xf0] }
 0x296   :  { %5929 = vmatpush.bf16.msrb.mxu3 %v10545_v57  ;;  %5888 = vmatmul.bf16.vlgmr.msrb.gmra.mxu0 %v15762_v39  ;;  %v10734_v39 = vld [vmem:[#allocation2 + $0x898] sm:$0xf0]  ;;  %v14759_v30 = vld [vmem:[#allocation2 + $0xb6c] sm:$0xf] }
 0x297   :  { %5936 = vmatpush.bf16.msra.mxu0 %v10785_v61  ;;  %5902 = vmatmul.bf16.vlgmr.msrb.gmra.mxu1 %v15766_v44  ;;  %v11118_v44 = vld [vmem:[#allocation2 + $0xb98] sm:$0xf0]  ;;  %v10737_v26 = vor.u32 %v14667_v52, %v10734_v39  ;;  %v14663_v61 = vld [vmem:[#allocation2 + $0x86c] sm:$0xf]  ;;  %v11105_v48 = vor.u32 %v14759_v30, %v11102_v54 }
 0x298   :  { %5950 = vmatpush.bf16.msra.mxu1 %v10913_v34  ;;  %5916 = vmatmul.bf16.vlgmr.msrb.gmra.mxu2 %v15764_v43  ;;  %v10990_v43 = vld [vmem:[#allocation2 + $0xa98] sm:$0xf0]  ;;  %v11121_v37 = vor.u32 %v14763_v7, %v11118_v44  ;;  %v14691_v50 = vld [vmem:[#allocation2 + $0x94c] sm:$0xf] }
 0x299   :  { %5964 = vmatpush.bf16.msra.mxu2 %v11041_v45  ;;  %5930 = vmatmul.bf16.vlgmr.msrb.gmra.mxu3 %v15768_v47  ;;  %v10865_v47 = vor.u32 %v14699_v62, %v10862_v20  ;;  %v10993_v57 = vor.u32 %v14731_v9, %v10990_v43  ;;  %v10718_v34 = vld [vmem:[#allocation2 + $0x878] sm:$0xf0]  ;;  %v14695_v45 = vld [vmem:[#allocation2 + $0x96c] sm:$0xf]  ;;  %v16100_v43 = vpop.f32.mrf.mxu2 }
 0x29a   :  { %5978 = vmatpush.bf16.msra.mxu3 %v11169_v24  ;;  %v10974_v24 = vld [vmem:[#allocation2 + $0xa78] sm:$0xf0]  ;;  %v10721_v1 = vor.u32 %v14663_v61, %v10718_v34  ;;  %v10849_v53 = vor.u32 %v14695_v45, %v10846_v6  ;;  %v14755_v2 = vld [vmem:[#allocation2 + $0xb4c] sm:$0xf]  ;;  %16500 = vst [vmem:[#allocation50_spill] sm:$0xff] %v16100_v43  ;;  %v16102_v61 = vpop.f32.mrf.mxu0 }
 0x29b   :  { %5937 = vmatpush.bf16.msra.mxu0 %v10769_v17  ;;  %v10977_v17 = vor.u32 %v14727_v58, %v10974_v24  ;;  %v11086_v27 = vld [vmem:[#allocation2 + $0xb58] sm:$0xf0]  ;;  %v14687_v39 = vld [vmem:[#allocation2 + $0x92c] sm:$0xf] }
 0x29c   :  { %5951 = vmatpush.bf16.msra.mxu1 %v10897_v16  ;;  %v14659_v16 = vld [vmem:[#allocation2 + $0x84c] sm:$0xf]  ;;  %v10686_v52 = vld [vmem:[#allocation2 + $0x838] sm:$0xf0]  ;;  %v11089_v62 = vor.u32 %v14755_v2, %v11086_v27 }
 0x29d   :  { %5965 = vmatpush.bf16.msra.mxu2 %v11025_v14  ;;  %v10702_v14 = vld [vmem:[#allocation2 + $0x858] sm:$0xf0]  ;;  %v14719_v20 = vld [vmem:[#allocation2 + $0xa2c] sm:$0xf] }
 0x29e   :  { %5979 = vmatpush.bf16.msra.mxu3 %v11153_v5  ;;  %v14723_v5 = vld [vmem:[#allocation2 + $0xa4c] sm:$0xf]  ;;  %v10705_v15 = vor.u32 %v14659_v16, %v10702_v14  ;;  %v10942_v9 = vld [vmem:[#allocation2 + $0xa38] sm:$0xf0] }
 0x29f   :  { %5938 = vmatpush.bf16.msra.mxu0 %v10753_v63  ;;  %v10833_v63 = vor.u32 %v14691_v50, %v10830_v42  ;;  %v14751_v7 = vld [vmem:[#allocation2 + $0xb2c] sm:$0xf]  ;;  %v11070_v44 = vld [vmem:[#allocation2 + $0xb38] sm:$0xf0]  ;;  %v10945_v45 = vor.u32 %v14719_v20, %v10942_v9 }
 0x2a0   :  { %5952 = vmatpush.bf16.msra.mxu1 %v10881_v12  ;;  %v10961_v12 = vor.u32 %v14723_v5, %v10958_v49  ;;  %v10798_v6 = vld [vmem:[#allocation2 + $0x918] sm:$0xf0]  ;;  %v14715_v58 = vld [vmem:[#allocation2 + $0xa0c] sm:$0xf]  ;;  %v11073_v24 = vor.u32 %v14751_v7, %v11070_v44  ;;  %v16106_v49 = vpop.f32.mrf.mxu1 }
 0x2a1   :  { %5966 = vmatpush.bf16.msra.mxu2 %v11009_v0  ;;  %v14655_v0 = vld [vmem:[#allocation2 + $0x82c] sm:$0xf]  ;;  %v10926_v30 = vld [vmem:[#allocation2 + $0xa18] sm:$0xf0] }
 0x2a2   :  { %5980 = vmatpush.bf16.msra.mxu3 %v11137_v21  ;;  %v10814_v21 = vld [vmem:[#allocation2 + $0x938] sm:$0xf0]  ;;  %v14747_v54 = vld [vmem:[#allocation2 + $0xb0c] sm:$0xf]  ;;  %v10929_v27 = vor.u32 %v14715_v58, %v10926_v30 }
 0x2a3   :  { %5939 = vmatpush.bf16.msra.mxu0 %v10737_v26  ;;  %v10689_v26 = vor.u32 %v14655_v0, %v10686_v52  ;;  %v10817_v34 = vor.u32 %v14687_v39, %v10814_v21  ;;  %v11294_v16 = vld [vmem:[#allocation2 + $0xcf8] sm:$0xf0]  ;;  %v14839_v14 = vld [vmem:[#allocation2 + $0xdec] sm:$0xf]  ;;  %v16108_v52 = vpop.f32.mrf.mxu2 }
 0x2a4   :  { %5953 = vmatpush.bf16.msra.mxu1 %v10865_v47  ;;  %v14651_v47 = vld [vmem:[#allocation2 + $0x80c] sm:$0xf]  ;;  %v11550_v5 = vld [vmem:[#allocation2 + $0xef8] sm:$0xf0] }
 0x2a5   :  { %5967 = vmatpush.bf16.msra.mxu2 %v10993_v57  ;;  %v10670_v57 = vld [vmem:[#allocation2 + $0x818] sm:$0xf0]  ;;  %v14871_v42 = vld [vmem:[#allocation2 + $0xeec] sm:$0xf] }
 0x2a6   :  { %5981 = vmatpush.bf16.msra.mxu3 %v11121_v37  ;;  %v14683_v37 = vld [vmem:[#allocation2 + $0x90c] sm:$0xf]  ;;  %v10673_v50 = vor.u32 %v14651_v47, %v10670_v57  ;;  %v11278_v20 = vld [vmem:[#allocation2 + $0xcd8] sm:$0xf0] }
 0x2a7   :  { %5940 = vmatpush.bf16.msra.mxu0 %v10721_v1  ;;  %v11054_v1 = vld [vmem:[#allocation2 + $0xb18] sm:$0xf0]  ;;  %v10801_v2 = vor.u32 %v14683_v37, %v10798_v6  ;;  %v14803_v21 = vld [vmem:[#allocation2 + $0xccc] sm:$0xf]  ;;  %v16110_v37 = vpop.f32.mrf.mxu0 }
 0x2a8   :  { %5954 = vmatpush.bf16.msra.mxu1 %v10849_v53  ;;  %v16104_v53 = vpop.f32.mrf.mxu3  ;;  %v14835_v9 = vld [vmem:[#allocation2 + $0xdcc] sm:$0xf]  ;;  %v11406_v44 = vld [vmem:[#allocation2 + $0xdd8] sm:$0xf0] }
 0x2a9   :  { %5968 = vmatpush.bf16.msra.mxu2 %v10977_v17  ;;  %16501 = vst [vmem:[#allocation51_spill] sm:$0xff] %v16104_v53  ;;  %v14807_v17 = vld [vmem:[#allocation2 + $0xcec] sm:$0xf]  ;;  %v11534_v47 = vld [vmem:[#allocation2 + $0xed8] sm:$0xf0]  ;;  %v11409_v58 = vor.u32 %v14835_v9, %v11406_v44 }
 0x2aa   :  { %5982 = vmatpush.bf16.msra.mxu3 %v11105_v48  ;;  %v11422_v48 = vld [vmem:[#allocation2 + $0xdf8] sm:$0xf0]  ;;  %v11297_v0 = vor.u32 %v14807_v17, %v11294_v16  ;;  %v14899_v57 = vld [vmem:[#allocation2 + $0xfcc] sm:$0xf] }
 0x2ab   :  { %5941 = vmatpush.bf16.msra.mxu0 %v10705_v15  ;;  %v14903_v15 = vld [vmem:[#allocation2 + $0xfec] sm:$0xf]  ;;  %v11425_v39 = vor.u32 %v14839_v14, %v11422_v48  ;;  %v11390_v16 = vld [vmem:[#allocation2 + $0xdb8] sm:$0xf0] }
 0x2ac   :  { %5955 = vmatpush.bf16.msra.mxu1 %v10833_v63  ;;  %v11678_v63 = vld [vmem:[#allocation2 + $0xff8] sm:$0xf0]  ;;  %v14799_v30 = vld [vmem:[#allocation2 + $0xcac] sm:$0xf] }
 0x2ad   :  { %5969 = vmatpush.bf16.msra.mxu2 %v10961_v12  ;;  %v11057_v12 = vor.u32 %v14747_v54, %v11054_v1  ;;  %v11681_v7 = vor.u32 %v14903_v15, %v11678_v63  ;;  %v11262_v54 = vld [vmem:[#allocation2 + $0xcb8] sm:$0xf0]  ;;  %v14831_v1 = vld [vmem:[#allocation2 + $0xdac] sm:$0xf] }
 0x2ae   :  { %5983 = vmatpush.bf16.msra.mxu3 %v11089_v62  ;;  %v11553_v62 = vor.u32 %v14871_v42, %v11550_v5  ;;  %v14863_v14 = vld [vmem:[#allocation2 + $0xeac] sm:$0xf]  ;;  %v11646_v42 = vld [vmem:[#allocation2 + $0xfb8] sm:$0xf0]  ;;  %v11265_v5 = vor.u32 %v14799_v30, %v11262_v54 }
 0x2af   :  { %5942 = vmatpush.bf16.msra.mxu0 %v10689_v26  ;;  %v14867_v26 = vld [vmem:[#allocation2 + $0xecc] sm:$0xf]  ;;  %v11246_v63 = vld [vmem:[#allocation2 + $0xc98] sm:$0xf0]  ;;  %v16124_v30 = vpop.f32.mrf.mxu0 }
 0x2b0   :  { %5956 = vmatpush.bf16.msra.mxu1 %v10817_v34  ;;  %v11662_v34 = vld [vmem:[#allocation2 + $0xfd8] sm:$0xf0]  ;;  %v16112_v6 = vpop.f32.mrf.mxu3  ;;  %v14895_v48 = vld [vmem:[#allocation2 + $0xfac] sm:$0xf] }
 0x2b1   :  { %5970 = vmatpush.bf16.msra.mxu2 %v10945_v45  ;;  %v11281_v45 = vor.u32 %v14803_v21, %v11278_v20  ;;  %v11665_v17 = vor.u32 %v14899_v57, %v11662_v34  ;;  %v14795_v15 = vld [vmem:[#allocation2 + $0xc8c] sm:$0xf]  ;;  %v11358_v34 = vld [vmem:[#allocation2 + $0xd78] sm:$0xf0] }
 0x2b2   :  { %5984 = vmatpush.bf16.msra.mxu3 %v11073_v24  ;;  %v11537_v24 = vor.u32 %v14867_v26, %v11534_v47  ;;  %v14891_v21 = vld [vmem:[#allocation2 + $0xf8c] sm:$0xf]  ;;  %v11249_v20 = vor.u32 %v14795_v15, %v11246_v63  ;;  %v11230_v26 = vld [vmem:[#allocation2 + $0xc78] sm:$0xf0] }
 0x2b3   :  { %5943 = vmatpush.bf16.msra.mxu0 %v10673_v50  ;;  %v11518_v50 = vld [vmem:[#allocation2 + $0xeb8] sm:$0xf0]  ;;  %v14791_v44 = vld [vmem:[#allocation2 + $0xc6c] sm:$0xf] }
 0x2b4   :  { %5957 = vmatpush.bf16.msra.mxu1 %v10801_v2  ;;  %v16118_v2 = vpop.f32.mrf.mxu1  ;;  %v14823_v47 = vld [vmem:[#allocation2 + $0xd6c] sm:$0xf]  ;;  %v11470_v15 = vld [vmem:[#allocation2 + $0xe58] sm:$0xf0] }
 0x2b5   :  { %5971 = vmatpush.bf16.msra.mxu2 %v10929_v27  ;;  %v11393_v27 = vor.u32 %v14831_v1, %v11390_v16  ;;  %v14887_v54 = vld [vmem:[#allocation2 + $0xf6c] sm:$0xf]  ;;  %v11614_v1 = vld [vmem:[#allocation2 + $0xf78] sm:$0xf0]  ;;  %v11361_v16 = vor.u32 %v14823_v47, %v11358_v34 }
 0x2b6   :  { %5985 = vmatpush.bf16.msra.mxu3 %v11057_v12  ;;  %5944 = vmatmul.bf16.vlgmr.msra.gmra.mxu0 %v15798_v31  ;;  %v11521_v31 = vor.u32 %v14863_v14, %v11518_v50  ;;  %v14827_v12 = vld [vmem:[#allocation2 + $0xd8c] sm:$0xf]  ;;  %v11454_v47 = vld [vmem:[#allocation2 + $0xe38] sm:$0xf0] }
 0x2b7   :  { %5992 = vmatpush.bf16.msrb.mxu0 %v11297_v0  ;;  %5958 = vmatmul.bf16.vlgmr.msra.gmra.mxu1 %v15802_v36  ;;  %v11649_v0 = vor.u32 %v14895_v48, %v11646_v42  ;;  %v11502_v36 = vld [vmem:[#allocation2 + $0xe98] sm:$0xf0]  ;;  %v14787_v50 = vld [vmem:[#allocation2 + $0xc4c] sm:$0xf] }
 0x2b8   :  { %6006 = vmatpush.bf16.msrb.mxu1 %v11425_v39  ;;  %5972 = vmatmul.bf16.vlgmr.msra.gmra.mxu2 %v15800_v35  ;;  %v11374_v35 = vld [vmem:[#allocation2 + $0xd98] sm:$0xf0]  ;;  %v14859_v39 = vld [vmem:[#allocation2 + $0xe8c] sm:$0xf] }
 0x2b9   :  { %6020 = vmatpush.bf16.msrb.mxu2 %v11553_v62  ;;  %5986 = vmatmul.bf16.vlgmr.msra.gmra.mxu3 %v15804_v40  ;;  %v16120_v62 = vpop.f32.mrf.mxu2  ;;  %v11630_v40 = vld [vmem:[#allocation2 + $0xf98] sm:$0xf0]  ;;  %v11377_v9 = vor.u32 %v14827_v12, %v11374_v35  ;;  %v14819_v42 = vld [vmem:[#allocation2 + $0xd4c] sm:$0xf] }
 0x2ba   :  { %6034 = vmatpush.bf16.msrb.mxu3 %v11681_v7  ;;  %v11505_v7 = vor.u32 %v14859_v39, %v11502_v36  ;;  %v11633_v57 = vor.u32 %v14891_v21, %v11630_v40  ;;  %v11214_v48 = vld [vmem:[#allocation2 + $0xc58] sm:$0xf0]  ;;  %v14883_v12 = vld [vmem:[#allocation2 + $0xf4c] sm:$0xf] }
 0x2bb   :  { %5993 = vmatpush.bf16.msrb.mxu0 %v11281_v45  ;;  %v14855_v45 = vld [vmem:[#allocation2 + $0xe6c] sm:$0xf]  ;;  %v11217_v35 = vor.u32 %v14787_v50, %v11214_v48  ;;  %v11582_v34 = vld [vmem:[#allocation2 + $0xf38] sm:$0xf0] }
 0x2bc   :  { %6007 = vmatpush.bf16.msrb.mxu1 %v11409_v58  ;;  %v11486_v58 = vld [vmem:[#allocation2 + $0xe78] sm:$0xf0]  ;;  %v16126_v63 = vpop.f32.mrf.mxu1  ;;  %v14783_v40 = vld [vmem:[#allocation2 + $0xc2c] sm:$0xf] }
 0x2bd   :  { %6021 = vmatpush.bf16.msrb.mxu2 %v11537_v24  ;;  %v16122_v24 = vpop.f32.mrf.mxu3  ;;  %v11489_v14 = vor.u32 %v14855_v45, %v11486_v58  ;;  %v14779_v58 = vld [vmem:[#allocation2 + $0xc0c] sm:$0xf]  ;;  %v11310_v48 = vld [vmem:[#allocation2 + $0xd18] sm:$0xf0] }
 0x2be   :  { %6035 = vmatpush.bf16.msrb.mxu3 %v11665_v17  ;;  %v11233_v17 = vor.u32 %v14791_v44, %v11230_v26  ;;  %v11326_v44 = vld [vmem:[#allocation2 + $0xd38] sm:$0xf0]  ;;  %v14847_v26 = vld [vmem:[#allocation2 + $0xe2c] sm:$0xf] }
 0x2bf   :  { %5994 = vmatpush.bf16.msrb.mxu0 %v11265_v5  ;;  %v11617_v5 = vor.u32 %v14887_v54, %v11614_v1  ;;  %v11182_v54 = vld [vmem:[#allocation2 + $0xc18] sm:$0xf0]  ;;  %v16130_v1 = vpop.f32.mrf.mxu0  ;;  %v14811_v50 = vld [vmem:[#allocation2 + $0xd0c] sm:$0xf] }
 0x2c0   :  { %6008 = vmatpush.bf16.msrb.mxu1 %v11393_v27  ;;  %v11342_v27 = vld [vmem:[#allocation2 + $0xd58] sm:$0xf0]  ;;  %v14999_v53 = vld [vmem:[#allocation2 + $0x12ec] sm:$0xf] }
 0x2c1   :  { %6022 = vmatpush.bf16.msrb.mxu2 %v11521_v31  ;;  %v14851_v31 = vld [vmem:[#allocation2 + $0xe4c] sm:$0xf]  ;;  %v16128_v39 = vpop.f32.mrf.mxu2  ;;  %v11345_v36 = vor.u32 %v14819_v42, %v11342_v27  ;;  %v11438_v27 = vld [vmem:[#allocation2 + $0xe18] sm:$0xf0] }
 0x2c2   :  { %6036 = vmatpush.bf16.msrb.mxu3 %v11649_v0  ;;  %v11598_v0 = vld [vmem:[#allocation2 + $0xf58] sm:$0xf0]  ;;  %v11473_v21 = vor.u32 %v14851_v31, %v11470_v15  ;;  %v14843_v42 = vld [vmem:[#allocation2 + $0xe0c] sm:$0xf] }
 0x2c3   :  { %5995 = vmatpush.bf16.msrb.mxu0 %v11249_v20  ;;  %v11198_v20 = vld [vmem:[#allocation2 + $0xc38] sm:$0xf0]  ;;  %v14875_v31 = vld [vmem:[#allocation2 + $0xf0c] sm:$0xf] }
 0x2c4   :  { %6009 = vmatpush.bf16.msrb.mxu1 %v11377_v9  ;;  %v14815_v9 = vld [vmem:[#allocation2 + $0xd2c] sm:$0xf]  ;;  %v11201_v45 = vor.u32 %v14783_v40, %v11198_v20  ;;  %v11566_v15 = vld [vmem:[#allocation2 + $0xf18] sm:$0xf0]  ;;  %v11185_v40 = vor.u32 %v14779_v58, %v11182_v54 }
 0x2c5   :  { %6023 = vmatpush.bf16.msrb.mxu2 %v11505_v7  ;;  %v11601_v7 = vor.u32 %v14883_v12, %v11598_v0  ;;  %v14935_v12 = vld [vmem:[#allocation2 + $0x10ec] sm:$0xf]  ;;  %v11806_v0 = vld [vmem:[#allocation2 + $0x10f8] sm:$0xf0] }
 0x2c6   :  { %6037 = vmatpush.bf16.msrb.mxu3 %v11633_v57  ;;  %v14879_v57 = vld [vmem:[#allocation2 + $0xf2c] sm:$0xf]  ;;  %v11934_v20 = vld [vmem:[#allocation2 + $0x11f8] sm:$0xf0] }
 0x2c7   :  { %5996 = vmatpush.bf16.msrb.mxu0 %v11233_v17  ;;  %v16132_v17 = vpop.f32.mrf.mxu3  ;;  %v12062_v43 = vld [vmem:[#allocation2 + $0x12f8] sm:$0xf0]  ;;  %v14963_v54 = vld [vmem:[#allocation2 + $0x11cc] sm:$0xf] }
 0x2c8   :  { %6010 = vmatpush.bf16.msrb.mxu1 %v11361_v16  ;;  %v11329_v16 = vor.u32 %v14815_v9, %v11326_v44  ;;  %v11441_v9 = vor.u32 %v14843_v42, %v11438_v27  ;;  %v15031_v44 = vld [vmem:[#allocation2 + $0x13ec] sm:$0xf]  ;;  %v12065_v33 = vor.u32 %v14999_v53, %v12062_v43  ;;  %v11790_v58 = vld [vmem:[#allocation2 + $0x10d8] sm:$0xf0] }
 0x2c9   :  { %6024 = vmatpush.bf16.msrb.mxu2 %v11489_v14  ;;  %v11457_v14 = vor.u32 %v14847_v26, %v11454_v47  ;;  %v11569_v26 = vor.u32 %v14875_v31, %v11566_v15  ;;  %v11809_v47 = vor.u32 %v14935_v12, %v11806_v0  ;;  %v11918_v29 = vld [vmem:[#allocation2 + $0x11d8] sm:$0xf0]  ;;  %v14995_v23 = vld [vmem:[#allocation2 + $0x12cc] sm:$0xf] }
 0x2ca   :  { %6038 = vmatpush.bf16.msrb.mxu3 %v11617_v5  ;;  %v11585_v5 = vor.u32 %v14879_v57, %v11582_v34  ;;  %v16136_v57 = vpop.f32.mrf.mxu2  ;;  %v11921_v43 = vor.u32 %v14963_v54, %v11918_v29  ;;  %v14927_v27 = vld [vmem:[#allocation2 + $0x10ac] sm:$0xf]  ;;  %v11774_v31 = vld [vmem:[#allocation2 + $0x10b8] sm:$0xf0]  ;;  %v5512_v54 = vadd.f32 %v16106_v49, %v16102_v61 }
 0x2cb   :  { %5997 = vmatpush.bf16.msrb.mxu0 %v11217_v35  ;;  %v14967_v35 = vld [vmem:[#allocation2 + $0x11ec] sm:$0xf]  ;;  %v11902_v0 = vld [vmem:[#allocation2 + $0x11b8] sm:$0xf0] }
 0x2cc   :  { %6011 = vmatpush.bf16.msrb.mxu1 %v11345_v36  ;;  %v16134_v36 = vpop.f32.mrf.mxu1  ;;  %v11937_v34 = vor.u32 %v14967_v35, %v11934_v20  ;;  %v14959_v15 = vld [vmem:[#allocation2 + $0x11ac] sm:$0xf]  ;;  %v11870_v49 = vld [vmem:[#allocation2 + $0x1178] sm:$0xf0] }
 0x2cd   :  { %6025 = vmatpush.bf16.msrb.mxu2 %v11473_v21  ;;  %v11313_v21 = vor.u32 %v14811_v50, %v11310_v48  ;;  %v15027_v50 = vld [vmem:[#allocation2 + $0x13cc] sm:$0xf]  ;;  %v12174_v48 = vld [vmem:[#allocation2 + $0x13d8] sm:$0xf0] }
 0x2ce   :  { %6039 = vmatpush.bf16.msrb.mxu3 %v11601_v7  ;;  %v12190_v7 = vld [vmem:[#allocation2 + $0x13f8] sm:$0xf0]  ;;  %v12177_v12 = vor.u32 %v15027_v50, %v12174_v48  ;;  %v14991_v35 = vld [vmem:[#allocation2 + $0x12ac] sm:$0xf] }
 0x2cf   :  { %5998 = vmatpush.bf16.msrb.mxu0 %v11201_v45  ;;  %v14931_v45 = vld [vmem:[#allocation2 + $0x10cc] sm:$0xf]  ;;  %v12193_v10 = vor.u32 %v15031_v44, %v12190_v7  ;;  %v11758_v44 = vld [vmem:[#allocation2 + $0x1098] sm:$0xf0] }
 0x2d0   :  { %6012 = vmatpush.bf16.msrb.mxu1 %v11329_v16  ;;  %v12046_v16 = vld [vmem:[#allocation2 + $0x12d8] sm:$0xf0]  ;;  %v11793_v42 = vor.u32 %v14931_v45, %v11790_v58  ;;  %v14955_v7 = vld [vmem:[#allocation2 + $0x118c] sm:$0xf] }
 0x2d1   :  { %6026 = vmatpush.bf16.msrb.mxu2 %v11457_v14  ;;  %v16138_v14 = vpop.f32.mrf.mxu0  ;;  %v12049_v53 = vor.u32 %v14995_v23, %v12046_v16  ;;  %v11777_v23 = vor.u32 %v14927_v27, %v11774_v31  ;;  %v15019_v45 = vld [vmem:[#allocation2 + $0x138c] sm:$0xf]  ;;  %v12142_v58 = vld [vmem:[#allocation2 + $0x1398] sm:$0xf0]  ;;  %v5514_v16 = vadd.f32 %v16118_v2, %v16110_v37 }
 0x2d2   :  { %6040 = vmatpush.bf16.msrb.mxu3 %v11585_v5  ;;  %v16140_v5 = vpop.f32.mrf.mxu3  ;;  %v16148_v29 = vpop.f32.mrf.mxu2  ;;  %v12145_v61 = vor.u32 %v15019_v45, %v12142_v58  ;;  %v14983_v27 = vld [vmem:[#allocation2 + $0x126c] sm:$0xf]  ;;  %v11998_v37 = vld [vmem:[#allocation2 + $0x1278] sm:$0xf0] }
 0x2d3   :  { %5999 = vmatpush.bf16.msrb.mxu0 %v11185_v40  ;;  %v12030_v40 = vld [vmem:[#allocation2 + $0x12b8] sm:$0xf0]  ;;  %v15015_v31 = vld [vmem:[#allocation2 + $0x136c] sm:$0xf] }
 0x2d4   :  { %6013 = vmatpush.bf16.msrb.mxu1 %v11313_v21  ;;  %v16143_v20 = vpop.f32.mrf.mxu1  ;;  %v15023_v21 = vld [vmem:[#allocation2 + $0x13ac] sm:$0xf] }
 0x2d5   :  { %6027 = vmatpush.bf16.msrb.mxu2 %v11441_v9  ;;  %v14923_v9 = vld [vmem:[#allocation2 + $0x108c] sm:$0xf] }
 0x2d6   :  { %6041 = vmatpush.bf16.msrb.mxu3 %v11569_v26  ;;  %6000 = vmatmul.bf16.vlgmr.msrb.gmra.mxu0 %v15834_v32  ;;  %v11905_v32 = vor.u32 %v14959_v15, %v11902_v0  ;;  %v11886_v26 = vld [vmem:[#allocation2 + $0x1198] sm:$0xf0]  ;;  %v11761_v50 = vor.u32 %v14923_v9, %v11758_v44  ;;  %v5528_v0 = vadd.f32 %v16120_v62, %v5514_v16  ;;  %v14979_v44 = vld [vmem:[#allocation2 + $0x124c] sm:$0xf] }
 0x2d7   :  { %6048 = vmatpush.bf16.msra.mxu0 %v11809_v47  ;;  %6014 = vmatmul.bf16.vlgmr.msrb.gmra.mxu1 %v15838_v41  ;;  %v14987_v47 = vld [vmem:[#allocation2 + $0x128c] sm:$0xf]  ;;  %v12126_v15 = vld [vmem:[#allocation2 + $0x1378] sm:$0xf0] }
 0x2d8   :  { %6062 = vmatpush.bf16.msra.mxu1 %v11937_v34  ;;  %6028 = vmatmul.bf16.vlgmr.msrb.gmra.mxu2 %v15836_v38  ;;  %v4842_v38 = vadd.f32 %v15916_v28, %v15908_v13  ;;  %v12014_v34 = vld [vmem:[#allocation2 + $0x1298] sm:$0xf0]  ;;  %v11889_v28 = vor.u32 %v14955_v7, %v11886_v26  ;;  %v5542_v45 = vadd.f32 %v16122_v24, %v5528_v0  ;;  %v14907_v0 = vld [vmem:[#allocation2 + $0x100c] sm:$0xf] }
 0x2d9   :  { %6076 = vmatpush.bf16.msra.mxu2 %v12065_v33  ;;  %v12158_v33 = vld [vmem:[#allocation2 + $0x13b8] sm:$0xf0]  ;;  %6042 = vmatmul.bf16.vlgmr.msrb.gmra.mxu3 %v15840_v46  ;;  %v5178_v46 = vadd.f32 %v16007_v3, %v16005_v22  ;;  %v16158_v48 = vpop.f32.mrf.mxu0  ;;  %v14951_v3 = vld [vmem:[#allocation2 + $0x116c] sm:$0xf] }
 0x2da   :  { %6090 = vmatpush.bf16.msra.mxu3 %v12193_v10  ;;  %v12033_v10 = vor.u32 %v14991_v35, %v12030_v40  ;;  %v12161_v41 = vor.u32 %v15023_v21, %v12158_v33  ;;  %v16160_v13 = vpop.f32.mrf.mxu3  ;;  %v11742_v22 = vld [vmem:[#allocation2 + $0x1078] sm:$0xf0]  ;;  %v12001_v21 = vor.u32 %v14983_v27, %v11998_v37  ;;  %v14915_v33 = vld [vmem:[#allocation2 + $0x104c] sm:$0xf] }
 0x2db   :  { %6049 = vmatpush.bf16.msra.mxu0 %v11793_v42  ;;  %v12017_v42 = vor.u32 %v14987_v47, %v12014_v34  ;;  %v5192_v2 = vadd.f32 %v16013_v18, %v5178_v46  ;;  %v12129_v18 = vor.u32 %v15015_v31, %v12126_v15  ;;  %v11854_v9 = vld [vmem:[#allocation2 + $0x1158] sm:$0xf0]  ;;  %v16503_v47 = vld [vmem:[#allocation11_spill] sm:$0xff]  ;;  %v15007_v27 = vld [vmem:[#allocation2 + $0x132c] sm:$0xf] }
 0x2dc   :  { %6063 = vmatpush.bf16.msra.mxu1 %v11921_v43  ;;  %v14919_v43 = vld [vmem:[#allocation2 + $0x106c] sm:$0xf]  ;;  %v16166_v40 = vpop.f32.mrf.mxu1  ;;  %v16502_v7 = vld [vmem:[#allocation32_spill] sm:$0xff] }
 0x2dd   :  { %6077 = vmatpush.bf16.msra.mxu2 %v12049_v53  ;;  %v4856_v53 = vadd.f32 %v15924_v59, %v4842_v38  ;;  %v11745_v35 = vor.u32 %v14919_v43, %v11742_v22  ;;  %v11873_v59 = vor.u32 %v14951_v3, %v11870_v49  ;;  %v5206_v62 = vadd.f32 %v16502_v7, %v5192_v2  ;;  %v16170_v38 = vpop.f32.mrf.mxu2  ;;  %v12110_v26 = vld [vmem:[#allocation2 + $0x1358] sm:$0xf0]  ;;  %v14943_v22 = vld [vmem:[#allocation2 + $0x112c] sm:$0xf] }
 0x2de   :  { %6091 = vmatpush.bf16.msra.mxu3 %v12177_v12  ;;  %v5526_v12 = vadd.f32 %v16108_v52, %v5512_v54  ;;  %v11982_v52 = vld [vmem:[#allocation2 + $0x1258] sm:$0xf0]  ;;  %v5556_v3 = vadd.f32 %v16130_v1, %v5542_v45 }
 0x2df   :  { %6050 = vmatpush.bf16.msra.mxu0 %v11777_v23  ;;  %v11726_v23 = vld [vmem:[#allocation2 + $0x1058] sm:$0xf0] }
 0x2e0   :  { %6064 = vmatpush.bf16.msra.mxu1 %v11905_v32  ;;  %v14947_v32 = vld [vmem:[#allocation2 + $0x114c] sm:$0xf]  ;;  %v5540_v46 = vadd.f32 %v16112_v6, %v5526_v12  ;;  %v11729_v58 = vor.u32 %v14915_v33, %v11726_v23  ;;  %v11710_v43 = vld [vmem:[#allocation2 + $0x1038] sm:$0xf0] }
 0x2e1   :  { %6078 = vmatpush.bf16.msra.mxu2 %v12033_v10  ;;  %v4870_v10 = vadd.f32 %v15926_v4, %v4856_v53  ;;  %v16504_v4 = vld [vmem:[#allocation33_spill] sm:$0xff]  ;;  %v16176_v16 = vpop.f32.mrf.mxu0  ;;  %v11838_v6 = vld [vmem:[#allocation2 + $0x1138] sm:$0xf0] }
 0x2e2   :  { %6092 = vmatpush.bf16.msra.mxu3 %v12161_v41  ;;  %v15011_v41 = vld [vmem:[#allocation2 + $0x134c] sm:$0xf]  ;;  %v5220_v54 = vadd.f32 %v16504_v4, %v5206_v62  ;;  %v11966_v24 = vld [vmem:[#allocation2 + $0x1238] sm:$0xf0]  ;;  %v16179_v49 = vpop.f32.mrf.mxu3  ;;  %v5554_v15 = vadd.f32 %v16124_v30, %v5540_v46  ;;  %v11841_v33 = vor.u32 %v14943_v22, %v11838_v6  ;;  %v16507_v62 = vld [vmem:[#allocation13_spill] sm:$0xff] }
 0x2e3   :  { %6051 = vmatpush.bf16.msra.mxu0 %v11761_v50  ;;  %v4884_v34 = vadd.f32 %v16503_v47, %v4870_v10  ;;  %v11857_v50 = vor.u32 %v14947_v32, %v11854_v9  ;;  %v12113_v53 = vor.u32 %v15011_v41, %v12110_v26  ;;  %v12094_v37 = vld [vmem:[#allocation2 + $0x1338] sm:$0xf0]  ;;  %v14939_v32 = vld [vmem:[#allocation2 + $0x110c] sm:$0xf]  ;;  %v5570_v9 = vadd.f32 %v16134_v36, %v5556_v3  ;;  %v16508_v26 = vld [vmem:[#allocation35_spill] sm:$0xff] }
 0x2e4   :  { %6065 = vmatpush.bf16.msra.mxu1 %v11889_v28  ;;  %v11985_v28 = vor.u32 %v14979_v44, %v11982_v52  ;;  %v16505_v2 = vld [vmem:[#allocation12_spill] sm:$0xff]  ;;  %v16184_v1 = vpop.f32.mrf.mxu1  ;;  %v12097_v44 = vor.u32 %v15007_v27, %v12094_v37  ;;  %v15003_v52 = vld [vmem:[#allocation2 + $0x130c] sm:$0xf]  ;;  %v5568_v4 = vadd.f32 %v16126_v63, %v5554_v15 }
 0x2e5   :  { %6079 = vmatpush.bf16.msra.mxu2 %v12017_v42  ;;  %v14911_v42 = vld [vmem:[#allocation2 + $0x102c] sm:$0xf]  ;;  %v4898_v31 = vadd.f32 %v16505_v2, %v4884_v34  ;;  %v11822_v10 = vld [vmem:[#allocation2 + $0x1118] sm:$0xf0]  ;;  %v16189_v34 = vpop.f32.mrf.mxu2 }
 0x2e6   :  { %6093 = vmatpush.bf16.msra.mxu3 %v12145_v61  ;;  %v14975_v61 = vld [vmem:[#allocation2 + $0x122c] sm:$0xf]  ;;  %v11713_v12 = vor.u32 %v14911_v42, %v11710_v43  ;;  %v11950_v30 = vld [vmem:[#allocation2 + $0x1218] sm:$0xf0]  ;;  %v11825_v43 = vor.u32 %v14939_v32, %v11822_v10 }
 0x2e7   :  { %6052 = vmatpush.bf16.msra.mxu0 %v11745_v35  ;;  %v11694_v35 = vld [vmem:[#allocation2 + $0x1018] sm:$0xf0]  ;;  %v11969_v23 = vor.u32 %v14975_v61, %v11966_v24  ;;  %v4912_v41 = vadd.f32 %v16507_v62, %v4898_v31  ;;  %v15063_v46 = vld [vmem:[#allocation2 + $0x14ec] sm:$0xf] }
 0x2e8   :  { %6066 = vmatpush.bf16.msra.mxu1 %v11873_v59  ;;  %v16506_v59 = vld [vmem:[#allocation34_spill] sm:$0xff]  ;;  %v12078_v7 = vld [vmem:[#allocation2 + $0x1318] sm:$0xf0]  ;;  %v11697_v36 = vor.u32 %v14907_v0, %v11694_v35 }
 0x2e9   :  { %6080 = vmatpush.bf16.msra.mxu2 %v12001_v21  ;;  %v5234_v21 = vadd.f32 %v16506_v59, %v5220_v54  ;;  %v12318_v45 = vld [vmem:[#allocation2 + $0x14f8] sm:$0xf0]  ;;  %v5584_v54 = vadd.f32 %v16136_v57, %v5570_v9  ;;  %v15159_v3 = vld [vmem:[#allocation2 + $0x17ec] sm:$0xf]  ;;  %v12081_v6 = vor.u32 %v15003_v52, %v12078_v7  ;;  %v16195_v2 = vpop.f32.mrf.mxu0  ;;  %v5582_v59 = vadd.f32 %v16128_v39, %v5568_v4 }
 0x2ea   :  { %6094 = vmatpush.bf16.msra.mxu3 %v12129_v18  ;;  %v14971_v18 = vld [vmem:[#allocation2 + $0x120c] sm:$0xf]  ;;  %v12574_v42 = vld [vmem:[#allocation2 + $0x16f8] sm:$0xf0]  ;;  %v12321_v61 = vor.u32 %v15063_v46, %v12318_v45  ;;  %v16197_v57 = vpop.f32.mrf.mxu3 }
 0x2eb   :  { %6053 = vmatpush.bf16.msra.mxu0 %v11729_v58  ;;  %v5248_v47 = vadd.f32 %v16508_v26, %v5234_v21  ;;  %v15095_v58 = vld [vmem:[#allocation2 + $0x15ec] sm:$0xf]  ;;  %v11953_v22 = vor.u32 %v14971_v18, %v11950_v30  ;;  %v16510_v37 = vld [vmem:[#allocation36_spill] sm:$0xff]  ;;  %v5598_v21 = vadd.f32 %v16140_v5, %v5584_v54  ;;  %v16511_v18 = vld [vmem:[#allocation15_spill] sm:$0xff] }
 0x2ec   :  { %6067 = vmatpush.bf16.msra.mxu1 %v11857_v50  ;;  %v12446_v50 = vld [vmem:[#allocation2 + $0x15f8] sm:$0xf0]  ;;  %v16509_v24 = vld [vmem:[#allocation14_spill] sm:$0xff] }
 0x2ed   :  { %6081 = vmatpush.bf16.msra.mxu2 %v11985_v28  ;;  %v15127_v28 = vld [vmem:[#allocation2 + $0x16ec] sm:$0xf]  ;;  %v4926_v27 = vadd.f32 %v16509_v24, %v4912_v41  ;;  %v5262_v63 = vadd.f32 %v16510_v37, %v5248_v47  ;;  %v12449_v31 = vor.u32 %v15095_v58, %v12446_v50  ;;  %v12302_v0 = vld [vmem:[#allocation2 + $0x14d8] sm:$0xf0]  ;;  %v5612_v62 = vadd.f32 %v16158_v48, %v5598_v21  ;;  %v16204_v41 = vpop.f32.mrf.mxu1 }
 0x2ee   :  { %6095 = vmatpush.bf16.msra.mxu3 %v12113_v53  ;;  %v12702_v53 = vld [vmem:[#allocation2 + $0x17f8] sm:$0xf0]  ;;  %v12577_v15 = vor.u32 %v15127_v28, %v12574_v42  ;;  %v15091_v35 = vld [vmem:[#allocation2 + $0x15cc] sm:$0xf]  ;;  %v5596_v58 = vadd.f32 %v16132_v17, %v5582_v59 }
 0x2ef   :  { %6054 = vmatpush.bf16.msra.mxu0 %v11713_v12  ;;  %v15059_v12 = vld [vmem:[#allocation2 + $0x14cc] sm:$0xf]  ;;  %v12558_v10 = vld [vmem:[#allocation2 + $0x16d8] sm:$0xf0]  ;;  %v4940_v9 = vadd.f32 %v16511_v18, %v4926_v27 }
 0x2f0   :  { %6068 = vmatpush.bf16.msra.mxu1 %v11841_v33  ;;  %v12705_v33 = vor.u32 %v15159_v3, %v12702_v53  ;;  %v15123_v32 = vld [vmem:[#allocation2 + $0x16cc] sm:$0xf]  ;;  %v12686_v7 = vld [vmem:[#allocation2 + $0x17d8] sm:$0xf0]  ;;  %v12305_v39 = vor.u32 %v15059_v12, %v12302_v0  ;;  %v5610_v17 = vadd.f32 %v16138_v14, %v5596_v58  ;;  %v16519_v58 = vld [vmem:[#allocation19_spill] sm:$0xff] }
 0x2f1   :  { %6082 = vmatpush.bf16.msra.mxu2 %v11969_v23  ;;  %v12430_v23 = vld [vmem:[#allocation2 + $0x15d8] sm:$0xf0]  ;;  %v15155_v52 = vld [vmem:[#allocation2 + $0x17cc] sm:$0xf]  ;;  %v12561_v26 = vor.u32 %v15123_v32, %v12558_v10  ;;  %v16218_v27 = vpop.f32.mrf.mxu0 }
 0x2f2   :  { %6096 = vmatpush.bf16.msra.mxu3 %v12097_v44  ;;  %v16512_v44 = vld [vmem:[#allocation37_spill] sm:$0xff]  ;;  %v12433_v5 = vor.u32 %v15091_v35, %v12430_v23  ;;  %v15055_v47 = vld [vmem:[#allocation2 + $0x14ac] sm:$0xf]  ;;  %v12286_v46 = vld [vmem:[#allocation2 + $0x14b8] sm:$0xf0]  ;;  %v12689_v4 = vor.u32 %v15155_v52, %v12686_v7  ;;  %v16222_v59 = vpop.f32.mrf.mxu3  ;;  %v5624_v23 = vadd.f32 %v16143_v20, %v5610_v17 }
 0x2f3   :  { %6055 = vmatpush.bf16.msra.mxu0 %v11697_v36  ;;  %v5276_v30 = vadd.f32 %v16512_v44, %v5262_v63  ;;  %v15087_v45 = vld [vmem:[#allocation2 + $0x15ac] sm:$0xf]  ;;  %v12414_v54 = vld [vmem:[#allocation2 + $0x15b8] sm:$0xf0] }
 0x2f4   :  { %6069 = vmatpush.bf16.msra.mxu1 %v11825_v43  ;;  %v15119_v48 = vld [vmem:[#allocation2 + $0x16ac] sm:$0xf]  ;;  %v12542_v36 = vld [vmem:[#allocation2 + $0x16b8] sm:$0xf0]  ;;  %v12417_v37 = vor.u32 %v15087_v45, %v12414_v54 }
 0x2f5   :  { %6083 = vmatpush.bf16.msra.mxu2 %v11953_v22  ;;  %v16513_v50 = vld [vmem:[#allocation16_spill] sm:$0xff]  ;;  %v16514_v42 = vld [vmem:[#allocation38_spill] sm:$0xff]  ;;  %v16210_v22 = vpop.f32.mrf.mxu2 }
 0x2f6   :  { %6097 = vmatpush.bf16.msra.mxu3 %v12081_v6  ;;  %6056 = vmatmul.bf16.vlgmr.msra.gmra.mxu0 %v15870_v51  ;;  %v4954_v28 = vadd.f32 %v16513_v50, %v4940_v9  ;;  %v5290_v43 = vadd.f32 %v16514_v42, %v5276_v30  ;;  %v15151_v3 = vld [vmem:[#allocation2 + $0x17ac] sm:$0xf]  ;;  %v12670_v53 = vld [vmem:[#allocation2 + $0x17b8] sm:$0xf0]  ;;  %v5626_v51 = vadd.f32 %v16166_v40, %v5612_v62  ;;  %v16226_v9 = vpop.f32.mrf.mxu1  ;;  %v16520_v50 = vld [vmem:[#allocation41_spill] sm:$0xff] }
 0x2f7   :  { %6104 = vmatpush.bf16.msrb.mxu0 %v12321_v61  ;;  %6070 = vmatmul.bf16.vlgmr.msra.gmra.mxu1 %v15874_v56  ;;  %v12289_v6 = vor.u32 %v15055_v47, %v12286_v46  ;;  %v16515_v61 = vld [vmem:[#allocation17_spill] sm:$0xff]  ;;  %v15051_v63 = vld [vmem:[#allocation2 + $0x148c] sm:$0xf]  ;;  %v12270_v56 = vld [vmem:[#allocation2 + $0x1498] sm:$0xf0]  ;;  %v12673_v40 = vor.u32 %v15151_v3, %v12670_v53 }
 0x2f8   :  { %6118 = vmatpush.bf16.msrb.mxu1 %v12449_v31  ;;  %6084 = vmatmul.bf16.vlgmr.msra.gmra.mxu2 %v15872_v55  ;;  %v4968_v24 = vadd.f32 %v16515_v61, %v4954_v28  ;;  %v12545_v55 = vor.u32 %v15119_v48, %v12542_v36  ;;  %v15083_v31 = vld [vmem:[#allocation2 + $0x158c] sm:$0xf]  ;;  %v5640_v14 = vadd.f32 %v16170_v38, %v5626_v51  ;;  %v12526_v35 = vld [vmem:[#allocation2 + $0x1698] sm:$0xf0] }
 0x2f9   :  { %6132 = vmatpush.bf16.msrb.mxu2 %v12577_v15  ;;  %6098 = vmatmul.bf16.vlgmr.msra.gmra.mxu3 %v15876_v60  ;;  %v16516_v15 = vld [vmem:[#allocation39_spill] sm:$0xff]  ;;  %v12398_v60 = vld [vmem:[#allocation2 + $0x1598] sm:$0xf0]  ;;  %v15115_v0 = vld [vmem:[#allocation2 + $0x168c] sm:$0xf]  ;;  %v12273_v32 = vor.u32 %v15051_v63, %v12270_v56  ;;  %v5723_v56 = vpop.f32.mrf.mxu0 }
 0x2fa   :  { %6146 = vmatpush.bf16.msrb.mxu3 %v12705_v33  ;;  %v5304_v12 = vadd.f32 %v16516_v15, %v5290_v43  ;;  %v15147_v21 = vld [vmem:[#allocation2 + $0x178c] sm:$0xf]  ;;  %v12654_v33 = vld [vmem:[#allocation2 + $0x1798] sm:$0xf0]  ;;  %v12401_v38 = vor.u32 %v15083_v31, %v12398_v60  ;;  %v12529_v44 = vor.u32 %v15115_v0, %v12526_v35  ;;  %v16523_v0 = vld [vmem:[#allocation21_spill] sm:$0xff] }
 0x2fb   :  { %6105 = vmatpush.bf16.msrb.mxu0 %v12305_v39  ;;  %v16517_v10 = vld [vmem:[#allocation18_spill] sm:$0xff]  ;;  %v12254_v52 = vld [vmem:[#allocation2 + $0x1478] sm:$0xf0]  ;;  %v12657_v20 = vor.u32 %v15147_v21, %v12654_v33 }
 0x2fc   :  { %6119 = vmatpush.bf16.msrb.mxu1 %v12433_v5  ;;  %v4982_v18 = vadd.f32 %v16517_v10, %v4968_v24  ;;  %v15047_v30 = vld [vmem:[#allocation2 + $0x146c] sm:$0xf]  ;;  %v16518_v62 = vld [vmem:[#allocation40_spill] sm:$0xff]  ;;  %v5638_v5 = vadd.f32 %v16148_v29, %v5624_v23 }
 0x2fd   :  { %6133 = vmatpush.bf16.msrb.mxu2 %v12561_v26  ;;  %v15079_v7 = vld [vmem:[#allocation2 + $0x156c] sm:$0xf]  ;;  %v5318_v39 = vadd.f32 %v16518_v62, %v5304_v12  ;;  %v5654_v26 = vadd.f32 %v16179_v49, %v5640_v14  ;;  %v12382_v47 = vld [vmem:[#allocation2 + $0x1578] sm:$0xf0]  ;;  %v16232_v54 = vpop.f32.mrf.mxu2  ;;  %v12257_v43 = vor.u32 %v15047_v30, %v12254_v52 }
 0x2fe   :  { %6147 = vmatpush.bf16.msrb.mxu3 %v12689_v4  ;;  %v15111_v46 = vld [vmem:[#allocation2 + $0x166c] sm:$0xf]  ;;  %v12510_v45 = vld [vmem:[#allocation2 + $0x1678] sm:$0xf0]  ;;  %v4996_v4 = vadd.f32 %v16519_v58, %v4982_v18  ;;  %v12385_v29 = vor.u32 %v15079_v7, %v12382_v47  ;;  %v5652_v51 = vadd.f32 %v16160_v13, %v5638_v5  ;;  %v16524_v18 = vld [vmem:[#allocation43_spill] sm:$0xff]  ;;  %v5737_v7 = vpop.f32.mrf.mxu1 }
 0x2ff   :  { %6106 = vmatpush.bf16.msrb.mxu0 %v12289_v6  ;;  %v15143_v48 = vld [vmem:[#allocation2 + $0x176c] sm:$0xf]  ;;  %v12638_v36 = vld [vmem:[#allocation2 + $0x1778] sm:$0xf0]  ;;  %v5332_v28 = vadd.f32 %v16520_v50, %v5318_v39  ;;  %v5668_v42 = vadd.f32 %v16195_v2, %v5654_v26  ;;  %v12513_v49 = vor.u32 %v15111_v46, %v12510_v45  ;;  %v16238_v2 = vpop.f32.mrf.mxu3 }
 0x300   :  { %6120 = vmatpush.bf16.msrb.mxu1 %v12417_v37  ;;  %v15043_v3 = vld [vmem:[#allocation2 + $0x144c] sm:$0xf]  ;;  %v12238_v53 = vld [vmem:[#allocation2 + $0x1458] sm:$0xf0]  ;;  %v12641_v6 = vor.u32 %v15143_v48, %v12638_v36 }
 0x301   :  { %6134 = vmatpush.bf16.msrb.mxu2 %v12545_v55  ;;  %v15075_v17 = vld [vmem:[#allocation2 + $0x154c] sm:$0xf]  ;;  %v12366_v61 = vld [vmem:[#allocation2 + $0x1558] sm:$0xf0]  ;;  %v5682_v60 = vadd.f32 %v16204_v41, %v5668_v42  ;;  %v12241_v13 = vor.u32 %v15043_v3, %v12238_v53 }
 0x302   :  { %6148 = vmatpush.bf16.msrb.mxu3 %v12673_v40  ;;  %v15107_v24 = vld [vmem:[#allocation2 + $0x164c] sm:$0xf]  ;;  %v12494_v37 = vld [vmem:[#allocation2 + $0x1658] sm:$0xf0]  ;;  %v5666_v40 = vadd.f32 %v16176_v16, %v5652_v51  ;;  %v12369_v21 = vor.u32 %v15075_v17, %v12366_v61  ;;  %v16527_v17 = vld [vmem:[#allocation23_spill] sm:$0xff] }
 0x303   :  { %6107 = vmatpush.bf16.msrb.mxu0 %v12273_v32  ;;  %v16521_v55 = vld [vmem:[#allocation20_spill] sm:$0xff]  ;;  %v15139_v31 = vld [vmem:[#allocation2 + $0x174c] sm:$0xf]  ;;  %v12497_v33 = vor.u32 %v15107_v24, %v12494_v37  ;;  %v12820_v61 = vld [vmem:[#allocation4 + $0xe0] sm:$0xf] }
 0x304   :  { %6121 = vmatpush.bf16.msrb.mxu1 %v12401_v38  ;;  %v5010_v63 = vadd.f32 %v16521_v55, %v4996_v4  ;;  %v12622_v15 = vld [vmem:[#allocation2 + $0x1758] sm:$0xf0]  ;;  %v16522_v12 = vld [vmem:[#allocation42_spill] sm:$0xff]  ;;  %v5680_v5 = vadd.f32 %v16184_v1, %v5666_v40  ;;  %v15192_v24 = vld [vmem:[#allocation4 + $0xec] sm:$0xf0] }
 0x305   :  { %6135 = vmatpush.bf16.msrb.mxu2 %v12529_v44  ;;  %v5346_v14 = vadd.f32 %v16522_v12, %v5332_v28  ;;  %v15039_v23 = vld [vmem:[#allocation2 + $0x142c] sm:$0xf]  ;;  %v12222_v32 = vld [vmem:[#allocation2 + $0x1438] sm:$0xf0]  ;;  %v5696_v44 = vadd.f32 %v16210_v22, %v5682_v60  ;;  %v12625_v30 = vor.u32 %v15139_v31, %v12622_v15  ;;  %v5751_v58 = vpop.f32.mrf.mxu2  ;;  %v12948_v37 = vld [vmem:[#allocation4 + $0x1e0] sm:$0xf] }
 0x306   :  { %6149 = vmatpush.bf16.msrb.mxu3 %v12657_v20  ;;  %v5024_v35 = vadd.f32 %v16523_v0, %v5010_v63  ;;  %v15071_v10 = vld [vmem:[#allocation2 + $0x152c] sm:$0xf]  ;;  %v12350_v16 = vld [vmem:[#allocation2 + $0x1538] sm:$0xf0]  ;;  %v12225_v26 = vor.u32 %v15039_v23, %v12222_v32  ;;  %v13076_v15 = vld [vmem:[#allocation4 + $0x2e0] sm:$0xf]  ;;  %v12821_v0 = vor.u32 %v15192_v24, %v12820_v61 }
 0x307   :  { %6108 = vmatpush.bf16.msrb.mxu0 %v12257_v43  ;;  %v5360_v38 = vadd.f32 %v16524_v18, %v5346_v14  ;;  %v15103_v52 = vld [vmem:[#allocation2 + $0x162c] sm:$0xf]  ;;  %v12478_v41 = vld [vmem:[#allocation2 + $0x1638] sm:$0xf0]  ;;  %v12353_v22 = vor.u32 %v15071_v10, %v12350_v16  ;;  %v5694_v43 = vadd.f32 %v16189_v34, %v5680_v5  ;;  %v5710_v1 = vadd.f32 %v16222_v59, %v5696_v44  ;;  %v15224_v34 = vld [vmem:[#allocation4 + $0x1ec] sm:$0xf0]  ;;  %v5765_v12 = vpop.f32.mrf.mxu3 }
 0x308   :  { %6122 = vmatpush.bf16.msrb.mxu1 %v12385_v29  ;;  %v15135_v62 = vld [vmem:[#allocation2 + $0x172c] sm:$0xf]  ;;  %v12606_v39 = vld [vmem:[#allocation2 + $0x1738] sm:$0xf0]  ;;  %v12481_v4 = vor.u32 %v15103_v52, %v12478_v41  ;;  %v15256_v59 = vld [vmem:[#allocation4 + $0x2ec] sm:$0xf0] }
 0x309   :  { %6136 = vmatpush.bf16.msrb.mxu2 %v12513_v49  ;;  %v15035_v20 = vld [vmem:[#allocation2 + $0x140c] sm:$0xf]  ;;  %v12206_v47 = vld [vmem:[#allocation2 + $0x1418] sm:$0xf0]  ;;  %v12609_v29 = vor.u32 %v15135_v62, %v12606_v39  ;;  %v5724_v63 = vadd.f32 %v5723_v56, %v5710_v1  ;;  %v5708_v60 = vadd.f32 %v16197_v57, %v5694_v43  ;;  %v13077_v56 = vor.u32 %v15256_v59, %v13076_v15  ;;  %v12804_v23 = vld [vmem:[#allocation4 + $0xc0] sm:$0xf] }
 0x30a   :  { %6150 = vmatpush.bf16.msrb.mxu3 %v12641_v6  ;;  %v16525_v46 = vld [vmem:[#allocation22_spill] sm:$0xff]  ;;  %v12334_v36 = vld [vmem:[#allocation2 + $0x1518] sm:$0xf0]  ;;  %v16252_v6 = vpop.f32.mrf.mxu0  ;;  %v12209_v31 = vor.u32 %v15035_v20, %v12206_v47  ;;  %v15188_v32 = vld [vmem:[#allocation4 + $0xcc] sm:$0xf0] }
 0x30b   :  { %6109 = vmatpush.bf16.msrb.mxu0 %v12241_v13  ;;  %v5038_v45 = vadd.f32 %v16525_v46, %v5024_v35  ;;  %v15067_v48 = vld [vmem:[#allocation2 + $0x150c] sm:$0xf]  ;;  %v16526_v28 = vld [vmem:[#allocation44_spill] sm:$0xff]  ;;  %v12932_v10 = vld [vmem:[#allocation4 + $0x1c0] sm:$0xf]  ;;  %v5738_v44 = vadd.f32 %v5737_v7, %v5724_v63  ;;  %v12805_v20 = vor.u32 %v15188_v32, %v12804_v23 }
 0x30c   :  { %6123 = vmatpush.bf16.msrb.mxu1 %v12369_v21  ;;  %v15099_v50 = vld [vmem:[#allocation2 + $0x160c] sm:$0xf]  ;;  %v5374_v42 = vadd.f32 %v16526_v28, %v5360_v38  ;;  %v12462_v49 = vld [vmem:[#allocation2 + $0x1618] sm:$0xf0]  ;;  %v12337_v14 = vor.u32 %v15067_v48, %v12334_v36  ;;  %v5722_v38 = vadd.f32 %v16218_v27, %v5708_v60  ;;  %v13060_v57 = vld [vmem:[#allocation4 + $0x2c0] sm:$0xf] }
 0x30d   :  { %6137 = vmatpush.bf16.msrb.mxu2 %v12497_v33  ;;  %v15131_v3 = vld [vmem:[#allocation2 + $0x170c] sm:$0xf]  ;;  %v12590_v53 = vld [vmem:[#allocation2 + $0x1718] sm:$0xf0]  ;;  %v5052_v51 = vadd.f32 %v16527_v17, %v5038_v45  ;;  %v12465_v40 = vor.u32 %v15099_v50, %v12462_v49  ;;  %v16257_v33 = vpop.f32.mrf.mxu1  ;;  %v15252_v16 = vld [vmem:[#allocation4 + $0x2cc] sm:$0xf0]  ;;  %v16262_v62 = vpop.f32.mrf.mxu2 }
 0x30e   :  { %6151 = vmatpush.bf16.msrb.mxu3 %v12625_v30  ;;  %v5388_v55 = vadd.f32 %v16065_v8, %v5374_v42  ;;  %v12593_v13 = vor.u32 %v15131_v3, %v12590_v53  ;;  %v16528_v35 = vld [vmem:[#allocation24_spill] sm:$0xff]  ;;  %v12949_v8 = vor.u32 %v15224_v34, %v12948_v37  ;;  %v15220_v30 = vld [vmem:[#allocation4 + $0x1cc] sm:$0xf0]  ;;  %v16529_v52 = vld [vmem:[#allocation25_spill] sm:$0xff]  ;;  %v13061_v27 = vor.u32 %v15252_v16, %v13060_v57 }
 0x30f   :  { %6110 = vmatpush.bf16.msrb.mxu0 %v12225_v26  ;;  %v5066_v21 = vadd.f32 %v16528_v35, %v5052_v51  ;;  %v16530_v39 = vld [vmem:[#allocation45_spill] sm:$0xff]  ;;  %v5752_v26 = vadd.f32 %v5751_v58, %v5738_v44  ;;  %v15184_v47 = vld [vmem:[#allocation4 + $0xac] sm:$0xf0]  ;;  %v5736_v45 = vadd.f32 %v16226_v9, %v5722_v38  ;;  %v16531_v58 = vld [vmem:[#allocation26_spill] sm:$0xff]  ;;  %v16269_v28 = vpop.f32.mrf.mxu3 }
 0x310   :  { %6124 = vmatpush.bf16.msrb.mxu1 %v12353_v22  ;;  %v5402_v18 = vadd.f32 %v16067_v11, %v5388_v55  ;;  %v12933_v11 = vor.u32 %v15220_v30, %v12932_v10  ;;  %v12788_v7 = vld [vmem:[#allocation4 + $0xa0] sm:$0xf]  ;;  %v15216_v22 = vld [vmem:[#allocation4 + $0x1ac] sm:$0xf0]  ;;  %v16533_v43 = vld [vmem:[#allocation10_spill] sm:$0xff] }
 0x311   :  { %6138 = vmatpush.bf16.msrb.mxu2 %v12481_v4  ;;  %v5080_v41 = vadd.f32 %v16529_v52, %v5066_v21  ;;  %v12916_v46 = vld [vmem:[#allocation4 + $0x1a0] sm:$0xf]  ;;  %v15248_v48 = vld [vmem:[#allocation4 + $0x2ac] sm:$0xf0]  ;;  %v16534_v1 = vld [vmem:[#allocation46_spill] sm:$0xff]  ;;  %v5750_v9 = vadd.f32 %v16232_v54, %v5736_v45  ;;  %v5766_v49 = vadd.f32 %v5765_v12, %v5752_v26 }
 0x312   :  { %6152 = vmatpush.bf16.msrb.mxu3 %v12609_v29  ;;  %v5416_v5 = vadd.f32 %v16530_v39, %v5402_v18  ;;  %v13044_v4 = vld [vmem:[#allocation4 + $0x2a0] sm:$0xf]  ;;  %v5779_v50 = vpop.f32.mrf.mxu0  ;;  %v12917_v53 = vor.u32 %v15216_v22, %v12916_v46  ;;  %v15180_v61 = vld [vmem:[#allocation4 + $0x8c] sm:$0xf0]  ;;  %v16536_v37 = vld [vmem:[#allocation48_spill] sm:$0xff] }
 0x313   :  { %6111 = vmatpush.bf16.msrb.mxu0 %v12209_v31  ;;  %v5094_v36 = vadd.f32 %v16531_v58, %v5080_v41  ;;  %v16532_v42 = vld [vmem:[#allocation9_spill] sm:$0xff]  ;;  %v13045_v17 = vor.u32 %v15248_v48, %v13044_v4  ;;  %v5780_v63 = vadd.f32 %v5779_v50, %v5766_v49  ;;  %v15212_v31 = vld [vmem:[#allocation4 + $0x18c] sm:$0xf0]  ;;  %v5764_v54 = vadd.f32 %v16238_v2, %v5750_v9  ;;  %v16539_v44 = vld [vmem:[#allocation30_spill] sm:$0xff] }
 0x314   :  { %6125 = vmatpush.bf16.msrb.mxu1 %v12337_v14  ;;  %v5430_v29 = vadd.f32 %v16534_v1, %v5416_v5  ;;  %v12772_v51 = vld [vmem:[#allocation4 + $0x80] sm:$0xf]  ;;  %v15244_v15 = vld [vmem:[#allocation4 + $0x28c] sm:$0xf0]  ;;  %v16540_v57 = vld [vmem:[#allocation50_spill] sm:$0xff] }
 0x315   :  { %6139 = vmatpush.bf16.msrb.mxu2 %v12465_v40  ;;  %v12900_v24 = vld [vmem:[#allocation4 + $0x180] sm:$0xf]  ;;  %v5793_v59 = vpop.f32.mrf.mxu1  ;;  %v12773_v12 = vor.u32 %v15180_v61, %v12772_v51  ;;  %v5807_v60 = vpop.f32.mrf.mxu2  ;;  %v15176_v21 = vld [vmem:[#allocation4 + $0x6c] sm:$0xf0]  ;;  %v5778_v32 = vadd.f32 %v16252_v6, %v5764_v54 }
 0x316   :  { %6153 = vmatpush.bf16.msrb.mxu3 %v12593_v13  ;;  %6112 = vmatmul.bf16.vlgmr.msrb.gmra.mxu0 %v15910_v19  ;;  %v12789_v19 = vor.u32 %v15184_v47, %v12788_v7  ;;  %v5444_v55 = vadd.f32 %v16536_v37, %v5430_v29  ;;  %v13028_v34 = vld [vmem:[#allocation4 + $0x280] sm:$0xf]  ;;  %v12901_v13 = vor.u32 %v15212_v31, %v12900_v24  ;;  %v15208_v18 = vld [vmem:[#allocation4 + $0x16c] sm:$0xf0] }
 0x317   :  { %6948 = vmatpush.bf16.msra.mxu0 %v12821_v0  ;;  %6126 = vmatmul.bf16.vlgmr.msrb.gmra.mxu1 %v15914_v25  ;;  %v16535_v25 = vld [vmem:[#allocation28_spill] sm:$0xff]  ;;  %v16537_v14 = vld [vmem:[#allocation29_spill] sm:$0xff]  ;;  %v13029_v0 = vor.u32 %v15244_v15, %v13028_v34  ;;  %v5794_v10 = vadd.f32 %v5793_v59, %v5780_v63  ;;  %v15240_v2 = vld [vmem:[#allocation4 + $0x26c] sm:$0xf0]  ;;  %v5821_v39 = vpop.f32.mrf.mxu3  ;;  %v5792_v6 = vadd.f32 %v16257_v33, %v5778_v32 }
 0x318   :  { %6962 = vmatpush.bf16.msra.mxu1 %v12949_v8  ;;  %6140 = vmatmul.bf16.vlgmr.msrb.gmra.mxu2 %v16532_v42  ;;  %v5108_v3 = vadd.f32 %v16535_v25, %v5094_v36  ;;  %v12756_v35 = vld [vmem:[#allocation4 + $0x60] sm:$0xf]  ;;  %v15204_v7 = vld [vmem:[#allocation4 + $0x14c] sm:$0xf0] }
 0x319   :  { %6976 = vmatpush.bf16.msra.mxu2 %v13077_v56  ;;  %6154 = vmatmul.bf16.vlgmr.msrb.gmra.mxu3 %v16533_v43  ;;  %v12884_v8 = vld [vmem:[#allocation4 + $0x160] sm:$0xf]  ;;  %v5808_v52 = vadd.f32 %v5807_v60, %v5794_v10  ;;  %v12757_v41 = vor.u32 %v15176_v21, %v12756_v35  ;;  %v15236_v46 = vld [vmem:[#allocation4 + $0x24c] sm:$0xf0]  ;;  %v5806_v50 = vadd.f32 %v16262_v62, %v5792_v6  ;;  %v12822_v60 = vld [vmem:[#allocation4 + $0xf0] sm:$0xf0] }
 0x31a   :  { %v5122_v40 = vadd.f32 %v16537_v14, %v5108_v3  ;;  %v16538_v56 = vld [vmem:[#allocation49_spill] sm:$0xff]  ;;  %v12885_v5 = vor.u32 %v15208_v18, %v12884_v8  ;;  %v16541_v45 = vld [vmem:[#allocation27_spill] sm:$0xff] }
 0x31b   :  { %6949 = vmatpush.bf16.msra.mxu0 %v12805_v20  ;;  %v5458_v23 = vadd.f32 %v16538_v56, %v5444_v55  ;;  %v13012_v38 = vld [vmem:[#allocation4 + $0x260] sm:$0xf]  ;;  %v6160_v22 = vmax.f32 %v16541_v45, 0.0  ;;  %v16542_v4 = vld [vmem:[#allocation31_spill] sm:$0xff]  ;;  %v5822_v42 = vadd.f32 %v5821_v39, %v5808_v52  ;;  %v5820_v62 = vadd.f32 %v16269_v28, %v5806_v50  ;;  %v15254_v21 = vld [vmem:[#allocation4 + $0x2e4] sm:$0xf] }
 0x31c   :  { %6963 = vmatpush.bf16.msra.mxu1 %v12933_v11  ;;  %v5136_v30 = vadd.f32 %v16539_v44, %v5122_v40  ;;  %v13013_v26 = vor.u32 %v15240_v2, %v13012_v38  ;;  %v12740_v20 = vld [vmem:[#allocation4 + $0x40] sm:$0xf]  ;;  %v15172_v11 = vld [vmem:[#allocation4 + $0x4c] sm:$0xf0]  ;;  %v15190_v40 = vld [vmem:[#allocation4 + $0xe4] sm:$0xf] }
 0x31d   :  { %6977 = vmatpush.bf16.msra.mxu2 %v13061_v27  ;;  %v5472_v16 = vadd.f32 %v16540_v57, %v5458_v23  ;;  %v12868_v27 = vld [vmem:[#allocation4 + $0x140] sm:$0xf]  ;;  %v16543_v58 = vld [vmem:[#allocation51_spill] sm:$0xff]  ;;  %v12741_v43 = vor.u32 %v15172_v11, %v12740_v20  ;;  %v6166_v37 = vmax.f32 %v5822_v42, 0.0  ;;  %v6162_v35 = vmax.f32 %v5820_v62, 0.0 }
 0x31e   :  { %v12996_v47 = vld [vmem:[#allocation4 + $0x240] sm:$0xf]  ;;  %v5150_v48 = vadd.f32 %v16542_v4, %v5136_v30  ;;  %v12869_v1 = vor.u32 %v15204_v7, %v12868_v27  ;;  %v15168_v33 = vld [vmem:[#allocation4 + $0x2c] sm:$0xf0]  ;;  %v13078_v8 = vld [vmem:[#allocation4 + $0x2f0] sm:$0xf0]  ;;  %v12825_v2 = vor.u32 %v15190_v40, %v12822_v60 }
 0x31f   :  { %6950 = vmatpush.bf16.msra.mxu0 %v12789_v19  ;;  %v5486_v36 = vadd.f32 %v16543_v58, %v5472_v16  ;;  %v12997_v29 = vor.u32 %v15236_v46, %v12996_v47  ;;  %v12724_v9 = vld [vmem:[#allocation4 + $0x20] sm:$0xf]  ;;  %v15200_v19 = vld [vmem:[#allocation4 + $0x12c] sm:$0xf0]  ;;  %v6174_v38 = vmul.f32 1.4142135, %v6166_v37  ;;  %v13081_v57 = vor.u32 %v15254_v21, %v13078_v8 }
 0x320   :  { %6964 = vmatpush.bf16.msra.mxu1 %v12917_v53  ;;  %v12852_v49 = vld [vmem:[#allocation4 + $0x120] sm:$0xf]  ;;  %v15232_v3 = vld [vmem:[#allocation4 + $0x22c] sm:$0xf0]  ;;  %v6168_v53 = vmul.f32 1.4142135, %v6160_v22  ;;  %v12725_v55 = vor.u32 %v15168_v33, %v12724_v9 }
 0x321   :  { %6978 = vmatpush.bf16.msra.mxu2 %v13045_v17  ;;  %v12980_v25 = vld [vmem:[#allocation4 + $0x220] sm:$0xf]  ;;  %v6164_v17 = vmax.f32 %v5150_v48, 0.0  ;;  %v16544_v51 = vld [vmem:[#allocation47_spill] sm:$0xff]  ;;  %v6165_v24 = vmax.f32 %v5486_v36, 0.0  ;;  %v12853_v31 = vor.u32 %v15200_v19, %v12852_v49 }
 0x322   :  { %v6161_v61 = vmax.f32 %v16544_v51, 0.0  ;;  %v12708_v63 = vld [vmem:[#allocation4] sm:$0xf]  ;;  %v12981_v34 = vor.u32 %v15232_v3, %v12980_v25  ;;  %v15164_v15 = vld [vmem:[#allocation4 + $0xc] sm:$0xf0]  ;;  %v16301_v25 = vpop.f32.mrf.mxu1 }
 0x323   :  { %6951 = vmatpush.bf16.msra.mxu0 %v12773_v12  ;;  %v12836_v59 = vld [vmem:[#allocation4 + $0x100] sm:$0xf]  ;;  %v15196_v54 = vld [vmem:[#allocation4 + $0x10c] sm:$0xf0]  ;;  %v12709_v28 = vor.u32 %v15164_v15, %v12708_v63  ;;  %v6172_v56 = vmul.f32 1.4142135, %v6164_v17  ;;  %v16303_v63 = vpop.f32.mrf.mxu2 }
 0x324   :  { %6965 = vmatpush.bf16.msra.mxu1 %v12901_v13  ;;  %v12964_v12 = vld [vmem:[#allocation4 + $0x200] sm:$0xf]  ;;  %v15228_v14 = vld [vmem:[#allocation4 + $0x20c] sm:$0xf0]  ;;  %v15222_v13 = vld [vmem:[#allocation4 + $0x1e4] sm:$0xf]  ;;  %v12837_v32 = vor.u32 %v15196_v54, %v12836_v59 }
 0x325   :  { %6979 = vmatpush.bf16.msra.mxu2 %v13029_v0  ;;  %v12950_v0 = vld [vmem:[#allocation4 + $0x1f0] sm:$0xf0]  ;;  %v6173_v23 = vmul.f32 1.4142135, %v6165_v24  ;;  %v12965_v10 = vor.u32 %v15228_v14, %v12964_v12  ;;  %v6169_v18 = vmul.f32 1.4142135, %v6161_v61  ;;  %v16290_v20 = vpack.c.bf16 %v6172_v56, %v6168_v53 }
 0x326   :  { %v12953_v44 = vor.u32 %v15222_v13, %v12950_v0  ;;  %v15186_v30 = vld [vmem:[#allocation4 + $0xc4] sm:$0xf]  ;;  %v12806_v16 = vld [vmem:[#allocation4 + $0xd0] sm:$0xf0]  ;;  %v6170_v39 = vmul.f32 1.4142135, %v6162_v35 }
 0x327   :  { %6952 = vmatpush.bf16.msra.mxu0 %v12757_v41  ;;  %v15218_v52 = vld [vmem:[#allocation4 + $0x1c4] sm:$0xf]  ;;  %v12934_v41 = vld [vmem:[#allocation4 + $0x1d0] sm:$0xf0]  ;;  %v16292_v11 = vpack.c.bf16 %v6173_v23, %v6169_v18  ;;  %v12809_v6 = vor.u32 %v15186_v30, %v12806_v16 }
 0x328   :  { %6966 = vmatpush.bf16.msra.mxu1 %v12885_v5  ;;  %v15250_v5 = vld [vmem:[#allocation4 + $0x2c4] sm:$0xf]  ;;  %v16294_v27 = vpack.c.bf16 %v6174_v38, %v6170_v39  ;;  %v12937_v7 = vor.u32 %v15218_v52, %v12934_v41  ;;  %v12790_v45 = vld [vmem:[#allocation4 + $0xb0] sm:$0xf0] }
 0x329   :  { %6980 = vmatpush.bf16.msra.mxu2 %v13013_v26  ;;  %v13062_v26 = vld [vmem:[#allocation4 + $0x2d0] sm:$0xf0]  ;;  %v15182_v47 = vld [vmem:[#allocation4 + $0xa4] sm:$0xf] }
 0x32a   :  { %v13065_v46 = vor.u32 %v15250_v5, %v13062_v26  ;;  %v15214_v22 = vld [vmem:[#allocation4 + $0x1a4] sm:$0xf]  ;;  %v12918_v4 = vld [vmem:[#allocation4 + $0x1b0] sm:$0xf0]  ;;  %v12793_v36 = vor.u32 %v15182_v47, %v12790_v45  ;;  %v15193_v47 = vld [vmem:[#allocation4 + $0xf4] sm:$0xf0] }
 0x32b   :  { %6953 = vmatpush.bf16.msra.mxu0 %v12741_v43  ;;  %v15246_v48 = vld [vmem:[#allocation4 + $0x2a4] sm:$0xf]  ;;  %v13046_v58 = vld [vmem:[#allocation4 + $0x2b0] sm:$0xf0]  ;;  %v12921_v50 = vor.u32 %v15214_v22, %v12918_v4  ;;  %v16299_v43 = vpop.f32.mrf.mxu0  ;;  %v16311_v26 = vpop.f32.mrf.mxu2  ;;  %v15225_v45 = vld [vmem:[#allocation4 + $0x1f4] sm:$0xf0] }
 0x32c   :  { %6967 = vmatpush.bf16.msra.mxu1 %v12869_v1  ;;  %v15178_v42 = vld [vmem:[#allocation4 + $0x84] sm:$0xf]  ;;  %v13049_v1 = vor.u32 %v15246_v48, %v13046_v58  ;;  %v12902_v33 = vld [vmem:[#allocation4 + $0x190] sm:$0xf0]  ;;  %v13084_v22 = vld [vmem:[#allocation4 + $0x2e8] sm:$0xf] }
 0x32d   :  { %6981 = vmatpush.bf16.msra.mxu2 %v12997_v29  ;;  %v12774_v29 = vld [vmem:[#allocation4 + $0x90] sm:$0xf0]  ;;  %v15210_v9 = vld [vmem:[#allocation4 + $0x184] sm:$0xf]  ;;  %v15257_v4 = vld [vmem:[#allocation4 + $0x2f4] sm:$0xf0] }
 0x32e   :  { %v15242_v49 = vld [vmem:[#allocation4 + $0x284] sm:$0xf]  ;;  %v13030_v19 = vld [vmem:[#allocation4 + $0x290] sm:$0xf0]  ;;  %v12777_v3 = vor.u32 %v15178_v42, %v12774_v29  ;;  %v12905_v53 = vor.u32 %v15210_v9, %v12902_v33  ;;  %v13085_v29 = vor.u32 %v15257_v4, %v13084_v22  ;;  %v12812_v9 = vld [vmem:[#allocation4 + $0xc8] sm:$0xf] }
 0x32f   :  { %6954 = vmatpush.bf16.msra.mxu0 %v12725_v55  ;;  %v15174_v17 = vld [vmem:[#allocation4 + $0x64] sm:$0xf]  ;;  %v13033_v51 = vor.u32 %v15242_v49, %v13030_v19  ;;  %v12758_v61 = vld [vmem:[#allocation4 + $0x70] sm:$0xf0]  ;;  %v15189_v33 = vld [vmem:[#allocation4 + $0xd4] sm:$0xf0] }
 0x330   :  { %6968 = vmatpush.bf16.msra.mxu1 %v12853_v31  ;;  %v15206_v24 = vld [vmem:[#allocation4 + $0x164] sm:$0xf]  ;;  %v12886_v62 = vld [vmem:[#allocation4 + $0x170] sm:$0xf0]  ;;  %v16305_v31 = vpop.f32.mrf.mxu3  ;;  %v12940_v49 = vld [vmem:[#allocation4 + $0x1c8] sm:$0xf] }
 0x331   :  { %6982 = vmatpush.bf16.msra.mxu2 %v12981_v34  ;;  %v15238_v37 = vld [vmem:[#allocation4 + $0x264] sm:$0xf]  ;;  %v13014_v55 = vld [vmem:[#allocation4 + $0x270] sm:$0xf0]  ;;  %v12761_v34 = vor.u32 %v15174_v17, %v12758_v61  ;;  %v12889_v15 = vor.u32 %v15206_v24, %v12886_v62  ;;  %v15221_v19 = vld [vmem:[#allocation4 + $0x1d4] sm:$0xf0] }
 0x332   :  { %v15170_v59 = vld [vmem:[#allocation4 + $0x44] sm:$0xf]  ;;  %v13017_v54 = vor.u32 %v15238_v37, %v13014_v55  ;;  %v12742_v12 = vld [vmem:[#allocation4 + $0x50] sm:$0xf0]  ;;  %v12941_v61 = vor.u32 %v15221_v19, %v12940_v49  ;;  %v12796_v62 = vld [vmem:[#allocation4 + $0xa8] sm:$0xf] }
 0x333   :  { %6955 = vmatpush.bf16.msra.mxu0 %v12709_v28  ;;  %v15202_v14 = vld [vmem:[#allocation4 + $0x144] sm:$0xf]  ;;  %v12870_v40 = vld [vmem:[#allocation4 + $0x150] sm:$0xf0]  ;;  %v16307_v0 = vpop.f32.mrf.mxu0  ;;  %v12745_v35 = vor.u32 %v15170_v59, %v12742_v12  ;;  %v15185_v37 = vld [vmem:[#allocation4 + $0xb4] sm:$0xf0] }
 0x334   :  { %6969 = vmatpush.bf16.msra.mxu1 %v12837_v32  ;;  %v15234_v60 = vld [vmem:[#allocation4 + $0x244] sm:$0xf]  ;;  %v12998_v13 = vld [vmem:[#allocation4 + $0x250] sm:$0xf0]  ;;  %v12873_v28 = vor.u32 %v15202_v14, %v12870_v40  ;;  %v12924_v55 = vld [vmem:[#allocation4 + $0x1a8] sm:$0xf] }
 0x335   :  { %6983 = vmatpush.bf16.msra.mxu2 %v12965_v10  ;;  %v15166_v21 = vld [vmem:[#allocation4 + $0x24] sm:$0xf]  ;;  %v13001_v8 = vor.u32 %v15234_v60, %v12998_v13  ;;  %v12726_v56 = vld [vmem:[#allocation4 + $0x30] sm:$0xf0]  ;;  %v16309_v10 = vpop.f32.mrf.mxu1  ;;  %v15249_v59 = vld [vmem:[#allocation4 + $0x2b4] sm:$0xf0]  ;;  %v12797_v60 = vor.u32 %v15185_v37, %v12796_v62 }
 0x336   :  { %6956 = vmatmul.bf16.vlgmr.msra.gmra.mxu0 %v16290_v20  ;;  %v15198_v23 = vld [vmem:[#allocation4 + $0x124] sm:$0xf]  ;;  %v12854_v32 = vld [vmem:[#allocation4 + $0x130] sm:$0xf0]  ;;  %v13204_v14 = vld [vmem:[#allocation4 + $0x3e0] sm:$0xf] }
 0x337   :  { %7004 = vmatpush.bf16.msrb.mxu0 %v12825_v2  ;;  %6970 = vmatmul.bf16.vlgmr.msra.gmra.mxu1 %v16292_v11  ;;  %v15230_v18 = vld [vmem:[#allocation4 + $0x224] sm:$0xf]  ;;  %v12982_v38 = vld [vmem:[#allocation4 + $0x230] sm:$0xf0]  ;;  %v12729_v2 = vor.u32 %v15166_v21, %v12726_v56  ;;  %v15288_v40 = vld [vmem:[#allocation4 + $0x3ec] sm:$0xf0] }
 0x338   :  { %7018 = vmatpush.bf16.msrb.mxu1 %v12953_v44  ;;  %6984 = vmatmul.bf16.vlgmr.msra.gmra.mxu2 %v16294_v27  ;;  %v12857_v44 = vor.u32 %v15198_v23, %v12854_v32  ;;  %v15162_v30 = vld [vmem:[#allocation4 + $0x4] sm:$0xf]  ;;  %v12985_v52 = vor.u32 %v15230_v18, %v12982_v38  ;;  %v12838_v41 = vld [vmem:[#allocation4 + $0x110] sm:$0xf0]  ;;  %v13205_v13 = vor.u32 %v15288_v40, %v13204_v14  ;;  %v12780_v21 = vld [vmem:[#allocation4 + $0x88] sm:$0xf] }
 0x339   :  { %7032 = vmatpush.bf16.msrb.mxu2 %v13081_v57  ;;  %v12710_v57 = vld [vmem:[#allocation4 + $0x10] sm:$0xf0]  ;;  %v15194_v16 = vld [vmem:[#allocation4 + $0x104] sm:$0xf]  ;;  %v12908_v56 = vld [vmem:[#allocation4 + $0x188] sm:$0xf] }
 0x33a   :  { %v15226_v39 = vld [vmem:[#allocation4 + $0x204] sm:$0xf]  ;;  %v12966_v5 = vld [vmem:[#allocation4 + $0x210] sm:$0xf0]  ;;  %v12713_v48 = vor.u32 %v15162_v30, %v12710_v57  ;;  %v12841_v58 = vor.u32 %v15194_v16, %v12838_v41  ;;  %v15213_v32 = vld [vmem:[#allocation4 + $0x194] sm:$0xf0]  ;;  %6990 = vmatpush.bf16.msra.mxu3 %v13205_v13  ;;  %v5848_v16 = vadd.f32 %v16301_v25, %v16299_v43 }
 0x33b   :  { %7005 = vmatpush.bf16.msrb.mxu0 %v12809_v6  ;;  %v16313_v6 = vpop.f32.mrf.mxu3  ;;  %v13036_v18 = vld [vmem:[#allocation4 + $0x288] sm:$0xf]  ;;  %v15245_v38 = vld [vmem:[#allocation4 + $0x294] sm:$0xf0]  ;;  %v12909_v41 = vor.u32 %v15213_v32, %v12908_v56  ;;  %v13172_v4 = vld [vmem:[#allocation4 + $0x3a0] sm:$0xf] }
 0x33c   :  { %7019 = vmatpush.bf16.msrb.mxu1 %v12937_v7  ;;  %v12828_v7 = vld [vmem:[#allocation4 + $0xe8] sm:$0xf]  ;;  %v15241_v22 = vld [vmem:[#allocation4 + $0x274] sm:$0xf0]  ;;  %v5862_v43 = vadd.f32 %v16303_v63, %v5848_v16 }
 0x33d   :  { %7033 = vmatpush.bf16.msrb.mxu2 %v13065_v46  ;;  %v12956_v46 = vld [vmem:[#allocation4 + $0x1e8] sm:$0xf]  ;;  %v12829_v42 = vor.u32 %v15193_v47, %v12828_v7  ;;  %v16317_v17 = vpop.f32.mrf.mxu1  ;;  %v15177_v7 = vld [vmem:[#allocation4 + $0x74] sm:$0xf0] }
 0x33e   :  { %v12892_v47 = vld [vmem:[#allocation4 + $0x168] sm:$0xf]  ;;  %v5876_v37 = vadd.f32 %v16305_v31, %v5862_v43  ;;  %v15169_v14 = vld [vmem:[#allocation4 + $0x34] sm:$0xf0] }
 0x33f   :  { %7006 = vmatpush.bf16.msrb.mxu0 %v12793_v36  ;;  %v16315_v36 = vpop.f32.mrf.mxu0  ;;  %v12876_v49 = vld [vmem:[#allocation4 + $0x148] sm:$0xf]  ;;  %v15165_v32 = vld [vmem:[#allocation4 + $0x14] sm:$0xf0] }
 0x340   :  { %7020 = vmatpush.bf16.msrb.mxu1 %v12921_v50  ;;  %v12969_v50 = vor.u32 %v15226_v39, %v12966_v5  ;;  %v13037_v39 = vor.u32 %v15245_v38, %v13036_v18  ;;  %v12764_v5 = vld [vmem:[#allocation4 + $0x68] sm:$0xf] }
 0x341   :  { %7034 = vmatpush.bf16.msrb.mxu2 %v13049_v1  ;;  %v12957_v1 = vor.u32 %v15225_v45, %v12956_v46  ;;  %v15209_v46 = vld [vmem:[#allocation4 + $0x174] sm:$0xf0]  ;;  %v13020_v45 = vld [vmem:[#allocation4 + $0x268] sm:$0xf] }
 0x342   :  { %v12860_v40 = vld [vmem:[#allocation4 + $0x128] sm:$0xf] }
 0x343   :  { %7007 = vmatpush.bf16.msrb.mxu0 %v12777_v3  ;;  %v13068_v3 = vld [vmem:[#allocation4 + $0x2c8] sm:$0xf]  ;;  %v16323_v12 = vpop.f32.mrf.mxu3 }
 0x344   :  { %7021 = vmatpush.bf16.msrb.mxu1 %v12905_v53  ;;  %v15253_v53 = vld [vmem:[#allocation4 + $0x2d4] sm:$0xf0]  ;;  %v12988_v13 = vld [vmem:[#allocation4 + $0x228] sm:$0xf] }
 0x345   :  { %7035 = vmatpush.bf16.msrb.mxu2 %v13033_v51  ;;  %v12813_v51 = vor.u32 %v15189_v33, %v12812_v9  ;;  %v13069_v24 = vor.u32 %v15253_v53, %v13068_v3  ;;  %v12748_v9 = vld [vmem:[#allocation4 + $0x48] sm:$0xf]  ;;  %v15173_v33 = vld [vmem:[#allocation4 + $0x54] sm:$0xf0] }
 0x346   :  { %v15205_v3 = vld [vmem:[#allocation4 + $0x154] sm:$0xf0]  ;;  %v13004_v53 = vld [vmem:[#allocation4 + $0x248] sm:$0xf]  ;;  %v12749_v63 = vor.u32 %v15173_v33, %v12748_v9 }
 0x347   :  { %7008 = vmatpush.bf16.msrb.mxu0 %v12761_v34  ;;  %v15217_v34 = vld [vmem:[#allocation4 + $0x1b4] sm:$0xf0]  ;;  %v16326_v23 = vpop.f32.mrf.mxu0  ;;  %v12716_v56 = vld [vmem:[#allocation4 + $0x8] sm:$0xf] }
 0x348   :  { %7022 = vmatpush.bf16.msrb.mxu1 %v12889_v15  ;;  %v13052_v15 = vld [vmem:[#allocation4 + $0x2a8] sm:$0xf] }
 0x349   :  { %7036 = vmatpush.bf16.msrb.mxu2 %v13017_v54  ;;  %v16321_v54 = vpop.f32.mrf.mxu2  ;;  %v12844_v18 = vld [vmem:[#allocation4 + $0x108] sm:$0xf] }
 0x34b   :  { %7009 = vmatpush.bf16.msrb.mxu0 %v12745_v35  ;;  %v12925_v35 = vor.u32 %v15217_v34, %v12924_v55  ;;  %v12877_v34 = vor.u32 %v15205_v3, %v12876_v49  ;;  %v15187_v49 = vld [vmem:[#allocation4 + $0xcc] sm:$0xf]  ;;  %v12814_v3 = vld [vmem:[#allocation4 + $0xd8] sm:$0xf0] }
 0x34c   :  { %7023 = vmatpush.bf16.msrb.mxu1 %v12873_v28  ;;  %v13053_v28 = vor.u32 %v15249_v59, %v13052_v15  ;;  %v12732_v59 = vld [vmem:[#allocation4 + $0x28] sm:$0xf] }
 0x34d   :  { %7037 = vmatpush.bf16.msrb.mxu2 %v13001_v8  ;;  %v15181_v8 = vld [vmem:[#allocation4 + $0x94] sm:$0xf0]  ;;  %v12733_v31 = vor.u32 %v15169_v14, %v12732_v59 }
 0x34e   :  { %v12781_v30 = vor.u32 %v15181_v8, %v12780_v21  ;;  %v15272_v21 = vld [vmem:[#allocation4 + $0x36c] sm:$0xf0]  ;;  %v5850_v8 = vadd.f32 %v16309_v10, %v16307_v0  ;;  %v15191_v0 = vld [vmem:[#allocation4 + $0xec] sm:$0xf]  ;;  %v12830_v10 = vld [vmem:[#allocation4 + $0xf8] sm:$0xf0] }
 0x34f   :  { %7010 = vmatpush.bf16.msrb.mxu0 %v12729_v2  ;;  %v13188_v2 = vld [vmem:[#allocation4 + $0x3c0] sm:$0xf]  ;;  %v16337_v19 = vpop.f32.mrf.mxu0  ;;  %v12833_v9 = vor.u32 %v15191_v0, %v12830_v10  ;;  %v12782_v0 = vld [vmem:[#allocation4 + $0x98] sm:$0xf0] }
 0x350   :  { %7024 = vmatpush.bf16.msrb.mxu1 %v12857_v44  ;;  %v15284_v44 = vld [vmem:[#allocation4 + $0x3cc] sm:$0xf0] }
 0x351   :  { %7038 = vmatpush.bf16.msrb.mxu2 %v12985_v52  ;;  %v13189_v57 = vor.u32 %v15284_v44, %v13188_v2  ;;  %v16330_v52 = vpop.f32.mrf.mxu1  ;;  %v16333_v25 = vpop.f32.mrf.mxu2  ;;  %v5890_v2 = vadd.f32 %v16315_v36, %v5876_v37  ;;  %v5864_v36 = vadd.f32 %v16311_v26, %v5850_v8  ;;  %v13070_v37 = vld [vmem:[#allocation4 + $0x2d8] sm:$0xf0]  ;;  %v15215_v8 = vld [vmem:[#allocation4 + $0x1ac] sm:$0xf] }
 0x353   :  { %7011 = vmatpush.bf16.msrb.mxu0 %v12713_v48  ;;  %6991 = vmatpush.bf16.msra.mxu3 %v13189_v57  ;;  %v15280_v48 = vld [vmem:[#allocation4 + $0x3ac] sm:$0xf0]  ;;  %v5904_v43 = vadd.f32 %v16317_v17, %v5890_v2  ;;  %v15251_v17 = vld [vmem:[#allocation4 + $0x2cc] sm:$0xf] }
 0x354   :  { %7025 = vmatpush.bf16.msrb.mxu1 %v12841_v58  ;;  %v12765_v58 = vor.u32 %v15177_v7, %v12764_v5  ;;  %v15229_v5 = vld [vmem:[#allocation4 + $0x214] sm:$0xf0]  ;;  %v15223_v7 = vld [vmem:[#allocation4 + $0x1ec] sm:$0xf] }
 0x355   :  { %7039 = vmatpush.bf16.msrb.mxu2 %v12969_v50  ;;  %v13173_v50 = vor.u32 %v15280_v48, %v13172_v4  ;;  %v12717_v4 = vor.u32 %v15165_v32, %v12716_v56  ;;  %v15255_v48 = vld [vmem:[#allocation4 + $0x2ec] sm:$0xf] }
 0x356   :  { %7012 = vmatmul.bf16.vlgmr.msrb.gmra.mxu0 %v16290_v20  ;;  %v15247_v56 = vld [vmem:[#allocation4 + $0x2ac] sm:$0xf] }
 0x357   :  { %7060 = vmatpush.bf16.msra.mxu0 %v12829_v42  ;;  %7026 = vmatmul.bf16.vlgmr.msrb.gmra.mxu1 %v16292_v11  ;;  %v16335_v42 = vpop.f32.mrf.mxu3 }
 0x358   :  { %7074 = vmatpush.bf16.msra.mxu1 %v12957_v1  ;;  %7040 = vmatmul.bf16.vlgmr.msrb.gmra.mxu2 %v16294_v27  ;;  %v12893_v1 = vor.u32 %v15209_v46, %v12892_v47  ;;  %v12958_v47 = vld [vmem:[#allocation4 + $0x1f8] sm:$0xf0]  ;;  %v13124_v46 = vld [vmem:[#allocation4 + $0x340] sm:$0xf] }
 0x359   :  { %7088 = vmatpush.bf16.msra.mxu2 %v13085_v29  ;;  %v13021_v29 = vor.u32 %v15241_v22, %v13020_v45  ;;  %6992 = vmatpush.bf16.msra.mxu3 %v13173_v50  ;;  %v16340_v55 = vpop.f32.mrf.mxu1  ;;  %v16345_v44 = vpop.f32.mrf.mxu2  ;;  %v15268_v45 = vld [vmem:[#allocation4 + $0x34c] sm:$0xf0]  ;;  %v12961_v33 = vor.u32 %v15223_v7, %v12958_v47 }
 0x35a   :  { %v16350_v22 = vpop.f32.mrf.mxu0  ;;  %v13125_v50 = vor.u32 %v15268_v45, %v13124_v46  ;;  %v15211_v46 = vld [vmem:[#allocation4 + $0x18c] sm:$0xf]  ;;  %v12910_v45 = vld [vmem:[#allocation4 + $0x198] sm:$0xf0] }
 0x35b   :  { %7061 = vmatpush.bf16.msra.mxu0 %v12813_v51  ;;  %v15237_v51 = vld [vmem:[#allocation4 + $0x254] sm:$0xf0] }
 0x35c   :  { %7075 = vmatpush.bf16.msra.mxu1 %v12941_v61  ;;  %v13156_v61 = vld [vmem:[#allocation4 + $0x380] sm:$0xf]  ;;  %v13005_v15 = vor.u32 %v15237_v51, %v13004_v53  ;;  %v15219_v53 = vld [vmem:[#allocation4 + $0x1cc] sm:$0xf] }
 0x35d   :  { %7089 = vmatpush.bf16.msra.mxu2 %v13069_v24  ;;  %v15276_v24 = vld [vmem:[#allocation4 + $0x38c] sm:$0xf0] }
 0x35e   :  { %v13157_v62 = vor.u32 %v15276_v24, %v13156_v61  ;;  %v12942_v61 = vld [vmem:[#allocation4 + $0x1d8] sm:$0xf0]  ;;  %v13108_v24 = vld [vmem:[#allocation4 + $0x320] sm:$0xf] }
 0x35f   :  { %7062 = vmatpush.bf16.msra.mxu0 %v12797_v60  ;;  %v15201_v60 = vld [vmem:[#allocation4 + $0x134] sm:$0xf0] }
 0x360   :  { %7076 = vmatpush.bf16.msra.mxu1 %v12925_v35  ;;  %v15233_v35 = vld [vmem:[#allocation4 + $0x234] sm:$0xf0]  ;;  %6993 = vmatpush.bf16.msra.mxu3 %v13157_v62  ;;  %v12861_v57 = vor.u32 %v15201_v60, %v12860_v40  ;;  %v5878_v62 = vadd.f32 %v16313_v6, %v5864_v36  ;;  %v12817_v40 = vor.u32 %v15187_v49, %v12814_v3  ;;  %v15243_v36 = vld [vmem:[#allocation4 + $0x28c] sm:$0xf] }
 0x361   :  { %7090 = vmatpush.bf16.msra.mxu2 %v13053_v28  ;;  %v13140_v28 = vld [vmem:[#allocation4 + $0x360] sm:$0xf]  ;;  %v12989_v16 = vor.u32 %v15233_v35, %v12988_v13  ;;  %v16353_v26 = vpop.f32.mrf.mxu1  ;;  %v12945_v60 = vor.u32 %v15219_v53, %v12942_v61  ;;  %v12798_v13 = vld [vmem:[#allocation4 + $0xb8] sm:$0xf0]  ;;  %v15207_v3 = vld [vmem:[#allocation4 + $0x16c] sm:$0xf] }
 0x362   :  { %v13141_v38 = vor.u32 %v15272_v21, %v13140_v28  ;;  %v5892_v14 = vadd.f32 %v16326_v23, %v5878_v62  ;;  %v13092_v35 = vld [vmem:[#allocation4 + $0x300] sm:$0xf]  ;;  %v15260_v28 = vld [vmem:[#allocation4 + $0x30c] sm:$0xf0]  ;;  %v16358_v21 = vpop.f32.mrf.mxu2  ;;  %v16363_v32 = vpop.f32.mrf.mxu0  ;;  %v13054_v23 = vld [vmem:[#allocation4 + $0x2b8] sm:$0xf0] }
 0x363   :  { %7063 = vmatpush.bf16.msra.mxu0 %v12781_v30  ;;  %v16347_v30 = vpop.f32.mrf.mxu3  ;;  %v13057_v47 = vor.u32 %v15247_v56, %v13054_v23  ;;  %v15239_v53 = vld [vmem:[#allocation4 + $0x26c] sm:$0xf]  ;;  %v13174_v62 = vld [vmem:[#allocation4 + $0x3b0] sm:$0xf0] }
 0x364   :  { %7077 = vmatpush.bf16.msra.mxu1 %v12909_v41  ;;  %v15197_v41 = vld [vmem:[#allocation4 + $0x114] sm:$0xf0]  ;;  %6994 = vmatpush.bf16.msra.mxu3 %v13141_v38  ;;  %v13206_v38 = vld [vmem:[#allocation4 + $0x3f0] sm:$0xf0] }
 0x365   :  { %7091 = vmatpush.bf16.msra.mxu2 %v13037_v39  ;;  %v12972_v39 = vld [vmem:[#allocation4 + $0x208] sm:$0xf] }
 0x367   :  { %7064 = vmatpush.bf16.msra.mxu0 %v12765_v58  ;;  %v13086_v58 = vld [vmem:[#allocation4 + $0x2f8] sm:$0xf0] }
 0x368   :  { %7078 = vmatpush.bf16.msra.mxu1 %v12893_v1  ;;  %v12845_v1 = vor.u32 %v15197_v41, %v12844_v18  ;;  %6995 = vmatpush.bf16.msra.mxu3 %v13125_v50  ;;  %v13089_v51 = vor.u32 %v15255_v48, %v13086_v58  ;;  %v15286_v18 = vld [vmem:[#allocation4 + $0x3e4] sm:$0xf]  ;;  %v13038_v48 = vld [vmem:[#allocation4 + $0x298] sm:$0xf0]  ;;  %v13190_v58 = vld [vmem:[#allocation4 + $0x3d0] sm:$0xf0] }
 0x369   :  { %7092 = vmatpush.bf16.msra.mxu2 %v13021_v29  ;;  %v12973_v29 = vor.u32 %v15229_v5, %v12972_v39  ;;  %v15179_v5 = vld [vmem:[#allocation4 + $0x8c] sm:$0xf]  ;;  %v16370_v7 = vpop.f32.mrf.mxu1  ;;  %v13041_v49 = vor.u32 %v15243_v36, %v13038_v48 }
 0x36a   :  { %v12785_v50 = vor.u32 %v15179_v5, %v12782_v0  ;;  %v12990_v0 = vld [vmem:[#allocation4 + $0x238] sm:$0xf0] }
 0x36b   :  { %7065 = vmatpush.bf16.msra.mxu0 %v12749_v63  ;;  %v15264_v63 = vld [vmem:[#allocation4 + $0x32c] sm:$0xf0]  ;;  %v16360_v6 = vpop.f32.mrf.mxu3 }
 0x36c   :  { %7079 = vmatpush.bf16.msra.mxu1 %v12877_v34  ;;  %v5918_v34 = vadd.f32 %v16321_v54, %v5904_v43  ;;  %v13109_v59 = vor.u32 %v15264_v63, %v13108_v24  ;;  %v13073_v54 = vor.u32 %v15251_v17, %v13070_v37  ;;  %v12913_v43 = vor.u32 %v15211_v46, %v12910_v45  ;;  %v13022_v24 = vld [vmem:[#allocation4 + $0x278] sm:$0xf0]  ;;  %v15278_v63 = vld [vmem:[#allocation4 + $0x3a4] sm:$0xf]  ;;  %v6003_v37 = vpop.f32.mrf.mxu0 }
 0x36d   :  { %7093 = vmatpush.bf16.msra.mxu2 %v13005_v15  ;;  %v15183_v15 = vld [vmem:[#allocation4 + $0xac] sm:$0xf] }
 0x36e   :  { %v5932_v2 = vadd.f32 %v16323_v12, %v5918_v34  ;;  %6996 = vmatpush.bf16.msra.mxu3 %v13109_v59  ;;  %v12801_v41 = vor.u32 %v15183_v15, %v12798_v13  ;;  %v13209_v12 = vor.u32 %v15286_v18, %v13206_v38  ;;  %v15171_v59 = vld [vmem:[#allocation4 + $0x4c] sm:$0xf]  ;;  %v12878_v13 = vld [vmem:[#allocation4 + $0x158] sm:$0xf0] }
 0x36f   :  { %7066 = vmatpush.bf16.msra.mxu0 %v12733_v31  ;;  %v12926_v31 = vld [vmem:[#allocation4 + $0x1b8] sm:$0xf0]  ;;  %v15167_v18 = vld [vmem:[#allocation4 + $0x2c] sm:$0xf] }
 0x370   :  { %7080 = vmatpush.bf16.msra.mxu1 %v12861_v57  ;;  %v13093_v57 = vor.u32 %v15260_v28, %v13092_v35  ;;  %v12929_v39 = vor.u32 %v15215_v8, %v12926_v31  ;;  %v5946_v10 = vadd.f32 %v16337_v19, %v5932_v2  ;;  %v12766_v19 = vld [vmem:[#allocation4 + $0x78] sm:$0xf0]  ;;  %v15235_v35 = vld [vmem:[#allocation4 + $0x24c] sm:$0xf]  ;;  %v13158_v8 = vld [vmem:[#allocation4 + $0x390] sm:$0xf0] }
 0x371   :  { %7094 = vmatpush.bf16.msra.mxu2 %v12989_v16  ;;  %v5906_v16 = vadd.f32 %v16330_v52, %v5892_v14  ;;  %v15282_v52 = vld [vmem:[#allocation4 + $0x3c4] sm:$0xf]  ;;  %v12750_v14 = vld [vmem:[#allocation4 + $0x58] sm:$0xf0] }
 0x372   :  { %6997 = vmatpush.bf16.msra.mxu3 %v13093_v57  ;;  %v13006_v28 = vld [vmem:[#allocation4 + $0x258] sm:$0xf0]  ;;  %v12753_v56 = vor.u32 %v15171_v59, %v12750_v14  ;;  %v15258_v14 = vld [vmem:[#allocation4 + $0x304] sm:$0xf] }
 0x373   :  { %7067 = vmatpush.bf16.msra.mxu0 %v12717_v4  ;;  %v5920_v4 = vadd.f32 %v16333_v25, %v5906_v16  ;;  %v12894_v25 = vld [vmem:[#allocation4 + $0x178] sm:$0xf0]  ;;  %v13009_v57 = vor.u32 %v15235_v35, %v13006_v28  ;;  %v15199_v16 = vld [vmem:[#allocation4 + $0x12c] sm:$0xf] }
 0x374   :  { %7081 = vmatpush.bf16.msra.mxu1 %v12845_v1  ;;  %v15175_v1 = vld [vmem:[#allocation4 + $0x6c] sm:$0xf]  ;;  %v12897_v15 = vor.u32 %v15207_v3, %v12894_v25  ;;  %v12734_v38 = vld [vmem:[#allocation4 + $0x38] sm:$0xf0]  ;;  %v6057_v45 = vpop.f32.mrf.mxu0 }
 0x375   :  { %7095 = vmatpush.bf16.msra.mxu2 %v12973_v29  ;;  %v5960_v29 = vadd.f32 %v16340_v55, %v5946_v10  ;;  %v5934_v61 = vadd.f32 %v16335_v42, %v5920_v4  ;;  %v12769_v34 = vor.u32 %v15175_v1, %v12766_v19  ;;  %v13177_v42 = vor.u32 %v15278_v63, %v13174_v62  ;;  %v15270_v10 = vld [vmem:[#allocation4 + $0x364] sm:$0xf]  ;;  %v12718_v4 = vld [vmem:[#allocation4 + $0x18] sm:$0xf0]  ;;  %v13110_v62 = vld [vmem:[#allocation4 + $0x330] sm:$0xf0] }
 0x376   :  { %7068 = vmatmul.bf16.vlgmr.msra.gmra.mxu0 %v16290_v20  ;;  %7046 = vmatpush.bf16.msrb.mxu3 %v13209_v12  ;;  %v12737_v36 = vor.u32 %v15167_v18, %v12734_v38  ;;  %v12974_v19 = vld [vmem:[#allocation4 + $0x218] sm:$0xf0]  ;;  %v15262_v63 = vld [vmem:[#allocation4 + $0x324] sm:$0xf] }
 0x377   :  { %7116 = vmatpush.bf16.msrb.mxu0 %v12833_v9  ;;  %7082 = vmatmul.bf16.vlgmr.msra.gmra.mxu1 %v16292_v11  ;;  %v16374_v9 = vpop.f32.mrf.mxu2  ;;  %v5974_v17 = vadd.f32 %v16345_v44, %v5960_v29  ;;  %v5948_v55 = vadd.f32 %v16350_v22, %v5934_v61  ;;  %v6017_v22 = vpop.f32.mrf.mxu1  ;;  %v15266_v29 = vld [vmem:[#allocation4 + $0x344] sm:$0xf] }
 0x378   :  { %7130 = vmatpush.bf16.msrb.mxu1 %v12961_v33  ;;  %7096 = vmatmul.bf16.vlgmr.msra.gmra.mxu2 %v16294_v27  ;;  %v16376_v33 = vpop.f32.mrf.mxu3 }
 0x379   :  { %7144 = vmatpush.bf16.msrb.mxu2 %v13089_v51  ;;  %v13193_v51 = vor.u32 %v15282_v52, %v13190_v58  ;;  %v5988_v44 = vadd.f32 %v16347_v30, %v5974_v17  ;;  %v5962_v31 = vadd.f32 %v16353_v26, %v5948_v55  ;;  %v13142_v26 = vld [vmem:[#allocation4 + $0x370] sm:$0xf0]  ;;  %v15195_v58 = vld [vmem:[#allocation4 + $0x10c] sm:$0xf] }
 0x37b   :  { %7117 = vmatpush.bf16.msrb.mxu0 %v12817_v40  ;;  %v13025_v40 = vor.u32 %v15239_v53, %v13022_v24  ;;  %7047 = vmatpush.bf16.msrb.mxu3 %v13193_v51  ;;  %v6002_v2 = vadd.f32 %v16363_v32, %v5988_v44  ;;  %v5976_v30 = vadd.f32 %v16358_v21, %v5962_v31  ;;  %v15163_v32 = vld [vmem:[#allocation4 + $0xc] sm:$0xf] }
 0x37c   :  { %7131 = vmatpush.bf16.msrb.mxu1 %v12945_v60  ;;  %v15203_v60 = vld [vmem:[#allocation4 + $0x14c] sm:$0xf]  ;;  %v13145_v21 = vor.u32 %v15270_v10, %v13142_v26  ;;  %v12721_v51 = vor.u32 %v15163_v32, %v12718_v4  ;;  %v6059_v59 = vpop.f32.mrf.mxu0 }
 0x37d   :  { %7145 = vmatpush.bf16.msrb.mxu2 %v13073_v54  ;;  %v15274_v54 = vld [vmem:[#allocation4 + $0x384] sm:$0xf]  ;;  %v12881_v23 = vor.u32 %v15203_v60, %v12878_v13  ;;  %v6016_v48 = vadd.f32 %v16370_v7, %v6002_v2  ;;  %v5990_v1 = vadd.f32 %v16360_v6, %v5976_v30 }
 0x37e   :  { %v13161_v5 = vor.u32 %v15274_v54, %v13158_v8 }
 0x37f   :  { %7118 = vmatpush.bf16.msrb.mxu0 %v12801_v41  ;;  %v12862_v41 = vld [vmem:[#allocation4 + $0x138] sm:$0xf0]  ;;  %7048 = vmatpush.bf16.msrb.mxu3 %v13177_v42  ;;  %v6030_v3 = vadd.f32 %v16374_v9, %v6016_v48  ;;  %v6071_v25 = vpop.f32.mrf.mxu1  ;;  %v6004_v53 = vadd.f32 %v6003_v37, %v5990_v1  ;;  %v13113_v9 = vor.u32 %v15262_v63, %v13110_v62  ;;  %v15265_v63 = vld [vmem:[#allocation4 + $0x334] sm:$0xf0] }
 0x380   :  { %7132 = vmatpush.bf16.msrb.mxu1 %v12929_v39  ;;  %v15231_v39 = vld [vmem:[#allocation4 + $0x22c] sm:$0xf]  ;;  %v6045_v46 = vpop.f32.mrf.mxu3  ;;  %v12865_v12 = vor.u32 %v15199_v16, %v12862_v41 }
 0x381   :  { %7146 = vmatpush.bf16.msrb.mxu2 %v13057_v47  ;;  %v6031_v47 = vpop.f32.mrf.mxu2  ;;  %v12993_v52 = vor.u32 %v15231_v39, %v12990_v0  ;;  %v6044_v6 = vadd.f32 %v16376_v33, %v6030_v3  ;;  %v13148_v3 = vld [vmem:[#allocation4 + $0x368] sm:$0xf] }
 0x383   :  { %7119 = vmatpush.bf16.msrb.mxu0 %v12785_v50  ;;  %v12846_v50 = vld [vmem:[#allocation4 + $0x118] sm:$0xf0]  ;;  %7049 = vmatpush.bf16.msrb.mxu3 %v13161_v5 }
 0x384   :  { %7133 = vmatpush.bf16.msrb.mxu1 %v12913_v43  ;;  %v15227_v43 = vld [vmem:[#allocation4 + $0x20c] sm:$0xf]  ;;  %v12849_v7 = vor.u32 %v15195_v58, %v12846_v50  ;;  %v15285_v58 = vld [vmem:[#allocation4 + $0x3d4] sm:$0xf0] }
 0x385   :  { %7147 = vmatpush.bf16.msrb.mxu2 %v13041_v49  ;;  %v13126_v49 = vld [vmem:[#allocation4 + $0x350] sm:$0xf0]  ;;  %v12977_v61 = vor.u32 %v15227_v43, %v12974_v19  ;;  %v13180_v43 = vld [vmem:[#allocation4 + $0x3a8] sm:$0xf] }
 0x386   :  { %v13129_v24 = vor.u32 %v15266_v29, %v13126_v49  ;;  %v13164_v19 = vld [vmem:[#allocation4 + $0x388] sm:$0xf]  ;;  %v15277_v29 = vld [vmem:[#allocation4 + $0x394] sm:$0xf0] }
 0x387   :  { %7120 = vmatpush.bf16.msrb.mxu0 %v12769_v34  ;;  %7050 = vmatpush.bf16.msrb.mxu3 %v13145_v21  ;;  %v6018_v34 = vadd.f32 %v6017_v22, %v6004_v53  ;;  %v6073_v60 = vpop.f32.mrf.mxu1  ;;  %v15281_v21 = vld [vmem:[#allocation4 + $0x3b4] sm:$0xf0]  ;;  %v13165_v49 = vor.u32 %v15277_v29, %v13164_v19  ;;  %v13428_v29 = vld [vmem:[#allocation4 + $0x5a0] sm:$0xf] }
 0x388   :  { %7134 = vmatpush.bf16.msrb.mxu1 %v12897_v15  ;;  %v6099_v55 = vpop.f32.mrf.mxu3  ;;  %v6058_v15 = vadd.f32 %v6057_v45, %v6044_v6  ;;  %v13212_v45 = vld [vmem:[#allocation4 + $0x3e8] sm:$0xf]  ;;  %v13181_v1 = vor.u32 %v15281_v21, %v13180_v43  ;;  %v15287_v6 = vld [vmem:[#allocation4 + $0x3ec] sm:$0xf]  ;;  %v15348_v43 = vld [vmem:[#allocation4 + $0x5cc] sm:$0xf0] }
 0x389   :  { %7148 = vmatpush.bf16.msrb.mxu2 %v13025_v40  ;;  %v6085_v17 = vpop.f32.mrf.mxu2  ;;  %v6032_v37 = vadd.f32 %v6031_v47, %v6018_v34  ;;  %v13094_v40 = vld [vmem:[#allocation4 + $0x310] sm:$0xf0]  ;;  %v13214_v34 = vld [vmem:[#allocation4 + $0x3f8] sm:$0xf0]  ;;  %v13236_v21 = vld [vmem:[#allocation4 + $0x420] sm:$0xf] }
 0x38a   :  { %v13097_v33 = vor.u32 %v15258_v14, %v13094_v40  ;;  %v6072_v35 = vadd.f32 %v6071_v25, %v6058_v15  ;;  %v15273_v25 = vld [vmem:[#allocation4 + $0x374] sm:$0xf0]  ;;  %v15283_v15 = vld [vmem:[#allocation4 + $0x3cc] sm:$0xf] }
 0x38b   :  { %7121 = vmatpush.bf16.msrb.mxu0 %v12753_v56  ;;  %7051 = vmatpush.bf16.msrb.mxu3 %v13129_v24  ;;  %v6046_v13 = vadd.f32 %v6045_v46, %v6032_v37  ;;  %v13149_v53 = vor.u32 %v15273_v25, %v13148_v3  ;;  %v13116_v24 = vld [vmem:[#allocation4 + $0x328] sm:$0xf]  ;;  %v13217_v37 = vor.u32 %v15287_v6, %v13214_v34  ;;  %v15279_v40 = vld [vmem:[#allocation4 + $0x3ac] sm:$0xf]  ;;  %v13220_v25 = vld [vmem:[#allocation4 + $0x400] sm:$0xf] }
 0x38c   :  { %7135 = vmatpush.bf16.msrb.mxu1 %v12881_v23  ;;  %v6086_v42 = vadd.f32 %v6085_v17, %v6072_v35  ;;  %v13117_v62 = vor.u32 %v15265_v63, %v13116_v24  ;;  %v13100_v17 = vld [vmem:[#allocation4 + $0x308] sm:$0xf]  ;;  %v13166_v35 = vld [vmem:[#allocation4 + $0x398] sm:$0xf0]  ;;  %v15384_v24 = vld [vmem:[#allocation4 + $0x6ec] sm:$0xf0] }
 0x38d   :  { %7149 = vmatpush.bf16.msrb.mxu2 %v13009_v57  ;;  %v6060_v28 = vadd.f32 %v6059_v59, %v6046_v13  ;;  %v13198_v59 = vld [vmem:[#allocation4 + $0x3d8] sm:$0xf0]  ;;  %v15275_v13 = vld [vmem:[#allocation4 + $0x38c] sm:$0xf]  ;;  %v15340_v63 = vld [vmem:[#allocation4 + $0x58c] sm:$0xf0] }
 0x38e   :  { %v6100_v22 = vadd.f32 %v6099_v55, %v6086_v42  ;;  %v15261_v55 = vld [vmem:[#allocation4 + $0x314] sm:$0xf0]  ;;  %v13201_v14 = vor.u32 %v15283_v15, %v13198_v59  ;;  %v13169_v42 = vor.u32 %v15275_v13, %v13166_v35  ;;  %v13572_v6 = vld [vmem:[#allocation4 + $0x6c0] sm:$0xf]  ;;  %v15380_v34 = vld [vmem:[#allocation4 + $0x6cc] sm:$0xf0] }
 0x38f   :  { %7122 = vmatpush.bf16.msrb.mxu0 %v12737_v36  ;;  %7052 = vmatpush.bf16.msrb.mxu3 %v13113_v9  ;;  %v6074_v31 = vadd.f32 %v6073_v60, %v6060_v28  ;;  %v15289_v36 = vld [vmem:[#allocation4 + $0x3f4] sm:$0xf0]  ;;  %v13101_v9 = vor.u32 %v15261_v55, %v13100_v17  ;;  %v13182_v60 = vld [vmem:[#allocation4 + $0x3b8] sm:$0xf0]  ;;  %v15271_v28 = vld [vmem:[#allocation4 + $0x36c] sm:$0xf] }
 0x390   :  { %7136 = vmatpush.bf16.msrb.mxu1 %v12865_v12  ;;  %v6101_v8 = vpop.f32.mrf.mxu3  ;;  %v13213_v4 = vor.u32 %v15289_v36, %v13212_v45  ;;  %v15304_v45 = vld [vmem:[#allocation4 + $0x46c] sm:$0xf0]  ;;  %v13460_v36 = vld [vmem:[#allocation4 + $0x5e0] sm:$0xf]  ;;  %v13334_v17 = vld [vmem:[#allocation4 + $0x4f0] sm:$0xf0] }
 0x391   :  { %7150 = vmatpush.bf16.msrb.mxu2 %v12993_v52  ;;  %v6087_v54 = vpop.f32.mrf.mxu2  ;;  %v13196_v52 = vld [vmem:[#allocation4 + $0x3c8] sm:$0xf]  ;;  %v15314_v13 = vld [vmem:[#allocation4 + $0x4c4] sm:$0xf]  ;;  %v13318_v35 = vld [vmem:[#allocation4 + $0x4d0] sm:$0xf0] }
 0x392   :  { %v6088_v23 = vadd.f32 %v6087_v54, %v6074_v31  ;;  %v13197_v50 = vor.u32 %v15285_v58, %v13196_v52  ;;  %v13150_v54 = vld [vmem:[#allocation4 + $0x378] sm:$0xf0]  ;;  %v15300_v52 = vld [vmem:[#allocation4 + $0x44c] sm:$0xf0]  ;;  %v13444_v58 = vld [vmem:[#allocation4 + $0x5c0] sm:$0xf] }
 0x393   :  { %7123 = vmatpush.bf16.msrb.mxu0 %v12721_v51  ;;  %7053 = vmatpush.bf16.msrb.mxu3 %v13097_v33  ;;  %v6113_v44 = vpop.f32.mrf.mxu0  ;;  %v13132_v51 = vld [vmem:[#allocation4 + $0x348] sm:$0xf]  ;;  %v13185_v33 = vor.u32 %v15279_v40, %v13182_v60  ;;  %v13445_v19 = vor.u32 %v15348_v43, %v13444_v58  ;;  %v13556_v40 = vld [vmem:[#allocation4 + $0x6a0] sm:$0xf]  ;;  %v15376_v60 = vld [vmem:[#allocation4 + $0x6ac] sm:$0xf0] }
 0x394   :  { %7137 = vmatpush.bf16.msrb.mxu1 %v12849_v7  ;;  %v6127_v56 = vpop.f32.mrf.mxu1  ;;  %v6102_v38 = vadd.f32 %v6101_v8, %v6088_v23  ;;  %v15269_v7 = vld [vmem:[#allocation4 + $0x354] sm:$0xf0]  ;;  %v13153_v8 = vor.u32 %v15271_v28, %v13150_v54  ;;  %v15320_v23 = vld [vmem:[#allocation4 + $0x4ec] sm:$0xf0]  ;;  %v13321_v54 = vor.u32 %v15314_v13, %v13318_v35 }
 0x395   :  { %7151 = vmatpush.bf16.msrb.mxu2 %v12977_v61  ;;  %v13133_v61 = vor.u32 %v15269_v7, %v13132_v51  ;;  %v13412_v7 = vld [vmem:[#allocation4 + $0x580] sm:$0xf] }
 0x396   :  { %7124 = vmatmul.bf16.vlgmr.msrb.gmra.mxu0 %v16290_v20  ;;  %v6114_v20 = vadd.f32 %v6113_v44, %v6100_v22  ;;  %v15267_v44 = vld [vmem:[#allocation4 + $0x34c] sm:$0xf]  ;;  %v13134_v22 = vld [vmem:[#allocation4 + $0x358] sm:$0xf0]  ;;  %v13413_v15 = vor.u32 %v15340_v63, %v13412_v7  ;;  %v13492_v7 = vld [vmem:[#allocation4 + $0x620] sm:$0xf] }
 0x397   :  { %7138 = vmatmul.bf16.vlgmr.msrb.gmra.mxu1 %v16292_v11  ;;  %v13137_v31 = vor.u32 %v15267_v44, %v13134_v22  ;;  %v15332_v44 = vld [vmem:[#allocation4 + $0x54c] sm:$0xf0]  ;;  %v15310_v22 = vld [vmem:[#allocation4 + $0x4a4] sm:$0xf] }
 0x398   :  { %7152 = vmatmul.bf16.vlgmr.msrb.gmra.mxu2 %v16294_v27  ;;  %v6128_v27 = vadd.f32 %v6127_v56, %v6114_v20  ;;  %v13332_v56 = vld [vmem:[#allocation4 + $0x4e0] sm:$0xf]  ;;  %v15263_v20 = vld [vmem:[#allocation4 + $0x32c] sm:$0xf]  ;;  %v15290_v63 = vld [vmem:[#allocation4 + $0x404] sm:$0xf] }
 0x39b   :  { %v6141_v18 = vpop.f32.mrf.mxu2  ;;  %v6115_v2 = vpop.f32.mrf.mxu0 }
 0x39c   :  { %v6155_v11 = vpop.f32.mrf.mxu3  ;;  %v6142_v57 = vadd.f32 %v6141_v18, %v6128_v27  ;;  %v6116_v16 = vadd.f32 %v6115_v2, %v6102_v38  ;;  %v6129_v41 = vpop.f32.mrf.mxu1  ;;  %v13118_v18 = vld [vmem:[#allocation4 + $0x338] sm:$0xf0]  ;;  %v15259_v27 = vld [vmem:[#allocation4 + $0x30c] sm:$0xf] }
 0x39d   :  { %v13121_v38 = vor.u32 %v15263_v20, %v13118_v18  ;;  %v13102_v2 = vld [vmem:[#allocation4 + $0x318] sm:$0xf0]  ;;  %v13364_v20 = vld [vmem:[#allocation4 + $0x520] sm:$0xf]  ;;  %v15328_v18 = vld [vmem:[#allocation4 + $0x52c] sm:$0xf0] }
 0x39e   :  { %v6156_v39 = vadd.f32 %v6155_v11, %v6142_v57  ;;  %v6130_v5 = vadd.f32 %v6129_v41, %v6116_v16  ;;  %v13333_v11 = vor.u32 %v15320_v23, %v13332_v56  ;;  %v13105_v57 = vor.u32 %v15259_v27, %v13102_v2  ;;  %v13316_v16 = vld [vmem:[#allocation4 + $0x4c0] sm:$0xf]  ;;  %v15316_v41 = vld [vmem:[#allocation4 + $0x4cc] sm:$0xf0]  ;;  %v13286_v27 = vld [vmem:[#allocation4 + $0x490] sm:$0xf0] }
 0x3a0   :  { %v6163_v26 = vmax.f32 %v6156_v39, 0.0  ;;  %7961 = vmatpush.bf16.msra.mxu0 %v13333_v11  ;;  %v13317_v39 = vor.u32 %v15316_v41, %v13316_v16  ;;  %v13365_v11 = vor.u32 %v15328_v18, %v13364_v20  ;;  %v15324_v16 = vld [vmem:[#allocation4 + $0x50c] sm:$0xf0]  ;;  %v13540_v41 = vld [vmem:[#allocation4 + $0x680] sm:$0xf] }
 0x3a1   :  { %v13382_v20 = vld [vmem:[#allocation4 + $0x550] sm:$0xf0]  ;;  %v15378_v18 = vld [vmem:[#allocation4 + $0x6c4] sm:$0xf] }
 0x3a2   :  { %v6171_v12 = vmul.f32 1.4142135, %v6163_v26  ;;  %v15308_v26 = vld [vmem:[#allocation4 + $0x48c] sm:$0xf0] }
 0x3a3   :  { %v6143_v30 = vpop.f32.mrf.mxu2 }
 0x3a4   :  { %v6144_v0 = vadd.f32 %v6143_v30, %v6130_v5  ;;  %v6157_v10 = vpop.f32.mrf.mxu3  ;;  %7962 = vmatpush.bf16.msra.mxu0 %v13317_v39  ;;  %v13300_v5 = vld [vmem:[#allocation4 + $0x4a0] sm:$0xf]  ;;  %v15312_v30 = vld [vmem:[#allocation4 + $0x4ac] sm:$0xf0] }
 0x3a6   :  { %v6158_v47 = vadd.f32 %v6157_v10, %v6144_v0  ;;  %v13301_v0 = vor.u32 %v15312_v30, %v13300_v5  ;;  %v13284_v10 = vld [vmem:[#allocation4 + $0x480] sm:$0xf]  ;;  %v15372_v5 = vld [vmem:[#allocation4 + $0x68c] sm:$0xf0]  ;;  %v15302_v30 = vld [vmem:[#allocation4 + $0x464] sm:$0xf] }
 0x3a8   :  { %v6167_v46 = vmax.f32 %v6158_v47, 0.0  ;;  %7963 = vmatpush.bf16.msra.mxu0 %v13301_v0  ;;  %v13285_v47 = vor.u32 %v15308_v26, %v13284_v10  ;;  %v13270_v0 = vld [vmem:[#allocation4 + $0x470] sm:$0xf0]  ;;  %v13541_v10 = vor.u32 %v15372_v5, %v13540_v41  ;;  %v15326_v41 = vld [vmem:[#allocation4 + $0x524] sm:$0xf] }
 0x3a9   :  { %v13273_v26 = vor.u32 %v15302_v30, %v13270_v0  ;;  %v15374_v5 = vld [vmem:[#allocation4 + $0x6a4] sm:$0xf]  ;;  %v13558_v0 = vld [vmem:[#allocation4 + $0x6b0] sm:$0xf0] }
 0x3aa   :  { %v6175_v32 = vmul.f32 1.4142135, %v6167_v46  ;;  %v13268_v46 = vld [vmem:[#allocation4 + $0x460] sm:$0xf] }
 0x3ac   :  { %v16392_v48 = vpack.c.bf16 %v6175_v32, %v6171_v12  ;;  %7964 = vmatpush.bf16.msra.mxu0 %v13285_v47  ;;  %v13269_v12 = vor.u32 %v15304_v45, %v13268_v46  ;;  %v15352_v32 = vld [vmem:[#allocation4 + $0x5ec] sm:$0xf0]  ;;  %v15350_v47 = vld [vmem:[#allocation4 + $0x5e4] sm:$0xf]  ;;  %v13462_v46 = vld [vmem:[#allocation4 + $0x5f0] sm:$0xf0] }
 0x3ad   :  { %v13465_v45 = vor.u32 %v15350_v47, %v13462_v46  ;;  %v13668_v46 = vld [vmem:[#allocation4 + $0x780] sm:$0xf] }
 0x3ae   :  { %6998 = vmatmul.bf16.vlgmr.msra.gmra.mxu3 %v16392_v48 }
 0x3af   :  { %7102 = vmatpush.bf16.msra.mxu3 %v13213_v4  ;;  %v13461_v4 = vor.u32 %v15352_v32, %v13460_v36  ;;  %v13524_v36 = vld [vmem:[#allocation4 + $0x660] sm:$0xf] }
 0x3b0   :  { %7965 = vmatpush.bf16.msra.mxu0 %v13269_v12  ;;  %v15368_v12 = vld [vmem:[#allocation4 + $0x66c] sm:$0xf0] }
 0x3b1   :  { %7975 = vmatpush.bf16.msra.mxu1 %v13461_v4  ;;  %v13525_v32 = vor.u32 %v15368_v12, %v13524_v36  ;;  %v15298_v4 = vld [vmem:[#allocation4 + $0x444] sm:$0xf] }
 0x3b2   :  { %v15322_v12 = vld [vmem:[#allocation4 + $0x504] sm:$0xf] }
 0x3b3   :  { %7103 = vmatpush.bf16.msra.mxu3 %v13197_v50 }
 0x3b4   :  { %v6971_v13 = vpop.f32.mrf.mxu1 }
 0x3b5   :  { %7976 = vmatpush.bf16.msra.mxu1 %v13445_v19 }
 0x3b7   :  { %7104 = vmatpush.bf16.msra.mxu3 %v13181_v1  ;;  %v15296_v1 = vld [vmem:[#allocation4 + $0x42c] sm:$0xf0] }
 0x3b8   :  { %v13237_v3 = vor.u32 %v15296_v1, %v13236_v21  ;;  %v13508_v21 = vld [vmem:[#allocation4 + $0x640] sm:$0xf]  ;;  %v15364_v1 = vld [vmem:[#allocation4 + $0x64c] sm:$0xf0] }
 0x3b9   :  { %v13509_v19 = vor.u32 %v15364_v1, %v13508_v21  ;;  %v13652_v1 = vld [vmem:[#allocation4 + $0x760] sm:$0xf] }
 0x3bb   :  { %7105 = vmatpush.bf16.msra.mxu3 %v13165_v49  ;;  %v15344_v49 = vld [vmem:[#allocation4 + $0x5ac] sm:$0xf0] }
 0x3bc   :  { %v13429_v51 = vor.u32 %v15344_v49, %v13428_v29  ;;  %v15294_v29 = vld [vmem:[#allocation4 + $0x424] sm:$0xf]  ;;  %v13238_v49 = vld [vmem:[#allocation4 + $0x430] sm:$0xf0]  ;;  %v6973_v47 = vpop.f32.mrf.mxu1 }
 0x3be   :  { %7054 = vmatmul.bf16.vlgmr.msrb.gmra.mxu3 %v16392_v48  ;;  %7977 = vmatpush.bf16.msra.mxu1 %v13429_v51 }
 0x3bf   :  { %7106 = vmatpush.bf16.msra.mxu3 %v13149_v53  ;;  %v15292_v53 = vld [vmem:[#allocation4 + $0x40c] sm:$0xf0] }
 0x3c2   :  { %7978 = vmatpush.bf16.msra.mxu1 %v13413_v15  ;;  %v13716_v15 = vld [vmem:[#allocation4 + $0x7e0] sm:$0xf] }
 0x3c3   :  { %7107 = vmatpush.bf16.msra.mxu3 %v13133_v61  ;;  %v13588_v61 = vld [vmem:[#allocation4 + $0x6e0] sm:$0xf] }
 0x3c4   :  { %v13589_v55 = vor.u32 %v15384_v24, %v13588_v61  ;;  %v15360_v61 = vld [vmem:[#allocation4 + $0x62c] sm:$0xf0] }
 0x3c5   :  { %v13493_v24 = vor.u32 %v15360_v61, %v13492_v7 }
 0x3c6   :  { %7989 = vmatpush.bf16.msra.mxu2 %v13589_v55 }
 0x3c7   :  { %7108 = vmatpush.bf16.msra.mxu3 %v13117_v62  ;;  %v15318_v62 = vld [vmem:[#allocation4 + $0x4e4] sm:$0xf] }
 0x3c8   :  { %v13337_v59 = vor.u32 %v15318_v62, %v13334_v17  ;;  %v13222_v62 = vld [vmem:[#allocation4 + $0x410] sm:$0xf0]  ;;  %v15338_v17 = vld [vmem:[#allocation4 + $0x584] sm:$0xf] }
 0x3c9   :  { %v13225_v55 = vor.u32 %v15290_v63, %v13222_v62  ;;  %v13636_v63 = vld [vmem:[#allocation4 + $0x740] sm:$0xf]  ;;  %v15396_v62 = vld [vmem:[#allocation4 + $0x74c] sm:$0xf0] }
 0x3cb   :  { %7109 = vmatpush.bf16.msra.mxu3 %v13101_v9  ;;  %v13221_v9 = vor.u32 %v15292_v53, %v13220_v25  ;;  %v13241_v25 = vor.u32 %v15294_v29, %v13238_v49  ;;  %v13430_v53 = vld [vmem:[#allocation4 + $0x5b0] sm:$0xf0] }
 0x3ce   :  { %7110 = vmatmul.bf16.vlgmr.msra.gmra.mxu3 %v16392_v48 }
 0x3cf   :  { %7158 = vmatpush.bf16.msrb.mxu3 %v13217_v37  ;;  %v13573_v37 = vor.u32 %v15380_v34, %v13572_v6  ;;  %v13414_v6 = vld [vmem:[#allocation4 + $0x590] sm:$0xf0] }
 0x3d0   :  { %v13417_v34 = vor.u32 %v15338_v17, %v13414_v6  ;;  %v15362_v6 = vld [vmem:[#allocation4 + $0x644] sm:$0xf] }
 0x3d1   :  { %7990 = vmatpush.bf16.msra.mxu2 %v13573_v37  ;;  %v15356_v37 = vld [vmem:[#allocation4 + $0x60c] sm:$0xf0] }
 0x3d3   :  { %7159 = vmatpush.bf16.msrb.mxu3 %v13201_v14  ;;  %v13396_v14 = vld [vmem:[#allocation4 + $0x560] sm:$0xf] }
 0x3d7   :  { %7160 = vmatpush.bf16.msrb.mxu3 %v13185_v33  ;;  %v15336_v33 = vld [vmem:[#allocation4 + $0x56c] sm:$0xf0] }
 0x3d8   :  { %v13397_v28 = vor.u32 %v15336_v33, %v13396_v14  ;;  %v13398_v33 = vld [vmem:[#allocation4 + $0x570] sm:$0xf0] }
 0x3da   :  { %7979 = vmatpush.bf16.msra.mxu1 %v13397_v28  ;;  %v15382_v28 = vld [vmem:[#allocation4 + $0x6e4] sm:$0xf] }
 0x3db   :  { %7161 = vmatpush.bf16.msrb.mxu3 %v13169_v42  ;;  %v13557_v42 = vor.u32 %v15376_v60, %v13556_v40  ;;  %v15416_v40 = vld [vmem:[#allocation4 + $0x7ec] sm:$0xf0]  ;;  %v15334_v60 = vld [vmem:[#allocation4 + $0x564] sm:$0xf] }
 0x3dc   :  { %v13717_v35 = vor.u32 %v15416_v40, %v13716_v15  ;;  %v13340_v40 = vld [vmem:[#allocation4 + $0x4e8] sm:$0xf] }
 0x3dd   :  { %7991 = vmatpush.bf16.msra.mxu2 %v13557_v42  ;;  %v13401_v42 = vor.u32 %v15334_v60, %v13398_v33  ;;  %v15321_v60 = vld [vmem:[#allocation4 + $0x4f4] sm:$0xf0]  ;;  %v13620_v33 = vld [vmem:[#allocation4 + $0x720] sm:$0xf] }
 0x3df   :  { %7162 = vmatpush.bf16.msrb.mxu3 %v13153_v8  ;;  %v13380_v8 = vld [vmem:[#allocation4 + $0x540] sm:$0xf] }
 0x3e0   :  { %v13381_v56 = vor.u32 %v15332_v44, %v13380_v8  ;;  %v6985_v44 = vpop.f32.mrf.mxu2 }
 0x3e1   :  { %7992 = vmatpush.bf16.msra.mxu2 %v13541_v10 }
 0x3e2   :  { %7980 = vmatpush.bf16.msra.mxu1 %v13381_v56 }
 0x3e3   :  { %7163 = vmatpush.bf16.msrb.mxu3 %v13137_v31  ;;  %v13302_v31 = vld [vmem:[#allocation4 + $0x4b0] sm:$0xf0] }
 0x3e4   :  { %v13305_v23 = vor.u32 %v15310_v22, %v13302_v31  ;;  %v13700_v22 = vld [vmem:[#allocation4 + $0x7c0] sm:$0xf]  ;;  %v15412_v31 = vld [vmem:[#allocation4 + $0x7cc] sm:$0xf0] }
 0x3e5   :  { %7993 = vmatpush.bf16.msra.mxu2 %v13525_v32  ;;  %v13701_v56 = vor.u32 %v15412_v31, %v13700_v22  ;;  %v13350_v32 = vld [vmem:[#allocation4 + $0x510] sm:$0xf0]  ;;  %v13324_v31 = vld [vmem:[#allocation4 + $0x4c8] sm:$0xf] }
 0x3e6   :  { %7981 = vmatpush.bf16.msra.mxu1 %v13365_v11 }
 0x3e7   :  { %7164 = vmatpush.bf16.msrb.mxu3 %v13121_v38  ;;  %v15306_v38 = vld [vmem:[#allocation4 + $0x484] sm:$0xf] }
 0x3e8   :  { %v13289_v2 = vor.u32 %v15306_v38, %v13286_v27  ;;  %v13574_v38 = vld [vmem:[#allocation4 + $0x6d0] sm:$0xf0] }
 0x3e9   :  { %7994 = vmatpush.bf16.msra.mxu2 %v13509_v19  ;;  %v13577_v27 = vor.u32 %v15378_v18, %v13574_v38  ;;  %v15400_v19 = vld [vmem:[#allocation4 + $0x76c] sm:$0xf0] }
 0x3ea   :  { %v13653_v49 = vor.u32 %v15400_v19, %v13652_v1  ;;  %v15388_v18 = vld [vmem:[#allocation4 + $0x70c] sm:$0xf0]  ;;  %v15309_v1 = vld [vmem:[#allocation4 + $0x494] sm:$0xf0]  ;;  %v15406_v19 = vld [vmem:[#allocation4 + $0x7a4] sm:$0xf] }
 0x3eb   :  { %7165 = vmatpush.bf16.msrb.mxu3 %v13105_v57  ;;  %v13348_v57 = vld [vmem:[#allocation4 + $0x500] sm:$0xf] }
 0x3ec   :  { %v13349_v39 = vor.u32 %v15324_v16, %v13348_v57  ;;  %v15408_v57 = vld [vmem:[#allocation4 + $0x7ac] sm:$0xf0] }
 0x3ed   :  { %7995 = vmatpush.bf16.msra.mxu2 %v13493_v24  ;;  %v7027_v24 = vpop.f32.mrf.mxu1 }
 0x3ee   :  { %7166 = vmatmul.bf16.vlgmr.msrb.gmra.mxu3 %v16392_v48  ;;  %v13252_v48 = vld [vmem:[#allocation4 + $0x440] sm:$0xf]  ;;  %7982 = vmatpush.bf16.msra.mxu1 %v13349_v39  ;;  %v13366_v39 = vld [vmem:[#allocation4 + $0x530] sm:$0xf0] }
 0x3ef   :  { %v13253_v50 = vor.u32 %v15300_v52, %v13252_v48  ;;  %v13254_v48 = vld [vmem:[#allocation4 + $0x450] sm:$0xf0]  ;;  %v15346_v52 = vld [vmem:[#allocation4 + $0x5c4] sm:$0xf]  ;;  %8003 = vmatpush.bf16.msra.mxu3 %v13717_v35  ;;  %v13369_v30 = vor.u32 %v15326_v41, %v13366_v39 }
 0x3f0   :  { %v13257_v58 = vor.u32 %v15298_v4, %v13254_v48  ;;  %v15370_v4 = vld [vmem:[#allocation4 + $0x684] sm:$0xf]  ;;  %v6987_v48 = vpop.f32.mrf.mxu2 }
 0x3f1   :  { %7966 = vmatpush.bf16.msra.mxu0 %v13253_v50  ;;  %v13446_v50 = vld [vmem:[#allocation4 + $0x5d0] sm:$0xf0] }
 0x3f2   :  { %8031 = vmatpush.bf16.msrb.mxu1 %v13465_v45  ;;  %v13449_v43 = vor.u32 %v15346_v52, %v13446_v50  ;;  %v15404_v45 = vld [vmem:[#allocation4 + $0x78c] sm:$0xf0]  ;;  %v13542_v50 = vld [vmem:[#allocation4 + $0x690] sm:$0xf0] }
 0x3f3   :  { %8004 = vmatpush.bf16.msra.mxu3 %v13701_v56  ;;  %v13669_v36 = vor.u32 %v15404_v45, %v13668_v46  ;;  %v13545_v21 = vor.u32 %v15370_v4, %v13542_v50  ;;  %v13341_v56 = vor.u32 %v15321_v60, %v13340_v40  ;;  %v13308_v46 = vld [vmem:[#allocation4 + $0x4a8] sm:$0xf]  ;;  %v15301_v60 = vld [vmem:[#allocation4 + $0x454] sm:$0xf0] }
 0x3f4   :  { %v13292_v50 = vld [vmem:[#allocation4 + $0x488] sm:$0xf] }
 0x3f5   :  { %7967 = vmatpush.bf16.msra.mxu0 %v13237_v3  ;;  %v15342_v3 = vld [vmem:[#allocation4 + $0x5a4] sm:$0xf]  ;;  %v7029_v41 = vpop.f32.mrf.mxu1  ;;  %v13260_v40 = vld [vmem:[#allocation4 + $0x448] sm:$0xf] }
 0x3f6   :  { %8032 = vmatpush.bf16.msrb.mxu1 %v13449_v43  ;;  %v13433_v51 = vor.u32 %v15342_v3, %v13430_v53  ;;  %v15366_v3 = vld [vmem:[#allocation4 + $0x664] sm:$0xf] }
 0x3f9   :  { %7968 = vmatpush.bf16.msra.mxu0 %v13221_v9  ;;  %v13476_v9 = vld [vmem:[#allocation4 + $0x600] sm:$0xf] }
 0x3fa   :  { %8033 = vmatpush.bf16.msrb.mxu1 %v13433_v51  ;;  %v13477_v14 = vor.u32 %v15356_v37, %v13476_v9  ;;  %v7041_v9 = vpop.f32.mrf.mxu2 }
 0x3fc   :  { %7996 = vmatpush.bf16.msra.mxu2 %v13477_v14 }
 0x3fd   :  { %8017 = vmatpush.bf16.msrb.mxu0 %v13337_v59  ;;  %v6957_v59 = vpop.f32.mrf.mxu0 }
 0x3fe   :  { %8034 = vmatpush.bf16.msrb.mxu1 %v13417_v34  ;;  %v6972_v43 = vadd.f32 %v6971_v13, %v6957_v59  ;;  %v13510_v34 = vld [vmem:[#allocation4 + $0x650] sm:$0xf0]  ;;  %v15392_v13 = vld [vmem:[#allocation4 + $0x72c] sm:$0xf0] }
 0x3ff   :  { %v13513_v15 = vor.u32 %v15362_v6, %v13510_v34  ;;  %v15402_v6 = vld [vmem:[#allocation4 + $0x784] sm:$0xf]  ;;  %v13670_v34 = vld [vmem:[#allocation4 + $0x790] sm:$0xf0] }
 0x400   :  { %v6986_v29 = vadd.f32 %v6985_v44, %v6972_v43 }
 0x401   :  { %8018 = vmatpush.bf16.msrb.mxu0 %v13321_v54  ;;  %v13590_v54 = vld [vmem:[#allocation4 + $0x6f0] sm:$0xf0] }
 0x402   :  { %v13593_v8 = vor.u32 %v15382_v28, %v13590_v54  ;;  %8035 = vmatpush.bf16.msrb.mxu1 %v13401_v42  ;;  %v13621_v42 = vor.u32 %v15392_v13, %v13620_v33  ;;  %v15358_v28 = vld [vmem:[#allocation4 + $0x624] sm:$0xf]  ;;  %v13494_v54 = vld [vmem:[#allocation4 + $0x630] sm:$0xf0]  ;;  %v13452_v33 = vld [vmem:[#allocation4 + $0x5c8] sm:$0xf] }
 0x404   :  { %8045 = vmatpush.bf16.msrb.mxu2 %v13593_v8  ;;  %v13497_v8 = vor.u32 %v15358_v28, %v13494_v54  ;;  %v13654_v28 = vld [vmem:[#allocation4 + $0x770] sm:$0xf0] }
 0x405   :  { %8019 = vmatpush.bf16.msrb.mxu0 %v13305_v23  ;;  %v15330_v23 = vld [vmem:[#allocation4 + $0x544] sm:$0xf]  ;;  %v6959_v10 = vpop.f32.mrf.mxu0 }
 0x406   :  { %v13385_v11 = vor.u32 %v15330_v23, %v13382_v20  ;;  %v6974_v51 = vadd.f32 %v6973_v47, %v6959_v10  ;;  %v15317_v23 = vld [vmem:[#allocation4 + $0x4d4] sm:$0xf0]  ;;  %v13604_v20 = vld [vmem:[#allocation4 + $0x700] sm:$0xf] }
 0x407   :  { %v13325_v47 = vor.u32 %v15317_v23, %v13324_v31 }
 0x408   :  { %8036 = vmatpush.bf16.msrb.mxu1 %v13385_v11  ;;  %8046 = vmatpush.bf16.msrb.mxu2 %v13577_v27  ;;  %v6988_v17 = vadd.f32 %v6987_v48, %v6974_v51  ;;  %v13605_v27 = vor.u32 %v15388_v18, %v13604_v20  ;;  %v13244_v20 = vld [vmem:[#allocation4 + $0x428] sm:$0xf]  ;;  %v15297_v18 = vld [vmem:[#allocation4 + $0x434] sm:$0xf0] }
 0x409   :  { %8020 = vmatpush.bf16.msrb.mxu0 %v13289_v2  ;;  %v13684_v2 = vld [vmem:[#allocation4 + $0x7a0] sm:$0xf] }
 0x40a   :  { %v13685_v16 = vor.u32 %v15408_v57, %v13684_v2  ;;  %v15354_v2 = vld [vmem:[#allocation4 + $0x604] sm:$0xf]  ;;  %v13478_v57 = vld [vmem:[#allocation4 + $0x610] sm:$0xf0] }
 0x40c   :  { %8005 = vmatpush.bf16.msra.mxu3 %v13685_v16  ;;  %8037 = vmatpush.bf16.msrb.mxu1 %v13369_v30  ;;  %v15414_v16 = vld [vmem:[#allocation4 + $0x7e4] sm:$0xf]  ;;  %v13718_v30 = vld [vmem:[#allocation4 + $0x7f0] sm:$0xf0] }
 0x40d   :  { %8021 = vmatpush.bf16.msrb.mxu0 %v13273_v26  ;;  %v13561_v26 = vor.u32 %v15374_v5, %v13558_v0  ;;  %v7013_v7 = vpop.f32.mrf.mxu0  ;;  %v13481_v5 = vor.u32 %v15354_v2, %v13478_v57  ;;  %v13721_v10 = vor.u32 %v15414_v16, %v13718_v30  ;;  %v15345_v2 = vld [vmem:[#allocation4 + $0x5b4] sm:$0xf0]  ;;  %v15394_v57 = vld [vmem:[#allocation4 + $0x744] sm:$0xf]  ;;  %v13638_v16 = vld [vmem:[#allocation4 + $0x750] sm:$0xf0] }
 0x40e   :  { %v7028_v0 = vadd.f32 %v7027_v24, %v7013_v7  ;;  %v13276_v7 = vld [vmem:[#allocation4 + $0x468] sm:$0xf]  ;;  %v13293_v24 = vor.u32 %v15309_v1, %v13292_v50 }
 0x40f   :  { %8047 = vmatpush.bf16.msrb.mxu2 %v13561_v26  ;;  %v7043_v26 = vpop.f32.mrf.mxu2 }
 0x410   :  { %8006 = vmatpush.bf16.msra.mxu3 %v13669_v36  ;;  %v7042_v45 = vadd.f32 %v7041_v9, %v7028_v0  ;;  %v15313_v36 = vld [vmem:[#allocation4 + $0x4b4] sm:$0xf0]  ;;  %v13673_v9 = vor.u32 %v15402_v6, %v13670_v34  ;;  %v13245_v0 = vor.u32 %v15297_v18, %v13244_v20 }
 0x411   :  { %8022 = vmatpush.bf16.msrb.mxu0 %v13257_v58  ;;  %v13353_v58 = vor.u32 %v15322_v12, %v13350_v32  ;;  %v15410_v12 = vld [vmem:[#allocation4 + $0x7c4] sm:$0xf]  ;;  %v13702_v32 = vld [vmem:[#allocation4 + $0x7d0] sm:$0xf0] }
 0x412   :  { %v13705_v4 = vor.u32 %v15410_v12, %v13702_v32  ;;  %v15390_v12 = vld [vmem:[#allocation4 + $0x724] sm:$0xf]  ;;  %v13622_v32 = vld [vmem:[#allocation4 + $0x730] sm:$0xf0] }
 0x413   :  { %8038 = vmatpush.bf16.msrb.mxu1 %v13353_v58  ;;  %8048 = vmatpush.bf16.msrb.mxu2 %v13545_v21  ;;  %v13309_v58 = vor.u32 %v15313_v36, %v13308_v46  ;;  %v13420_v46 = vld [vmem:[#allocation4 + $0x588] sm:$0xf]  ;;  %v15341_v36 = vld [vmem:[#allocation4 + $0x594] sm:$0xf0] }
 0x414   :  { %8007 = vmatpush.bf16.msra.mxu3 %v13653_v49  ;;  %v7083_v49 = vpop.f32.mrf.mxu1  ;;  %v13421_v1 = vor.u32 %v15341_v36, %v13420_v46  ;;  %v13532_v46 = vld [vmem:[#allocation4 + $0x668] sm:$0xf]  ;;  %v15369_v36 = vld [vmem:[#allocation4 + $0x674] sm:$0xf0] }
 0x415   :  { %8023 = vmatpush.bf16.msrb.mxu0 %v13241_v25  ;;  %v13526_v25 = vld [vmem:[#allocation4 + $0x670] sm:$0xf0]  ;;  %v7015_v11 = vpop.f32.mrf.mxu0 }
 0x416   :  { %v13529_v53 = vor.u32 %v15366_v3, %v13526_v25  ;;  %v7030_v48 = vadd.f32 %v7029_v41, %v7015_v11  ;;  %v13436_v11 = vld [vmem:[#allocation4 + $0x5a8] sm:$0xf] }
 0x418   :  { %8049 = vmatpush.bf16.msrb.mxu2 %v13529_v53  ;;  %v7044_v43 = vadd.f32 %v7043_v26, %v7030_v48  ;;  %v13228_v26 = vld [vmem:[#allocation4 + $0x408] sm:$0xf]  ;;  %v15319_v48 = vld [vmem:[#allocation4 + $0x4ec] sm:$0xf] }
 0x419   :  { %8024 = vmatpush.bf16.msrb.mxu0 %v13225_v55  ;;  %v13637_v55 = vor.u32 %v15396_v62, %v13636_v63  ;;  %v15305_v63 = vld [vmem:[#allocation4 + $0x474] sm:$0xf0]  ;;  %v13468_v62 = vld [vmem:[#allocation4 + $0x5e8] sm:$0xf] }
 0x41b   :  { %8008 = vmatpush.bf16.msra.mxu3 %v13637_v55 }
 0x41c   :  { %8050 = vmatpush.bf16.msrb.mxu2 %v13513_v15  ;;  %v7085_v31 = vpop.f32.mrf.mxu1 }
 0x41d   :  { %v7069_v21 = vpop.f32.mrf.mxu0 }
 0x41f   :  { %8009 = vmatpush.bf16.msra.mxu3 %v13621_v42  ;;  %v15398_v42 = vld [vmem:[#allocation4 + $0x764] sm:$0xf] }
 0x420   :  { %8051 = vmatpush.bf16.msrb.mxu2 %v13497_v8  ;;  %v13657_v8 = vor.u32 %v15398_v42, %v13654_v28  ;;  %v13372_v28 = vld [vmem:[#allocation4 + $0x528] sm:$0xf] }
 0x423   :  { %8010 = vmatpush.bf16.msra.mxu3 %v13605_v27 }
 0x424   :  { %8052 = vmatpush.bf16.msrb.mxu2 %v13481_v5 }
 0x427   :  { %8059 = vmatpush.bf16.msrb.mxu3 %v13721_v10  ;;  %v13437_v10 = vor.u32 %v15345_v2, %v13436_v11  ;;  %v13356_v2 = vld [vmem:[#allocation4 + $0x508] sm:$0xf] }
 0x42b   :  { %8060 = vmatpush.bf16.msrb.mxu3 %v13705_v4 }
 0x431   :  { %v6999_v52 = vpop.f32.mrf.mxu3 }
 0x432   :  { %v7000_v61 = vadd.f32 %v6999_v52, %v6986_v29  ;;  %v13686_v29 = vld [vmem:[#allocation4 + $0x7b0] sm:$0xf0] }
 0x433   :  { %v13689_v25 = vor.u32 %v15406_v19, %v13686_v29  ;;  %v13404_v19 = vld [vmem:[#allocation4 + $0x568] sm:$0xf]  ;;  %v15337_v29 = vld [vmem:[#allocation4 + $0x574] sm:$0xf0] }
 0x434   :  { %v7172_v59 = vmax.f32 %v7000_v61, 0.0  ;;  %v7097_v61 = vpop.f32.mrf.mxu2 }
 0x435   :  { %8061 = vmatpush.bf16.msrb.mxu3 %v13689_v25 }
 0x436   :  { %v7180_v44 = vmul.f32 1.4142135, %v7172_v59  ;;  %v13277_v59 = vor.u32 %v15305_v63, %v13276_v7  ;;  %v15385_v7 = vld [vmem:[#allocation4 + $0x6f4] sm:$0xf0] }
 0x439   :  { %v7001_v37 = vpop.f32.mrf.mxu3  ;;  %8062 = vmatpush.bf16.msrb.mxu3 %v13673_v9 }
 0x43a   :  { %v7002_v14 = vadd.f32 %v7001_v37, %v6988_v17  ;;  %v15353_v17 = vld [vmem:[#allocation4 + $0x5f4] sm:$0xf0] }
 0x43c   :  { %v7176_v35 = vmax.f32 %v7002_v14, 0.0  ;;  %v13469_v14 = vor.u32 %v15353_v17, %v13468_v62  ;;  %v7099_v41 = vpop.f32.mrf.mxu2 }
 0x43d   :  { %8063 = vmatpush.bf16.msrb.mxu3 %v13657_v8  ;;  %v13564_v8 = vld [vmem:[#allocation4 + $0x6a8] sm:$0xf] }
 0x43e   :  { %v7184_v22 = vmul.f32 1.4142135, %v7176_v35  ;;  %v15349_v35 = vld [vmem:[#allocation4 + $0x5d4] sm:$0xf0] }
 0x43f   :  { %v13453_v23 = vor.u32 %v15349_v35, %v13452_v33 }
 0x440   :  { %v16398_v38 = vpack.c.bf16 %v7184_v22, %v7180_v44  ;;  %v7084_v44 = vadd.f32 %v7083_v49, %v7069_v21  ;;  %v7071_v22 = vpop.f32.mrf.mxu0  ;;  %v13596_v49 = vld [vmem:[#allocation4 + $0x6e8] sm:$0xf] }
 0x441   :  { %v7055_v39 = vpop.f32.mrf.mxu3  ;;  %v7086_v5 = vadd.f32 %v7085_v31, %v7071_v22  ;;  %v13597_v34 = vor.u32 %v15385_v7, %v13596_v49  ;;  %v15307_v22 = vld [vmem:[#allocation4 + $0x48c] sm:$0xf]  ;;  %v13294_v31 = vld [vmem:[#allocation4 + $0x498] sm:$0xf0] }
 0x442   :  { %7969 = vmatmul.bf16.vlgmr.msra.gmra.mxu0 %v16398_v38  ;;  %v7056_v52 = vadd.f32 %v7055_v39, %v7042_v45  ;;  %v7098_v27 = vadd.f32 %v7097_v61, %v7084_v44  ;;  %v13641_v39 = vor.u32 %v15394_v57, %v13638_v16  ;;  %v15315_v61 = vld [vmem:[#allocation4 + $0x4cc] sm:$0xf]  ;;  %v15377_v44 = vld [vmem:[#allocation4 + $0x6b4] sm:$0xf0]  ;;  %v13548_v16 = vld [vmem:[#allocation4 + $0x688] sm:$0xf] }
 0x443   :  { %8073 = vmatpush.bf16.msra.mxu0 %v13341_v56  ;;  %v13261_v56 = vor.u32 %v15301_v60, %v13260_v40  ;;  %v7100_v45 = vadd.f32 %v7099_v41, %v7086_v5  ;;  %v15311_v40 = vld [vmem:[#allocation4 + $0x4ac] sm:$0xf]  ;;  %v13310_v60 = vld [vmem:[#allocation4 + $0x4b8] sm:$0xf0]  ;;  %v13565_v11 = vor.u32 %v15377_v44, %v13564_v8  ;;  %v15325_v57 = vld [vmem:[#allocation4 + $0x514] sm:$0xf0] }
 0x444   :  { %v7173_v53 = vmax.f32 %v7056_v52, 0.0  ;;  %8064 = vmatpush.bf16.msrb.mxu3 %v13641_v39  ;;  %v13342_v52 = vld [vmem:[#allocation4 + $0x4f8] sm:$0xf0]  ;;  %v13313_v42 = vor.u32 %v15311_v40, %v13310_v60  ;;  %v7153_v18 = vpop.f32.mrf.mxu2  ;;  %v15373_v41 = vld [vmem:[#allocation4 + $0x694] sm:$0xf0] }
 0x445   :  { %v13345_v25 = vor.u32 %v15319_v48, %v13342_v52  ;;  %v15303_v39 = vld [vmem:[#allocation4 + $0x46c] sm:$0xf]  ;;  %v13278_v5 = vld [vmem:[#allocation4 + $0x478] sm:$0xf0]  ;;  %v15357_v8 = vld [vmem:[#allocation4 + $0x614] sm:$0xf0] }
 0x446   :  { %v7181_v37 = vmul.f32 1.4142135, %v7173_v53  ;;  %v15386_v53 = vld [vmem:[#allocation4 + $0x704] sm:$0xf]  ;;  %v15347_v48 = vld [vmem:[#allocation4 + $0x5cc] sm:$0xf] }
 0x447   :  { %8074 = vmatpush.bf16.msra.mxu0 %v13325_v47  ;;  %v15293_v47 = vld [vmem:[#allocation4 + $0x414] sm:$0xf0]  ;;  %v13454_v52 = vld [vmem:[#allocation4 + $0x5d8] sm:$0xf0]  ;;  %v15343_v7 = vld [vmem:[#allocation4 + $0x5ac] sm:$0xf] }
 0x448   :  { %v13229_v21 = vor.u32 %v15293_v47, %v13228_v26  ;;  %v13549_v26 = vor.u32 %v15373_v41, %v13548_v16  ;;  %v13281_v47 = vor.u32 %v15303_v39, %v13278_v5  ;;  %v13457_v49 = vor.u32 %v15347_v48, %v13454_v52  ;;  %v15339_v40 = vld [vmem:[#allocation4 + $0x58c] sm:$0xf]  ;;  %v13422_v60 = vld [vmem:[#allocation4 + $0x598] sm:$0xf0]  ;;  %v13724_v44 = vld [vmem:[#allocation4 + $0x7e8] sm:$0xf] }
 0x449   :  { %v7057_v3 = vpop.f32.mrf.mxu3  ;;  %v15327_v48 = vld [vmem:[#allocation4 + $0x52c] sm:$0xf]  ;;  %v13374_v52 = vld [vmem:[#allocation4 + $0x538] sm:$0xf0] }
 0x44a   :  { %v7058_v51 = vadd.f32 %v7057_v3, %v7044_v43 }
 0x44b   :  { %8075 = vmatpush.bf16.msra.mxu0 %v13309_v58  ;;  %v13625_v58 = vor.u32 %v15390_v12, %v13622_v32  ;;  %v15299_v12 = vld [vmem:[#allocation4 + $0x44c] sm:$0xf]  ;;  %v13262_v32 = vld [vmem:[#allocation4 + $0x458] sm:$0xf0] }
 0x44c   :  { %v7177_v55 = vmax.f32 %v7058_v51, 0.0  ;;  %v13606_v51 = vld [vmem:[#allocation4 + $0x710] sm:$0xf0] }
 0x44d   :  { %8065 = vmatpush.bf16.msrb.mxu3 %v13625_v58  ;;  %v13609_v63 = vor.u32 %v15386_v53, %v13606_v51  ;;  %v13246_v53 = vld [vmem:[#allocation4 + $0x438] sm:$0xf0]  ;;  %v7155_v51 = vpop.f32.mrf.mxu2 }
 0x44e   :  { %v7185_v15 = vmul.f32 1.4142135, %v7177_v55  ;;  %v13405_v55 = vor.u32 %v15337_v29, %v13404_v19  ;;  %v13516_v19 = vld [vmem:[#allocation4 + $0x648] sm:$0xf] }
 0x44f   :  { %8076 = vmatpush.bf16.msra.mxu0 %v13293_v24  ;;  %v13326_v24 = vld [vmem:[#allocation4 + $0x4d8] sm:$0xf0] }
 0x450   :  { %v16401_v13 = vpack.c.bf16 %v7185_v15, %v7181_v37  ;;  %v13329_v9 = vor.u32 %v15315_v61, %v13326_v24  ;;  %v13388_v37 = vld [vmem:[#allocation4 + $0x548] sm:$0xf]  ;;  %v15333_v15 = vld [vmem:[#allocation4 + $0x554] sm:$0xf0]  ;;  %v13438_v61 = vld [vmem:[#allocation4 + $0x5b8] sm:$0xf0] }
 0x451   :  { %v7111_v54 = vpop.f32.mrf.mxu3  ;;  %8066 = vmatpush.bf16.msrb.mxu3 %v13609_v63  ;;  %v13389_v33 = vor.u32 %v15333_v15, %v13388_v37  ;;  %v15361_v37 = vld [vmem:[#allocation4 + $0x634] sm:$0xf0]  ;;  %v15291_v15 = vld [vmem:[#allocation4 + $0x40c] sm:$0xf] }
 0x452   :  { %7983 = vmatmul.bf16.vlgmr.msra.gmra.mxu1 %v16401_v13  ;;  %8025 = vmatmul.bf16.vlgmr.msrb.gmra.mxu0 %v16398_v38  ;;  %v7112_v30 = vadd.f32 %v7111_v54, %v7098_v27  ;;  %v15329_v54 = vld [vmem:[#allocation4 + $0x534] sm:$0xf0]  ;;  %v13297_v27 = vor.u32 %v15307_v22, %v13294_v31  ;;  %v13425_v31 = vor.u32 %v15339_v40, %v13422_v60  ;;  %v13628_v40 = vld [vmem:[#allocation4 + $0x728] sm:$0xf] }
 0x453   :  { %8077 = vmatpush.bf16.msra.mxu0 %v13277_v59  ;;  %8087 = vmatpush.bf16.msra.mxu1 %v13469_v14  ;;  %v13580_v59 = vld [vmem:[#allocation4 + $0x6c8] sm:$0xf]  ;;  %v15381_v14 = vld [vmem:[#allocation4 + $0x6d4] sm:$0xf0]  ;;  %v13373_v20 = vor.u32 %v15329_v54, %v13372_v28 }
 0x454   :  { %v7174_v50 = vmax.f32 %v7112_v30, 0.0  ;;  %v13581_v35 = vor.u32 %v15381_v14, %v13580_v59  ;;  %v15351_v30 = vld [vmem:[#allocation4 + $0x5ec] sm:$0xf]  ;;  %v13230_v59 = vld [vmem:[#allocation4 + $0x418] sm:$0xf0] }
 0x455   :  { %v13233_v28 = vor.u32 %v15291_v15, %v13230_v59  ;;  %v13484_v54 = vld [vmem:[#allocation4 + $0x608] sm:$0xf]  ;;  %v13518_v15 = vld [vmem:[#allocation4 + $0x658] sm:$0xf0]  ;;  %v15393_v60 = vld [vmem:[#allocation4 + $0x734] sm:$0xf0] }
 0x456   :  { %v7182_v62 = vmul.f32 1.4142135, %v7174_v50 }
 0x457   :  { %8078 = vmatpush.bf16.msra.mxu0 %v13261_v56  ;;  %8088 = vmatpush.bf16.msra.mxu1 %v13453_v23  ;;  %v7125_v56 = vpop.f32.mrf.mxu0  ;;  %v7139_v23 = vpop.f32.mrf.mxu1 }
 0x458   :  { %v7140_v58 = vadd.f32 %v7139_v23, %v7125_v56  ;;  %v15417_v56 = vld [vmem:[#allocation4 + $0x7f4] sm:$0xf0]  ;;  %v15335_v23 = vld [vmem:[#allocation4 + $0x56c] sm:$0xf] }
 0x459   :  { %v7113_v4 = vpop.f32.mrf.mxu3  ;;  %v13725_v16 = vor.u32 %v15417_v56, %v13724_v44  ;;  %v15355_v44 = vld [vmem:[#allocation4 + $0x60c] sm:$0xf]  ;;  %v13726_v56 = vld [vmem:[#allocation4 + $0x7f8] sm:$0xf0] }
 0x45a   :  { %v7114_v43 = vadd.f32 %v7113_v4, %v7100_v45  ;;  %v7154_v29 = vadd.f32 %v7153_v18, %v7140_v58  ;;  %v15383_v18 = vld [vmem:[#allocation4 + $0x6ec] sm:$0xf] }
 0x45b   :  { %8079 = vmatpush.bf16.msra.mxu0 %v13245_v0  ;;  %8089 = vmatpush.bf16.msra.mxu1 %v13437_v10  ;;  %v13470_v0 = vld [vmem:[#allocation4 + $0x5f8] sm:$0xf0]  ;;  %v13357_v10 = vor.u32 %v15325_v57, %v13356_v2  ;;  %v13485_v57 = vor.u32 %v15357_v8, %v13484_v54  ;;  %v15375_v58 = vld [vmem:[#allocation4 + $0x6ac] sm:$0xf]  ;;  %v13612_v54 = vld [vmem:[#allocation4 + $0x708] sm:$0xf] }
 0x45c   :  { %v7178_v3 = vmax.f32 %v7114_v43, 0.0  ;;  %v13473_v45 = vor.u32 %v15351_v30, %v13470_v0  ;;  %v13708_v30 = vld [vmem:[#allocation4 + $0x7c8] sm:$0xf]  ;;  %v15413_v0 = vld [vmem:[#allocation4 + $0x7d4] sm:$0xf0] }
 0x45d   :  { %v15389_v8 = vld [vmem:[#allocation4 + $0x714] sm:$0xf0] }
 0x45e   :  { %v7186_v17 = vmul.f32 1.4142135, %v7178_v3  ;;  %v15365_v3 = vld [vmem:[#allocation4 + $0x654] sm:$0xf0] }
 0x45f   :  { %8080 = vmatpush.bf16.msra.mxu0 %v13229_v21  ;;  %8090 = vmatpush.bf16.msra.mxu1 %v13421_v1  ;;  %v7127_v50 = vpop.f32.mrf.mxu0  ;;  %v7141_v43 = vpop.f32.mrf.mxu1  ;;  %v13533_v21 = vor.u32 %v15369_v36, %v13532_v46  ;;  %v13265_v1 = vor.u32 %v15299_v12, %v13262_v32  ;;  %v13582_v46 = vld [vmem:[#allocation4 + $0x6d8] sm:$0xf0]  ;;  %v13692_v32 = vld [vmem:[#allocation4 + $0x7a8] sm:$0xf] }
 0x460   :  { %v16405_v6 = vpack.c.bf16 %v7186_v17, %v7182_v62  ;;  %v7142_v24 = vadd.f32 %v7141_v43, %v7127_v50  ;;  %v13517_v62 = vor.u32 %v15365_v3, %v13516_v19  ;;  %v13566_v50 = vld [vmem:[#allocation4 + $0x6b8] sm:$0xf0]  ;;  %v15405_v19 = vld [vmem:[#allocation4 + $0x794] sm:$0xf0]  ;;  %v15371_v3 = vld [vmem:[#allocation4 + $0x68c] sm:$0xf] }
 0x462   :  { %7997 = vmatmul.bf16.vlgmr.msra.gmra.mxu2 %v16405_v6  ;;  %8039 = vmatmul.bf16.vlgmr.msrb.gmra.mxu1 %v16401_v13 }
 0x463   :  { %8129 = vmatpush.bf16.msrb.mxu0 %v13345_v25  ;;  %8091 = vmatpush.bf16.msra.mxu1 %v13405_v55  ;;  %v15295_v25 = vld [vmem:[#allocation4 + $0x42c] sm:$0xf]  ;;  %v13500_v55 = vld [vmem:[#allocation4 + $0x628] sm:$0xf] }
 0x464   :  { %8081 = vmatmul.bf16.vlgmr.msra.gmra.mxu0 %v16398_v38  ;;  %8101 = vmatpush.bf16.msra.mxu2 %v13597_v34  ;;  %v13249_v17 = vor.u32 %v15295_v25, %v13246_v53  ;;  %v7156_v34 = vadd.f32 %v7155_v51, %v7142_v24  ;;  %v13550_v25 = vld [vmem:[#allocation4 + $0x698] sm:$0xf0]  ;;  %v15401_v24 = vld [vmem:[#allocation4 + $0x774] sm:$0xf0] }
 0x467   :  { %8130 = vmatpush.bf16.msrb.mxu0 %v13329_v9  ;;  %8092 = vmatpush.bf16.msra.mxu1 %v13389_v33  ;;  %v13441_v9 = vor.u32 %v15343_v7, %v13438_v61  ;;  %v13553_v7 = vor.u32 %v15371_v3, %v13550_v25  ;;  %v13660_v61 = vld [vmem:[#allocation4 + $0x768] sm:$0xf]  ;;  %v15436_v3 = vld [vmem:[#allocation4 + $0x88c] sm:$0xf0] }
 0x468   :  { %8102 = vmatpush.bf16.msra.mxu2 %v13581_v35 }
 0x46b   :  { %8131 = vmatpush.bf16.msrb.mxu0 %v13313_v42  ;;  %8093 = vmatpush.bf16.msra.mxu1 %v13373_v20  ;;  %v13501_v42 = vor.u32 %v15361_v37, %v13500_v55  ;;  %v13406_v20 = vld [vmem:[#allocation4 + $0x578] sm:$0xf0]  ;;  %v15363_v37 = vld [vmem:[#allocation4 + $0x64c] sm:$0xf] }
 0x46c   :  { %8103 = vmatpush.bf16.msra.mxu2 %v13565_v11  ;;  %v13598_v11 = vld [vmem:[#allocation4 + $0x6f8] sm:$0xf0]  ;;  %v13409_v39 = vor.u32 %v15335_v23, %v13406_v20  ;;  %v13613_v23 = vor.u32 %v15389_v8, %v13612_v54 }
 0x46d   :  { %v13601_v5 = vor.u32 %v15383_v18, %v13598_v11  ;;  %v15411_v18 = vld [vmem:[#allocation4 + $0x7cc] sm:$0xf]  ;;  %v13710_v11 = vld [vmem:[#allocation4 + $0x7d8] sm:$0xf0] }
 0x46f   :  { %8132 = vmatpush.bf16.msrb.mxu0 %v13297_v27  ;;  %8094 = vmatpush.bf16.msra.mxu1 %v13357_v10  ;;  %v15331_v10 = vld [vmem:[#allocation4 + $0x54c] sm:$0xf] }
 0x470   :  { %8104 = vmatpush.bf16.msra.mxu2 %v13549_v26  ;;  %v13390_v26 = vld [vmem:[#allocation4 + $0x558] sm:$0xf0] }
 0x471   :  { %v7167_v4 = vpop.f32.mrf.mxu3  ;;  %v13393_v36 = vor.u32 %v15331_v10, %v13390_v26  ;;  %v13662_v10 = vld [vmem:[#allocation4 + $0x778] sm:$0xf0] }
 0x472   :  { %8053 = vmatmul.bf16.vlgmr.msrb.gmra.mxu2 %v16405_v6  ;;  %8095 = vmatmul.bf16.vlgmr.msra.gmra.mxu1 %v16401_v13  ;;  %v7168_v63 = vadd.f32 %v7167_v4, %v7154_v29  ;;  %v15409_v4 = vld [vmem:[#allocation4 + $0x7b4] sm:$0xf0]  ;;  %v15323_v29 = vld [vmem:[#allocation4 + $0x50c] sm:$0xf] }
 0x473   :  { %8133 = vmatpush.bf16.msrb.mxu0 %v13281_v47  ;;  %8143 = vmatpush.bf16.msrb.mxu1 %v13473_v45  ;;  %v15379_v47 = vld [vmem:[#allocation4 + $0x6cc] sm:$0xf]  ;;  %v13709_v45 = vor.u32 %v15413_v0, %v13708_v30  ;;  %v13693_v43 = vor.u32 %v15409_v4, %v13692_v32 }
 0x474   :  { %8105 = vmatpush.bf16.msra.mxu2 %v13533_v21  ;;  %v7175_v33 = vmax.f32 %v7168_v63, 0.0  ;;  %v13585_v12 = vor.u32 %v15379_v47, %v13582_v46  ;;  %v13569_v21 = vor.u32 %v15375_v58, %v13566_v50  ;;  %v15367_v63 = vld [vmem:[#allocation4 + $0x66c] sm:$0xf]  ;;  %v13646_v46 = vld [vmem:[#allocation4 + $0x758] sm:$0xf0] }
 0x475   :  { %v15399_v0 = vld [vmem:[#allocation4 + $0x76c] sm:$0xf]  ;;  %v15448_v58 = vld [vmem:[#allocation4 + $0x8ec] sm:$0xf0] }
 0x476   :  { %v7183_v27 = vmul.f32 1.4142135, %v7175_v33  ;;  %v15359_v33 = vld [vmem:[#allocation4 + $0x62c] sm:$0xf]  ;;  %v13665_v26 = vor.u32 %v15399_v0, %v13662_v10  ;;  %v15508_v0 = vld [vmem:[#allocation4 + $0xacc] sm:$0xf0] }
 0x477   :  { %8134 = vmatpush.bf16.msrb.mxu0 %v13265_v1  ;;  %8144 = vmatpush.bf16.msrb.mxu1 %v13457_v49  ;;  %v13676_v1 = vld [vmem:[#allocation4 + $0x788] sm:$0xf]  ;;  %v13358_v49 = vld [vmem:[#allocation4 + $0x518] sm:$0xf0]  ;;  %v15395_v47 = vld [vmem:[#allocation4 + $0x74c] sm:$0xf] }
 0x478   :  { %8106 = vmatpush.bf16.msra.mxu2 %v13517_v62  ;;  %v13677_v53 = vor.u32 %v15405_v19, %v13676_v1  ;;  %v13361_v51 = vor.u32 %v15323_v29, %v13358_v49  ;;  %v13534_v62 = vld [vmem:[#allocation4 + $0x678] sm:$0xf0]  ;;  %v15387_v4 = vld [vmem:[#allocation4 + $0x70c] sm:$0xf]  ;;  %v13812_v1 = vld [vmem:[#allocation4 + $0x8a0] sm:$0xf] }
 0x479   :  { %v7169_v14 = vpop.f32.mrf.mxu3  ;;  %v13537_v55 = vor.u32 %v15367_v63, %v13534_v62  ;;  %v15440_v19 = vld [vmem:[#allocation4 + $0x8ac] sm:$0xf0]  ;;  %v13796_v49 = vld [vmem:[#allocation4 + $0x880] sm:$0xf]  ;;  %v15438_v10 = vld [vmem:[#allocation4 + $0x8a4] sm:$0xf] }
 0x47a   :  { %v7170_v35 = vadd.f32 %v7169_v14, %v7156_v34  ;;  %v13644_v34 = vld [vmem:[#allocation4 + $0x748] sm:$0xf]  ;;  %v13521_v14 = vor.u32 %v15363_v37, %v13518_v15  ;;  %v13813_v29 = vor.u32 %v15440_v19, %v13812_v1  ;;  %v13797_v25 = vor.u32 %v15436_v3, %v13796_v49  ;;  %v13764_v63 = vld [vmem:[#allocation4 + $0x840] sm:$0xf]  ;;  %v15428_v62 = vld [vmem:[#allocation4 + $0x84c] sm:$0xf0] }
 0x47b   :  { %8135 = vmatpush.bf16.msrb.mxu0 %v13249_v17  ;;  %8145 = vmatpush.bf16.msrb.mxu1 %v13441_v9  ;;  %v13661_v17 = vor.u32 %v15401_v24, %v13660_v61  ;;  %v15397_v9 = vld [vmem:[#allocation4 + $0x754] sm:$0xf0]  ;;  %v15480_v24 = vld [vmem:[#allocation4 + $0x9ec] sm:$0xf0]  ;;  %v13748_v37 = vld [vmem:[#allocation4 + $0x820] sm:$0xf] }
 0x47c   :  { %v7179_v22 = vmax.f32 %v7170_v35, 0.0  ;;  %8107 = vmatpush.bf16.msra.mxu2 %v13501_v42  ;;  %v13645_v59 = vor.u32 %v15397_v9, %v13644_v34  ;;  %v13502_v35 = vld [vmem:[#allocation4 + $0x638] sm:$0xf0]  ;;  %v13629_v42 = vor.u32 %v15393_v60, %v13628_v40  ;;  %v15476_v34 = vld [vmem:[#allocation4 + $0x9cc] sm:$0xf0] }
 0x47d   :  { %v15424_v15 = vld [vmem:[#allocation4 + $0x82c] sm:$0xf0]  ;;  %v13732_v60 = vld [vmem:[#allocation4 + $0x800] sm:$0xf]  ;;  %v15430_v19 = vld [vmem:[#allocation4 + $0x864] sm:$0xf] }
 0x47e   :  { %v7187_v2 = vmul.f32 1.4142135, %v7179_v22  ;;  %v13486_v22 = vld [vmem:[#allocation4 + $0x618] sm:$0xf0]  ;;  %v15472_v40 = vld [vmem:[#allocation4 + $0x9ac] sm:$0xf0] }
 0x47f   :  { %8136 = vmatpush.bf16.msrb.mxu0 %v13233_v28  ;;  %8146 = vmatpush.bf16.msrb.mxu1 %v13425_v31  ;;  %v13505_v28 = vor.u32 %v15359_v33, %v13502_v35  ;;  %v15415_v31 = vld [vmem:[#allocation4 + $0x7ec] sm:$0xf]  ;;  %v15420_v33 = vld [vmem:[#allocation4 + $0x80c] sm:$0xf0] }
 0x480   :  { %v16412_v41 = vpack.c.bf16 %v7187_v2, %v7183_v27  ;;  %8108 = vmatpush.bf16.msra.mxu2 %v13485_v57  ;;  %v13729_v20 = vor.u32 %v15415_v31, %v13726_v56  ;;  %v13713_v27 = vor.u32 %v15411_v18, %v13710_v11  ;;  %v15407_v2 = vld [vmem:[#allocation4 + $0x7ac] sm:$0xf]  ;;  %v13694_v57 = vld [vmem:[#allocation4 + $0x7b8] sm:$0xf0]  ;;  %v13733_v54 = vor.u32 %v15420_v33, %v13732_v60  ;;  %v13908_v56 = vld [vmem:[#allocation4 + $0x960] sm:$0xf] }
 0x481   :  { %v15512_v18 = vld [vmem:[#allocation4 + $0xaec] sm:$0xf0]  ;;  %v15442_v11 = vld [vmem:[#allocation4 + $0x8c4] sm:$0xf]  ;;  %v13942_v33 = vld [vmem:[#allocation4 + $0x9b0] sm:$0xf0] }
 0x482   :  { %8011 = vmatmul.bf16.vlgmr.msra.gmra.mxu3 %v16412_v41  ;;  %8137 = vmatmul.bf16.vlgmr.msrb.gmra.mxu0 %v16398_v38  ;;  %v13377_v38 = vor.u32 %v15327_v48, %v13374_v52  ;;  %v13844_v52 = vld [vmem:[#allocation4 + $0x8e0] sm:$0xf]  ;;  %v15500_v1 = vld [vmem:[#allocation4 + $0xa8c] sm:$0xf0] }
 0x483   :  { %8115 = vmatpush.bf16.msra.mxu3 %v13725_v16  ;;  %8147 = vmatpush.bf16.msrb.mxu1 %v13409_v39  ;;  %v13697_v16 = vor.u32 %v15407_v2, %v13694_v57  ;;  %v15403_v39 = vld [vmem:[#allocation4 + $0x78c] sm:$0xf]  ;;  %v13845_v50 = vor.u32 %v15448_v58, %v13844_v52  ;;  %v13798_v52 = vld [vmem:[#allocation4 + $0x890] sm:$0xf0] }
 0x484   :  { %8157 = vmatpush.bf16.msrb.mxu2 %v13601_v5  ;;  %v13678_v5 = vld [vmem:[#allocation4 + $0x798] sm:$0xf0] }
 0x485   :  { %8109 = vmatmul.bf16.vlgmr.msra.gmra.mxu2 %v16405_v6  ;;  %v13681_v30 = vor.u32 %v15403_v39, %v13678_v5  ;;  %8974 = vmatpush.bf16.msra.mxu0 %v13845_v50  ;;  %v15460_v39 = vld [vmem:[#allocation4 + $0x94c] sm:$0xf0]  ;;  %v14084_v5 = vld [vmem:[#allocation4 + $0xac0] sm:$0xf] }
 0x486   :  { %v13860_v50 = vld [vmem:[#allocation4 + $0x900] sm:$0xf] }
 0x487   :  { %8116 = vmatpush.bf16.msra.mxu3 %v13709_v45  ;;  %8148 = vmatpush.bf16.msrb.mxu1 %v13393_v36  ;;  %v13649_v45 = vor.u32 %v15395_v47, %v13646_v46  ;;  %v15391_v36 = vld [vmem:[#allocation4 + $0x72c] sm:$0xf]  ;;  %v14085_v47 = vor.u32 %v15508_v0, %v14084_v5  ;;  %v13910_v5 = vld [vmem:[#allocation4 + $0x970] sm:$0xf0] }
 0x488   :  { %8158 = vmatpush.bf16.msrb.mxu2 %v13585_v12  ;;  %v13630_v12 = vld [vmem:[#allocation4 + $0x738] sm:$0xf0] }
 0x489   :  { %v13633_v32 = vor.u32 %v15391_v36, %v13630_v12  ;;  %v15456_v36 = vld [vmem:[#allocation4 + $0x92c] sm:$0xf0]  ;;  %v14068_v12 = vld [vmem:[#allocation4 + $0xaa0] sm:$0xf] }
 0x48b   :  { %8117 = vmatpush.bf16.msra.mxu3 %v13693_v43  ;;  %8149 = vmatpush.bf16.msrb.mxu1 %v13377_v38  ;;  %v13828_v43 = vld [vmem:[#allocation4 + $0x8c0] sm:$0xf]  ;;  %v15444_v38 = vld [vmem:[#allocation4 + $0x8cc] sm:$0xf0] }
 0x48c   :  { %8159 = vmatpush.bf16.msrb.mxu2 %v13569_v21  ;;  %v13829_v21 = vor.u32 %v15444_v38, %v13828_v43  ;;  %v15452_v43 = vld [vmem:[#allocation4 + $0x90c] sm:$0xf0]  ;;  %v14052_v38 = vld [vmem:[#allocation4 + $0xa80] sm:$0xf] }
 0x48d   :  { %v14053_v49 = vor.u32 %v15500_v1, %v14052_v38  ;;  %v13878_v1 = vld [vmem:[#allocation4 + $0x930] sm:$0xf0] }
 0x48e   :  { %8975 = vmatpush.bf16.msra.mxu0 %v13829_v21  ;;  %v13861_v21 = vor.u32 %v15452_v43, %v13860_v50  ;;  %v15536_v50 = vld [vmem:[#allocation4 + $0xbac] sm:$0xf0] }
 0x48f   :  { %8118 = vmatpush.bf16.msra.mxu3 %v13677_v53  ;;  %8150 = vmatpush.bf16.msrb.mxu1 %v13361_v51  ;;  %v13780_v53 = vld [vmem:[#allocation4 + $0x860] sm:$0xf]  ;;  %v15432_v51 = vld [vmem:[#allocation4 + $0x86c] sm:$0xf0] }
 0x490   :  { %8160 = vmatpush.bf16.msrb.mxu2 %v13553_v7  ;;  %v13972_v7 = vld [vmem:[#allocation4 + $0x9e0] sm:$0xf]  ;;  %v13781_v61 = vor.u32 %v15432_v51, %v13780_v53  ;;  %v13974_v53 = vld [vmem:[#allocation4 + $0x9f0] sm:$0xf0] }
 0x492   :  { %8067 = vmatmul.bf16.vlgmr.msrb.gmra.mxu3 %v16412_v41  ;;  %8151 = vmatmul.bf16.vlgmr.msrb.gmra.mxu1 %v16401_v13  ;;  %v13489_v13 = vor.u32 %v15355_v44, %v13486_v22  ;;  %v15446_v44 = vld [vmem:[#allocation4 + $0x8e4] sm:$0xf]  ;;  %v13846_v22 = vld [vmem:[#allocation4 + $0x8f0] sm:$0xf0] }
 0x493   :  { %8119 = vmatpush.bf16.msra.mxu3 %v13661_v17  ;;  %8976 = vmatpush.bf16.msra.mxu0 %v13813_v29  ;;  %v13973_v17 = vor.u32 %v15480_v24, %v13972_v7  ;;  %v13849_v31 = vor.u32 %v15446_v44, %v13846_v22  ;;  %v13782_v29 = vld [vmem:[#allocation4 + $0x870] sm:$0xf0]  ;;  %v14036_v7 = vld [vmem:[#allocation4 + $0xa60] sm:$0xf]  ;;  %v15466_v22 = vld [vmem:[#allocation4 + $0x984] sm:$0xf] }
 0x494   :  { %8161 = vmatpush.bf16.msrb.mxu2 %v13537_v55  ;;  %v13956_v55 = vld [vmem:[#allocation4 + $0x9c0] sm:$0xf]  ;;  %v13785_v3 = vor.u32 %v15430_v19, %v13782_v29  ;;  %v13734_v44 = vld [vmem:[#allocation4 + $0x810] sm:$0xf0]  ;;  %v15502_v19 = vld [vmem:[#allocation4 + $0xaa4] sm:$0xf] }
 0x495   :  { %8988 = vmatpush.bf16.msra.mxu1 %v13973_v17  ;;  %v13957_v9 = vor.u32 %v15476_v34, %v13956_v55  ;;  %v15474_v17 = vld [vmem:[#allocation4 + $0x9c4] sm:$0xf]  ;;  %v13958_v34 = vld [vmem:[#allocation4 + $0x9d0] sm:$0xf0] }
 0x497   :  { %8120 = vmatpush.bf16.msra.mxu3 %v13645_v59  ;;  %8977 = vmatpush.bf16.msra.mxu0 %v13797_v25  ;;  %v13940_v59 = vld [vmem:[#allocation4 + $0x9a0] sm:$0xf]  ;;  %v15478_v25 = vld [vmem:[#allocation4 + $0x9e4] sm:$0xf] }
 0x498   :  { %8162 = vmatpush.bf16.msrb.mxu2 %v13521_v14  ;;  %v13749_v14 = vor.u32 %v15424_v15, %v13748_v37  ;;  %v13941_v35 = vor.u32 %v15472_v40, %v13940_v59  ;;  %v13977_v51 = vor.u32 %v15478_v25, %v13974_v53  ;;  %v15492_v37 = vld [vmem:[#allocation4 + $0xa4c] sm:$0xf0]  ;;  %v15422_v59 = vld [vmem:[#allocation4 + $0x824] sm:$0xf] }
 0x499   :  { %8989 = vmatpush.bf16.msra.mxu1 %v13957_v9  ;;  %v14020_v9 = vld [vmem:[#allocation4 + $0xa40] sm:$0xf]  ;;  %v15470_v40 = vld [vmem:[#allocation4 + $0x9a4] sm:$0xf] }
 0x49a   :  { %v14021_v15 = vor.u32 %v15492_v37, %v14020_v9  ;;  %v14164_v37 = vld [vmem:[#allocation4 + $0xb60] sm:$0xf] }
 0x49b   :  { %8121 = vmatpush.bf16.msra.mxu3 %v13629_v42  ;;  %8978 = vmatpush.bf16.msra.mxu0 %v13781_v61  ;;  %v13924_v42 = vld [vmem:[#allocation4 + $0x980] sm:$0xf]  ;;  %v15496_v61 = vld [vmem:[#allocation4 + $0xa6c] sm:$0xf0] }
 0x49c   :  { %8163 = vmatpush.bf16.msrb.mxu2 %v13505_v28  ;;  %v15468_v28 = vld [vmem:[#allocation4 + $0x98c] sm:$0xf0]  ;;  %v14037_v24 = vor.u32 %v15496_v61, %v14036_v7 }
 0x49d   :  { %8990 = vmatpush.bf16.msra.mxu1 %v13941_v35  ;;  %v13925_v8 = vor.u32 %v15468_v28, %v13924_v42  ;;  %v13945_v35 = vor.u32 %v15470_v40, %v13942_v33  ;;  %v14004_v42 = vld [vmem:[#allocation4 + $0xa20] sm:$0xf]  ;;  %v15488_v28 = vld [vmem:[#allocation4 + $0xa2c] sm:$0xf0]  ;;  %v14038_v40 = vld [vmem:[#allocation4 + $0xa70] sm:$0xf0] }
 0x49e   :  { %v15532_v7 = vld [vmem:[#allocation4 + $0xb8c] sm:$0xf0] }
 0x49f   :  { %8122 = vmatpush.bf16.msra.mxu3 %v13613_v23  ;;  %v15464_v23 = vld [vmem:[#allocation4 + $0x96c] sm:$0xf0] }
 0x4a0   :  { %8164 = vmatpush.bf16.msrb.mxu2 %v13489_v13  ;;  %v14100_v13 = vld [vmem:[#allocation4 + $0xae0] sm:$0xf] }
 0x4a1   :  { %8991 = vmatpush.bf16.msra.mxu1 %v13925_v8  ;;  %v14101_v2 = vor.u32 %v15512_v18, %v14100_v13  ;;  %v15418_v8 = vld [vmem:[#allocation4 + $0x804] sm:$0xf]  ;;  %v13988_v18 = vld [vmem:[#allocation4 + $0xa00] sm:$0xf] }
 0x4a2   :  { %8123 = vmatmul.bf16.vlgmr.msra.gmra.mxu3 %v16412_v41 }
 0x4a3   :  { %8171 = vmatpush.bf16.msrb.mxu3 %v13729_v20  ;;  %8165 = vmatmul.bf16.vlgmr.msrb.gmra.mxu2 %v16405_v6  ;;  %v13614_v6 = vld [vmem:[#allocation4 + $0x718] sm:$0xf0]  ;;  %v13909_v20 = vor.u32 %v15464_v23, %v13908_v56  ;;  %v13926_v56 = vld [vmem:[#allocation4 + $0x990] sm:$0xf0] }
 0x4a4   :  { %v13617_v48 = vor.u32 %v15387_v4, %v13614_v6  ;;  %9002 = vmatpush.bf16.msra.mxu2 %v14101_v2  ;;  %v15504_v4 = vld [vmem:[#allocation4 + $0xaac] sm:$0xf0]  ;;  %v13929_v13 = vor.u32 %v15466_v22, %v13926_v56  ;;  %v15490_v56 = vld [vmem:[#allocation4 + $0xa44] sm:$0xf] }
 0x4a5   :  { %8992 = vmatpush.bf16.msra.mxu1 %v13909_v20  ;;  %v14069_v6 = vor.u32 %v15504_v4, %v14068_v12  ;;  %v15458_v12 = vld [vmem:[#allocation4 + $0x944] sm:$0xf] }
 0x4a6   :  { %v15506_v4 = vld [vmem:[#allocation4 + $0xac4] sm:$0xf] }
 0x4a7   :  { %8172 = vmatpush.bf16.msrb.mxu3 %v13713_v27  ;;  %v13830_v27 = vld [vmem:[#allocation4 + $0x8d0] sm:$0xf0] }
 0x4a8   :  { %v13833_v57 = vor.u32 %v15442_v11, %v13830_v27  ;;  %9003 = vmatpush.bf16.msra.mxu2 %v14085_v47  ;;  %v15484_v11 = vld [vmem:[#allocation4 + $0xa0c] sm:$0xf0]  ;;  %v14228_v27 = vld [vmem:[#allocation4 + $0xbe0] sm:$0xf] }
 0x4ab   :  { %8173 = vmatpush.bf16.msrb.mxu3 %v13697_v16  ;;  %v13892_v16 = vld [vmem:[#allocation4 + $0x940] sm:$0xf] }
 0x4ac   :  { %9004 = vmatpush.bf16.msra.mxu2 %v14069_v6 }
 0x4af   :  { %8174 = vmatpush.bf16.msrb.mxu3 %v13681_v30  ;;  %v13893_v30 = vor.u32 %v15460_v39, %v13892_v16  ;;  %v15544_v16 = vld [vmem:[#allocation4 + $0xbec] sm:$0xf0]  ;;  %v15462_v39 = vld [vmem:[#allocation4 + $0x964] sm:$0xf] }
 0x4b0   :  { %9005 = vmatpush.bf16.msra.mxu2 %v14053_v49  ;;  %v13913_v0 = vor.u32 %v15462_v39, %v13910_v5  ;;  %v15486_v39 = vld [vmem:[#allocation4 + $0xa24] sm:$0xf]  ;;  %v14006_v5 = vld [vmem:[#allocation4 + $0xa30] sm:$0xf0] }
 0x4b1   :  { %8993 = vmatpush.bf16.msra.mxu1 %v13893_v30  ;;  %v14229_v30 = vor.u32 %v15544_v16, %v14228_v27 }
 0x4b3   :  { %8175 = vmatpush.bf16.msrb.mxu3 %v13665_v26  ;;  %v13814_v26 = vld [vmem:[#allocation4 + $0x8b0] sm:$0xf0] }
 0x4b4   :  { %v13817_v46 = vor.u32 %v15438_v10, %v13814_v26  ;;  %9006 = vmatpush.bf16.msra.mxu2 %v14037_v24  ;;  %v15510_v10 = vld [vmem:[#allocation4 + $0xae4] sm:$0xf]  ;;  %v14102_v26 = vld [vmem:[#allocation4 + $0xaf0] sm:$0xf0] }
 0x4b5   :  { %v14105_v47 = vor.u32 %v15510_v10, %v14102_v26  ;;  %v15450_v24 = vld [vmem:[#allocation4 + $0x904] sm:$0xf]  ;;  %v15449_v10 = vld [vmem:[#allocation4 + $0x8f4] sm:$0xf0]  ;;  %v14009_v26 = vor.u32 %v15486_v39, %v14006_v5 }
 0x4b6   :  { %v15477_v5 = vld [vmem:[#allocation4 + $0x9d4] sm:$0xf0] }
 0x4b7   :  { %8176 = vmatpush.bf16.msrb.mxu3 %v13649_v45  ;;  %v13876_v45 = vld [vmem:[#allocation4 + $0x920] sm:$0xf] }
 0x4b8   :  { %9007 = vmatpush.bf16.msra.mxu2 %v14021_v15  ;;  %v15528_v15 = vld [vmem:[#allocation4 + $0xb6c] sm:$0xf0] }
 0x4bb   :  { %8177 = vmatpush.bf16.msrb.mxu3 %v13633_v32  ;;  %v13877_v32 = vor.u32 %v15456_v36, %v13876_v45  ;;  %v15540_v45 = vld [vmem:[#allocation4 + $0xbcc] sm:$0xf0] }
 0x4bd   :  { %8994 = vmatpush.bf16.msra.mxu1 %v13877_v32  ;;  %v13894_v32 = vld [vmem:[#allocation4 + $0x950] sm:$0xf0] }
 0x4be   :  { %v13897_v6 = vor.u32 %v15458_v12, %v13894_v32 }
 0x4bf   :  { %8178 = vmatpush.bf16.msrb.mxu3 %v13617_v48  ;;  %v15434_v48 = vld [vmem:[#allocation4 + $0x884] sm:$0xf]  ;;  %v7970_v20 = vpop.f32.mrf.mxu0 }
 0x4c0   :  { %v13801_v58 = vor.u32 %v15434_v48, %v13798_v52  ;;  %v14086_v48 = vld [vmem:[#allocation4 + $0xad0] sm:$0xf0] }
 0x4c1   :  { %8995 = vmatpush.bf16.msra.mxu1 %v13861_v21  ;;  %v14089_v52 = vor.u32 %v15506_v4, %v14086_v48  ;;  %v15454_v21 = vld [vmem:[#allocation4 + $0x924] sm:$0xf]  ;;  %v15516_v4 = vld [vmem:[#allocation4 + $0xb0c] sm:$0xf0]  ;;  %v13990_v48 = vld [vmem:[#allocation4 + $0xa10] sm:$0xf0] }
 0x4c2   :  { %8179 = vmatmul.bf16.vlgmr.msrb.gmra.mxu3 %v16412_v41  ;;  %v13765_v41 = vor.u32 %v15428_v62, %v13764_v63  ;;  %v15426_v63 = vld [vmem:[#allocation4 + $0x844] sm:$0xf]  ;;  %v13766_v62 = vld [vmem:[#allocation4 + $0x850] sm:$0xf0]  ;;  %v13881_v49 = vor.u32 %v15454_v21, %v13878_v1 }
 0x4c3   :  { %v13769_v55 = vor.u32 %v15426_v63, %v13766_v62  ;;  %9016 = vmatpush.bf16.msra.mxu3 %v14229_v30  ;;  %v13862_v63 = vld [vmem:[#allocation4 + $0x910] sm:$0xf0]  ;;  %v15498_v62 = vld [vmem:[#allocation4 + $0xa84] sm:$0xf] }
 0x4c4   :  { %8979 = vmatpush.bf16.msra.mxu0 %v13765_v41  ;;  %v13961_v41 = vor.u32 %v15474_v17, %v13958_v34  ;;  %v13865_v17 = vor.u32 %v15450_v24, %v13862_v63  ;;  %v15542_v21 = vld [vmem:[#allocation4 + $0xbe4] sm:$0xf]  ;;  %v14230_v1 = vld [vmem:[#allocation4 + $0xbf0] sm:$0xf0] }
 0x4c5   :  { %9044 = vmatpush.bf16.msrb.mxu1 %v13977_v51  ;;  %v14180_v51 = vld [vmem:[#allocation4 + $0xb80] sm:$0xf]  ;;  %v14214_v24 = vld [vmem:[#allocation4 + $0xbd0] sm:$0xf0] }
 0x4c6   :  { %v14181_v61 = vor.u32 %v15532_v7, %v14180_v51  ;;  %v15441_v7 = vld [vmem:[#allocation4 + $0x8b4] sm:$0xf0] }
 0x4c7   :  { %v7972_v29 = vpop.f32.mrf.mxu0 }
 0x4c8   :  { %8980 = vmatpush.bf16.msra.mxu0 %v13749_v14  ;;  %v13750_v14 = vld [vmem:[#allocation4 + $0x830] sm:$0xf0] }
 0x4c9   :  { %9045 = vmatpush.bf16.msrb.mxu1 %v13961_v41  ;;  %v13753_v60 = vor.u32 %v15422_v59, %v13750_v14  ;;  %v14165_v59 = vor.u32 %v15528_v15, %v14164_v37  ;;  %v15494_v14 = vld [vmem:[#allocation4 + $0xa64] sm:$0xf]  ;;  %v14198_v15 = vld [vmem:[#allocation4 + $0xbb0] sm:$0xf0] }
 0x4ca   :  { %v14041_v33 = vor.u32 %v15494_v14, %v14038_v40  ;;  %v15534_v37 = vld [vmem:[#allocation4 + $0xba4] sm:$0xf] }
 0x4cb   :  { %v14201_v40 = vor.u32 %v15534_v37, %v14198_v15  ;;  %v13916_v15 = vld [vmem:[#allocation4 + $0x968] sm:$0xf] }
 0x4cc   :  { %8981 = vmatpush.bf16.msra.mxu0 %v13733_v54  ;;  %v14005_v54 = vor.u32 %v15488_v28, %v14004_v42 }
 0x4cd   :  { %9046 = vmatpush.bf16.msrb.mxu1 %v13945_v35 }
 0x4ce   :  { %9008 = vmatpush.bf16.msra.mxu2 %v14005_v54 }
 0x4cf   :  { %v7984_v23 = vpop.f32.mrf.mxu1  ;;  %v8026_v42 = vpop.f32.mrf.mxu0 }
 0x4d0   :  { %9030 = vmatpush.bf16.msrb.mxu0 %v13849_v31  ;;  %v13737_v31 = vor.u32 %v15418_v8, %v13734_v44  ;;  %v7985_v9 = vadd.f32 %v7984_v23, %v7970_v20  ;;  %v14148_v8 = vld [vmem:[#allocation4 + $0xb40] sm:$0xf]  ;;  %v15524_v44 = vld [vmem:[#allocation4 + $0xb4c] sm:$0xf0]  ;;  %v14022_v23 = vld [vmem:[#allocation4 + $0xa50] sm:$0xf0] }
 0x4d1   :  { %9047 = vmatpush.bf16.msrb.mxu1 %v13929_v13  ;;  %v14025_v20 = vor.u32 %v15490_v56, %v14022_v23  ;;  %v15530_v56 = vld [vmem:[#allocation4 + $0xb84] sm:$0xf]  ;;  %v14182_v23 = vld [vmem:[#allocation4 + $0xb90] sm:$0xf0] }
 0x4d4   :  { %9031 = vmatpush.bf16.msrb.mxu0 %v13833_v57  ;;  %v13989_v57 = vor.u32 %v15484_v11, %v13988_v18 }
 0x4d5   :  { %9048 = vmatpush.bf16.msrb.mxu1 %v13913_v0  ;;  %v13852_v0 = vld [vmem:[#allocation4 + $0x8e8] sm:$0xf] }
 0x4d6   :  { %9009 = vmatpush.bf16.msra.mxu2 %v13989_v57  ;;  %v15520_v57 = vld [vmem:[#allocation4 + $0xb2c] sm:$0xf0]  ;;  %v13853_v32 = vor.u32 %v15449_v10, %v13852_v0  ;;  %v14166_v0 = vld [vmem:[#allocation4 + $0xb70] sm:$0xf0] }
 0x4d7   :  { %v7986_v43 = vpop.f32.mrf.mxu1 }
 0x4d8   :  { %9032 = vmatpush.bf16.msrb.mxu0 %v13817_v46  ;;  %v14212_v46 = vld [vmem:[#allocation4 + $0xbc0] sm:$0xf]  ;;  %v7987_v28 = vadd.f32 %v7986_v43, %v7972_v29 }
 0x4d9   :  { %v14213_v36 = vor.u32 %v15540_v45, %v14212_v46  ;;  %9049 = vmatpush.bf16.msrb.mxu1 %v13897_v6  ;;  %v13836_v45 = vld [vmem:[#allocation4 + $0x8c8] sm:$0xf]  ;;  %v15482_v6 = vld [vmem:[#allocation4 + $0xa04] sm:$0xf] }
 0x4da   :  { %9058 = vmatpush.bf16.msrb.mxu2 %v14105_v47 }
 0x4db   :  { %9017 = vmatpush.bf16.msra.mxu3 %v14213_v36  ;;  %v14116_v36 = vld [vmem:[#allocation4 + $0xb00] sm:$0xf] }
 0x4dc   :  { %9033 = vmatpush.bf16.msrb.mxu0 %v13801_v58  ;;  %v14196_v58 = vld [vmem:[#allocation4 + $0xba0] sm:$0xf]  ;;  %v14117_v43 = vor.u32 %v15516_v4, %v14116_v36  ;;  %v13948_v4 = vld [vmem:[#allocation4 + $0x9a8] sm:$0xf] }
 0x4dd   :  { %v14197_v38 = vor.u32 %v15536_v50, %v14196_v58  ;;  %9050 = vmatpush.bf16.msrb.mxu1 %v13881_v49  ;;  %v15445_v50 = vld [vmem:[#allocation4 + $0x8d4] sm:$0xf0]  ;;  %v14233_v49 = vor.u32 %v15542_v21, %v14230_v1 }
 0x4de   :  { %9059 = vmatpush.bf16.msrb.mxu2 %v14089_v52  ;;  %v8028_v52 = vpop.f32.mrf.mxu0 }
 0x4df   :  { %9018 = vmatpush.bf16.msra.mxu3 %v14197_v38  ;;  %v8040_v35 = vpop.f32.mrf.mxu1  ;;  %v13993_v38 = vor.u32 %v15482_v6, %v13990_v48  ;;  %v15473_v48 = vld [vmem:[#allocation4 + $0x9b4] sm:$0xf0] }
 0x4e0   :  { %9034 = vmatpush.bf16.msrb.mxu0 %v13785_v3  ;;  %v14070_v3 = vld [vmem:[#allocation4 + $0xab0] sm:$0xf0] }
 0x4e1   :  { %v14073_v53 = vor.u32 %v15502_v19, %v14070_v3  ;;  %9051 = vmatpush.bf16.msrb.mxu1 %v13865_v17  ;;  %v8041_v3 = vadd.f32 %v8040_v35, %v8026_v42  ;;  %v13788_v35 = vld [vmem:[#allocation4 + $0x868] sm:$0xf] }
 0x4e3   :  { %9060 = vmatpush.bf16.msrb.mxu2 %v14073_v53  ;;  %9019 = vmatpush.bf16.msra.mxu3 %v14181_v61  ;;  %v13820_v53 = vld [vmem:[#allocation4 + $0x8a8] sm:$0xf]  ;;  %v15538_v61 = vld [vmem:[#allocation4 + $0xbc4] sm:$0xf] }
 0x4e4   :  { %9035 = vmatpush.bf16.msrb.mxu0 %v13769_v55  ;;  %v14054_v55 = vld [vmem:[#allocation4 + $0xa90] sm:$0xf0]  ;;  %v14217_v63 = vor.u32 %v15538_v61, %v14214_v24  ;;  %v15518_v61 = vld [vmem:[#allocation4 + $0xb24] sm:$0xf] }
 0x4e5   :  { %v7998_v2 = vpop.f32.mrf.mxu2  ;;  %v14057_v41 = vor.u32 %v15498_v62, %v14054_v55  ;;  %v13821_v55 = vor.u32 %v15441_v7, %v13820_v53  ;;  %v13932_v53 = vld [vmem:[#allocation4 + $0x988] sm:$0xf]  ;;  %v15469_v7 = vld [vmem:[#allocation4 + $0x994] sm:$0xf0]  ;;  %v14134_v24 = vld [vmem:[#allocation4 + $0xb30] sm:$0xf0] }
 0x4e6   :  { %v8082_v42 = vpop.f32.mrf.mxu0  ;;  %v13933_v37 = vor.u32 %v15469_v7, %v13932_v53  ;;  %v14044_v53 = vld [vmem:[#allocation4 + $0xa68] sm:$0xf]  ;;  %v15497_v7 = vld [vmem:[#allocation4 + $0xa74] sm:$0xf0] }
 0x4e7   :  { %9061 = vmatpush.bf16.msrb.mxu2 %v14057_v41  ;;  %9020 = vmatpush.bf16.msra.mxu3 %v14165_v59  ;;  %v8042_v12 = vpop.f32.mrf.mxu1 }
 0x4e8   :  { %9036 = vmatpush.bf16.msrb.mxu0 %v13753_v60  ;;  %v7999_v60 = vadd.f32 %v7998_v2, %v7985_v9  ;;  %v14132_v2 = vld [vmem:[#allocation4 + $0xb20] sm:$0xf]  ;;  %v8043_v62 = vadd.f32 %v8042_v12, %v8028_v52  ;;  %v15437_v9 = vld [vmem:[#allocation4 + $0x894] sm:$0xf0]  ;;  %v13756_v12 = vld [vmem:[#allocation4 + $0x828] sm:$0xf] }
 0x4e9   :  { %v14133_v16 = vor.u32 %v15520_v57, %v14132_v2  ;;  %v13772_v2 = vld [vmem:[#allocation4 + $0x848] sm:$0xf]  ;;  %v15429_v57 = vld [vmem:[#allocation4 + $0x854] sm:$0xf0]  ;;  %v15522_v52 = vld [vmem:[#allocation4 + $0xb44] sm:$0xf] }
 0x4eb   :  { %9062 = vmatpush.bf16.msrb.mxu2 %v14041_v33 }
 0x4ec   :  { %9037 = vmatpush.bf16.msrb.mxu0 %v13737_v31  ;;  %v14149_v31 = vor.u32 %v15524_v44, %v14148_v8  ;;  %v15433_v8 = vld [vmem:[#allocation4 + $0x874] sm:$0xf0]  ;;  %v13980_v44 = vld [vmem:[#allocation4 + $0x9e8] sm:$0xf] }
 0x4ed   :  { %v8000_v25 = vpop.f32.mrf.mxu2 }
 0x4ee   :  { %v8001_v13 = vadd.f32 %v8000_v25, %v7987_v28  ;;  %9021 = vmatpush.bf16.msra.mxu3 %v14149_v31  ;;  %v13837_v25 = vor.u32 %v15445_v50, %v13836_v45  ;;  %v13773_v45 = vor.u32 %v15429_v57, %v13772_v2  ;;  %v14150_v50 = vld [vmem:[#allocation4 + $0xb50] sm:$0xf0]  ;;  %v15439_v2 = vld [vmem:[#allocation4 + $0x8ac] sm:$0xf]  ;;  %v13822_v57 = vld [vmem:[#allocation4 + $0x8b8] sm:$0xf0] }
 0x4ef   :  { %9063 = vmatpush.bf16.msrb.mxu2 %v14025_v20  ;;  %v8096_v59 = vpop.f32.mrf.mxu1  ;;  %v14153_v21 = vor.u32 %v15522_v52, %v14150_v50  ;;  %v13868_v52 = vld [vmem:[#allocation4 + $0x908] sm:$0xf]  ;;  %v15453_v50 = vld [vmem:[#allocation4 + $0x914] sm:$0xf0] }
 0x4f2   :  { %9022 = vmatpush.bf16.msra.mxu3 %v14133_v16  ;;  %v13964_v16 = vld [vmem:[#allocation4 + $0x9c8] sm:$0xf] }
 0x4f3   :  { %9064 = vmatpush.bf16.msrb.mxu2 %v14009_v26  ;;  %v13965_v36 = vor.u32 %v15477_v5, %v13964_v16 }
 0x4f5   :  { %v8054_v22 = vpop.f32.mrf.mxu2 }
 0x4f6   :  { %9023 = vmatpush.bf16.msra.mxu3 %v14117_v43  ;;  %v8055_v51 = vadd.f32 %v8054_v22, %v8041_v3  ;;  %v15481_v22 = vld [vmem:[#allocation4 + $0x9f4] sm:$0xf0]  ;;  %v8084_v43 = vpop.f32.mrf.mxu0  ;;  %v13740_v3 = vld [vmem:[#allocation4 + $0x808] sm:$0xf] }
 0x4f7   :  { %9065 = vmatpush.bf16.msrb.mxu2 %v13993_v38 }
 0x4fa   :  { %9072 = vmatpush.bf16.msrb.mxu3 %v14233_v49  ;;  %v13949_v49 = vor.u32 %v15473_v48, %v13948_v4 }
 0x4fd   :  { %v8056_v19 = vpop.f32.mrf.mxu2 }
 0x4fe   :  { %v8057_v41 = vadd.f32 %v8056_v19, %v8043_v62  ;;  %9073 = vmatpush.bf16.msrb.mxu3 %v14217_v63  ;;  %v15447_v62 = vld [vmem:[#allocation4 + $0x8ec] sm:$0xf] }
 0x502   :  { %9074 = vmatpush.bf16.msrb.mxu3 %v14201_v40 }
 0x505   :  { %v8012_v34 = vpop.f32.mrf.mxu3 }
 0x506   :  { %v8013_v54 = vadd.f32 %v8012_v34, %v7999_v60  ;;  %v13804_v34 = vld [vmem:[#allocation4 + $0x888] sm:$0xf] }
 0x508   :  { %v8185_v11 = vmax.f32 %v8013_v54, 0.0  ;;  %v8110_v28 = vpop.f32.mrf.mxu2  ;;  %v13805_v54 = vor.u32 %v15437_v9, %v13804_v34 }
 0x50a   :  { %v8193_v47 = vmul.f32 1.4142135, %v8185_v11  ;;  %v13789_v11 = vor.u32 %v15433_v8, %v13788_v35  ;;  %v14118_v35 = vld [vmem:[#allocation4 + $0xb10] sm:$0xf0] }
 0x50d   :  { %v8014_v18 = vpop.f32.mrf.mxu3 }
 0x50e   :  { %v8015_v27 = vadd.f32 %v8014_v18, %v8001_v13  ;;  %v14185_v13 = vor.u32 %v15530_v56, %v14182_v23 }
 0x510   :  { %v8189_v30 = vmax.f32 %v8015_v27, 0.0  ;;  %v13981_v27 = vor.u32 %v15481_v22, %v13980_v44  ;;  %9075 = vmatpush.bf16.msrb.mxu3 %v14185_v13  ;;  %v8112_v38 = vpop.f32.mrf.mxu2 }
 0x512   :  { %v8197_v46 = vmul.f32 1.4142135, %v8189_v30  ;;  %v15526_v30 = vld [vmem:[#allocation4 + $0xb64] sm:$0xf] }
 0x513   :  { %v14169_v26 = vor.u32 %v15526_v30, %v14166_v0  ;;  %v13825_v30 = vor.u32 %v15439_v2, %v13822_v57  ;;  %v13884_v0 = vld [vmem:[#allocation4 + $0x928] sm:$0xf]  ;;  %v15467_v2 = vld [vmem:[#allocation4 + $0x98c] sm:$0xf]  ;;  %v13934_v57 = vld [vmem:[#allocation4 + $0x998] sm:$0xf0] }
 0x514   :  { %v16422_v58 = vpack.c.bf16 %v8197_v46, %v8193_v47  ;;  %v8097_v47 = vadd.f32 %v8096_v59, %v8082_v42  ;;  %v8098_v46 = vpop.f32.mrf.mxu1  ;;  %v15465_v59 = vld [vmem:[#allocation4 + $0x974] sm:$0xf0] }
 0x515   :  { %v8068_v29 = vpop.f32.mrf.mxu3  ;;  %9076 = vmatpush.bf16.msrb.mxu3 %v14169_v26  ;;  %v8099_v1 = vadd.f32 %v8098_v46, %v8084_v43  ;;  %v15513_v42 = vld [vmem:[#allocation4 + $0xaf4] sm:$0xf0]  ;;  %v14076_v26 = vld [vmem:[#allocation4 + $0xaa8] sm:$0xf]  ;;  %v15435_v46 = vld [vmem:[#allocation4 + $0x88c] sm:$0xf] }
 0x516   :  { %8982 = vmatmul.bf16.vlgmr.msra.gmra.mxu0 %v16422_v58  ;;  %v8069_v17 = vadd.f32 %v8068_v29, %v8055_v51  ;;  %v8111_v6 = vadd.f32 %v8110_v28, %v8097_v47  ;;  %v15443_v28 = vld [vmem:[#allocation4 + $0x8cc] sm:$0xf]  ;;  %v15505_v47 = vld [vmem:[#allocation4 + $0xab4] sm:$0xf0]  ;;  %v14060_v43 = vld [vmem:[#allocation4 + $0xa88] sm:$0xf] }
 0x517   :  { %9086 = vmatpush.bf16.msra.mxu0 %v13853_v32  ;;  %v15425_v32 = vld [vmem:[#allocation4 + $0x834] sm:$0xf0]  ;;  %v8113_v51 = vadd.f32 %v8112_v38, %v8099_v1  ;;  %v13790_v1 = vld [vmem:[#allocation4 + $0x878] sm:$0xf0] }
 0x518   :  { %v8186_v60 = vmax.f32 %v8069_v17, 0.0  ;;  %v13757_v29 = vor.u32 %v15425_v32, %v13756_v12  ;;  %v13854_v17 = vld [vmem:[#allocation4 + $0x8f8] sm:$0xf0]  ;;  %v8138_v32 = vpop.f32.mrf.mxu0  ;;  %v15501_v38 = vld [vmem:[#allocation4 + $0xa94] sm:$0xf0] }
 0x519   :  { %9077 = vmatpush.bf16.msrb.mxu3 %v14153_v21  ;;  %v15431_v21 = vld [vmem:[#allocation4 + $0x86c] sm:$0xf] }
 0x51a   :  { %v8194_v20 = vmul.f32 1.4142135, %v8186_v60  ;;  %v13857_v60 = vor.u32 %v15447_v62, %v13854_v17  ;;  %v15475_v62 = vld [vmem:[#allocation4 + $0x9cc] sm:$0xf]  ;;  %v13966_v17 = vld [vmem:[#allocation4 + $0x9d8] sm:$0xf0] }
 0x51b   :  { %9087 = vmatpush.bf16.msra.mxu0 %v13837_v25  ;;  %v15421_v25 = vld [vmem:[#allocation4 + $0x814] sm:$0xf0] }
 0x51c   :  { %v13741_v9 = vor.u32 %v15421_v25, %v13740_v3  ;;  %v14061_v3 = vor.u32 %v15501_v38, %v14060_v43  ;;  %v13793_v25 = vor.u32 %v15431_v21, %v13790_v1 }
 0x51d   :  { %v8070_v14 = vpop.f32.mrf.mxu3 }
 0x51e   :  { %v8071_v33 = vadd.f32 %v8070_v14, %v8057_v41  ;;  %v14108_v14 = vld [vmem:[#allocation4 + $0xae8] sm:$0xf] }
 0x51f   :  { %9088 = vmatpush.bf16.msra.mxu0 %v13821_v55  ;;  %v14137_v55 = vor.u32 %v15518_v61, %v14134_v24  ;;  %v14109_v23 = vor.u32 %v15513_v42, %v14108_v14  ;;  %v15427_v61 = vld [vmem:[#allocation4 + $0x84c] sm:$0xf]  ;;  %v13774_v24 = vld [vmem:[#allocation4 + $0x858] sm:$0xf0]  ;;  %v15493_v14 = vld [vmem:[#allocation4 + $0xa54] sm:$0xf0] }
 0x520   :  { %v8190_v31 = vmax.f32 %v8071_v33, 0.0  ;;  %v15514_v33 = vld [vmem:[#allocation4 + $0xb04] sm:$0xf]  ;;  %v15471_v42 = vld [vmem:[#allocation4 + $0x9ac] sm:$0xf] }
 0x521   :  { %9078 = vmatpush.bf16.msrb.mxu3 %v14137_v55  ;;  %v14121_v8 = vor.u32 %v15514_v33, %v14118_v35  ;;  %v8140_v33 = vpop.f32.mrf.mxu0 }
 0x522   :  { %v8198_v18 = vmul.f32 1.4142135, %v8190_v31  ;;  %v13917_v31 = vor.u32 %v15465_v59, %v13916_v15  ;;  %v13969_v59 = vor.u32 %v15475_v62, %v13966_v17  ;;  %v15455_v62 = vld [vmem:[#allocation4 + $0x92c] sm:$0xf]  ;;  %v13886_v17 = vld [vmem:[#allocation4 + $0x938] sm:$0xf0] }
 0x523   :  { %9089 = vmatpush.bf16.msra.mxu0 %v13805_v54  ;;  %v13838_v54 = vld [vmem:[#allocation4 + $0x8d8] sm:$0xf0] }
 0x524   :  { %v16425_v39 = vpack.c.bf16 %v8198_v18, %v8194_v20  ;;  %v13841_v13 = vor.u32 %v15443_v28, %v13838_v54  ;;  %v13900_v20 = vld [vmem:[#allocation4 + $0x948] sm:$0xf]  ;;  %v15461_v18 = vld [vmem:[#allocation4 + $0x954] sm:$0xf0]  ;;  %v13950_v28 = vld [vmem:[#allocation4 + $0x9b8] sm:$0xf0] }
 0x525   :  { %v8124_v10 = vpop.f32.mrf.mxu3  ;;  %9079 = vmatpush.bf16.msrb.mxu3 %v14121_v8  ;;  %v13901_v16 = vor.u32 %v15461_v18, %v13900_v20  ;;  %v15489_v20 = vld [vmem:[#allocation4 + $0xa34] sm:$0xf0]  ;;  %v15419_v18 = vld [vmem:[#allocation4 + $0x80c] sm:$0xf] }
 0x526   :  { %8996 = vmatmul.bf16.vlgmr.msra.gmra.mxu1 %v16425_v39  ;;  %9038 = vmatmul.bf16.vlgmr.msrb.gmra.mxu0 %v16422_v58  ;;  %v8125_v19 = vadd.f32 %v8124_v10, %v8111_v6  ;;  %v15457_v10 = vld [vmem:[#allocation4 + $0x934] sm:$0xf0]  ;;  %v8166_v4 = vpop.f32.mrf.mxu2  ;;  %v14077_v6 = vor.u32 %v15505_v47, %v14076_v26  ;;  %v14236_v47 = vld [vmem:[#allocation4 + $0xbe8] sm:$0xf] }
 0x527   :  { %9090 = vmatpush.bf16.msra.mxu0 %v13789_v11  ;;  %9100 = vmatpush.bf16.msra.mxu1 %v13981_v27  ;;  %v14092_v11 = vld [vmem:[#allocation4 + $0xac8] sm:$0xf]  ;;  %v15509_v27 = vld [vmem:[#allocation4 + $0xad4] sm:$0xf0]  ;;  %v13885_v12 = vor.u32 %v15457_v10, %v13884_v0 }
 0x528   :  { %v8187_v34 = vmax.f32 %v8125_v19, 0.0  ;;  %v14093_v5 = vor.u32 %v15509_v27, %v14092_v11  ;;  %v15479_v19 = vld [vmem:[#allocation4 + $0x9ec] sm:$0xf]  ;;  %v13742_v11 = vld [vmem:[#allocation4 + $0x818] sm:$0xf0] }
 0x529   :  { %v13745_v0 = vor.u32 %v15419_v18, %v13742_v11  ;;  %v13996_v10 = vld [vmem:[#allocation4 + $0xa08] sm:$0xf]  ;;  %v15485_v26 = vld [vmem:[#allocation4 + $0xa14] sm:$0xf0]  ;;  %v14030_v18 = vld [vmem:[#allocation4 + $0xa58] sm:$0xf0] }
 0x52a   :  { %v8195_v44 = vmul.f32 1.4142135, %v8187_v34 }
 0x52b   :  { %9091 = vmatpush.bf16.msra.mxu0 %v13773_v45  ;;  %9101 = vmatpush.bf16.msra.mxu1 %v13965_v36  ;;  %v13806_v45 = vld [vmem:[#allocation4 + $0x898] sm:$0xf0]  ;;  %v8152_v36 = vpop.f32.mrf.mxu1 }
 0x52c   :  { %v13809_v48 = vor.u32 %v15435_v46, %v13806_v45  ;;  %v8153_v55 = vadd.f32 %v8152_v36, %v8138_v32  ;;  %v13937_v45 = vor.u32 %v15467_v2, %v13934_v57  ;;  %v15545_v36 = vld [vmem:[#allocation4 + $0xbf4] sm:$0xf0]  ;;  %v13918_v32 = vld [vmem:[#allocation4 + $0x978] sm:$0xf0]  ;;  %v14140_v2 = vld [vmem:[#allocation4 + $0xb28] sm:$0xf] }
 0x52d   :  { %v8126_v63 = vpop.f32.mrf.mxu3  ;;  %v14237_v43 = vor.u32 %v15545_v36, %v14236_v47  ;;  %v15521_v57 = vld [vmem:[#allocation4 + $0xb34] sm:$0xf0]  ;;  %v15483_v47 = vld [vmem:[#allocation4 + $0xa0c] sm:$0xf]  ;;  %v14238_v36 = vld [vmem:[#allocation4 + $0xbf8] sm:$0xf0] }
 0x52e   :  { %v8127_v41 = vadd.f32 %v8126_v63, %v8113_v51  ;;  %v8167_v15 = vadd.f32 %v8166_v4, %v8153_v55  ;;  %v8168_v35 = vpop.f32.mrf.mxu2  ;;  %v15511_v4 = vld [vmem:[#allocation4 + $0xaec] sm:$0xf] }
 0x52f   :  { %9092 = vmatpush.bf16.msra.mxu0 %v13757_v29  ;;  %9102 = vmatpush.bf16.msra.mxu1 %v13949_v49  ;;  %v13982_v29 = vld [vmem:[#allocation4 + $0x9f8] sm:$0xf0]  ;;  %v13869_v49 = vor.u32 %v15453_v50, %v13868_v52  ;;  %v13997_v50 = vor.u32 %v15485_v26, %v13996_v10  ;;  %v15503_v55 = vld [vmem:[#allocation4 + $0xaac] sm:$0xf]  ;;  %v14124_v10 = vld [vmem:[#allocation4 + $0xb08] sm:$0xf] }
 0x530   :  { %v8191_v40 = vmax.f32 %v8127_v41, 0.0  ;;  %v13985_v51 = vor.u32 %v15479_v19, %v13982_v29  ;;  %v14045_v41 = vor.u32 %v15497_v7, %v14044_v53  ;;  %v14220_v19 = vld [vmem:[#allocation4 + $0xbc8] sm:$0xf]  ;;  %v15541_v29 = vld [vmem:[#allocation4 + $0xbd4] sm:$0xf0] }
 0x531   :  { %v14094_v53 = vld [vmem:[#allocation4 + $0xad8] sm:$0xf0]  ;;  %v15517_v26 = vld [vmem:[#allocation4 + $0xb14] sm:$0xf0] }
 0x532   :  { %v8199_v22 = vmul.f32 1.4142135, %v8191_v40  ;;  %v15423_v40 = vld [vmem:[#allocation4 + $0x82c] sm:$0xf] }
 0x533   :  { %9093 = vmatpush.bf16.msra.mxu0 %v13741_v9  ;;  %9103 = vmatpush.bf16.msra.mxu1 %v13933_v37  ;;  %v8154_v34 = vpop.f32.mrf.mxu1  ;;  %v13777_v9 = vor.u32 %v15427_v61, %v13774_v24  ;;  %v14028_v37 = vld [vmem:[#allocation4 + $0xa48] sm:$0xf] }
 0x534   :  { %v16429_v56 = vpack.c.bf16 %v8199_v22, %v8195_v44  ;;  %v8155_v54 = vadd.f32 %v8154_v34, %v8140_v33  ;;  %v14029_v44 = vor.u32 %v15493_v14, %v14028_v37  ;;  %v14204_v24 = vld [vmem:[#allocation4 + $0xba8] sm:$0xf]  ;;  %v14078_v34 = vld [vmem:[#allocation4 + $0xab8] sm:$0xf0] }
 0x535   :  { %v14188_v37 = vld [vmem:[#allocation4 + $0xb88] sm:$0xf]  ;;  %v13870_v14 = vld [vmem:[#allocation4 + $0x918] sm:$0xf0] }
 0x536   :  { %9010 = vmatmul.bf16.vlgmr.msra.gmra.mxu2 %v16429_v56  ;;  %9052 = vmatmul.bf16.vlgmr.msrb.gmra.mxu1 %v16425_v39 }
 0x537   :  { %9142 = vmatpush.bf16.msrb.mxu0 %v13857_v60  ;;  %9104 = vmatpush.bf16.msra.mxu1 %v13917_v31  ;;  %v13758_v60 = vld [vmem:[#allocation4 + $0x838] sm:$0xf0]  ;;  %v14012_v31 = vld [vmem:[#allocation4 + $0xa28] sm:$0xf] }
 0x538   :  { %9094 = vmatmul.bf16.vlgmr.msra.gmra.mxu0 %v16422_v58  ;;  %9114 = vmatpush.bf16.msra.mxu2 %v14109_v23  ;;  %v13761_v22 = vor.u32 %v15423_v40, %v13758_v60  ;;  %v8169_v23 = vadd.f32 %v8168_v35, %v8155_v54  ;;  %v15499_v40 = vld [vmem:[#allocation4 + $0xa8c] sm:$0xf]  ;;  %v14062_v60 = vld [vmem:[#allocation4 + $0xa98] sm:$0xf0]  ;;  %v15529_v54 = vld [vmem:[#allocation4 + $0xb74] sm:$0xf0] }
 0x53b   :  { %9143 = vmatpush.bf16.msrb.mxu0 %v13841_v13  ;;  %9105 = vmatpush.bf16.msra.mxu1 %v13901_v16  ;;  %v13953_v13 = vor.u32 %v15471_v42, %v13950_v28  ;;  %v14065_v42 = vor.u32 %v15499_v40, %v14062_v60  ;;  %v14172_v28 = vld [vmem:[#allocation4 + $0xb68] sm:$0xf]  ;;  %v15558_v40 = vld [vmem:[#allocation6 + $0x60] sm:$0xff] }
 0x53c   :  { %9115 = vmatpush.bf16.msra.mxu2 %v14093_v5 }
 0x53f   :  { %9144 = vmatpush.bf16.msrb.mxu0 %v13825_v30  ;;  %9106 = vmatpush.bf16.msra.mxu1 %v13885_v12  ;;  %v14013_v30 = vor.u32 %v15489_v20, %v14012_v31  ;;  %v15463_v12 = vld [vmem:[#allocation4 + $0x96c] sm:$0xf] }
 0x540   :  { %9116 = vmatpush.bf16.msra.mxu2 %v14077_v6  ;;  %v14110_v6 = vld [vmem:[#allocation4 + $0xaf8] sm:$0xf0]  ;;  %v13921_v21 = vor.u32 %v15463_v12, %v13918_v32  ;;  %v15491_v20 = vld [vmem:[#allocation4 + $0xa4c] sm:$0xf]  ;;  %v14125_v12 = vor.u32 %v15517_v26, %v14124_v10  ;;  %v15564_v10 = vld [vmem:[#allocation6 + $0x90] sm:$0xff] }
 0x541   :  { %v14113_v1 = vor.u32 %v15511_v4, %v14110_v6  ;;  %v15539_v4 = vld [vmem:[#allocation4 + $0xbcc] sm:$0xf]  ;;  %v14222_v6 = vld [vmem:[#allocation4 + $0xbd8] sm:$0xf0] }
 0x543   :  { %9145 = vmatpush.bf16.msrb.mxu0 %v13809_v48  ;;  %9107 = vmatpush.bf16.msra.mxu1 %v13869_v49  ;;  %v15459_v49 = vld [vmem:[#allocation4 + $0x94c] sm:$0xf] }
 0x544   :  { %9117 = vmatpush.bf16.msra.mxu2 %v14061_v3  ;;  %v13902_v3 = vld [vmem:[#allocation4 + $0x958] sm:$0xf0] }
 0x545   :  { %v8180_v63 = vpop.f32.mrf.mxu3  ;;  %v13905_v7 = vor.u32 %v15459_v49, %v13902_v3  ;;  %v14174_v49 = vld [vmem:[#allocation4 + $0xb78] sm:$0xf0] }
 0x546   :  { %9066 = vmatmul.bf16.vlgmr.msrb.gmra.mxu2 %v16429_v56  ;;  %9108 = vmatmul.bf16.vlgmr.msra.gmra.mxu1 %v16425_v39  ;;  %v8181_v8 = vadd.f32 %v8180_v63, %v8167_v15  ;;  %v15537_v63 = vld [vmem:[#allocation4 + $0xbb4] sm:$0xf0] }
 0x547   :  { %9146 = vmatpush.bf16.msrb.mxu0 %v13793_v25  ;;  %9156 = vmatpush.bf16.msrb.mxu1 %v13985_v51  ;;  %v15507_v25 = vld [vmem:[#allocation4 + $0xacc] sm:$0xf]  ;;  %v14221_v51 = vor.u32 %v15541_v29, %v14220_v19  ;;  %v15533_v15 = vld [vmem:[#allocation4 + $0xb94] sm:$0xf0] }
 0x548   :  { %9118 = vmatpush.bf16.msra.mxu2 %v14045_v41  ;;  %v8188_v16 = vmax.f32 %v8181_v8, 0.0  ;;  %v14097_v61 = vor.u32 %v15507_v25, %v14094_v53  ;;  %v14205_v41 = vor.u32 %v15537_v63, %v14204_v24  ;;  %v14189_v33 = vor.u32 %v15533_v15, %v14188_v37  ;;  %v15495_v8 = vld [vmem:[#allocation4 + $0xa6c] sm:$0xf]  ;;  %v14158_v53 = vld [vmem:[#allocation4 + $0xb58] sm:$0xf0]  ;;  %v15548_v37 = vld [vmem:[#allocation6 + $0x10] sm:$0xff] }
 0x549   :  { %v15527_v29 = vld [vmem:[#allocation4 + $0xb6c] sm:$0xf]  ;;  %v15560_v15 = vld [vmem:[#allocation6 + $0x70] sm:$0xff] }
 0x54a   :  { %v8196_v48 = vmul.f32 1.4142135, %v8188_v16  ;;  %v15487_v16 = vld [vmem:[#allocation4 + $0xa2c] sm:$0xf]  ;;  %v14177_v3 = vor.u32 %v15527_v29, %v14174_v49  ;;  %v15576_v29 = vld [vmem:[#allocation6 + $0xf0] sm:$0xff] }
 0x54b   :  { %9147 = vmatpush.bf16.msrb.mxu0 %v13777_v9  ;;  %9157 = vmatpush.bf16.msrb.mxu1 %v13969_v59  ;;  %v14081_v9 = vor.u32 %v15503_v55, %v14078_v34  ;;  %v15451_v59 = vld [vmem:[#allocation4 + $0x90c] sm:$0xf]  ;;  %v15552_v55 = vld [vmem:[#allocation6 + $0x30] sm:$0xff] }
 0x54c   :  { %9119 = vmatpush.bf16.msra.mxu2 %v14029_v44  ;;  %v13873_v35 = vor.u32 %v15451_v59, %v13870_v14  ;;  %v14046_v44 = vld [vmem:[#allocation4 + $0xa78] sm:$0xf0]  ;;  %v15523_v25 = vld [vmem:[#allocation4 + $0xb4c] sm:$0xf] }
 0x54d   :  { %v8182_v27 = vpop.f32.mrf.mxu3  ;;  %v14049_v31 = vor.u32 %v15495_v8, %v14046_v44  ;;  %v15515_v63 = vld [vmem:[#allocation4 + $0xb0c] sm:$0xf]  ;;  %v15568_v8 = vld [vmem:[#allocation6 + $0xb0] sm:$0xff] }
 0x54e   :  { %v8183_v5 = vadd.f32 %v8182_v27, %v8169_v23  ;;  %v14156_v23 = vld [vmem:[#allocation4 + $0xb48] sm:$0xf]  ;;  %v14033_v27 = vor.u32 %v15491_v20, %v14030_v18  ;;  %v15554_v20 = vld [vmem:[#allocation6 + $0x40] sm:$0xff] }
 0x54f   :  { %9148 = vmatpush.bf16.msrb.mxu0 %v13761_v22  ;;  %9158 = vmatpush.bf16.msrb.mxu1 %v13953_v13  ;;  %v14173_v22 = vor.u32 %v15529_v54, %v14172_v28  ;;  %v15525_v13 = vld [vmem:[#allocation4 + $0xb54] sm:$0xf0]  ;;  %v15551_v34 = vld [vmem:[#allocation6 + $0x28] sm:$0xff]  ;;  %v15556_v54 = vld [vmem:[#allocation6 + $0x50] sm:$0xff] }
 0x550   :  { %v8192_v46 = vmax.f32 %v8183_v5, 0.0  ;;  %9120 = vmatpush.bf16.msra.mxu2 %v14013_v30  ;;  %v14157_v11 = vor.u32 %v15525_v13, %v14156_v23  ;;  %v14014_v5 = vld [vmem:[#allocation4 + $0xa38] sm:$0xf0]  ;;  %v14141_v30 = vor.u32 %v15521_v57, %v14140_v2  ;;  %v15547_v59 = vld [vmem:[#allocation6 + $0x8] sm:$0xff]  ;;  %v15566_v18 = vld [vmem:[#allocation6 + $0xa0] sm:$0xff] }
 0x551   :  { %v15559_v14 = vld [vmem:[#allocation6 + $0x68] sm:$0xff]  ;;  %v15565_v2 = vld [vmem:[#allocation6 + $0x98] sm:$0xff] }
 0x552   :  { %v8200_v52 = vmul.f32 1.4142135, %v8192_v46  ;;  %v13998_v46 = vld [vmem:[#allocation4 + $0xa18] sm:$0xf0]  ;;  %v15555_v44 = vld [vmem:[#allocation6 + $0x48] sm:$0xff] }
 0x553   :  { %9149 = vmatpush.bf16.msrb.mxu0 %v13745_v0  ;;  %9159 = vmatpush.bf16.msrb.mxu1 %v13937_v45  ;;  %v14017_v0 = vor.u32 %v15487_v16, %v14014_v5  ;;  %v15543_v45 = vld [vmem:[#allocation4 + $0xbec] sm:$0xf] }
 0x554   :  { %v16436_v38 = vpack.c.bf16 %v8200_v52, %v8196_v48  ;;  %9121 = vmatpush.bf16.msra.mxu2 %v13997_v50  ;;  %v14241_v32 = vor.u32 %v15543_v45, %v14238_v36  ;;  %v14225_v48 = vor.u32 %v15539_v4, %v14222_v6  ;;  %v15535_v52 = vld [vmem:[#allocation4 + $0xbac] sm:$0xf]  ;;  %v14206_v50 = vld [vmem:[#allocation4 + $0xbb8] sm:$0xf0]  ;;  %v15562_v6 = vld [vmem:[#allocation6 + $0x80] sm:$0xff] }
 0x556   :  { %9024 = vmatmul.bf16.vlgmr.msra.gmra.mxu3 %v16436_v38  ;;  %9150 = vmatmul.bf16.vlgmr.msrb.gmra.mxu0 %v16422_v58  ;;  %v13889_v58 = vor.u32 %v15455_v62, %v13886_v17  ;;  %v15553_v17 = vld [vmem:[#allocation6 + $0x38] sm:$0xff] }
 0x557   :  { %9128 = vmatpush.bf16.msra.mxu3 %v14237_v43  ;;  %9160 = vmatpush.bf16.msrb.mxu1 %v13921_v21  ;;  %v14209_v43 = vor.u32 %v15535_v52, %v14206_v50  ;;  %v15531_v21 = vld [vmem:[#allocation4 + $0xb8c] sm:$0xf] }
 0x558   :  { %9170 = vmatpush.bf16.msrb.mxu2 %v14113_v1  ;;  %v14190_v1 = vld [vmem:[#allocation4 + $0xb98] sm:$0xf0]  ;;  %9474 = vmatpush.bf16.msra.mxu0 %v15553_v17 }
 0x559   :  { %9122 = vmatmul.bf16.vlgmr.msra.gmra.mxu2 %v16429_v56  ;;  %v14193_v19 = vor.u32 %v15531_v21, %v14190_v1 }
 0x55b   :  { %9129 = vmatpush.bf16.msra.mxu3 %v14221_v51  ;;  %9161 = vmatpush.bf16.msrb.mxu1 %v13905_v7  ;;  %v14161_v51 = vor.u32 %v15523_v25, %v14158_v53  ;;  %v15519_v7 = vld [vmem:[#allocation4 + $0xb2c] sm:$0xf] }
 0x55c   :  { %9171 = vmatpush.bf16.msrb.mxu2 %v14097_v61  ;;  %v14142_v61 = vld [vmem:[#allocation4 + $0xb38] sm:$0xf0]  ;;  %9475 = vmatpush.bf16.msra.mxu0 %v15552_v55 }
 0x55d   :  { %v14145_v24 = vor.u32 %v15519_v7, %v14142_v61  ;;  %v15574_v7 = vld [vmem:[#allocation6 + $0xe0] sm:$0xff] }
 0x55f   :  { %9130 = vmatpush.bf16.msra.mxu3 %v14205_v41  ;;  %9162 = vmatpush.bf16.msrb.mxu1 %v13889_v58  ;;  %v15550_v41 = vld [vmem:[#allocation6 + $0x20] sm:$0xff]  ;;  %v15549_v58 = vld [vmem:[#allocation6 + $0x18] sm:$0xff] }
 0x560   :  { %9172 = vmatpush.bf16.msrb.mxu2 %v14081_v9  ;;  %9476 = vmatpush.bf16.msra.mxu0 %v15551_v34  ;;  %v15561_v9 = vld [vmem:[#allocation6 + $0x78] sm:$0xff] }
 0x563   :  { %9131 = vmatpush.bf16.msra.mxu3 %v14189_v33  ;;  %9163 = vmatpush.bf16.msrb.mxu1 %v13873_v35  ;;  %v15557_v35 = vld [vmem:[#allocation6 + $0x58] sm:$0xff] }
 0x564   :  { %9173 = vmatpush.bf16.msrb.mxu2 %v14065_v42  ;;  %9477 = vmatpush.bf16.msra.mxu0 %v15550_v41  ;;  %v15569_v42 = vld [vmem:[#allocation6 + $0xb8] sm:$0xff] }
 0x566   :  { %9080 = vmatmul.bf16.vlgmr.msrb.gmra.mxu3 %v16436_v38  ;;  %9164 = vmatmul.bf16.vlgmr.msrb.gmra.mxu1 %v16425_v39  ;;  %v14001_v39 = vor.u32 %v15483_v47, %v13998_v46 }
 0x567   :  { %9132 = vmatpush.bf16.msra.mxu3 %v14173_v22  ;;  %9488 = vmatpush.bf16.msra.mxu1 %v15561_v9  ;;  %v15567_v22 = vld [vmem:[#allocation6 + $0xa8] sm:$0xff] }
 0x568   :  { %9174 = vmatpush.bf16.msrb.mxu2 %v14049_v31  ;;  %9478 = vmatpush.bf16.msra.mxu0 %v15549_v58  ;;  %v15573_v58 = vld [vmem:[#allocation6 + $0xd8] sm:$0xff] }
 0x56b   :  { %9133 = vmatpush.bf16.msra.mxu3 %v14157_v11  ;;  %9489 = vmatpush.bf16.msra.mxu1 %v15560_v15 }
 0x56c   :  { %9175 = vmatpush.bf16.msrb.mxu2 %v14033_v27  ;;  %9479 = vmatpush.bf16.msra.mxu0 %v15548_v37 }
 0x56f   :  { %9134 = vmatpush.bf16.msra.mxu3 %v14141_v30  ;;  %9490 = vmatpush.bf16.msra.mxu1 %v15559_v14 }
 0x570   :  { %9176 = vmatpush.bf16.msrb.mxu2 %v14017_v0  ;;  %9480 = vmatpush.bf16.msra.mxu0 %v15547_v59  ;;  %v15572_v59 = vld [vmem:[#allocation6 + $0xd0] sm:$0xff] }
 0x573   :  { %9135 = vmatpush.bf16.msra.mxu3 %v14125_v12  ;;  %9491 = vmatpush.bf16.msra.mxu1 %v15558_v40  ;;  %v15563_v12 = vld [vmem:[#allocation6 + $0x88] sm:$0xff] }
 0x574   :  { %9177 = vmatpush.bf16.msrb.mxu2 %v14001_v39 }
 0x576   :  { %9136 = vmatmul.bf16.vlgmr.msra.gmra.mxu3 %v16436_v38 }
 0x577   :  { %9184 = vmatpush.bf16.msrb.mxu3 %v14241_v32  ;;  %9178 = vmatmul.bf16.vlgmr.msrb.gmra.mxu2 %v16429_v56  ;;  %v14126_v56 = vld [vmem:[#allocation4 + $0xb18] sm:$0xf0] }
 0x578   :  { %v14129_v62 = vor.u32 %v15515_v63, %v14126_v56  ;;  %9492 = vmatpush.bf16.msra.mxu1 %v15557_v35  ;;  %9502 = vmatpush.bf16.msra.mxu2 %v15569_v42  ;;  %v15571_v42 = vld [vmem:[#allocation6 + $0xc8] sm:$0xff] }
 0x57b   :  { %9185 = vmatpush.bf16.msrb.mxu3 %v14225_v48  ;;  %v15577_v48 = vld [vmem:[#allocation6 + $0xf8] sm:$0xff] }
 0x57c   :  { %9493 = vmatpush.bf16.msra.mxu1 %v15556_v54  ;;  %9503 = vmatpush.bf16.msra.mxu2 %v15568_v8 }
 0x57f   :  { %9186 = vmatpush.bf16.msrb.mxu3 %v14209_v43 }
 0x580   :  { %9494 = vmatpush.bf16.msra.mxu1 %v15555_v44  ;;  %9504 = vmatpush.bf16.msra.mxu2 %v15567_v22  ;;  %v15570_v22 = vld [vmem:[#allocation6 + $0xc0] sm:$0xff] }
 0x583   :  { %9187 = vmatpush.bf16.msrb.mxu3 %v14193_v19 }
 0x584   :  { %9495 = vmatpush.bf16.msra.mxu1 %v15554_v20  ;;  %9505 = vmatpush.bf16.msra.mxu2 %v15566_v18 }
 0x587   :  { %9188 = vmatpush.bf16.msrb.mxu3 %v14177_v3  ;;  %v15575_v3 = vld [vmem:[#allocation6 + $0xe8] sm:$0xff] }
 0x588   :  { %9506 = vmatpush.bf16.msra.mxu2 %v15565_v2 }
 0x58b   :  { %9189 = vmatpush.bf16.msrb.mxu3 %v14161_v51 }
 0x58c   :  { %9507 = vmatpush.bf16.msra.mxu2 %v15564_v10 }
 0x58f   :  { %9190 = vmatpush.bf16.msrb.mxu3 %v14145_v24 }
 0x590   :  { %9508 = vmatpush.bf16.msra.mxu2 %v15563_v12 }
 0x593   :  { %9191 = vmatpush.bf16.msrb.mxu3 %v14129_v62  ;;  %v8983_v33 = vpop.f32.mrf.mxu0 }
 0x594   :  { %9509 = vmatpush.bf16.msra.mxu2 %v15562_v6 }
 0x596   :  { %9192 = vmatmul.bf16.vlgmr.msrb.gmra.mxu3 %v16436_v38  ;;  %v15546_v38 = vld [vmem:[#allocation6] sm:$0xff] }
 0x597   :  { %9481 = vmatpush.bf16.msra.mxu0 %v15546_v38  ;;  %9516 = vmatpush.bf16.msra.mxu3 %v15577_v48 }
 0x59b   :  { %v8985_v23 = vpop.f32.mrf.mxu0  ;;  %9517 = vmatpush.bf16.msra.mxu3 %v15576_v29 }
 0x59f   :  { %9518 = vmatpush.bf16.msra.mxu3 %v15575_v3 }
 0x5a3   :  { %v8997_v60 = vpop.f32.mrf.mxu1  ;;  %v9039_v5 = vpop.f32.mrf.mxu0  ;;  %9519 = vmatpush.bf16.msra.mxu3 %v15574_v7 }
 0x5a4   :  { %v8998_v27 = vadd.f32 %v8997_v60, %v8983_v33 }
 0x5a7   :  { %9520 = vmatpush.bf16.msra.mxu3 %v15573_v58 }
 0x5ab   :  { %v8999_v31 = vpop.f32.mrf.mxu1  ;;  %v9041_v50 = vpop.f32.mrf.mxu0  ;;  %9521 = vmatpush.bf16.msra.mxu3 %v15572_v59 }
 0x5ac   :  { %v9000_v30 = vadd.f32 %v8999_v31, %v8985_v23 }
 0x5af   :  { %9522 = vmatpush.bf16.msra.mxu3 %v15571_v42 }
 0x5b3   :  { %v9053_v16 = vpop.f32.mrf.mxu1  ;;  %9523 = vmatpush.bf16.msra.mxu3 %v15570_v22 }
 0x5b4   :  { %v9054_v19 = vadd.f32 %v9053_v16, %v9039_v5 }
 0x5b5   :  { %v9095_v62 = vpop.f32.mrf.mxu0 }
 0x5b9   :  { %v9011_v28 = vpop.f32.mrf.mxu2 }
 0x5ba   :  { %v9012_v57 = vadd.f32 %v9011_v28, %v8998_v27 }
 0x5bb   :  { %v9055_v52 = vpop.f32.mrf.mxu1 }
 0x5bc   :  { %v9056_v25 = vadd.f32 %v9055_v52, %v9041_v50 }
 0x5bd   :  { %v9097_v40 = vpop.f32.mrf.mxu0 }
 0x5c1   :  { %v9013_v13 = vpop.f32.mrf.mxu2 }
 0x5c2   :  { %v9014_v47 = vadd.f32 %v9013_v13, %v9000_v30 }
 0x5c3   :  { %v9109_v61 = vpop.f32.mrf.mxu1 }
 0x5c4   :  { %v9110_v15 = vadd.f32 %v9109_v61, %v9095_v62 }
 0x5c9   :  { %v9067_v26 = vpop.f32.mrf.mxu2 }
 0x5ca   :  { %v9068_v49 = vadd.f32 %v9067_v26, %v9054_v19 }
 0x5cb   :  { %v9111_v14 = vpop.f32.mrf.mxu1 }
 0x5cc   :  { %v9112_v33 = vadd.f32 %v9111_v14, %v9097_v40 }
 0x5d1   :  { %v9069_v21 = vpop.f32.mrf.mxu2 }
 0x5d2   :  { %v9070_v51 = vadd.f32 %v9069_v21, %v9056_v25 }
 0x5d9   :  { %v9025_v11 = vpop.f32.mrf.mxu3 }
 0x5da   :  { %v9026_v0 = vadd.f32 %v9025_v11, %v9012_v57  ;;  %v9151_v11 = vpop.f32.mrf.mxu0 }
 0x5dc   :  { %v9198_v45 = vmax.f32 %v9026_v0, 0.0  ;;  %v9123_v17 = vpop.f32.mrf.mxu2 }
 0x5dd   :  { %v9124_v38 = vadd.f32 %v9123_v17, %v9110_v15 }
 0x5de   :  { %v9206_v32 = vmul.f32 1.4142135, %v9198_v45 }
 0x5e1   :  { %v9027_v46 = vpop.f32.mrf.mxu3 }
 0x5e2   :  { %v9028_v36 = vadd.f32 %v9027_v46, %v9014_v47  ;;  %v9153_v30 = vpop.f32.mrf.mxu0 }
 0x5e3   :  { %v9165_v18 = vpop.f32.mrf.mxu1 }
 0x5e4   :  { %v9202_v39 = vmax.f32 %v9028_v36, 0.0  ;;  %v9125_v60 = vpop.f32.mrf.mxu2  ;;  %v9166_v57 = vadd.f32 %v9165_v18, %v9151_v11 }
 0x5e5   :  { %v9126_v28 = vadd.f32 %v9125_v60, %v9112_v33 }
 0x5e6   :  { %v9210_v4 = vmul.f32 1.4142135, %v9202_v39 }
 0x5e8   :  { %v9214_v43 = vpack.c.bf16 %v9210_v4, %v9206_v32 }
 0x5e9   :  { %v9081_v1 = vpop.f32.mrf.mxu3 }
 0x5ea   :  { %9482 = vmatmul.bf16.vlgmr.msra.gmra.mxu0 %v9214_v43  ;;  %v9082_v53 = vadd.f32 %v9081_v1, %v9068_v49 }
 0x5eb   :  { %v9167_v16 = vpop.f32.mrf.mxu1 }
 0x5ec   :  { %v9199_v63 = vmax.f32 %v9082_v53, 0.0  ;;  %v9168_v10 = vadd.f32 %v9167_v16, %v9153_v30 }
 0x5ee   :  { %v9207_v34 = vmul.f32 1.4142135, %v9199_v63 }
 0x5f1   :  { %v9083_v24 = vpop.f32.mrf.mxu3 }
 0x5f2   :  { %v9084_v56 = vadd.f32 %v9083_v24, %v9070_v51 }
 0x5f4   :  { %v9203_v55 = vmax.f32 %v9084_v56, 0.0 }
 0x5f6   :  { %v9211_v41 = vmul.f32 1.4142135, %v9203_v55 }
 0x5f8   :  { %v9215_v9 = vpack.c.bf16 %v9211_v41, %v9207_v34 }
 0x5f9   :  { %v9137_v37 = vpop.f32.mrf.mxu3 }
 0x5fa   :  { %9496 = vmatmul.bf16.vlgmr.msra.gmra.mxu1 %v9215_v9  ;;  %v9138_v35 = vadd.f32 %v9137_v37, %v9124_v38  ;;  %v9179_v27 = vpop.f32.mrf.mxu2 }
 0x5fb   :  { %v9180_v5 = vadd.f32 %v9179_v27, %v9166_v57 }
 0x5fc   :  { %v9200_v8 = vmax.f32 %v9138_v35, 0.0 }
 0x5fe   :  { %v9208_v23 = vmul.f32 1.4142135, %v9200_v8 }
 0x601   :  { %v9139_v54 = vpop.f32.mrf.mxu3 }
 0x602   :  { %v9140_v44 = vadd.f32 %v9139_v54, %v9126_v28  ;;  %v9181_v0 = vpop.f32.mrf.mxu2 }
 0x603   :  { %v9182_v47 = vadd.f32 %v9181_v0, %v9168_v10 }
 0x604   :  { %v9204_v31 = vmax.f32 %v9140_v44, 0.0 }
 0x606   :  { %v9212_v13 = vmul.f32 1.4142135, %v9204_v31 }
 0x608   :  { %v9216_v20 = vpack.c.bf16 %v9212_v13, %v9208_v23 }
 0x60a   :  { %9510 = vmatmul.bf16.vlgmr.msra.gmra.mxu2 %v9216_v20 }
 0x619   :  { %v9193_v2 = vpop.f32.mrf.mxu3 }
 0x61a   :  { %v9194_v26 = vadd.f32 %v9193_v2, %v9180_v5 }
 0x61c   :  { %v9201_v45 = vmax.f32 %v9194_v26, 0.0 }
 0x61e   :  { %v9209_v39 = vmul.f32 1.4142135, %v9201_v45 }
 0x621   :  { %v9195_v46 = vpop.f32.mrf.mxu3 }
 0x622   :  { %v9196_v36 = vadd.f32 %v9195_v46, %v9182_v47 }
 0x624   :  { %v9205_v12 = vmax.f32 %v9196_v36, 0.0 }
 0x626   :  { %v9213_v32 = vmul.f32 1.4142135, %v9205_v12 }
 0x628   :  { %v9217_v4 = vpack.c.bf16 %v9213_v32, %v9209_v39 }
 0x62a   :  { %9524 = vmatmul.bf16.vlgmr.msra.gmra.mxu3 %v9217_v4 }
 0x667   :  { %v9483_v48 = vpop.f32.mrf.mxu0 }
 0x66f   :  { %v9485_v29 = vpop.f32.mrf.mxu0 }
 0x677   :  { %v9497_v6 = vpop.f32.mrf.mxu1 }
 0x678   :  { %v9498_v50 = vadd.f32 %v9497_v6, %v9483_v48 }
 0x67f   :  { %v9499_v19 = vpop.f32.mrf.mxu1 }
 0x680   :  { %v9500_v3 = vadd.f32 %v9499_v19, %v9485_v29 }
 0x68d   :  { %v9511_v52 = vpop.f32.mrf.mxu2 }
 0x68e   :  { %v9512_v43 = vadd.f32 %v9511_v52, %v9498_v50 }
 0x695   :  { %v9513_v49 = vpop.f32.mrf.mxu2 }
 0x696   :  { %v9514_v25 = vadd.f32 %v9513_v49, %v9500_v3 }
 0x6ad   :  { %v9525_v21 = vpop.f32.mrf.mxu3 }
 0x6ae   :  { %v9526_v1 = vadd.f32 %v9525_v21, %v9512_v43 }
 0x6b0   :  { %9530 = vst [vmem:[%s16456_s4] sm:$0xff] %v9526_v1 }
 0x6b5   :  { %v9527_v53 = vpop.f32.mrf.mxu3 }
 0x6b6   :  { %v9528_v51 = vadd.f32 %v9527_v53, %v9514_v25 }
 0x6b8   :  { %9531 = vst [vmem:[%s16456_s4 + $0x8] sm:$0xff] %v9528_v51 }
 0x6b9   :  { %9536 = vsyncpa [#allocation3], 1 }
 0x6ba   :  { %9537 = vsyncpa [#allocation5], 1 }

</bundles_post_ra>
